<compile_context>
chip_gen: v7x
topology: tpu7x:2x2x1
jax: 0.10.0
libtpu: 0.0.40
codegen_flags: <defaults>
</compile_context>

<pallas_src>
import jax
import jax.numpy as jnp
from jax.experimental import pallas as pl
from jax.experimental.pallas import tpu as pltpu

# deepnovo_config constants implied by the module (fc = Linear(750, 256) forces these)
NEIGHBOR = 5               # deepnovo_config.neighbor_size
RES = 50                   # deepnovo_config.SPECTRUM_RESOLUTION == maxpool1 window
MZ = 150000                # deepnovo_config.MZ_SIZE
W1 = MZ // RES             # 3000  (width after maxpool1 / convs)
WPOOL = W1 // 4            # 750   (width after maxpool2)
HID = 256
WPAD = 3072                # W1 lane-padded to 24 * 128
KTAP = 8                   # sublane-aligned rows per im2col tap slab
MAX_BT = 8                 # samples fused per grid step (FC M = 16 * Bt)


def _shift(x, s):
    """y[:, w] = x[:, w + s] along the lane axis with zero fill (== conv zero padding)."""
    if s == 0:
        return x
    rows = x.shape[0]
    z = jnp.zeros((rows, abs(s)), x.dtype)
    if s > 0:
        return jnp.concatenate([x[:, s:], z], axis=1)
    return jnp.concatenate([z, x[:, :s]], axis=1)


def _tap8(x, s):
    """One im2col tap: x shifted by s along lanes, zero-padded to KTAP sublane rows."""
    rows = x.shape[0]
    t = _shift(x, s)
    if rows == KTAP:
        return t
    return jnp.concatenate([t, jnp.zeros((KTAP - rows, x.shape[1]), x.dtype)], axis=0)


def spectrum_kernel(x_ref, w1_ref, b1_ref, w2_ref, b2_ref, wfc_ref, bfc_ref,
                    o_ref, m6_ref):
    """Fused conv1+ReLU -> conv2+ReLU -> maxpool2 -> fc+ReLU for Bt samples.

    x_ref : (Bt, 5, 3072) f32 maxpool1 output; lanes >= 3000 are zero.
    w1/w2 : (4, 40) / (16, 40) bf16 im2col conv weights (8-row-aligned tap blocks).
    wfc   : (3072, 256) bf16 FC weight with the maxpool2 stride-4 decimation folded
            into zero rows (row 4*j holds fc.weight.T[j]; all other rows are zero).
    m6_ref: (16*Bt, 3072) bf16 VMEM scratch staging the stacked maxpool2 outputs.
    """
    bt = x_ref.shape[0]
    col = jax.lax.broadcasted_iota(jnp.int32, (1, WPAD), 1)
    valid = col < W1                       # keep the 3000..3071 lane padding at zero

    for s in range(bt):
        pooled = x_ref[s].astype(jnp.bfloat16)                                      # (5,3072)

        # conv1: Conv2d(1, 4, (5,5), stride=(5,1), padding=(0,2)) + ReLU (im2col, MXU)
        p1 = jnp.concatenate([_tap8(pooled, kw - 2) for kw in range(5)], axis=0)    # (40,3072)
        c1 = jnp.dot(w1_ref[...], p1, preferred_element_type=jnp.float32) + b1_ref[...]
        c1 = jnp.where(valid, jnp.maximum(c1, 0.0), 0.0).astype(jnp.bfloat16)       # (4,3072)

        # conv2: Conv2d(4, 16, (1,5), padding=(0,2)) + ReLU (im2col, MXU)
        p2 = jnp.concatenate([_tap8(c1, kw - 2) for kw in range(5)], axis=0)        # (40,3072)
        c2 = jnp.dot(w2_ref[...], p2, preferred_element_type=jnp.float32) + b2_ref[...]
        c2 = jnp.where(valid, jnp.maximum(c2, 0.0), 0.0).astype(jnp.bfloat16)       # (16,3072)

        # maxpool2: MaxPool2d((1,6), stride=(1,4), padding=(0,1)) — 6-wide sliding max
        # here; the stride-4 column selection is folded into wfc's zero rows.  Zero
        # fill at the boundaries is exact only because c2 is post-ReLU (>= 0).
        m6 = c2
        for sh in (-1, 1, 2, 3, 4):
            m6 = jnp.maximum(m6, _shift(c2, sh))                                    # (16,3072)
        m6_ref[16 * s:16 * (s + 1), :] = m6

    # fc: Linear(750, 256) + ReLU — a single MXU matmul with M = 16*Bt
    # (bf16 operands, f32 accumulation).  dropout1/dropout2: eval-mode identity.
    out = jnp.dot(m6_ref[...], wfc_ref[...], preferred_element_type=jnp.float32)
    out = jnp.maximum(out + bfc_ref[...], 0.0)                                      # (16*Bt,256)
    for s in range(bt):
        o_ref[s] = out[16 * s:16 * (s + 1), :]


def spectrum_cnn_forward(x, params):
    """x: (B, neighbor_size, MZ_SIZE) float32  ->  (B, 16, 256) float32 (eval mode)."""
    B = x.shape[0]
    Bt = min(B, MAX_BT)
    Bp = ((B + Bt - 1) // Bt) * Bt         # pad batch to a multiple of Bt (sliced off below)

    # ---- maxpool1 hoisted to XLA: one mem-bound pass over the 3 MB/sample spectrum,
    # producing a lane-dense 60 KB/sample slab (padded to 3072 lanes; zero batch pad).
    pooled = jnp.max(x.reshape(B, NEIGHBOR, W1, RES), axis=-1)
    pooled = jnp.pad(pooled, ((0, Bp - B), (0, 0), (0, WPAD - W1)))

    # ---- tiny one-time weight prep ----
    # conv1 (4,1,5,5) -> (4, 5 taps * 8 rows): col = kw*8 + kh, rows 5..7 of each tap zero.
    w1m = jnp.zeros((4, 5, KTAP), jnp.float32)
    w1m = w1m.at[:, :, :5].set(params["w1"][:, 0].transpose(0, 2, 1))
    w1m = w1m.reshape(4, 5 * KTAP).astype(jnp.bfloat16)
    # conv2 (16,4,1,5) -> (16, 5 taps * 8 rows): col = kw*8 + ci, rows 4..7 of each tap zero.
    w2m = jnp.zeros((16, 5, KTAP), jnp.float32)
    w2m = w2m.at[:, :, :4].set(params["w2"][:, :, 0, :].transpose(0, 2, 1))
    w2m = w2m.reshape(16, 5 * KTAP).astype(jnp.bfloat16)
    b1c = params["b1"].reshape(4, 1)
    b2c = params["b2"].reshape(16, 1)
    # fc weight with the maxpool2 stride-4 selection folded in: row 4*j holds wfc.T[j],
    # rows 4j+1..4j+3 and j >= 750 are zero.
    wspread = jnp.zeros((WPAD // 4, 4, HID), jnp.float32)
    wspread = wspread.at[:WPOOL, 0, :].set(params["wfc"].T)
    wspread = wspread.reshape(WPAD, HID).astype(jnp.bfloat16)                  # (3072, 256)
    bfc2 = params["bfc"].reshape(1, HID)

    out = pl.pallas_call(
        spectrum_kernel,
        out_shape=jax.ShapeDtypeStruct((Bp, 16, HID), jnp.float32),
        grid=(Bp // Bt,),
        in_specs=[
            pl.BlockSpec((Bt, NEIGHBOR, WPAD), lambda b: (b, 0, 0)),
            pl.BlockSpec((4, 5 * KTAP), lambda b: (0, 0)),
            pl.BlockSpec((4, 1), lambda b: (0, 0)),
            pl.BlockSpec((16, 5 * KTAP), lambda b: (0, 0)),
            pl.BlockSpec((16, 1), lambda b: (0, 0)),
            pl.BlockSpec((WPAD, HID), lambda b: (0, 0)),
            pl.BlockSpec((1, HID), lambda b: (0, 0)),
        ],
        out_specs=pl.BlockSpec((Bt, 16, HID), lambda b: (b, 0, 0)),
        scratch_shapes=[pltpu.VMEM((16 * Bt, WPAD), jnp.bfloat16)],
        compiler_params=pltpu.CompilerParams(
            dimension_semantics=("parallel",),   # megacore shards samples on v7x
            vmem_limit_bytes=16 * 1024 * 1024,   # footprint ~6 MiB; fits every generation
        ),
    )(pooled, w1m, b1c, w2m, b2c, wspread, bfc2)
    return out[:B]


def reference_forward(x, params):
    """Pure-JAX NCHW reference mirroring the PyTorch forward (eval mode, f32)."""
    B = x.shape[0]
    xi = x.reshape(B, 1, NEIGHBOR, MZ)
    p = jax.lax.reduce_window(xi, -jnp.inf, jax.lax.max,
                              (1, 1, 1, RES), (1, 1, 1, RES), "VALID")
    c1 = jax.lax.conv_general_dilated(
        p, params["w1"], window_strides=(5, 1), padding=((0, 0), (2, 2)),
        dimension_numbers=("NCHW", "OIHW", "NCHW"))
    c1 = jax.nn.relu(c1 + params["b1"].reshape(1, 4, 1, 1))
    c2 = jax.lax.conv_general_dilated(
        c1, params["w2"], window_strides=(1, 1), padding=((0, 0), (2, 2)),
        dimension_numbers=("NCHW", "OIHW", "NCHW"))
    c2 = jax.nn.relu(c2 + params["b2"].reshape(1, 16, 1, 1))
    c2p = jnp.pad(c2, ((0, 0), (0, 0), (0, 0), (1, 1)), constant_values=-jnp.inf)
    mp = jax.lax.reduce_window(c2p, -jnp.inf, jax.lax.max,
                               (1, 1, 1, 6), (1, 1, 1, 4), "VALID")
    feat = mp.reshape(B, 16, WPOOL)
    return jax.nn.relu(feat @ params["wfc"].T + params["bfc"])


if __name__ == "__main__":
    key = jax.random.PRNGKey(0)
    ks = jax.random.split(key, 7)
    # deterministic synthetic parameters (shapes from SpectrumCNN.__init__)
    params = {
        "w1": jax.random.normal(ks[0], (4, 1, 5, 5), jnp.float32) * 0.1,
        "b1": jax.random.normal(ks[1], (4,), jnp.float32) * 0.1,
        "w2": jax.random.normal(ks[2], (16, 4, 1, 5), jnp.float32) * 0.1,
        "b2": jax.random.normal(ks[3], (16,), jnp.float32) * 0.1,
        "wfc": jax.random.normal(ks[4], (HID, WPOOL), jnp.float32) * 0.05,
        "bfc": jax.random.normal(ks[5], (HID,), jnp.float32) * 0.05,
    }
    # spectrum_holder: batch=2, neighbor_size=5, MZ_SIZE=150000
    x = jax.random.normal(ks[6], (2, NEIGHBOR, MZ), jnp.float32)

    out = jax.block_until_ready(jax.jit(spectrum_cnn_forward)(x, params))
    assert out.shape == (2, 16, HID) and out.dtype == jnp.float32

    ref = jax.block_until_ready(reference_forward(x, params))
    err = float(jnp.max(jnp.abs(out - ref)))
    scale = float(jnp.max(jnp.abs(ref))) + 1e-6
    # Tolerance covers the deliberate bf16-operand / f32-accumulation matmuls.
    if err / scale > 1.5e-2:
        raise AssertionError(f"kernel/reference mismatch: max_abs_err={err}, scale={scale}")

    print("KERNEL_OK")
</pallas_src>

<mosaic_0001>
module attributes {stable_mosaic.version = 11 : i64} {
  func.func @spectrum_kernel(%arg0: i32, %arg1: memref<2x5x3072xf32, #tpu.memory_space<vmem>>, %arg2: memref<4x40xbf16, #tpu.memory_space<vmem>>, %arg3: memref<4x1xf32, #tpu.memory_space<vmem>>, %arg4: memref<16x40xbf16, #tpu.memory_space<vmem>>, %arg5: memref<16x1xf32, #tpu.memory_space<vmem>>, %arg6: memref<3072x256xbf16, #tpu.memory_space<vmem>>, %arg7: memref<1x256xf32, #tpu.memory_space<vmem>>, %arg8: memref<2x16x256xf32, #tpu.memory_space<vmem>>, %arg9: memref<32x3072xbf16, #tpu.memory_space<vmem>>) attributes {dimension_semantics = [#tpu.dimension_semantics<parallel>], iteration_bounds = array<i64: 1>, scalar_prefetch = 0 : i64, scratch_operands = 1 : i64, tpu.core_type = #tpu.core_type<tc>, window_params = [{transform_indices = @transform_0, window_bounds = array<i64: 2, 5, 3072>}, {pipeline_mode = #tpu.pipeline_mode<synchronous>, transform_indices = @transform_1, window_bounds = array<i64: 4, 40>}, {pipeline_mode = #tpu.pipeline_mode<synchronous>, transform_indices = @transform_2, window_bounds = array<i64: 4, 1>}, {pipeline_mode = #tpu.pipeline_mode<synchronous>, transform_indices = @transform_3, window_bounds = array<i64: 16, 40>}, {pipeline_mode = #tpu.pipeline_mode<synchronous>, transform_indices = @transform_4, window_bounds = array<i64: 16, 1>}, {pipeline_mode = #tpu.pipeline_mode<synchronous>, transform_indices = @transform_5, window_bounds = array<i64: 3072, 256>}, {pipeline_mode = #tpu.pipeline_mode<synchronous>, transform_indices = @transform_6, window_bounds = array<i64: 1, 256>}, {transform_indices = @transform_7, window_bounds = array<i64: 2, 16, 256>}]} {
    %0 = tpu.iota {dimensions = array<i32: 1>} : vector<1x3072xi32>
    %c3000_i32 = arith.constant 3000 : i32
    %1 = vector.broadcast %c3000_i32 : i32 to vector<1x3072xi32>
    %2 = arith.cmpi slt, %0, %1 : vector<1x3072xi32>
    %c0 = arith.constant 0 : index
    %c0_0 = arith.constant 0 : index
    %c0_1 = arith.constant 0 : index
    %3 = vector.load %arg1[%c0, %c0_0, %c0_1] : memref<2x5x3072xf32, #tpu.memory_space<vmem>>, vector<1x5x3072xf32>
    %4 = vector.shape_cast %3 : vector<1x5x3072xf32> to vector<5x3072xf32>
    %5 = arith.truncf %4 : vector<5x3072xf32> to vector<5x3072xbf16>
    %cst = arith.constant 0.000000e+00 : bf16
    %6 = vector.broadcast %cst : bf16 to vector<5x2xbf16>
    %7 = vector.extract_strided_slice %5 {offsets = [0, 0], sizes = [5, 3070], strides = [1, 1]} : vector<5x3072xbf16> to vector<5x3070xbf16>
    %8 = tpu.concatenate %6, %7 in 1 : vector<5x2xbf16>, vector<5x3070xbf16> -> vector<5x3072xbf16>
    %cst_2 = arith.constant 0.000000e+00 : bf16
    %9 = vector.broadcast %cst_2 : bf16 to vector<3x3072xbf16>
    %10 = tpu.concatenate %8, %9 in 0 : vector<5x3072xbf16>, vector<3x3072xbf16> -> vector<8x3072xbf16>
    %cst_3 = arith.constant 0.000000e+00 : bf16
    %11 = vector.broadcast %cst_3 : bf16 to vector<5x1xbf16>
    %12 = vector.extract_strided_slice %5 {offsets = [0, 0], sizes = [5, 3071], strides = [1, 1]} : vector<5x3072xbf16> to vector<5x3071xbf16>
    %13 = tpu.concatenate %11, %12 in 1 : vector<5x1xbf16>, vector<5x3071xbf16> -> vector<5x3072xbf16>
    %cst_4 = arith.constant 0.000000e+00 : bf16
    %14 = vector.broadcast %cst_4 : bf16 to vector<3x3072xbf16>
    %15 = tpu.concatenate %13, %14 in 0 : vector<5x3072xbf16>, vector<3x3072xbf16> -> vector<8x3072xbf16>
    %cst_5 = arith.constant 0.000000e+00 : bf16
    %16 = vector.broadcast %cst_5 : bf16 to vector<3x3072xbf16>
    %17 = tpu.concatenate %5, %16 in 0 : vector<5x3072xbf16>, vector<3x3072xbf16> -> vector<8x3072xbf16>
    %cst_6 = arith.constant 0.000000e+00 : bf16
    %18 = vector.broadcast %cst_6 : bf16 to vector<5x1xbf16>
    %19 = vector.extract_strided_slice %5 {offsets = [0, 1], sizes = [5, 3071], strides = [1, 1]} : vector<5x3072xbf16> to vector<5x3071xbf16>
    %20 = tpu.concatenate %19, %18 in 1 : vector<5x3071xbf16>, vector<5x1xbf16> -> vector<5x3072xbf16>
    %cst_7 = arith.constant 0.000000e+00 : bf16
    %21 = vector.broadcast %cst_7 : bf16 to vector<3x3072xbf16>
    %22 = tpu.concatenate %20, %21 in 0 : vector<5x3072xbf16>, vector<3x3072xbf16> -> vector<8x3072xbf16>
    %cst_8 = arith.constant 0.000000e+00 : bf16
    %23 = vector.broadcast %cst_8 : bf16 to vector<5x2xbf16>
    %24 = vector.extract_strided_slice %5 {offsets = [0, 2], sizes = [5, 3070], strides = [1, 1]} : vector<5x3072xbf16> to vector<5x3070xbf16>
    %25 = tpu.concatenate %24, %23 in 1 : vector<5x3070xbf16>, vector<5x2xbf16> -> vector<5x3072xbf16>
    %cst_9 = arith.constant 0.000000e+00 : bf16
    %26 = vector.broadcast %cst_9 : bf16 to vector<3x3072xbf16>
    %27 = tpu.concatenate %25, %26 in 0 : vector<5x3072xbf16>, vector<3x3072xbf16> -> vector<8x3072xbf16>
    %28 = tpu.concatenate %10, %15, %17, %22, %27 in 0 : vector<8x3072xbf16>, vector<8x3072xbf16>, vector<8x3072xbf16>, vector<8x3072xbf16>, vector<8x3072xbf16> -> vector<40x3072xbf16>
    %c0_10 = arith.constant 0 : index
    %c0_11 = arith.constant 0 : index
    %29 = vector.load %arg2[%c0_10, %c0_11] : memref<4x40xbf16, #tpu.memory_space<vmem>>, vector<4x40xbf16>
    %cst_12 = arith.constant dense<0.000000e+00> : vector<4x3072xf32>
    %30 = tpu.matmul %29, %28, %cst_12 {dimension_numbers = #tpu.dot_dimension_numbers<[1], [0], [0], [1], [0, 0, 1, 1], [], []>} : vector<4x40xbf16>, vector<40x3072xbf16>, vector<4x3072xf32> -> vector<4x3072xf32>
    %c0_13 = arith.constant 0 : index
    %c0_14 = arith.constant 0 : index
    %31 = vector.load %arg3[%c0_13, %c0_14] : memref<4x1xf32, #tpu.memory_space<vmem>>, vector<4x1xf32>
    %32 = vector.broadcast %31 : vector<4x1xf32> to vector<4x3072xf32>
    %33 = arith.addf %30, %32 : vector<4x3072xf32>
    %cst_15 = arith.constant 0.000000e+00 : f32
    %34 = vector.broadcast %cst_15 : f32 to vector<4x3072xf32>
    %35 = arith.maximumf %33, %34 : vector<4x3072xf32>
    %cst_16 = arith.constant 0.000000e+00 : f32
    %36 = vector.shape_cast %2 : vector<1x3072xi1> to vector<1x3072xi1>
    %37 = vector.broadcast %36 : vector<1x3072xi1> to vector<4x3072xi1>
    %38 = vector.broadcast %cst_16 : f32 to vector<4x3072xf32>
    %39 = arith.select %37, %35, %38 : vector<4x3072xi1>, vector<4x3072xf32>
    %40 = arith.truncf %39 : vector<4x3072xf32> to vector<4x3072xbf16>
    %cst_17 = arith.constant 0.000000e+00 : bf16
    %41 = vector.broadcast %cst_17 : bf16 to vector<4x2xbf16>
    %42 = vector.extract_strided_slice %40 {offsets = [0, 0], sizes = [4, 3070], strides = [1, 1]} : vector<4x3072xbf16> to vector<4x3070xbf16>
    %43 = tpu.concatenate %41, %42 in 1 : vector<4x2xbf16>, vector<4x3070xbf16> -> vector<4x3072xbf16>
    %cst_18 = arith.constant 0.000000e+00 : bf16
    %44 = vector.broadcast %cst_18 : bf16 to vector<4x3072xbf16>
    %45 = tpu.concatenate %43, %44 in 0 : vector<4x3072xbf16>, vector<4x3072xbf16> -> vector<8x3072xbf16>
    %cst_19 = arith.constant 0.000000e+00 : bf16
    %46 = vector.broadcast %cst_19 : bf16 to vector<4x1xbf16>
    %47 = vector.extract_strided_slice %40 {offsets = [0, 0], sizes = [4, 3071], strides = [1, 1]} : vector<4x3072xbf16> to vector<4x3071xbf16>
    %48 = tpu.concatenate %46, %47 in 1 : vector<4x1xbf16>, vector<4x3071xbf16> -> vector<4x3072xbf16>
    %cst_20 = arith.constant 0.000000e+00 : bf16
    %49 = vector.broadcast %cst_20 : bf16 to vector<4x3072xbf16>
    %50 = tpu.concatenate %48, %49 in 0 : vector<4x3072xbf16>, vector<4x3072xbf16> -> vector<8x3072xbf16>
    %cst_21 = arith.constant 0.000000e+00 : bf16
    %51 = vector.broadcast %cst_21 : bf16 to vector<4x3072xbf16>
    %52 = tpu.concatenate %40, %51 in 0 : vector<4x3072xbf16>, vector<4x3072xbf16> -> vector<8x3072xbf16>
    %cst_22 = arith.constant 0.000000e+00 : bf16
    %53 = vector.broadcast %cst_22 : bf16 to vector<4x1xbf16>
    %54 = vector.extract_strided_slice %40 {offsets = [0, 1], sizes = [4, 3071], strides = [1, 1]} : vector<4x3072xbf16> to vector<4x3071xbf16>
    %55 = tpu.concatenate %54, %53 in 1 : vector<4x3071xbf16>, vector<4x1xbf16> -> vector<4x3072xbf16>
    %cst_23 = arith.constant 0.000000e+00 : bf16
    %56 = vector.broadcast %cst_23 : bf16 to vector<4x3072xbf16>
    %57 = tpu.concatenate %55, %56 in 0 : vector<4x3072xbf16>, vector<4x3072xbf16> -> vector<8x3072xbf16>
    %cst_24 = arith.constant 0.000000e+00 : bf16
    %58 = vector.broadcast %cst_24 : bf16 to vector<4x2xbf16>
    %59 = vector.extract_strided_slice %40 {offsets = [0, 2], sizes = [4, 3070], strides = [1, 1]} : vector<4x3072xbf16> to vector<4x3070xbf16>
    %60 = tpu.concatenate %59, %58 in 1 : vector<4x3070xbf16>, vector<4x2xbf16> -> vector<4x3072xbf16>
    %cst_25 = arith.constant 0.000000e+00 : bf16
    %61 = vector.broadcast %cst_25 : bf16 to vector<4x3072xbf16>
    %62 = tpu.concatenate %60, %61 in 0 : vector<4x3072xbf16>, vector<4x3072xbf16> -> vector<8x3072xbf16>
    %63 = tpu.concatenate %45, %50, %52, %57, %62 in 0 : vector<8x3072xbf16>, vector<8x3072xbf16>, vector<8x3072xbf16>, vector<8x3072xbf16>, vector<8x3072xbf16> -> vector<40x3072xbf16>
    %c0_26 = arith.constant 0 : index
    %c0_27 = arith.constant 0 : index
    %64 = vector.load %arg4[%c0_26, %c0_27] : memref<16x40xbf16, #tpu.memory_space<vmem>>, vector<16x40xbf16>
    %cst_28 = arith.constant dense<0.000000e+00> : vector<16x3072xf32>
    %65 = tpu.matmul %64, %63, %cst_28 {dimension_numbers = #tpu.dot_dimension_numbers<[1], [0], [0], [1], [0, 0, 1, 1], [], []>} : vector<16x40xbf16>, vector<40x3072xbf16>, vector<16x3072xf32> -> vector<16x3072xf32>
    %c0_29 = arith.constant 0 : index
    %c0_30 = arith.constant 0 : index
    %66 = vector.load %arg5[%c0_29, %c0_30] : memref<16x1xf32, #tpu.memory_space<vmem>>, vector<16x1xf32>
    %67 = vector.broadcast %66 : vector<16x1xf32> to vector<16x3072xf32>
    %68 = arith.addf %65, %67 : vector<16x3072xf32>
    %cst_31 = arith.constant 0.000000e+00 : f32
    %69 = vector.broadcast %cst_31 : f32 to vector<16x3072xf32>
    %70 = arith.maximumf %68, %69 : vector<16x3072xf32>
    %cst_32 = arith.constant 0.000000e+00 : f32
    %71 = vector.shape_cast %2 : vector<1x3072xi1> to vector<1x3072xi1>
    %72 = vector.broadcast %71 : vector<1x3072xi1> to vector<16x3072xi1>
    %73 = vector.broadcast %cst_32 : f32 to vector<16x3072xf32>
    %74 = arith.select %72, %70, %73 : vector<16x3072xi1>, vector<16x3072xf32>
    %75 = arith.truncf %74 : vector<16x3072xf32> to vector<16x3072xbf16>
    %cst_33 = arith.constant 0.000000e+00 : bf16
    %76 = vector.broadcast %cst_33 : bf16 to vector<16x1xbf16>
    %77 = vector.extract_strided_slice %75 {offsets = [0, 0], sizes = [16, 3071], strides = [1, 1]} : vector<16x3072xbf16> to vector<16x3071xbf16>
    %78 = tpu.concatenate %76, %77 in 1 : vector<16x1xbf16>, vector<16x3071xbf16> -> vector<16x3072xbf16>
    %79 = arith.maximumf %75, %78 : vector<16x3072xbf16>
    %cst_34 = arith.constant 0.000000e+00 : bf16
    %80 = vector.broadcast %cst_34 : bf16 to vector<16x1xbf16>
    %81 = vector.extract_strided_slice %75 {offsets = [0, 1], sizes = [16, 3071], strides = [1, 1]} : vector<16x3072xbf16> to vector<16x3071xbf16>
    %82 = tpu.concatenate %81, %80 in 1 : vector<16x3071xbf16>, vector<16x1xbf16> -> vector<16x3072xbf16>
    %83 = arith.maximumf %79, %82 : vector<16x3072xbf16>
    %cst_35 = arith.constant 0.000000e+00 : bf16
    %84 = vector.broadcast %cst_35 : bf16 to vector<16x2xbf16>
    %85 = vector.extract_strided_slice %75 {offsets = [0, 2], sizes = [16, 3070], strides = [1, 1]} : vector<16x3072xbf16> to vector<16x3070xbf16>
    %86 = tpu.concatenate %85, %84 in 1 : vector<16x3070xbf16>, vector<16x2xbf16> -> vector<16x3072xbf16>
    %87 = arith.maximumf %83, %86 : vector<16x3072xbf16>
    %cst_36 = arith.constant 0.000000e+00 : bf16
    %88 = vector.broadcast %cst_36 : bf16 to vector<16x3xbf16>
    %89 = vector.extract_strided_slice %75 {offsets = [0, 3], sizes = [16, 3069], strides = [1, 1]} : vector<16x3072xbf16> to vector<16x3069xbf16>
    %90 = tpu.concatenate %89, %88 in 1 : vector<16x3069xbf16>, vector<16x3xbf16> -> vector<16x3072xbf16>
    %91 = arith.maximumf %87, %90 : vector<16x3072xbf16>
    %cst_37 = arith.constant 0.000000e+00 : bf16
    %92 = vector.broadcast %cst_37 : bf16 to vector<16x4xbf16>
    %93 = vector.extract_strided_slice %75 {offsets = [0, 4], sizes = [16, 3068], strides = [1, 1]} : vector<16x3072xbf16> to vector<16x3068xbf16>
    %94 = tpu.concatenate %93, %92 in 1 : vector<16x3068xbf16>, vector<16x4xbf16> -> vector<16x3072xbf16>
    %95 = arith.maximumf %91, %94 : vector<16x3072xbf16>
    %c0_38 = arith.constant 0 : index
    %c0_39 = arith.constant 0 : index
    %96 = vector.load %arg9[%c0_38, %c0_39] : memref<32x3072xbf16, #tpu.memory_space<vmem>>, vector<16x3072xbf16>
    tpu.vector_store %arg9[%c0_38, %c0_39], %95 {strides = array<i32>} : memref<32x3072xbf16, #tpu.memory_space<vmem>>, vector<16x3072xbf16>,
    %c1 = arith.constant 1 : index
    %c0_40 = arith.constant 0 : index
    %c0_41 = arith.constant 0 : index
    %97 = vector.load %arg1[%c1, %c0_40, %c0_41] : memref<2x5x3072xf32, #tpu.memory_space<vmem>>, vector<1x5x3072xf32>
    %98 = vector.shape_cast %97 : vector<1x5x3072xf32> to vector<5x3072xf32>
    %99 = arith.truncf %98 : vector<5x3072xf32> to vector<5x3072xbf16>
    %cst_42 = arith.constant 0.000000e+00 : bf16
    %100 = vector.broadcast %cst_42 : bf16 to vector<5x2xbf16>
    %101 = vector.extract_strided_slice %99 {offsets = [0, 0], sizes = [5, 3070], strides = [1, 1]} : vector<5x3072xbf16> to vector<5x3070xbf16>
    %102 = tpu.concatenate %100, %101 in 1 : vector<5x2xbf16>, vector<5x3070xbf16> -> vector<5x3072xbf16>
    %cst_43 = arith.constant 0.000000e+00 : bf16
    %103 = vector.broadcast %cst_43 : bf16 to vector<3x3072xbf16>
    %104 = tpu.concatenate %102, %103 in 0 : vector<5x3072xbf16>, vector<3x3072xbf16> -> vector<8x3072xbf16>
    %cst_44 = arith.constant 0.000000e+00 : bf16
    %105 = vector.broadcast %cst_44 : bf16 to vector<5x1xbf16>
    %106 = vector.extract_strided_slice %99 {offsets = [0, 0], sizes = [5, 3071], strides = [1, 1]} : vector<5x3072xbf16> to vector<5x3071xbf16>
    %107 = tpu.concatenate %105, %106 in 1 : vector<5x1xbf16>, vector<5x3071xbf16> -> vector<5x3072xbf16>
    %cst_45 = arith.constant 0.000000e+00 : bf16
    %108 = vector.broadcast %cst_45 : bf16 to vector<3x3072xbf16>
    %109 = tpu.concatenate %107, %108 in 0 : vector<5x3072xbf16>, vector<3x3072xbf16> -> vector<8x3072xbf16>
    %cst_46 = arith.constant 0.000000e+00 : bf16
    %110 = vector.broadcast %cst_46 : bf16 to vector<3x3072xbf16>
    %111 = tpu.concatenate %99, %110 in 0 : vector<5x3072xbf16>, vector<3x3072xbf16> -> vector<8x3072xbf16>
    %cst_47 = arith.constant 0.000000e+00 : bf16
    %112 = vector.broadcast %cst_47 : bf16 to vector<5x1xbf16>
    %113 = vector.extract_strided_slice %99 {offsets = [0, 1], sizes = [5, 3071], strides = [1, 1]} : vector<5x3072xbf16> to vector<5x3071xbf16>
    %114 = tpu.concatenate %113, %112 in 1 : vector<5x3071xbf16>, vector<5x1xbf16> -> vector<5x3072xbf16>
    %cst_48 = arith.constant 0.000000e+00 : bf16
    %115 = vector.broadcast %cst_48 : bf16 to vector<3x3072xbf16>
    %116 = tpu.concatenate %114, %115 in 0 : vector<5x3072xbf16>, vector<3x3072xbf16> -> vector<8x3072xbf16>
    %cst_49 = arith.constant 0.000000e+00 : bf16
    %117 = vector.broadcast %cst_49 : bf16 to vector<5x2xbf16>
    %118 = vector.extract_strided_slice %99 {offsets = [0, 2], sizes = [5, 3070], strides = [1, 1]} : vector<5x3072xbf16> to vector<5x3070xbf16>
    %119 = tpu.concatenate %118, %117 in 1 : vector<5x3070xbf16>, vector<5x2xbf16> -> vector<5x3072xbf16>
    %cst_50 = arith.constant 0.000000e+00 : bf16
    %120 = vector.broadcast %cst_50 : bf16 to vector<3x3072xbf16>
    %121 = tpu.concatenate %119, %120 in 0 : vector<5x3072xbf16>, vector<3x3072xbf16> -> vector<8x3072xbf16>
    %122 = tpu.concatenate %104, %109, %111, %116, %121 in 0 : vector<8x3072xbf16>, vector<8x3072xbf16>, vector<8x3072xbf16>, vector<8x3072xbf16>, vector<8x3072xbf16> -> vector<40x3072xbf16>
    %c0_51 = arith.constant 0 : index
    %c0_52 = arith.constant 0 : index
    %123 = vector.load %arg2[%c0_51, %c0_52] : memref<4x40xbf16, #tpu.memory_space<vmem>>, vector<4x40xbf16>
    %cst_53 = arith.constant dense<0.000000e+00> : vector<4x3072xf32>
    %124 = tpu.matmul %123, %122, %cst_53 {dimension_numbers = #tpu.dot_dimension_numbers<[1], [0], [0], [1], [0, 0, 1, 1], [], []>} : vector<4x40xbf16>, vector<40x3072xbf16>, vector<4x3072xf32> -> vector<4x3072xf32>
    %c0_54 = arith.constant 0 : index
    %c0_55 = arith.constant 0 : index
    %125 = vector.load %arg3[%c0_54, %c0_55] : memref<4x1xf32, #tpu.memory_space<vmem>>, vector<4x1xf32>
    %126 = vector.broadcast %125 : vector<4x1xf32> to vector<4x3072xf32>
    %127 = arith.addf %124, %126 : vector<4x3072xf32>
    %cst_56 = arith.constant 0.000000e+00 : f32
    %128 = vector.broadcast %cst_56 : f32 to vector<4x3072xf32>
    %129 = arith.maximumf %127, %128 : vector<4x3072xf32>
    %cst_57 = arith.constant 0.000000e+00 : f32
    %130 = vector.shape_cast %2 : vector<1x3072xi1> to vector<1x3072xi1>
    %131 = vector.broadcast %130 : vector<1x3072xi1> to vector<4x3072xi1>
    %132 = vector.broadcast %cst_57 : f32 to vector<4x3072xf32>
    %133 = arith.select %131, %129, %132 : vector<4x3072xi1>, vector<4x3072xf32>
    %134 = arith.truncf %133 : vector<4x3072xf32> to vector<4x3072xbf16>
    %cst_58 = arith.constant 0.000000e+00 : bf16
    %135 = vector.broadcast %cst_58 : bf16 to vector<4x2xbf16>
    %136 = vector.extract_strided_slice %134 {offsets = [0, 0], sizes = [4, 3070], strides = [1, 1]} : vector<4x3072xbf16> to vector<4x3070xbf16>
    %137 = tpu.concatenate %135, %136 in 1 : vector<4x2xbf16>, vector<4x3070xbf16> -> vector<4x3072xbf16>
    %cst_59 = arith.constant 0.000000e+00 : bf16
    %138 = vector.broadcast %cst_59 : bf16 to vector<4x3072xbf16>
    %139 = tpu.concatenate %137, %138 in 0 : vector<4x3072xbf16>, vector<4x3072xbf16> -> vector<8x3072xbf16>
    %cst_60 = arith.constant 0.000000e+00 : bf16
    %140 = vector.broadcast %cst_60 : bf16 to vector<4x1xbf16>
    %141 = vector.extract_strided_slice %134 {offsets = [0, 0], sizes = [4, 3071], strides = [1, 1]} : vector<4x3072xbf16> to vector<4x3071xbf16>
    %142 = tpu.concatenate %140, %141 in 1 : vector<4x1xbf16>, vector<4x3071xbf16> -> vector<4x3072xbf16>
    %cst_61 = arith.constant 0.000000e+00 : bf16
    %143 = vector.broadcast %cst_61 : bf16 to vector<4x3072xbf16>
    %144 = tpu.concatenate %142, %143 in 0 : vector<4x3072xbf16>, vector<4x3072xbf16> -> vector<8x3072xbf16>
    %cst_62 = arith.constant 0.000000e+00 : bf16
    %145 = vector.broadcast %cst_62 : bf16 to vector<4x3072xbf16>
    %146 = tpu.concatenate %134, %145 in 0 : vector<4x3072xbf16>, vector<4x3072xbf16> -> vector<8x3072xbf16>
    %cst_63 = arith.constant 0.000000e+00 : bf16
    %147 = vector.broadcast %cst_63 : bf16 to vector<4x1xbf16>
    %148 = vector.extract_strided_slice %134 {offsets = [0, 1], sizes = [4, 3071], strides = [1, 1]} : vector<4x3072xbf16> to vector<4x3071xbf16>
    %149 = tpu.concatenate %148, %147 in 1 : vector<4x3071xbf16>, vector<4x1xbf16> -> vector<4x3072xbf16>
    %cst_64 = arith.constant 0.000000e+00 : bf16
    %150 = vector.broadcast %cst_64 : bf16 to vector<4x3072xbf16>
    %151 = tpu.concatenate %149, %150 in 0 : vector<4x3072xbf16>, vector<4x3072xbf16> -> vector<8x3072xbf16>
    %cst_65 = arith.constant 0.000000e+00 : bf16
    %152 = vector.broadcast %cst_65 : bf16 to vector<4x2xbf16>
    %153 = vector.extract_strided_slice %134 {offsets = [0, 2], sizes = [4, 3070], strides = [1, 1]} : vector<4x3072xbf16> to vector<4x3070xbf16>
    %154 = tpu.concatenate %153, %152 in 1 : vector<4x3070xbf16>, vector<4x2xbf16> -> vector<4x3072xbf16>
    %cst_66 = arith.constant 0.000000e+00 : bf16
    %155 = vector.broadcast %cst_66 : bf16 to vector<4x3072xbf16>
    %156 = tpu.concatenate %154, %155 in 0 : vector<4x3072xbf16>, vector<4x3072xbf16> -> vector<8x3072xbf16>
    %157 = tpu.concatenate %139, %144, %146, %151, %156 in 0 : vector<8x3072xbf16>, vector<8x3072xbf16>, vector<8x3072xbf16>, vector<8x3072xbf16>, vector<8x3072xbf16> -> vector<40x3072xbf16>
    %c0_67 = arith.constant 0 : index
    %c0_68 = arith.constant 0 : index
    %158 = vector.load %arg4[%c0_67, %c0_68] : memref<16x40xbf16, #tpu.memory_space<vmem>>, vector<16x40xbf16>
    %cst_69 = arith.constant dense<0.000000e+00> : vector<16x3072xf32>
    %159 = tpu.matmul %158, %157, %cst_69 {dimension_numbers = #tpu.dot_dimension_numbers<[1], [0], [0], [1], [0, 0, 1, 1], [], []>} : vector<16x40xbf16>, vector<40x3072xbf16>, vector<16x3072xf32> -> vector<16x3072xf32>
    %c0_70 = arith.constant 0 : index
    %c0_71 = arith.constant 0 : index
    %160 = vector.load %arg5[%c0_70, %c0_71] : memref<16x1xf32, #tpu.memory_space<vmem>>, vector<16x1xf32>
    %161 = vector.broadcast %160 : vector<16x1xf32> to vector<16x3072xf32>
    %162 = arith.addf %159, %161 : vector<16x3072xf32>
    %cst_72 = arith.constant 0.000000e+00 : f32
    %163 = vector.broadcast %cst_72 : f32 to vector<16x3072xf32>
    %164 = arith.maximumf %162, %163 : vector<16x3072xf32>
    %cst_73 = arith.constant 0.000000e+00 : f32
    %165 = vector.shape_cast %2 : vector<1x3072xi1> to vector<1x3072xi1>
    %166 = vector.broadcast %165 : vector<1x3072xi1> to vector<16x3072xi1>
    %167 = vector.broadcast %cst_73 : f32 to vector<16x3072xf32>
    %168 = arith.select %166, %164, %167 : vector<16x3072xi1>, vector<16x3072xf32>
    %169 = arith.truncf %168 : vector<16x3072xf32> to vector<16x3072xbf16>
    %cst_74 = arith.constant 0.000000e+00 : bf16
    %170 = vector.broadcast %cst_74 : bf16 to vector<16x1xbf16>
    %171 = vector.extract_strided_slice %169 {offsets = [0, 0], sizes = [16, 3071], strides = [1, 1]} : vector<16x3072xbf16> to vector<16x3071xbf16>
    %172 = tpu.concatenate %170, %171 in 1 : vector<16x1xbf16>, vector<16x3071xbf16> -> vector<16x3072xbf16>
    %173 = arith.maximumf %169, %172 : vector<16x3072xbf16>
    %cst_75 = arith.constant 0.000000e+00 : bf16
    %174 = vector.broadcast %cst_75 : bf16 to vector<16x1xbf16>
    %175 = vector.extract_strided_slice %169 {offsets = [0, 1], sizes = [16, 3071], strides = [1, 1]} : vector<16x3072xbf16> to vector<16x3071xbf16>
    %176 = tpu.concatenate %175, %174 in 1 : vector<16x3071xbf16>, vector<16x1xbf16> -> vector<16x3072xbf16>
    %177 = arith.maximumf %173, %176 : vector<16x3072xbf16>
    %cst_76 = arith.constant 0.000000e+00 : bf16
    %178 = vector.broadcast %cst_76 : bf16 to vector<16x2xbf16>
    %179 = vector.extract_strided_slice %169 {offsets = [0, 2], sizes = [16, 3070], strides = [1, 1]} : vector<16x3072xbf16> to vector<16x3070xbf16>
    %180 = tpu.concatenate %179, %178 in 1 : vector<16x3070xbf16>, vector<16x2xbf16> -> vector<16x3072xbf16>
    %181 = arith.maximumf %177, %180 : vector<16x3072xbf16>
    %cst_77 = arith.constant 0.000000e+00 : bf16
    %182 = vector.broadcast %cst_77 : bf16 to vector<16x3xbf16>
    %183 = vector.extract_strided_slice %169 {offsets = [0, 3], sizes = [16, 3069], strides = [1, 1]} : vector<16x3072xbf16> to vector<16x3069xbf16>
    %184 = tpu.concatenate %183, %182 in 1 : vector<16x3069xbf16>, vector<16x3xbf16> -> vector<16x3072xbf16>
    %185 = arith.maximumf %181, %184 : vector<16x3072xbf16>
    %cst_78 = arith.constant 0.000000e+00 : bf16
    %186 = vector.broadcast %cst_78 : bf16 to vector<16x4xbf16>
    %187 = vector.extract_strided_slice %169 {offsets = [0, 4], sizes = [16, 3068], strides = [1, 1]} : vector<16x3072xbf16> to vector<16x3068xbf16>
    %188 = tpu.concatenate %187, %186 in 1 : vector<16x3068xbf16>, vector<16x4xbf16> -> vector<16x3072xbf16>
    %189 = arith.maximumf %185, %188 : vector<16x3072xbf16>
    %c16 = arith.constant 16 : index
    %c0_79 = arith.constant 0 : index
    %190 = vector.load %arg9[%c16, %c0_79] : memref<32x3072xbf16, #tpu.memory_space<vmem>>, vector<16x3072xbf16>
    tpu.vector_store %arg9[%c16, %c0_79], %189 {strides = array<i32>} : memref<32x3072xbf16, #tpu.memory_space<vmem>>, vector<16x3072xbf16>,
    %c0_80 = arith.constant 0 : index
    %c0_81 = arith.constant 0 : index
    %191 = vector.load %arg9[%c0_80, %c0_81] : memref<32x3072xbf16, #tpu.memory_space<vmem>>, vector<32x3072xbf16>
    %c0_82 = arith.constant 0 : index
    %c0_83 = arith.constant 0 : index
    %192 = vector.load %arg6[%c0_82, %c0_83] : memref<3072x256xbf16, #tpu.memory_space<vmem>>, vector<3072x256xbf16>
    %cst_84 = arith.constant dense<0.000000e+00> : vector<32x256xf32>
    %193 = tpu.matmul %191, %192, %cst_84 {dimension_numbers = #tpu.dot_dimension_numbers<[1], [0], [0], [1], [0, 0, 1, 1], [], []>} : vector<32x3072xbf16>, vector<3072x256xbf16>, vector<32x256xf32> -> vector<32x256xf32>
    %c0_85 = arith.constant 0 : index
    %c0_86 = arith.constant 0 : index
    %194 = vector.load %arg7[%c0_85, %c0_86] : memref<1x256xf32, #tpu.memory_space<vmem>>, vector<1x256xf32>
    %195 = vector.broadcast %194 : vector<1x256xf32> to vector<32x256xf32>
    %196 = arith.addf %193, %195 : vector<32x256xf32>
    %cst_87 = arith.constant 0.000000e+00 : f32
    %197 = vector.broadcast %cst_87 : f32 to vector<32x256xf32>
    %198 = arith.maximumf %196, %197 : vector<32x256xf32>
    %199 = vector.extract_strided_slice %198 {offsets = [0, 0], sizes = [16, 256], strides = [1, 1]} : vector<32x256xf32> to vector<16x256xf32>
    %c0_88 = arith.constant 0 : index
    %c0_89 = arith.constant 0 : index
    %c0_90 = arith.constant 0 : index
    %200 = vector.load %arg8[%c0_88, %c0_89, %c0_90] : memref<2x16x256xf32, #tpu.memory_space<vmem>>, vector<1x16x256xf32>
    %201 = vector.shape_cast %200 : vector<1x16x256xf32> to vector<16x256xf32>
    %202 = vector.shape_cast %199 : vector<16x256xf32> to vector<1x16x256xf32>
    tpu.vector_store %arg8[%c0_88, %c0_89, %c0_90], %202 {strides = array<i32>} : memref<2x16x256xf32, #tpu.memory_space<vmem>>, vector<1x16x256xf32>,
    %203 = vector.extract_strided_slice %198 {offsets = [16, 0], sizes = [16, 256], strides = [1, 1]} : vector<32x256xf32> to vector<16x256xf32>
    %c1_91 = arith.constant 1 : index
    %c0_92 = arith.constant 0 : index
    %c0_93 = arith.constant 0 : index
    %204 = vector.load %arg8[%c1_91, %c0_92, %c0_93] : memref<2x16x256xf32, #tpu.memory_space<vmem>>, vector<1x16x256xf32>
    %205 = vector.shape_cast %204 : vector<1x16x256xf32> to vector<16x256xf32>
    %206 = vector.shape_cast %203 : vector<16x256xf32> to vector<1x16x256xf32>
    tpu.vector_store %arg8[%c1_91, %c0_92, %c0_93], %206 {strides = array<i32>} : memref<2x16x256xf32, #tpu.memory_space<vmem>>, vector<1x16x256xf32>,
    return
  }
  func.func @transform_0(%arg0: i32) -> (i32, i32, i32) {
    %c0_i32 = arith.constant 0 : i32
    %c0_i32_0 = arith.constant 0 : i32
    %c0_i32_1 = arith.constant 0 : i32
    return %arg0, %c0_i32, %c0_i32_0 : i32, i32, i32
  }
  func.func @transform_1(%arg0: i32) -> (i32, i32) {
    %c0_i32 = arith.constant 0 : i32
    %c0_i32_0 = arith.constant 0 : i32
    %c0_i32_1 = arith.constant 0 : i32
    return %c0_i32, %c0_i32_0 : i32, i32
  }
  func.func @transform_2(%arg0: i32) -> (i32, i32) {
    %c0_i32 = arith.constant 0 : i32
    %c0_i32_0 = arith.constant 0 : i32
    %c0_i32_1 = arith.constant 0 : i32
    return %c0_i32, %c0_i32_0 : i32, i32
  }
  func.func @transform_3(%arg0: i32) -> (i32, i32) {
    %c0_i32 = arith.constant 0 : i32
    %c0_i32_0 = arith.constant 0 : i32
    %c0_i32_1 = arith.constant 0 : i32
    return %c0_i32, %c0_i32_0 : i32, i32
  }
  func.func @transform_4(%arg0: i32) -> (i32, i32) {
    %c0_i32 = arith.constant 0 : i32
    %c0_i32_0 = arith.constant 0 : i32
    %c0_i32_1 = arith.constant 0 : i32
    return %c0_i32, %c0_i32_0 : i32, i32
  }
  func.func @transform_5(%arg0: i32) -> (i32, i32) {
    %c0_i32 = arith.constant 0 : i32
    %c0_i32_0 = arith.constant 0 : i32
    %c0_i32_1 = arith.constant 0 : i32
    return %c0_i32, %c0_i32_0 : i32, i32
  }
  func.func @transform_6(%arg0: i32) -> (i32, i32) {
    %c0_i32 = arith.constant 0 : i32
    %c0_i32_0 = arith.constant 0 : i32
    %c0_i32_1 = arith.constant 0 : i32
    return %c0_i32, %c0_i32_0 : i32, i32
  }
  func.func @transform_7(%arg0: i32) -> (i32, i32, i32) {
    %c0_i32 = arith.constant 0 : i32
    %c0_i32_0 = arith.constant 0 : i32
    %c0_i32_1 = arith.constant 0 : i32
    return %arg0, %c0_i32, %c0_i32_0 : i32, i32, i32
  }
}

</mosaic_0001>

<bundles_post_ra>
// kernel: spectrum_cnn_forward.1
= control target key start
LH: loop header
LB: loop body
LE: loop exit
PB: predicated region body
PF: predicated region fallthrough
CT: control target
= control target key end

     0   :  { %s11727_s28 = smov 2   ;;  %s11728_s29 = smov 1   ;;  %v18264_v10 = vmov 0   ;;  %vm249_vm0 = vcmask 1042432   ;;  %vm250_vm1 = vsmask.f32 2304  ;;  %s18256_s0 = inlined_call_operand.vmem [shape: f32[2,5,3072], index: 0, kind: input, shape index: {}]   ;;  %s18257_s1 = inlined_call_operand.vmem [shape: bf16[4,40], index: 1, kind: input, shape index: {}]   ;;  %s18258_s2 = inlined_call_operand.vmem [shape: f32[4,1], index: 2, kind: input, shape index: {}]   ;;  %s18259_s3 = inlined_call_operand.vmem [shape: bf16[16,40], index: 3, kind: input, shape index: {}]   ;;  %s18260_s4 = inlined_call_operand.vmem [shape: f32[16,1], index: 4, kind: input, shape index: {}]   ;;  %s18261_s5 = inlined_call_operand.vmem [shape: bf16[3072,256], index: 5, kind: input, shape index: {}]   ;;  %s18262_s6 = inlined_call_operand.vmem [shape: f32[1,256], index: 6, kind: input, shape index: {}]   ;;  %s18263_s7 = inlined_call_operand.hbm [shape: f32[2,16,256], index: 7, kind: output, shape index: {}]  }
   0x1   :  { %v77_v0 = vld [vmem:[%s18256_s0] sm:$0x1f]  ;;  %v78_v1 = vld [vmem:[%s18256_s0 + $0x8] sm:$0x1f]  ;;  %v79_v4 = vld [vmem:[%s18256_s0 + $0x10] sm:$0x1f]  ;;  %1073 = vmatprep.mubr.bf16.mxu0 %v18264_v10  ;;  %1114 = vmatprep.mubr.bf16.mxu1 %v18264_v10 }
   0x2   :  { %v11783_v2 = vpack.c.bf16 %v77_v0, %v77_v0  ;;  %v11789_v3 = vpack.c.bf16 %v78_v1, %v78_v1  ;;  %v11798_v5 = vpack.c.bf16 %v79_v4, %v79_v4  ;;  %v80_v6 = vld [vmem:[%s18256_s0 + $0x18] sm:$0x1f]  ;;  %s11729_s11 = smov 127   ;;  %v81_v8 = vld [vmem:[%s18256_s0 + $0x20] sm:$0x1f]  ;;  %11120 = vset.pattern.permute.xlu0 %v18264_v10  ;;  %11121 = vset.pattern.permute.xlu1 %v18264_v10  ;;  %s11731_s16 = smov 126   ;;  %vm11980_vm2 = vmand %vm249_vm0, %vm250_vm1 }
   0x3   :  { %v11807_v7 = vpack.c.bf16 %v80_v6, %v80_v6  ;;  %v11824_v9 = vpack.c.bf16 %v81_v8, %v81_v8  ;;  %v82_v11 = vld [vmem:[%s18256_s0 + $0x28] sm:$0x1f]  ;;  %v83_v13 = vld [vmem:[%s18256_s0 + $0x30] sm:$0x1f]  ;;  %v84_v15 = vld [vmem:[%s18256_s0 + $0x38] sm:$0x1f] }
   0x4   :  { %149 = vrot.lane.b32.xlu1 %v11783_v2, %s11727_s28  ;;  %276 = vrot.lane.b32.xlu0 %v11783_v2, %s11728_s29  ;;  %v11841_v12 = vpack.c.bf16 %v82_v11, %v82_v11  ;;  %v11854_v14 = vpack.c.bf16 %v83_v13, %v83_v13  ;;  %v11867_v16 = vpack.c.bf16 %v84_v15, %v84_v15  ;;  %v85_v17 = vld [vmem:[%s18256_s0 + $0x40] sm:$0x1f]  ;;  %v86_v19 = vld [vmem:[%s18256_s0 + $0x48] sm:$0x1f]  ;;  %vm324_vm3 = vcmask 7168  }
   0x5   :  { %v11880_v18 = vpack.c.bf16 %v85_v17, %v85_v17  ;;  %v11893_v20 = vpack.c.bf16 %v86_v19, %v86_v19  ;;  %v87_v21 = vld [vmem:[%s18256_s0 + $0x50] sm:$0x1f]  ;;  %v88_v23 = vld [vmem:[%s18256_s0 + $0x58] sm:$0x1f]  ;;  %v89_v25 = vld [vmem:[%s18256_s0 + $0x60] sm:$0x1f] }
   0x6   :  { %v11906_v22 = vpack.c.bf16 %v87_v21, %v87_v21  ;;  %v11919_v24 = vpack.c.bf16 %v88_v23, %v88_v23  ;;  %v11932_v26 = vpack.c.bf16 %v89_v25, %v89_v25  ;;  %v90_v27 = vld [vmem:[%s18256_s0 + $0x68] sm:$0x1f]  ;;  %v91_v29 = vld [vmem:[%s18256_s0 + $0x70] sm:$0x1f]  ;;  %v92_v31 = vld [vmem:[%s18256_s0 + $0x78] sm:$0x1f] }
   0x7   :  { %v11945_v28 = vpack.c.bf16 %v90_v27, %v90_v27  ;;  %v11958_v30 = vpack.c.bf16 %v91_v29, %v91_v29  ;;  %v11971_v32 = vpack.c.bf16 %v92_v31, %v92_v31  ;;  %v93_v33 = vld [vmem:[%s18256_s0 + $0x80] sm:$0x1f]  ;;  %vm197_vm4 = vcmask 15360   ;;  %v94_v44 = vld [vmem:[%s18256_s0 + $0x88] sm:$0x1f] }
   0x8   :  { %151 = vrot.lane.b32.xlu1 %v11789_v3, %s11727_s28  ;;  %278 = vrot.lane.b32.xlu0 %v11789_v3, %s11728_s29  ;;  %v11989_v38 = vpack.c.bf16 %v93_v33, %v93_v33  ;;  %vm471_vm5 = vcmask 1039360   ;;  %vm765_vm6 = vcmask 1043456   ;;  %v12017_v56 = vpack.c.bf16 %v94_v44, %v94_v44  ;;  %v95_v63 = vld [vmem:[%s18256_s0 + $0x90] sm:$0x1f] }
   0x9   :  { %v400_v57 = vsel %vm11980_vm2, %v11789_v3, 0  ;;  %v12046_v15 = vpack.c.bf16 %v95_v63, %v95_v63  ;;  %v399_v17 = vsel %vm11980_vm2, %v11783_v2, 0  ;;  %vm594_vm7 = vcmask 1031168  }
   0xa   :  { %vm965_vm8 = vcmask 326656  }
   0xc   :  { %427 = vrot.lane.b32.xlu1 %v11798_v5, %s11729_s11  ;;  %425 = vrot.lane.b32.xlu0 %v11789_v3, %s11729_s11 }
  0x10   :  { %282 = vrot.lane.b32.xlu1 %v11807_v7, %s11728_s29  ;;  %280 = vrot.lane.b32.xlu0 %v11798_v5, %s11728_s29 }
  0x14   :  { %153 = vrot.lane.b32.xlu1 %v11798_v5, %s11727_s28  ;;  %423 = vrot.lane.b32.xlu0 %v11783_v2, %s11729_s11 }
  0x18   :  { %429 = vrot.lane.b32.xlu1 %v11807_v7, %s11729_s11  ;;  %155 = vrot.lane.b32.xlu0 %v11807_v7, %s11727_s28 }
  0x1c   :  { %546 = vrot.lane.b32.xlu1 %v11783_v2, %s11731_s16  ;;  %431 = vrot.lane.b32.xlu0 %v11824_v9, %s11729_s11  ;;  %v96_v2 = vld [vmem:[%s18256_s0 + $0x98] sm:$0x1f] }
  0x20   :  { %550 = vrot.lane.b32.xlu1 %v11798_v5, %s11731_s16  ;;  %548 = vrot.lane.b32.xlu0 %v11789_v3, %s11731_s16 }
  0x24   :  { %286 = vrot.lane.b32.xlu1 %v11841_v12, %s11728_s29  ;;  %284 = vrot.lane.b32.xlu0 %v11824_v9, %s11728_s29 }
  0x28   :  { %159 = vrot.lane.b32.xlu1 %v11841_v12, %s11727_s28  ;;  %157 = vrot.lane.b32.xlu0 %v11824_v9, %s11727_s28 }
  0x2c   :  { %435 = vrot.lane.b32.xlu1 %v11854_v14, %s11729_s11  ;;  %433 = vrot.lane.b32.xlu0 %v11841_v12, %s11729_s11 }
  0x30   :  { %554 = vrot.lane.b32.xlu1 %v11824_v9, %s11731_s16  ;;  %552 = vrot.lane.b32.xlu0 %v11807_v7, %s11731_s16 }
  0x34   :  { %290 = vrot.lane.b32.xlu1 %v11867_v16, %s11728_s29  ;;  %288 = vrot.lane.b32.xlu0 %v11854_v14, %s11728_s29 }
  0x38   :  { %163 = vrot.lane.b32.xlu1 %v11867_v16, %s11727_s28  ;;  %161 = vrot.lane.b32.xlu0 %v11854_v14, %s11727_s28 }
  0x3c   :  { %439 = vrot.lane.b32.xlu1 %v11880_v18, %s11729_s11  ;;  %437 = vrot.lane.b32.xlu0 %v11867_v16, %s11729_s11 }
  0x40   :  { %558 = vrot.lane.b32.xlu1 %v11854_v14, %s11731_s16  ;;  %556 = vrot.lane.b32.xlu0 %v11841_v12, %s11731_s16 }
  0x44   :  { %294 = vrot.lane.b32.xlu1 %v11893_v20, %s11728_s29  ;;  %292 = vrot.lane.b32.xlu0 %v11880_v18, %s11728_s29 }
  0x48   :  { %167 = vrot.lane.b32.xlu1 %v11893_v20, %s11727_s28  ;;  %165 = vrot.lane.b32.xlu0 %v11880_v18, %s11727_s28 }
  0x4c   :  { %443 = vrot.lane.b32.xlu1 %v11906_v22, %s11729_s11  ;;  %441 = vrot.lane.b32.xlu0 %v11893_v20, %s11729_s11 }
  0x50   :  { %562 = vrot.lane.b32.xlu1 %v11880_v18, %s11731_s16  ;;  %560 = vrot.lane.b32.xlu0 %v11867_v16, %s11731_s16 }
  0x54   :  { %298 = vrot.lane.b32.xlu1 %v11919_v24, %s11728_s29  ;;  %296 = vrot.lane.b32.xlu0 %v11906_v22, %s11728_s29 }
  0x58   :  { %171 = vrot.lane.b32.xlu1 %v11919_v24, %s11727_s28  ;;  %169 = vrot.lane.b32.xlu0 %v11906_v22, %s11727_s28 }
  0x5c   :  { %447 = vrot.lane.b32.xlu1 %v11932_v26, %s11729_s11  ;;  %445 = vrot.lane.b32.xlu0 %v11919_v24, %s11729_s11 }
  0x60   :  { %566 = vrot.lane.b32.xlu1 %v11906_v22, %s11731_s16  ;;  %564 = vrot.lane.b32.xlu0 %v11893_v20, %s11731_s16 }
  0x64   :  { %302 = vrot.lane.b32.xlu1 %v11945_v28, %s11728_s29  ;;  %300 = vrot.lane.b32.xlu0 %v11932_v26, %s11728_s29 }
  0x68   :  { %175 = vrot.lane.b32.xlu1 %v11945_v28, %s11727_s28  ;;  %173 = vrot.lane.b32.xlu0 %v11932_v26, %s11727_s28 }
  0x6c   :  { %451 = vrot.lane.b32.xlu1 %v11958_v30, %s11729_s11  ;;  %449 = vrot.lane.b32.xlu0 %v11945_v28, %s11729_s11 }
  0x70   :  { %570 = vrot.lane.b32.xlu1 %v11932_v26, %s11731_s16  ;;  %568 = vrot.lane.b32.xlu0 %v11919_v24, %s11731_s16 }
  0x74   :  { %306 = vrot.lane.b32.xlu1 %v11971_v32, %s11728_s29  ;;  %304 = vrot.lane.b32.xlu0 %v11958_v30, %s11728_s29 }
  0x76   :  { %v150_v35 = vpop.permute.xlu1 %149  ;;  %v277_v36 = vpop.permute.xlu0 %276 }
  0x77   :  { %v373_v37 = vsel %vm324_vm3, 0, %v277_v36  ;;  %v247_v46 = vsel %vm197_vm4, 0, %v150_v35 }
  0x78   :  { %179 = vrot.lane.b32.xlu1 %v11971_v32, %s11727_s28  ;;  %177 = vrot.lane.b32.xlu0 %v11958_v30, %s11727_s28  ;;  %v375_v39 = vsel %vm11980_vm2, %v373_v37, 0  ;;  %v252_v55 = vsel %vm11980_vm2, %v247_v46, 0  ;;  %v12081_v46 = vpack.c.bf16 %v96_v2, %v96_v2 }
  0x79   :  { %v693_v47 = vrot.slane %v375_v39, 4 }
  0x7a   :  { %v152_v40 = vpop.permute.xlu1 %151  ;;  %v279_v41 = vpop.permute.xlu0 %278 }
  0x7b   :  { %v325_v42 = vsel %vm324_vm3, %v277_v36, %v279_v41  ;;  %v198_v43 = vsel %vm197_vm4, %v150_v35, %v152_v40  ;;  %v768_v59 = vsel %vm765_vm6, %v252_v55, %v693_v47  ;;  %v402_v47 = vsel %vm11980_vm2, %v11807_v7, 0 }
  0x7c   :  { %455 = vrot.lane.b32.xlu1 %v11989_v38, %s11729_s11  ;;  %453 = vrot.lane.b32.xlu0 %v11971_v32, %s11729_s11  ;;  %v376_v45 = vsel %vm11980_vm2, %v325_v42, 0  ;;  %v253_v51 = vsel %vm11980_vm2, %v198_v43, 0 }
  0x7d   :  { %v694_v48 = vrot.slane %v376_v45, 4 }
  0x7e   :  { %v428_v49 = vpop.permute.xlu1 %427  ;;  %v426_v50 = vpop.permute.xlu0 %425 }
  0x7f   :  { %v473_v52 = vsel %vm471_vm5, %v426_v50, %v428_v49  ;;  %v772_v53 = vsel %vm765_vm6, %v253_v51, %v694_v48 }
  0x80   :  { %v523_v54 = vsel %vm11980_vm2, %v473_v52, 0  ;;  %574 = vrot.lane.b32.xlu1 %v11958_v30, %s11731_s16  ;;  %572 = vrot.lane.b32.xlu0 %v11945_v28, %s11731_s16  ;;  %v401_v52 = vsel %vm11980_vm2, %v11798_v5, 0 }
  0x81   :  { %v742_v58 = vrot.slane %v523_v54, 4  ;;  %1041 = vmatprep.subr.bf16.mxu0 %v772_v53 }
  0x82   :  { %1042 = vmatpush1.bf16.msra.mxu0 %v768_v59  ;;  %v12023_v60 = vpop.permute.xlu1 %282  ;;  %v281_v61 = vpop.permute.xlu0 %280 }
  0x83   :  { %v868_v62 = vsel %vm765_vm6, %v400_v57, %v742_v58  ;;  %v327_v0 = vsel %vm324_vm3, %v281_v61, %v12023_v60  ;;  %v326_v1 = vsel %vm324_vm3, %v279_v41, %v281_v61  ;;  %v97_v57 = vld [vmem:[%s18256_s0 + $0xa0] sm:$0x1f] }
  0x84   :  { %310 = vrot.lane.b32.xlu1 %v12017_v56, %s11728_s29  ;;  %308 = vrot.lane.b32.xlu0 %v11989_v38, %s11728_s29  ;;  %v378_v8 = vsel %vm11980_vm2, %v327_v0, 0  ;;  %v377_v19 = vsel %vm11980_vm2, %v326_v1, 0  ;;  %v12106_v58 = vld [vmem:[%s18257_s1] sm:$0x3] }
  0x85   :  { %1043 = vmatprep.subr.bf16.mxu0 %v868_v62  ;;  %v696_v27 = vrot.slane %v378_v8, 4  ;;  %v695_v36 = vrot.slane %v377_v19, 4 }
  0x86   :  { %v154_v3 = vpop.permute.xlu1 %153  ;;  %v424_v4 = vpop.permute.xlu0 %423 }
  0x87   :  { %v472_v6 = vsel %vm471_vm5, %v424_v4, %v426_v50  ;;  %v199_v11 = vsel %vm197_vm4, %v152_v40, %v154_v3 }
  0x88   :  { %v522_v13 = vsel %vm11980_vm2, %v472_v6, 0  ;;  %183 = vrot.lane.b32.xlu1 %v12017_v56, %s11727_s28  ;;  %181 = vrot.lane.b32.xlu0 %v11989_v38, %s11727_s28  ;;  %v254_v35 = vsel %vm11980_vm2, %v199_v11, 0  ;;  %v12122_v6 = vpack.c.bf16 %v97_v57, %v97_v57 }
  0x89   :  { %v741_v21 = vrot.slane %v522_v13, 4  ;;  %v776_v43 = vsel %vm765_vm6, %v254_v35, %v695_v36 }
  0x8a   :  { %v430_v23 = vpop.permute.xlu1 %429  ;;  %v12053_v25 = vpop.permute.xlu0 %155 }
  0x8b   :  { %v474_v29 = vsel %vm471_vm5, %v428_v49, %v430_v23  ;;  %v864_v31 = vsel %vm765_vm6, %v399_v17, %v741_v21  ;;  %v200_v33 = vsel %vm197_vm4, %v154_v3, %v12053_v25 }
  0x8c   :  { %459 = vrot.lane.b32.xlu1 %v12046_v15, %s11729_s11  ;;  %457 = vrot.lane.b32.xlu0 %v12017_v56, %s11729_s11  ;;  %v255_v37 = vsel %vm11980_vm2, %v200_v33, 0  ;;  %v524_v40 = vsel %vm11980_vm2, %v474_v29, 0 }
  0x8d   :  { %1044 = vmatpush1.bf16.msra.mxu0 %v864_v31  ;;  %v780_v39 = vsel %vm765_vm6, %v255_v37, %v696_v27  ;;  %v743_v48 = vrot.slane %v524_v40, 4 }
  0x8e   :  { %v547_v41 = vpop.permute.xlu1 %546  ;;  %1082 = vmatprep.subr.bf16.mxu1 %v780_v39  ;;  %v432_v42 = vpop.permute.xlu0 %431 }
  0x8f   :  { %v475_v44 = vsel %vm471_vm5, %v430_v23, %v432_v42  ;;  %1083 = vmatpush1.bf16.msra.mxu1 %v776_v43  ;;  %v872_v59 = vsel %vm765_vm6, %v401_v52, %v743_v48 }
  0x90   :  { %v525_v45 = vsel %vm11980_vm2, %v475_v44, 0  ;;  %578 = vrot.lane.b32.xlu1 %v11989_v38, %s11731_s16  ;;  %576 = vrot.lane.b32.xlu0 %v11971_v32, %s11731_s16 }
  0x91   :  { %v744_v49 = vrot.slane %v525_v45, 4 }
  0x92   :  { %v551_v50 = vpop.permute.xlu1 %550  ;;  %v549_v51 = vpop.permute.xlu0 %548 }
  0x93   :  { %v595_v53 = vsel %vm594_vm7, %v547_v41, %v549_v51  ;;  %v596_v54 = vsel %vm594_vm7, %v549_v51, %v551_v50  ;;  %v876_v55 = vsel %vm765_vm6, %v402_v47, %v744_v49 }
  0x94   :  { %314 = vrot.lane.b32.xlu1 %v12081_v46, %s11728_s29  ;;  %312 = vrot.lane.b32.xlu0 %v12046_v15, %s11728_s29  ;;  %v646_v7 = vsel %vm11980_vm2, %v596_v54, 0  ;;  %v645_v5 = vsel %vm11980_vm2, %v595_v53, 0 }
  0x95   :  { %1084 = vmatprep.subr.bf16.mxu1 %v876_v55  ;;  %10508 = vmatprep.subr.msk.bf16.mxu0 %vm765_vm6, %v646_v7  ;;  %v970_v61 = vsel %vm765_vm6, %v645_v5, 0 }
  0x96   :  { %1085 = vmatpush1.bf16.msra.mxu1 %v872_v59  ;;  %v287_v62 = vpop.permute.xlu1 %286  ;;  %v285_v63 = vpop.permute.xlu0 %284  ;;  %1046 = vmatpush1.bf16.msra.mxu0 %v970_v61 }
  0x97   :  { %v328_v0 = vsel %vm324_vm3, %v12023_v60, %v285_v63  ;;  %v329_v1 = vsel %vm324_vm3, %v285_v63, %v287_v62 }
  0x98   :  { %v379_v3 = vsel %vm11980_vm2, %v328_v0, 0  ;;  %v380_v4 = vsel %vm11980_vm2, %v329_v1, 0  ;;  %187 = vrot.lane.b32.xlu1 %v12081_v46, %s11727_s28  ;;  %185 = vrot.lane.b32.xlu0 %v12046_v15, %s11727_s28 }
  0x99   :  { %12 = vsyncpa [#allocation4], 0  ;;  %10509 = vmatmul.mubr.msk.bf16.vlgmr.msra.gmra.mrb[0].mxu0 %vm965_vm8, %v12106_v58  ;;  %v697_v11 = vrot.slane %v379_v3, 4  ;;  %v698_v13 = vrot.slane %v380_v4, 4  ;;  %v98_v27 = vld [vmem:[%s18256_s0 + $0xa8] sm:$0x1f] }
  0x9a   :  { %v160_v60 = vpop.permute.xlu1 %159  ;;  %v158_v8 = vpop.permute.xlu0 %157  ;;  %1155 = vmatprep.mubr.bf16.mxu0 %v18264_v10  ;;  %v12145_v36 = vpack.c.bf16 %v98_v27, %v98_v27  ;;  %v404_v40 = vsel %vm11980_vm2, %v11841_v12, 0  ;;  %v403_v41 = vsel %vm11980_vm2, %v11824_v9, 0  ;;  %v99_v52 = vld [vmem:[%s18256_s0 + $0xb0] sm:$0x1f]  ;;  %vm1750_vm9 = vcmask 1041408   ;;  %s11732_s22 = smov 125  }
  0x9b   :  { %v201_v17 = vsel %vm197_vm4, %v12053_v25, %v158_v8  ;;  %v202_v19 = vsel %vm197_vm4, %v158_v8, %v160_v60  ;;  %v12188_v59 = vpack.c.bf16 %v99_v52, %v99_v52  ;;  %s11733_s23 = smov 124   ;;  %vm3587_vm11 = vcmask 1022976  }
  0x9c   :  { %v256_v21 = vsel %vm11980_vm2, %v201_v17, 0  ;;  %463 = vrot.lane.b32.xlu1 %v12122_v6, %s11729_s11  ;;  %461 = vrot.lane.b32.xlu0 %v12081_v46, %s11729_s11  ;;  %v257_v23 = vsel %vm11980_vm2, %v202_v19, 0  ;;  %vm3710_vm12 = vcmask 1014784  }
  0x9d   :  { %v788_v25 = vsel %vm765_vm6, %v257_v23, %v698_v13  ;;  %v784_v29 = vsel %vm765_vm6, %v256_v21, %v697_v11  ;;  %v100_v11 = vld [vmem:[%s18256_s0 + $0xb8] sm:$0x1f] }
  0x9e   :  { %v436_v31 = vpop.permute.xlu1 %435  ;;  %v434_v33 = vpop.permute.xlu0 %433  ;;  %1123 = vmatprep.subr.bf16.mxu0 %v788_v25  ;;  %v12210_v27 = vpack.c.bf16 %v100_v11, %v100_v11  ;;  %v408_v11 = vsel %vm11980_vm2, %v11893_v20, 0 }
  0x9f   :  { %v476_v35 = vsel %vm471_vm5, %v432_v42, %v434_v33  ;;  %v477_v2 = vsel %vm471_vm5, %v434_v33, %v436_v31  ;;  %1124 = vmatpush1.bf16.msra.mxu0 %v784_v29  ;;  %v405_v33 = vsel %vm11980_vm2, %v11854_v14, 0 }
  0xa0   :  { %v526_v37 = vsel %vm11980_vm2, %v476_v35, 0  ;;  %v527_v39 = vsel %vm11980_vm2, %v477_v2, 0  ;;  %582 = vrot.lane.b32.xlu1 %v12046_v15, %s11731_s16  ;;  %580 = vrot.lane.b32.xlu0 %v12017_v56, %s11731_s16 }
  0xa1   :  { %v745_v42 = vrot.slane %v526_v37, 4  ;;  %v746_v43 = vrot.slane %v527_v39, 4 }
  0xa2   :  { %v555_v44 = vpop.permute.xlu1 %554  ;;  %v553_v45 = vpop.permute.xlu0 %552 }
  0xa3   :  { %v597_v47 = vsel %vm594_vm7, %v551_v50, %v553_v45  ;;  %v598_v48 = vsel %vm594_vm7, %v553_v45, %v555_v44  ;;  %v884_v49 = vsel %vm765_vm6, %v404_v40, %v746_v43  ;;  %v880_v51 = vsel %vm765_vm6, %v403_v41, %v745_v42 }
  0xa4   :  { %318 = vrot.lane.b32.xlu1 %v12145_v36, %s11728_s29  ;;  %316 = vrot.lane.b32.xlu0 %v12122_v6, %s11728_s29  ;;  %v648_v9 = vsel %vm11980_vm2, %v598_v48, 0  ;;  %v647_v12 = vsel %vm11980_vm2, %v597_v47, 0 }
  0xa5   :  { %1125 = vmatprep.subr.bf16.mxu0 %v884_v49  ;;  %10510 = vmatprep.subr.msk.bf16.mxu1 %vm765_vm6, %v648_v9  ;;  %v976_v50 = vsel %vm765_vm6, %v647_v12, 0 }
  0xa6   :  { %1126 = vmatpush1.bf16.msra.mxu0 %v880_v51  ;;  %v291_v53 = vpop.permute.xlu1 %290  ;;  %1087 = vmatpush1.bf16.msra.mxu1 %v976_v50  ;;  %v289_v54 = vpop.permute.xlu0 %288 }
  0xa7   :  { %v330_v55 = vsel %vm324_vm3, %v287_v62, %v289_v54  ;;  %v331_v57 = vsel %vm324_vm3, %v289_v54, %v291_v53 }
  0xa8   :  { %v381_v7 = vsel %vm11980_vm2, %v330_v55, 0  ;;  %v382_v5 = vsel %vm11980_vm2, %v331_v57, 0  ;;  %191 = vrot.lane.b32.xlu1 %v12145_v36, %s11727_s28  ;;  %189 = vrot.lane.b32.xlu0 %v12122_v6, %s11727_s28 }
  0xa9   :  { %10511 = vmatmul.mubr.msk.bf16.vlgmr.msra.gmra.mrb[0].mxu1 %vm965_vm8, %v12106_v58  ;;  %v699_v63 = vrot.slane %v381_v7, 4  ;;  %v700_v0 = vrot.slane %v382_v5, 4 }
  0xaa   :  { %v164_v61 = vpop.permute.xlu1 %163  ;;  %v162_v62 = vpop.permute.xlu0 %161  ;;  %1196 = vmatprep.mubr.bf16.mxu1 %v18264_v10 }
  0xab   :  { %v203_v1 = vsel %vm197_vm4, %v160_v60, %v162_v62  ;;  %v204_v3 = vsel %vm197_vm4, %v162_v62, %v164_v61 }
  0xac   :  { %v258_v4 = vsel %vm11980_vm2, %v203_v1, 0  ;;  %467 = vrot.lane.b32.xlu1 %v12188_v59, %s11729_s11  ;;  %465 = vrot.lane.b32.xlu0 %v12145_v36, %s11729_s11  ;;  %v259_v8 = vsel %vm11980_vm2, %v204_v3, 0  ;;  %v10557_v3 = vld [vmem:[%s18256_s0 + $0xc0] sm:$0x1f] }
  0xad   :  { %v796_v60 = vsel %vm765_vm6, %v259_v8, %v700_v0  ;;  %v792_v13 = vsel %vm765_vm6, %v258_v4, %v699_v63 }
  0xae   :  { %v440_v17 = vpop.permute.xlu1 %439  ;;  %1164 = vmatprep.subr.bf16.mxu1 %v796_v60  ;;  %v438_v19 = vpop.permute.xlu0 %437  ;;  %v407_v60 = vsel %vm11980_vm2, %v11880_v18, 0 }
  0xaf   :  { %v478_v21 = vsel %vm471_vm5, %v436_v31, %v438_v19  ;;  %v479_v23 = vsel %vm471_vm5, %v438_v19, %v440_v17  ;;  %1165 = vmatpush1.bf16.msra.mxu1 %v792_v13  ;;  %v406_v31 = vsel %vm11980_vm2, %v11867_v16, 0  ;;  %v959_v19 = vld [vmem:[%s18258_s2] sm:$0xf] }
  0xb0   :  { %v528_v25 = vsel %vm11980_vm2, %v478_v21, 0  ;;  %v529_v29 = vsel %vm11980_vm2, %v479_v23, 0  ;;  %586 = vrot.lane.b32.xlu1 %v12122_v6, %s11731_s16  ;;  %584 = vrot.lane.b32.xlu0 %v12081_v46, %s11731_s16  ;;  %v10558_v21 = vld [vmem:[%s18256_s0 + $0xc8] sm:$0x1f] }
  0xb1   :  { %v747_v35 = vrot.slane %v528_v25, 4  ;;  %v748_v2 = vrot.slane %v529_v29, 4  ;;  %v12296_v29 = vpack.c.bf16 %v10557_v3, %v10557_v3  ;;  %v409_v3 = vsel %vm11980_vm2, %v11906_v22, 0 }
  0xb2   :  { %v559_v37 = vpop.permute.xlu1 %558  ;;  %v557_v39 = vpop.permute.xlu0 %556 }
  0xb3   :  { %v599_v40 = vsel %vm594_vm7, %v555_v44, %v557_v39  ;;  %v600_v41 = vsel %vm594_vm7, %v557_v39, %v559_v37  ;;  %v892_v42 = vsel %vm765_vm6, %v406_v31, %v748_v2  ;;  %v888_v43 = vsel %vm765_vm6, %v405_v33, %v747_v35  ;;  %18386 = vst [vmem:[#allocation6_spill] sm:$0xff] %v12296_v29 }
  0xb4   :  { %322 = vrot.lane.b32.xlu1 %v12210_v27, %s11728_s29  ;;  %320 = vrot.lane.b32.xlu0 %v12188_v59, %s11728_s29  ;;  %v650_v14 = vsel %vm11980_vm2, %v600_v41, 0  ;;  %v649_v16 = vsel %vm11980_vm2, %v599_v40, 0  ;;  %v12306_v39 = vpack.c.bf16 %v10558_v21, %v10558_v21 }
  0xb5   :  { %1166 = vmatprep.subr.bf16.mxu1 %v892_v42  ;;  %10512 = vmatprep.subr.msk.bf16.mxu0 %vm765_vm6, %v650_v14  ;;  %v982_v44 = vsel %vm765_vm6, %v649_v16, 0 }
  0xb6   :  { %1167 = vmatpush1.bf16.msra.mxu1 %v888_v43  ;;  %v295_v45 = vpop.permute.xlu1 %294  ;;  %v293_v47 = vpop.permute.xlu0 %292  ;;  %1128 = vmatpush1.bf16.msra.mxu0 %v982_v44  ;;  %v10559_v44 = vld [vmem:[%s18256_s0 + $0xd0] sm:$0x1f] }
  0xb7   :  { %v332_v48 = vsel %vm324_vm3, %v291_v53, %v293_v47  ;;  %v333_v49 = vsel %vm324_vm3, %v293_v47, %v295_v45 }
  0xb8   :  { %v383_v51 = vsel %vm11980_vm2, %v332_v48, 0  ;;  %v384_v9 = vsel %vm11980_vm2, %v333_v49, 0  ;;  %195 = vrot.lane.b32.xlu1 %v12210_v27, %s11727_s28  ;;  %193 = vrot.lane.b32.xlu0 %v12188_v59, %s11727_s28 }
  0xb9   :  { %10513 = vmatmul.mubr.msk.bf16.vlgmr.msra.gmra.mrb[4].mxu0 %vm965_vm8, %v12106_v58  ;;  %v701_v52 = vrot.slane %v383_v51, 4  ;;  %v702_v53 = vrot.slane %v384_v9, 4 }
  0xba   :  { %v12252_v12 = vpop.permute.xlu1 %167  ;;  %v166_v50 = vpop.permute.xlu0 %165  ;;  %1237 = vmatprep.mubr.bf16.mxu0 %v18264_v10 }
  0xbb   :  { %v205_v54 = vsel %vm197_vm4, %v164_v61, %v166_v50  ;;  %v206_v55 = vsel %vm197_vm4, %v166_v50, %v12252_v12 }
  0xbc   :  { %v260_v57 = vsel %vm11980_vm2, %v205_v54, 0  ;;  %588 = vrot.lane.b32.xlu1 %v12145_v36, %s11731_s16  ;;  %469 = vrot.lane.b32.xlu0 %v12210_v27, %s11729_s11  ;;  %v261_v7 = vsel %vm11980_vm2, %v206_v55, 0 }
  0xbd   :  { %v804_v5 = vsel %vm765_vm6, %v261_v7, %v702_v53  ;;  %v800_v62 = vsel %vm765_vm6, %v260_v57, %v701_v52  ;;  %v12337_v53 = vpack.c.bf16 %v10559_v44, %v10559_v44 }
  0xbe   :  { %v12268_v61 = vpop.permute.xlu1 %443  ;;  %v442_v63 = vpop.permute.xlu0 %441  ;;  %1205 = vmatprep.subr.bf16.mxu0 %v804_v5 }
  0xbf   :  { %v480_v0 = vsel %vm471_vm5, %v440_v17, %v442_v63  ;;  %v481_v1 = vsel %vm471_vm5, %v442_v63, %v12268_v61  ;;  %1206 = vmatpush1.bf16.msra.mxu0 %v800_v62  ;;  %v410_v63 = vsel %vm11980_vm2, %v11919_v24, 0 }
  0xc0   :  { %v530_v4 = vsel %vm11980_vm2, %v480_v0, 0  ;;  %v531_v8 = vsel %vm11980_vm2, %v481_v1, 0  ;;  %590 = vrot.lane.b32.xlu0 %v12188_v59, %s11731_s16  ;;  %592 = vrot.lane.b32.xlu1 %v12210_v27, %s11731_s16 }
  0xc1   :  { %v749_v13 = vrot.slane %v530_v4, 4  ;;  %v750_v17 = vrot.slane %v531_v8, 4 }
  0xc2   :  { %v563_v23 = vpop.permute.xlu1 %562  ;;  %v561_v25 = vpop.permute.xlu0 %560 }
  0xc3   :  { %v601_v20 = vsel %vm594_vm7, %v559_v37, %v561_v25  ;;  %v602_v31 = vsel %vm594_vm7, %v561_v25, %v563_v23  ;;  %v900_v18 = vsel %vm765_vm6, %v408_v11, %v750_v17  ;;  %v896_v33 = vsel %vm765_vm6, %v407_v60, %v749_v13 }
  0xc4   :  { %1207 = vmatprep.subr.bf16.mxu0 %v900_v18  ;;  %v652_v35 = vsel %vm11980_vm2, %v602_v31, 0  ;;  %v651_v2 = vsel %vm11980_vm2, %v601_v20, 0  ;;  %962 = vperm.xlu0 %11120, %v959_v19  }
  0xc5   :  { %10514 = vmatprep.subr.msk.bf16.mxu1 %vm765_vm6, %v652_v35  ;;  %1208 = vmatpush1.bf16.msra.mxu0 %v896_v33  ;;  %v988_v37 = vsel %vm765_vm6, %v651_v2, 0 }
  0xc6   :  { %v299_v40 = vpop.permute.xlu1 %298  ;;  %1169 = vmatpush1.bf16.msra.mxu1 %v988_v37  ;;  %v297_v41 = vpop.permute.xlu0 %296  ;;  %4003 = vrot.lane.b32.xlu1 %v12296_v29, %s11728_s29 }
  0xc7   :  { %v334_v42 = vsel %vm324_vm3, %v295_v45, %v297_v41  ;;  %v335_v43 = vsel %vm324_vm3, %v297_v41, %v299_v40 }
  0xc8   :  { %v385_v14 = vsel %vm11980_vm2, %v334_v42, 0  ;;  %v386_v16 = vsel %vm11980_vm2, %v335_v43, 0  ;;  %4005 = vrot.lane.b32.xlu0 %v12306_v39, %s11728_s29 }
  0xc9   :  { %10515 = vmatmul.mubr.msk.bf16.vlgmr.msra.gmra.mrb[4].mxu1 %vm965_vm8, %v12106_v58  ;;  %v703_v48 = vrot.slane %v385_v14, 4  ;;  %v704_v49 = vrot.slane %v386_v16, 4 }
  0xca   :  { %v172_v47 = vpop.permute.xlu1 %171  ;;  %v170_v45 = vpop.permute.xlu0 %169  ;;  %1278 = vmatprep.mubr.bf16.mxu1 %v18264_v10  ;;  %3882 = vrot.lane.b32.xlu1 %v12296_v29, %s11727_s28 }
  0xcb   :  { %v207_v51 = vsel %vm197_vm4, %v12252_v12, %v170_v45  ;;  %v208_v9 = vsel %vm197_vm4, %v170_v45, %v172_v47  ;;  %v10560_v12 = vld [vmem:[%s18256_s0 + $0xd8] sm:$0x1f] }
  0xcc   :  { %v262_v50 = vsel %vm11980_vm2, %v207_v51, 0  ;;  %v263_v52 = vsel %vm11980_vm2, %v208_v9, 0  ;;  %3884 = vrot.lane.b32.xlu0 %v12306_v39, %s11727_s28 }
  0xcd   :  { %v812_v54 = vsel %vm765_vm6, %v263_v52, %v704_v49  ;;  %v808_v55 = vsel %vm765_vm6, %v262_v50, %v703_v48  ;;  %v412_v52 = vsel %vm11980_vm2, %v11945_v28, 0 }
  0xce   :  { %v448_v57 = vpop.permute.xlu1 %447  ;;  %1246 = vmatprep.subr.bf16.mxu1 %v812_v54  ;;  %v446_v7 = vpop.permute.xlu0 %445  ;;  %4150 = vrot.lane.b32.xlu1 %v12306_v39, %s11729_s11  ;;  %v411_v54 = vsel %vm11980_vm2, %v11932_v26, 0 }
  0xcf   :  { %v482_v5 = vsel %vm471_vm5, %v12268_v61, %v446_v7  ;;  %v483_v62 = vsel %vm471_vm5, %v446_v7, %v448_v57  ;;  %1247 = vmatpush1.bf16.msra.mxu1 %v808_v55  ;;  %v12361_v61 = vpack.c.bf16 %v10560_v12, %v10560_v12 }
  0xd0   :  { %v532_v0 = vsel %vm11980_vm2, %v482_v5, 0  ;;  %v533_v1 = vsel %vm11980_vm2, %v483_v62, 0  ;;  %4152 = vrot.lane.b32.xlu0 %v12337_v53, %s11729_s11 }
  0xd1   :  { %v751_v4 = vrot.slane %v532_v0, 4  ;;  %v752_v8 = vrot.slane %v533_v1, 4 }
  0xd2   :  { %v567_v11 = vpop.permute.xlu1 %566  ;;  %v565_v60 = vpop.permute.xlu0 %564  ;;  %4148 = vrot.lane.b32.xlu1 %v12296_v29, %s11729_s11 }
  0xd3   :  { %v603_v24 = vsel %vm594_vm7, %v563_v23, %v565_v60  ;;  %v604_v13 = vsel %vm594_vm7, %v565_v60, %v567_v11  ;;  %v908_v17 = vsel %vm765_vm6, %v410_v63, %v752_v8  ;;  %v904_v22 = vsel %vm765_vm6, %v409_v3, %v751_v4 }
  0xd4   :  { %1248 = vmatprep.subr.bf16.mxu1 %v908_v17  ;;  %v654_v19 = vsel %vm11980_vm2, %v604_v13, 0  ;;  %v653_v21 = vsel %vm11980_vm2, %v603_v24, 0  ;;  %4009 = vrot.lane.b32.xlu0 %v12361_v61, %s11728_s29 }
  0xd5   :  { %10516 = vmatprep.subr.msk.bf16.mxu0 %vm765_vm6, %v654_v19  ;;  %1249 = vmatpush1.bf16.msra.mxu1 %v904_v22  ;;  %v994_v23 = vsel %vm765_vm6, %v653_v21, 0 }
  0xd6   :  { %v303_v25 = vpop.permute.xlu1 %302  ;;  %v301_v20 = vpop.permute.xlu0 %300  ;;  %1210 = vmatpush1.bf16.msra.mxu0 %v994_v23  ;;  %4007 = vrot.lane.b32.xlu1 %v12337_v53, %s11728_s29 }
  0xd7   :  { %v336_v31 = vsel %vm324_vm3, %v299_v40, %v301_v20  ;;  %v337_v18 = vsel %vm324_vm3, %v301_v20, %v303_v25 }
  0xd8   :  { %v387_v33 = vsel %vm11980_vm2, %v336_v31, 0  ;;  %v388_v35 = vsel %vm11980_vm2, %v337_v18, 0  ;;  %3888 = vrot.lane.b32.xlu0 %v12361_v61, %s11727_s28 }
  0xd9   :  { %10517 = vmatmul.mubr.msk.bf16.vlgmr.msra.gmra.mrb[8].mxu0 %vm965_vm8, %v12106_v58  ;;  %v705_v40 = vrot.slane %v387_v33, 4  ;;  %v706_v41 = vrot.slane %v388_v35, 4  ;;  %v10561_v33 = vld [vmem:[%s18256_s0 + $0xe0] sm:$0x1f] }
  0xda   :  { %v176_v2 = vpop.permute.xlu1 %175  ;;  %v174_v37 = vpop.permute.xlu0 %173  ;;  %1319 = vmatprep.mubr.bf16.mxu0 %v18264_v10  ;;  %3886 = vrot.lane.b32.xlu1 %v12337_v53, %s11727_s28 }
  0xdb   :  { %v209_v42 = vsel %vm197_vm4, %v172_v47, %v174_v37  ;;  %v210_v43 = vsel %vm197_vm4, %v174_v37, %v176_v2 }
  0xdc   :  { %v264_v14 = vsel %vm11980_vm2, %v209_v42, 0  ;;  %v265_v16 = vsel %vm11980_vm2, %v210_v43, 0 }
  0xdd   :  { %v820_v44 = vsel %vm765_vm6, %v265_v16, %v706_v41  ;;  %v816_v45 = vsel %vm765_vm6, %v264_v14, %v705_v40  ;;  %v414_v14 = vsel %vm11980_vm2, %v11971_v32, 0  ;;  %v413_v16 = vsel %vm11980_vm2, %v11958_v30, 0 }
  0xde   :  { %v452_v48 = vpop.permute.xlu1 %451  ;;  %v450_v49 = vpop.permute.xlu0 %449  ;;  %1287 = vmatprep.subr.bf16.mxu0 %v820_v44  ;;  %4154 = vrot.lane.b32.xlu1 %v12361_v61, %s11729_s11 }
  0xdf   :  { %v484_v47 = vsel %vm471_vm5, %v448_v57, %v450_v49  ;;  %v485_v51 = vsel %vm471_vm5, %v450_v49, %v452_v48  ;;  %1288 = vmatpush1.bf16.msra.mxu0 %v816_v45 }
  0xe0   :  { %v534_v9 = vsel %vm11980_vm2, %v484_v47, 0  ;;  %v535_v50 = vsel %vm11980_vm2, %v485_v51, 0 }
  0xe1   :  { %v753_v55 = vrot.slane %v534_v9, 4  ;;  %v754_v12 = vrot.slane %v535_v50, 4 }
  0xe2   :  { %v571_v57 = vpop.permute.xlu1 %570  ;;  %v569_v7 = vpop.permute.xlu0 %568  ;;  %4269 = vrot.lane.b32.xlu1 %v12296_v29, %s11731_s16 }
  0xe3   :  { %v605_v5 = vsel %vm594_vm7, %v567_v11, %v569_v7  ;;  %v606_v62 = vsel %vm594_vm7, %v569_v7, %v571_v57  ;;  %v916_v63 = vsel %vm765_vm6, %v412_v52, %v754_v12  ;;  %v912_v0 = vsel %vm765_vm6, %v411_v54, %v753_v55 }
  0xe4   :  { %1289 = vmatprep.subr.bf16.mxu0 %v916_v63  ;;  %v656_v28 = vsel %vm11980_vm2, %v606_v62, 0  ;;  %v655_v26 = vsel %vm11980_vm2, %v605_v5, 0 }
  0xe5   :  { %10518 = vmatprep.subr.msk.bf16.mxu1 %vm765_vm6, %v656_v28  ;;  %1290 = vmatpush1.bf16.msra.mxu0 %v912_v0  ;;  %v1000_v1 = vsel %vm765_vm6, %v655_v26, 0 }
  0xe6   :  { %v307_v3 = vpop.permute.xlu1 %306  ;;  %1251 = vmatpush1.bf16.msra.mxu1 %v1000_v1  ;;  %v305_v4 = vpop.permute.xlu0 %304 }
  0xe7   :  { %v338_v8 = vsel %vm324_vm3, %v303_v25, %v305_v4  ;;  %v339_v11 = vsel %vm324_vm3, %v305_v4, %v307_v3 }
  0xe8   :  { %v389_v60 = vsel %vm11980_vm2, %v338_v8, 0  ;;  %v390_v24 = vsel %vm11980_vm2, %v339_v11, 0 }
  0xe9   :  { %10519 = vmatmul.mubr.msk.bf16.vlgmr.msra.gmra.mrb[8].mxu1 %vm965_vm8, %v12106_v58  ;;  %v707_v22 = vrot.slane %v389_v60, 4  ;;  %v708_v19 = vrot.slane %v390_v24, 4 }
  0xea   :  { %v180_v13 = vpop.permute.xlu1 %179  ;;  %v178_v17 = vpop.permute.xlu0 %177  ;;  %1360 = vmatprep.mubr.bf16.mxu1 %v18264_v10 }
  0xeb   :  { %v211_v21 = vsel %vm197_vm4, %v176_v2, %v178_v17  ;;  %v212_v23 = vsel %vm197_vm4, %v178_v17, %v180_v13  ;;  %v12446_v2 = vpack.c.bf16 %v10561_v33, %v10561_v33 }
  0xec   :  { %v266_v25 = vsel %vm11980_vm2, %v211_v21, 0  ;;  %v267_v20 = vsel %vm11980_vm2, %v212_v23, 0  ;;  %v416_v21 = vsel %vm11980_vm2, %v12017_v56, 0  ;;  %v415_v23 = vsel %vm11980_vm2, %v11989_v38, 0 }
  0xed   :  { %v828_v31 = vsel %vm765_vm6, %v267_v20, %v708_v19  ;;  %v824_v18 = vsel %vm765_vm6, %v266_v25, %v707_v22  ;;  %4156 = vrot.lane.b32.xlu0 %v12446_v2, %s11729_s11 }
  0xee   :  { %v456_v35 = vpop.permute.xlu1 %455  ;;  %1328 = vmatprep.subr.bf16.mxu1 %v828_v31  ;;  %v454_v37 = vpop.permute.xlu0 %453 }
  0xef   :  { %v486_v40 = vsel %vm471_vm5, %v452_v48, %v454_v37  ;;  %v487_v41 = vsel %vm471_vm5, %v454_v37, %v456_v35  ;;  %1329 = vmatpush1.bf16.msra.mxu1 %v824_v18 }
  0xf0   :  { %v536_v42 = vsel %vm11980_vm2, %v486_v40, 0  ;;  %v537_v43 = vsel %vm11980_vm2, %v487_v41, 0 }
  0xf1   :  { %v755_v44 = vrot.slane %v536_v42, 4  ;;  %v756_v45 = vrot.slane %v537_v43, 4 }
  0xf2   :  { %v575_v48 = vpop.permute.xlu1 %574  ;;  %v573_v49 = vpop.permute.xlu0 %572 }
  0xf3   :  { %v607_v47 = vsel %vm594_vm7, %v571_v57, %v573_v49  ;;  %v608_v51 = vsel %vm594_vm7, %v573_v49, %v575_v48  ;;  %v924_v9 = vsel %vm765_vm6, %v414_v14, %v756_v45  ;;  %v920_v50 = vsel %vm765_vm6, %v413_v16, %v755_v44 }
  0xf4   :  { %1330 = vmatprep.subr.bf16.mxu1 %v924_v9  ;;  %v658_v32 = vsel %vm11980_vm2, %v608_v51, 0  ;;  %v657_v30 = vsel %vm11980_vm2, %v607_v47, 0 }
  0xf5   :  { %10520 = vmatprep.subr.msk.bf16.mxu0 %vm765_vm6, %v658_v32  ;;  %1331 = vmatpush1.bf16.msra.mxu1 %v920_v50  ;;  %v1006_v52 = vsel %vm765_vm6, %v657_v30, 0 }
  0xf6   :  { %v311_v54 = vpop.permute.xlu1 %310  ;;  %v309_v55 = vpop.permute.xlu0 %308  ;;  %1292 = vmatpush1.bf16.msra.mxu0 %v1006_v52 }
  0xf7   :  { %v340_v12 = vsel %vm324_vm3, %v307_v3, %v309_v55  ;;  %v341_v57 = vsel %vm324_vm3, %v309_v55, %v311_v54 }
  0xf8   :  { %v391_v7 = vsel %vm11980_vm2, %v340_v12, 0  ;;  %v392_v5 = vsel %vm11980_vm2, %v341_v57, 0 }
  0xf9   :  { %10521 = vmatmul.mubr.msk.bf16.vlgmr.msra.gmra.mrb[12].mxu0 %vm965_vm8, %v12106_v58  ;;  %v709_v0 = vrot.slane %v391_v7, 4  ;;  %v710_v28 = vrot.slane %v392_v5, 4 }
  0xfa   :  { %v184_v62 = vpop.permute.xlu1 %183  ;;  %v182_v63 = vpop.permute.xlu0 %181  ;;  %1401 = vmatprep.mubr.bf16.mxu0 %v18264_v10 }
  0xfb   :  { %v213_v26 = vsel %vm197_vm4, %v180_v13, %v182_v63  ;;  %v214_v1 = vsel %vm197_vm4, %v182_v63, %v184_v62  ;;  %v418_v63 = vsel %vm11980_vm2, %v12081_v46, 0 }
  0xfc   :  { %v268_v3 = vsel %vm11980_vm2, %v213_v26, 0  ;;  %v269_v4 = vsel %vm11980_vm2, %v214_v1, 0 }
  0xfd   :  { %v836_v8 = vsel %vm765_vm6, %v269_v4, %v710_v28  ;;  %v832_v11 = vsel %vm765_vm6, %v268_v3, %v709_v0  ;;  %v417_v0 = vsel %vm11980_vm2, %v12046_v15, 0 }
  0xfe   :  { %v460_v60 = vpop.permute.xlu1 %459  ;;  %v458_v24 = vpop.permute.xlu0 %457  ;;  %1369 = vmatprep.subr.bf16.mxu0 %v836_v8 }
  0xff   :  { %v488_v17 = vsel %vm471_vm5, %v456_v35, %v458_v24  ;;  %v489_v22 = vsel %vm471_vm5, %v458_v24, %v460_v60  ;;  %1370 = vmatpush1.bf16.msra.mxu0 %v832_v11 }
 0x100   :  { %v538_v13 = vsel %vm11980_vm2, %v488_v17, 0  ;;  %v539_v19 = vsel %vm11980_vm2, %v489_v22, 0 }
 0x101   :  { %v757_v25 = vrot.slane %v538_v13, 4  ;;  %v758_v20 = vrot.slane %v539_v19, 4 }
 0x102   :  { %v579_v31 = vpop.permute.xlu1 %578  ;;  %v577_v18 = vpop.permute.xlu0 %576 }
 0x103   :  { %v609_v33 = vsel %vm594_vm7, %v575_v48, %v577_v18  ;;  %v610_v35 = vsel %vm594_vm7, %v577_v18, %v579_v31  ;;  %v932_v37 = vsel %vm765_vm6, %v416_v21, %v758_v20  ;;  %v928_v40 = vsel %vm765_vm6, %v415_v23, %v757_v25 }
 0x104   :  { %1371 = vmatprep.subr.bf16.mxu0 %v932_v37  ;;  %v660_v56 = vsel %vm11980_vm2, %v610_v35, 0  ;;  %v659_v41 = vsel %vm11980_vm2, %v609_v33, 0 }
 0x105   :  { %10522 = vmatprep.subr.msk.bf16.mxu1 %vm765_vm6, %v660_v56  ;;  %1372 = vmatpush1.bf16.msra.mxu0 %v928_v40  ;;  %v1012_v38 = vsel %vm765_vm6, %v659_v41, 0 }
 0x106   :  { %v315_v42 = vpop.permute.xlu1 %314  ;;  %1333 = vmatpush1.bf16.msra.mxu1 %v1012_v38  ;;  %v313_v43 = vpop.permute.xlu0 %312 }
 0x107   :  { %v342_v14 = vsel %vm324_vm3, %v311_v54, %v313_v43  ;;  %v343_v16 = vsel %vm324_vm3, %v313_v43, %v315_v42 }
 0x108   :  { %v393_v44 = vsel %vm11980_vm2, %v342_v14, 0  ;;  %v394_v45 = vsel %vm11980_vm2, %v343_v16, 0 }
 0x109   :  { %10523 = vmatmul.mubr.msk.bf16.vlgmr.msra.gmra.mrb[12].mxu1 %vm965_vm8, %v12106_v58  ;;  %v711_v47 = vrot.slane %v393_v44, 4  ;;  %v712_v51 = vrot.slane %v394_v45, 4  ;;  %v420_v45 = vsel %vm11980_vm2, %v12145_v36, 0 }
 0x10a   :  { %v188_v48 = vpop.permute.xlu1 %187  ;;  %v186_v49 = vpop.permute.xlu0 %185  ;;  %1442 = vmatprep.mubr.bf16.mxu1 %v18264_v10 }
 0x10b   :  { %v215_v9 = vsel %vm197_vm4, %v184_v62, %v186_v49  ;;  %v216_v50 = vsel %vm197_vm4, %v186_v49, %v188_v48 }
 0x10c   :  { %v270_v32 = vsel %vm11980_vm2, %v215_v9, 0  ;;  %v271_v30 = vsel %vm11980_vm2, %v216_v50, 0 }
 0x10d   :  { %v844_v52 = vsel %vm765_vm6, %v271_v30, %v712_v51  ;;  %v840_v54 = vsel %vm765_vm6, %v270_v32, %v711_v47 }
 0x10e   :  { %v464_v55 = vpop.permute.xlu1 %463  ;;  %1410 = vmatprep.subr.bf16.mxu1 %v844_v52  ;;  %v462_v12 = vpop.permute.xlu0 %461 }
 0x10f   :  { %v490_v57 = vsel %vm471_vm5, %v460_v60, %v462_v12  ;;  %v491_v7 = vsel %vm471_vm5, %v462_v12, %v464_v55  ;;  %1411 = vmatpush1.bf16.msra.mxu1 %v840_v54 }
 0x110   :  { %v540_v5 = vsel %vm11980_vm2, %v490_v57, 0  ;;  %v541_v62 = vsel %vm11980_vm2, %v491_v7, 0 }
 0x111   :  { %v759_v28 = vrot.slane %v540_v5, 4  ;;  %v760_v26 = vrot.slane %v541_v62, 4 }
 0x112   :  { %v583_v1 = vpop.permute.xlu1 %582  ;;  %v581_v3 = vpop.permute.xlu0 %580 }
 0x113   :  { %v611_v4 = vsel %vm594_vm7, %v579_v31, %v581_v3  ;;  %v612_v8 = vsel %vm594_vm7, %v581_v3, %v583_v1  ;;  %v940_v11 = vsel %vm765_vm6, %v418_v63, %v760_v26  ;;  %v936_v60 = vsel %vm765_vm6, %v417_v0, %v759_v28 }
 0x114   :  { %1412 = vmatprep.subr.bf16.mxu1 %v940_v11  ;;  %v662_v46 = vsel %vm11980_vm2, %v612_v8, 0  ;;  %v661_v24 = vsel %vm11980_vm2, %v611_v4, 0 }
 0x115   :  { %10524 = vmatprep.subr.msk.bf16.mxu0 %vm765_vm6, %v662_v46  ;;  %1413 = vmatpush1.bf16.msra.mxu1 %v936_v60  ;;  %v1018_v15 = vsel %vm765_vm6, %v661_v24, 0 }
 0x116   :  { %v319_v17 = vpop.permute.xlu1 %318  ;;  %v317_v22 = vpop.permute.xlu0 %316  ;;  %1374 = vmatpush1.bf16.msra.mxu0 %v1018_v15 }
 0x117   :  { %v344_v13 = vsel %vm324_vm3, %v315_v42, %v317_v22  ;;  %v345_v19 = vsel %vm324_vm3, %v317_v22, %v319_v17 }
 0x118   :  { %v395_v21 = vsel %vm11980_vm2, %v344_v13, 0  ;;  %v396_v23 = vsel %vm11980_vm2, %v345_v19, 0  ;;  %v422_v19 = vsel %vm11980_vm2, %v12210_v27, 0 }
 0x119   :  { %10525 = vmatmul.mubr.msk.bf16.vlgmr.msra.gmra.mrb[16].mxu0 %vm965_vm8, %v12106_v58  ;;  %v713_v31 = vrot.slane %v395_v21, 4  ;;  %v714_v18 = vrot.slane %v396_v23, 4 }
 0x11a   :  { %v192_v25 = vpop.permute.xlu1 %191  ;;  %v190_v20 = vpop.permute.xlu0 %189  ;;  %1483 = vmatprep.mubr.bf16.mxu0 %v18264_v10 }
 0x11b   :  { %v217_v33 = vsel %vm197_vm4, %v188_v48, %v190_v20  ;;  %v218_v35 = vsel %vm197_vm4, %v190_v20, %v192_v25  ;;  %v419_v48 = vsel %vm11980_vm2, %v12122_v6, 0 }
 0x11c   :  { %v272_v37 = vsel %vm11980_vm2, %v217_v33, 0  ;;  %v273_v40 = vsel %vm11980_vm2, %v218_v35, 0 }
 0x11d   :  { %v852_v56 = vsel %vm765_vm6, %v273_v40, %v714_v18  ;;  %v848_v41 = vsel %vm765_vm6, %v272_v37, %v713_v31 }
 0x11e   :  { %v468_v38 = vpop.permute.xlu1 %467  ;;  %v466_v42 = vpop.permute.xlu0 %465  ;;  %1451 = vmatprep.subr.bf16.mxu0 %v852_v56 }
 0x11f   :  { %v492_v43 = vsel %vm471_vm5, %v464_v55, %v466_v42  ;;  %v493_v14 = vsel %vm471_vm5, %v466_v42, %v468_v38  ;;  %1452 = vmatpush1.bf16.msra.mxu0 %v848_v41 }
 0x120   :  { %v542_v16 = vsel %vm11980_vm2, %v492_v43, 0  ;;  %v543_v44 = vsel %vm11980_vm2, %v493_v14, 0  ;;  %v11700_v43 = vld [vmem:[%s18257_s1] sm:$0x3] }
 0x121   :  { %v761_v49 = vrot.slane %v542_v16, 4  ;;  %v762_v47 = vrot.slane %v543_v44, 4 }
 0x122   :  { %v587_v51 = vpop.permute.xlu1 %586  ;;  %v585_v9 = vpop.permute.xlu0 %584 }
 0x123   :  { %v613_v50 = vsel %vm594_vm7, %v583_v1, %v585_v9  ;;  %v614_v32 = vsel %vm594_vm7, %v585_v9, %v587_v51  ;;  %v948_v30 = vsel %vm765_vm6, %v420_v45, %v762_v47  ;;  %v944_v52 = vsel %vm765_vm6, %v419_v48, %v761_v49 }
 0x124   :  { %1453 = vmatprep.subr.bf16.mxu0 %v948_v30  ;;  %v664_v36 = vsel %vm11980_vm2, %v614_v32, 0  ;;  %v663_v54 = vsel %vm11980_vm2, %v613_v50, 0 }
 0x125   :  { %10526 = vmatprep.subr.msk.bf16.mxu1 %vm765_vm6, %v664_v36  ;;  %1454 = vmatpush1.bf16.msra.mxu0 %v944_v52  ;;  %v1024_v6 = vsel %vm765_vm6, %v663_v54, 0 }
 0x126   :  { %v323_v55 = vpop.permute.xlu1 %322  ;;  %1415 = vmatpush1.bf16.msra.mxu1 %v1024_v6  ;;  %v321_v12 = vpop.permute.xlu0 %320 }
 0x127   :  { %v346_v57 = vsel %vm324_vm3, %v319_v17, %v321_v12  ;;  %v347_v7 = vsel %vm324_vm3, %v321_v12, %v323_v55 }
 0x128   :  { %v397_v5 = vsel %vm11980_vm2, %v346_v57, 0  ;;  %v398_v62 = vsel %vm11980_vm2, %v347_v7, 0 }
 0x129   :  { %v716_v63 = vrot.slane %v398_v62, 4  ;;  %10527 = vmatmul.mubr.msk.bf16.vlgmr.msra.gmra.mrb[16].mxu1 %vm965_vm8, %v12106_v58  ;;  %v715_v26 = vrot.slane %v397_v5, 4 }
 0x12a   :  { %v196_v0 = vpop.permute.xlu1 %195  ;;  %v194_v28 = vpop.permute.xlu0 %193  ;;  %1524 = vmatprep.mubr.bf16.mxu1 %v18264_v10 }
 0x12b   :  { %v219_v1 = vsel %vm197_vm4, %v192_v25, %v194_v28  ;;  %v220_v3 = vsel %vm197_vm4, %v194_v28, %v196_v0  ;;  %v421_v25 = vsel %vm11980_vm2, %v12188_v59, 0 }
 0x12c   :  { %v274_v4 = vsel %vm11980_vm2, %v219_v1, 0  ;;  %v275_v8 = vsel %vm11980_vm2, %v220_v3, 0 }
 0x12d   :  { %v860_v11 = vsel %vm765_vm6, %v275_v8, %v716_v63  ;;  %v856_v60 = vsel %vm765_vm6, %v274_v4, %v715_v26 }
 0x12e   :  { %v589_v58 = vpop.permute.xlu1 %588  ;;  %1492 = vmatprep.subr.bf16.mxu1 %v860_v11  ;;  %v470_v46 = vpop.permute.xlu0 %469 }
 0x12f   :  { %v615_v24 = vsel %vm594_vm7, %v587_v51, %v589_v58  ;;  %v494_v15 = vsel %vm471_vm5, %v468_v38, %v470_v46  ;;  %v520_v17 = vsel %vm471_vm5, %v470_v46, 0  ;;  %1493 = vmatpush1.bf16.msra.mxu1 %v856_v60 }
 0x130   :  { %v544_v22 = vsel %vm11980_vm2, %v494_v15, 0  ;;  %v545_v13 = vsel %vm11980_vm2, %v520_v17, 0  ;;  %v665_v18 = vsel %vm11980_vm2, %v615_v24, 0 }
 0x131   :  { %v763_v21 = vrot.slane %v544_v22, 4  ;;  %v764_v23 = vrot.slane %v545_v13, 4  ;;  %v1030_v38 = vsel %vm765_vm6, %v665_v18, 0 }
 0x132   :  { %v591_v20 = vpop.permute.xlu0 %590  ;;  %v593_v31 = vpop.permute.xlu1 %592 }
 0x133   :  { %v616_v33 = vsel %vm594_vm7, %v589_v58, %v591_v20  ;;  %v956_v35 = vsel %vm765_vm6, %v422_v19, %v764_v23  ;;  %v617_v37 = vsel %vm594_vm7, %v591_v20, %v593_v31  ;;  %v643_v40 = vsel %vm594_vm7, %v593_v31, 0 }
 0x134   :  { %1494 = vmatprep.subr.bf16.mxu1 %v956_v35  ;;  %v666_v27 = vsel %vm11980_vm2, %v616_v33, 0  ;;  %v952_v56 = vsel %vm765_vm6, %v421_v25, %v763_v21  ;;  %v668_v59 = vsel %vm11980_vm2, %v643_v40, 0  ;;  %v667_v41 = vsel %vm11980_vm2, %v617_v37, 0 }
 0x135   :  { %10528 = vmatprep.subr.msk.bf16.mxu0 %vm765_vm6, %v666_v27  ;;  %1495 = vmatpush1.bf16.msra.mxu1 %v952_v56  ;;  %v1036_v42 = vsel %vm765_vm6, %v667_v41, 0 }
 0x136   :  { %1456 = vmatpush1.bf16.msra.mxu0 %v1030_v38  ;;  %10530 = vmatprep.subr.msk.bf16.mxu1 %vm765_vm6, %v668_v59 }
 0x139   :  { %10529 = vmatmul.mubr.msk.bf16.vlgmr.msra.gmra.mrb[20].mxu0 %vm965_vm8, %v11700_v43  ;;  %1497 = vmatpush1.bf16.msra.mxu1 %v1036_v42 }
 0x13a   :  { %2548 = vmatprep.mubr.bf16.mxu0 %v18264_v10 }
 0x13c   :  { %10531 = vmatmul.mubr.msk.bf16.vlgmr.msra.gmra.mrb[20].mxu1 %vm965_vm8, %v11700_v43 }
 0x13d   :  { %2591 = vmatprep.mubr.bf16.mxu1 %v18264_v10 }
 0x143   :  { %v12643_v14 = vpop.permute.xlu0 %962 }
 0x147   :  { %v12746_v43 = vpop.permute.xlu0 %4005 }
 0x16c   :  { %v1075_v16 = vpop.f32.mrb[0].mxu0 }
 0x16d   :  { %v1076_v44 = vadd.f32 %v1075_v16, %v12643_v14  ;;  %v1077_v45 = vpop.f32.mrb[1].mxu0 }
 0x16e   :  { %v1079_v48 = vpop.f32.mrb[2].mxu0  ;;  %v1078_v47 = vadd.f32 %v1077_v45, %v12643_v14  ;;  %v12753_v45 = vpop.permute.xlu1 %4003 }
 0x16f   :  { %v1533_v49 = vmax.f32 %v1076_v44, 0.0  ;;  %v1080_v51 = vpop.f32.mrb[3].mxu0  ;;  %v12759_v48 = vpop.permute.xlu0 %3884 }
 0x170   :  { %v1534_v50 = vmax.f32 %v1078_v47, 0.0 }
 0x171   :  { %v12647_v9 = vpack.c.bf16 %v1533_v49, %v1533_v49 }
 0x172   :  { %v12653_v32 = vpack.c.bf16 %v1534_v50, %v1534_v50  ;;  %v12763_v51 = vpop.permute.xlu1 %3882 }
 0x173   :  { %1677 = vrot.lane.b32.xlu0 %v12647_v9, %s11727_s28  ;;  %1798 = vrot.lane.b32.xlu1 %v12647_v9, %s11728_s29 }
 0x177   :  { %1966 = vrot.lane.b32.xlu0 %v12647_v9, %s11729_s11 }
 0x17b   :  { %1968 = vrot.lane.b32.xlu0 %v12653_v32, %s11729_s11 }
 0x17c   :  { %v1116_v30 = vpop.f32.mrb[0].mxu1 }
 0x17d   :  { %v1117_v52 = vadd.f32 %v1116_v30, %v12643_v14  ;;  %v1118_v36 = vpop.f32.mrb[1].mxu1 }
 0x17e   :  { %v1119_v54 = vadd.f32 %v1118_v36, %v12643_v14  ;;  %v1120_v6 = vpop.f32.mrb[2].mxu1  ;;  %v12771_v36 = vpop.permute.xlu0 %4152 }
 0x17f   :  { %v1535_v55 = vmax.f32 %v1117_v52, 0.0  ;;  %v1121_v12 = vpop.f32.mrb[3].mxu1 }
 0x180   :  { %v1536_v57 = vmax.f32 %v1119_v54, 0.0  ;;  %v12778_v12 = vpop.permute.xlu1 %4150 }
 0x181   :  { %v12661_v7 = vpack.c.bf16 %v1535_v55, %v1535_v55 }
 0x182   :  { %v12663_v5 = vpack.c.bf16 %v1536_v57, %v1536_v57  ;;  %v12784_v57 = vpop.permute.xlu0 %4009 }
 0x183   :  { %1970 = vrot.lane.b32.xlu1 %v12661_v7, %s11729_s11  ;;  %18387 = vst [vmem:[#allocation7_spill] sm:$0xff] %v12784_v57 }
 0x184   :  { %1804 = vrot.lane.b32.xlu0 %v12663_v5, %s11728_s29 }
 0x187   :  { %1802 = vrot.lane.b32.xlu1 %v12661_v7, %s11728_s29 }
 0x188   :  { %1683 = vrot.lane.b32.xlu0 %v12663_v5, %s11727_s28 }
 0x18b   :  { %1681 = vrot.lane.b32.xlu1 %v12661_v7, %s11727_s28 }
 0x18c   :  { %v1157_v62 = vpop.f32.mrb[4].mxu0  ;;  %2088 = vrot.lane.b32.xlu0 %v12653_v32, %s11731_s16 }
 0x18d   :  { %v1158_v63 = vadd.f32 %v1157_v62, %v12643_v14  ;;  %v1159_v0 = vpop.f32.mrb[5].mxu0 }
 0x18e   :  { %v1161_v28 = vpop.f32.mrb[6].mxu0  ;;  %v1160_v24 = vadd.f32 %v1159_v0, %v12643_v14 }
 0x18f   :  { %v1537_v26 = vmax.f32 %v1158_v63, 0.0  ;;  %2086 = vrot.lane.b32.xlu1 %v12647_v9, %s11731_s16  ;;  %v1162_v1 = vpop.f32.mrb[7].mxu0  ;;  %v12786_v63 = vpop.permute.xlu1 %4148 }
 0x190   :  { %2092 = vrot.lane.b32.xlu0 %v12663_v5, %s11731_s16  ;;  %v1538_v17 = vmax.f32 %v1160_v24, 0.0  ;;  %v12794_v28 = vpop.permute.xlu0 %3888 }
 0x191   :  { %v12682_v3 = vpack.c.bf16 %v1537_v26, %v1537_v26  ;;  %18388 = vst [vmem:[#allocation8_spill] sm:$0xff] %v12794_v28 }
 0x192   :  { %v12711_v13 = vpack.c.bf16 %v1538_v17, %v1538_v17 }
 0x193   :  { %2090 = vrot.lane.b32.xlu1 %v12661_v7, %s11731_s16  ;;  %v12800_v1 = vpop.permute.xlu1 %4007 }
 0x194   :  { %1974 = vrot.lane.b32.xlu0 %v12682_v3, %s11729_s11  ;;  %18389 = vst [vmem:[#allocation9_spill] sm:$0xff] %v12800_v1 }
 0x197   :  { %1800 = vrot.lane.b32.xlu1 %v12653_v32, %s11728_s29 }
 0x198   :  { %1806 = vrot.lane.b32.xlu0 %v12682_v3, %s11728_s29 }
 0x19b   :  { %1679 = vrot.lane.b32.xlu1 %v12653_v32, %s11727_s28 }
 0x19c   :  { %v1198_v4 = vpop.f32.mrb[4].mxu1  ;;  %1685 = vrot.lane.b32.xlu0 %v12682_v3, %s11727_s28 }
 0x19d   :  { %v1199_v8 = vadd.f32 %v1198_v4, %v12643_v14  ;;  %v1200_v11 = vpop.f32.mrb[5].mxu1 }
 0x19e   :  { %v1202_v60 = vpop.f32.mrb[6].mxu1  ;;  %v1201_v22 = vadd.f32 %v1200_v11, %v12643_v14 }
 0x19f   :  { %v1539_v58 = vmax.f32 %v1199_v8, 0.0  ;;  %v1203_v46 = vpop.f32.mrb[7].mxu1  ;;  %1972 = vrot.lane.b32.xlu1 %v12663_v5, %s11729_s11 }
 0x1a0   :  { %v1540_v19 = vmax.f32 %v1201_v22, 0.0  ;;  %v12807_v46 = vpop.permute.xlu0 %4156  ;;  %v12812_v22 = vpop.permute.xlu1 %3886 }
 0x1a1   :  { %v12700_v15 = vpack.c.bf16 %v1539_v58, %v1539_v58  ;;  %18390 = vst [vmem:[#allocation10_spill] sm:$0xff] %v12807_v46  ;;  %18391 = vst [vmem:[#allocation11_spill] sm:$0xff] %v12812_v22 }
 0x1a2   :  { %v12717_v23 = vpack.c.bf16 %v1540_v19, %v1540_v19 }
 0x1a3   :  { %1810 = vrot.lane.b32.xlu0 %v12700_v15, %s11728_s29  ;;  %1978 = vrot.lane.b32.xlu1 %v12700_v15, %s11729_s11 }
 0x1a7   :  { %1689 = vrot.lane.b32.xlu0 %v12700_v15, %s11727_s28  ;;  %2094 = vrot.lane.b32.xlu1 %v12682_v3, %s11731_s16 }
 0x1ab   :  { %1976 = vrot.lane.b32.xlu0 %v12711_v13, %s11729_s11  ;;  %2098 = vrot.lane.b32.xlu1 %v12700_v15, %s11731_s16 }
 0x1ac   :  { %v1239_v21 = vpop.f32.mrb[8].mxu0 }
 0x1ad   :  { %v1241_v25 = vpop.f32.mrb[9].mxu0  ;;  %v1240_v18 = vadd.f32 %v1239_v21, %v12643_v14 }
 0x1ae   :  { %v1243_v20 = vpop.f32.mrb[10].mxu0  ;;  %v1242_v38 = vadd.f32 %v1241_v25, %v12643_v14 }
 0x1af   :  { %1980 = vrot.lane.b32.xlu0 %v12717_v23, %s11729_s11  ;;  %1808 = vrot.lane.b32.xlu1 %v12711_v13, %s11728_s29  ;;  %v1244_v31 = vpop.f32.mrb[11].mxu0  ;;  %v1541_v33 = vmax.f32 %v1240_v18, 0.0  ;;  %v12821_v20 = vpop.permute.xlu1 %4154 }
 0x1b0   :  { %v1542_v16 = vmax.f32 %v1242_v38, 0.0  ;;  %18392 = vst [vmem:[#allocation12_spill] sm:$0xff] %v12821_v20 }
 0x1b1   :  { %v12732_v35 = vpack.c.bf16 %v1541_v33, %v1541_v33 }
 0x1b2   :  { %v12761_v49 = vpack.c.bf16 %v1542_v16, %v1542_v16 }
 0x1b3   :  { %2096 = vrot.lane.b32.xlu0 %v12711_v13, %s11731_s16  ;;  %1687 = vrot.lane.b32.xlu1 %v12711_v13, %s11727_s28  ;;  %v12829_v33 = vpop.permute.xlu1 %4269 }
 0x1b4   :  { %18393 = vst [vmem:[#allocation13_spill] sm:$0xff] %v12829_v33 }
 0x1b7   :  { %2100 = vrot.lane.b32.xlu0 %v12717_v23, %s11731_s16  ;;  %1812 = vrot.lane.b32.xlu1 %v12717_v23, %s11728_s29 }
 0x1bb   :  { %1814 = vrot.lane.b32.xlu0 %v12732_v35, %s11728_s29  ;;  %1691 = vrot.lane.b32.xlu1 %v12717_v23, %s11727_s28 }
 0x1bc   :  { %v1280_v37 = vpop.f32.mrb[8].mxu1 }
 0x1bd   :  { %v1281_v40 = vadd.f32 %v1280_v37, %v12643_v14  ;;  %v1282_v27 = vpop.f32.mrb[9].mxu1 }
 0x1be   :  { %v1284_v56 = vpop.f32.mrb[10].mxu1  ;;  %v1283_v44 = vadd.f32 %v1282_v27, %v12643_v14 }
 0x1bf   :  { %v1543_v59 = vmax.f32 %v1281_v40, 0.0  ;;  %v1285_v41 = vpop.f32.mrb[11].mxu1  ;;  %1693 = vrot.lane.b32.xlu0 %v12732_v35, %s11727_s28  ;;  %1982 = vrot.lane.b32.xlu1 %v12732_v35, %s11729_s11 }
 0x1c0   :  { %v1544_v47 = vmax.f32 %v1283_v44, 0.0 }
 0x1c1   :  { %v12744_v42 = vpack.c.bf16 %v1543_v59, %v1543_v59 }
 0x1c2   :  { %v12769_v30 = vpack.c.bf16 %v1544_v47, %v1544_v47 }
 0x1c3   :  { %1818 = vrot.lane.b32.xlu0 %v12744_v42, %s11728_s29  ;;  %1986 = vrot.lane.b32.xlu1 %v12744_v42, %s11729_s11 }
 0x1c7   :  { %1697 = vrot.lane.b32.xlu0 %v12744_v42, %s11727_s28  ;;  %2102 = vrot.lane.b32.xlu1 %v12732_v35, %s11731_s16 }
 0x1cb   :  { %1984 = vrot.lane.b32.xlu0 %v12761_v49, %s11729_s11  ;;  %2106 = vrot.lane.b32.xlu1 %v12744_v42, %s11731_s16 }
 0x1cc   :  { %v1321_v50 = vpop.f32.mrb[12].mxu0 }
 0x1cd   :  { %v1323_v52 = vpop.f32.mrb[13].mxu0  ;;  %v1322_v55 = vadd.f32 %v1321_v50, %v12643_v14 }
 0x1ce   :  { %v1325_v54 = vpop.f32.mrb[14].mxu0  ;;  %v1324_v24 = vadd.f32 %v1323_v52, %v12643_v14 }
 0x1cf   :  { %1988 = vrot.lane.b32.xlu0 %v12769_v30, %s11729_s11  ;;  %1816 = vrot.lane.b32.xlu1 %v12761_v49, %s11728_s29  ;;  %v1326_v6 = vpop.f32.mrb[15].mxu0  ;;  %v1545_v62 = vmax.f32 %v1322_v55, 0.0 }
 0x1d0   :  { %v1546_v19 = vmax.f32 %v1324_v24, 0.0 }
 0x1d1   :  { %v12792_v0 = vpack.c.bf16 %v1545_v62, %v1545_v62 }
 0x1d2   :  { %v12827_v31 = vpack.c.bf16 %v1546_v19, %v1546_v19 }
 0x1d3   :  { %2104 = vrot.lane.b32.xlu0 %v12761_v49, %s11731_s16  ;;  %1695 = vrot.lane.b32.xlu1 %v12761_v49, %s11727_s28 }
 0x1d7   :  { %2108 = vrot.lane.b32.xlu0 %v12769_v30, %s11731_s16  ;;  %1820 = vrot.lane.b32.xlu1 %v12769_v30, %s11728_s29 }
 0x1db   :  { %1822 = vrot.lane.b32.xlu0 %v12792_v0, %s11728_s29  ;;  %1699 = vrot.lane.b32.xlu1 %v12769_v30, %s11727_s28 }
 0x1dc   :  { %v1362_v26 = vpop.f32.mrb[12].mxu1 }
 0x1dd   :  { %v1363_v4 = vadd.f32 %v1362_v26, %v12643_v14  ;;  %v1364_v8 = vpop.f32.mrb[13].mxu1 }
 0x1de   :  { %v1366_v11 = vpop.f32.mrb[14].mxu1  ;;  %v1365_v21 = vadd.f32 %v1364_v8, %v12643_v14 }
 0x1df   :  { %v1547_v60 = vmax.f32 %v1363_v4, 0.0  ;;  %v1367_v58 = vpop.f32.mrb[15].mxu1  ;;  %1701 = vrot.lane.b32.xlu0 %v12792_v0, %s11727_s28  ;;  %1990 = vrot.lane.b32.xlu1 %v12792_v0, %s11729_s11 }
 0x1e0   :  { %v1548_v18 = vmax.f32 %v1365_v21, 0.0 }
 0x1e1   :  { %v12810_v17 = vpack.c.bf16 %v1547_v60, %v1547_v60 }
 0x1e2   :  { %v12837_v27 = vpack.c.bf16 %v1548_v18, %v1548_v18 }
 0x1e3   :  { %1826 = vrot.lane.b32.xlu0 %v12810_v17, %s11728_s29  ;;  %1994 = vrot.lane.b32.xlu1 %v12810_v17, %s11729_s11 }
 0x1e5   :  { %v12819_v25 = vpop.permute.xlu0 %1677  ;;  %v1799_v16 = vpop.permute.xlu1 %1798 }
 0x1e7   :  { %1705 = vrot.lane.b32.xlu0 %v12810_v17, %s11727_s28  ;;  %2110 = vrot.lane.b32.xlu1 %v12792_v0, %s11731_s16 }
 0x1e9   :  { %v12835_v37 = vpop.permute.xlu0 %1966 }
 0x1eb   :  { %1992 = vrot.lane.b32.xlu0 %v12827_v31, %s11729_s11  ;;  %2114 = vrot.lane.b32.xlu1 %v12810_v17, %s11731_s16 }
 0x1ec   :  { %v1403_v40 = vpop.f32.mrb[16].mxu0 }
 0x1ed   :  { %v1405_v56 = vpop.f32.mrb[17].mxu0  ;;  %v1404_v38 = vadd.f32 %v1403_v40, %v12643_v14  ;;  %v1969_v44 = vpop.permute.xlu0 %1968 }
 0x1ee   :  { %v1407_v59 = vpop.f32.mrb[18].mxu0 }
 0x1ef   :  { %1996 = vrot.lane.b32.xlu0 %v12837_v27, %s11729_s11  ;;  %1824 = vrot.lane.b32.xlu1 %v12827_v31, %s11728_s29  ;;  %v1408_v41 = vpop.f32.mrb[19].mxu0  ;;  %v1549_v47 = vmax.f32 %v1404_v38, 0.0  ;;  %v1406_v38 = vadd.f32 %v1405_v56, %v12643_v14  ;;  %v1870_v56 = vsel %vm324_vm3, 0, %v1799_v16 }
 0x1f1   :  { %v12856_v54 = vpack.c.bf16 %v1549_v47, %v1549_v47 }
 0x1f3   :  { %2112 = vrot.lane.b32.xlu0 %v12827_v31, %s11731_s16  ;;  %1703 = vrot.lane.b32.xlu1 %v12827_v31, %s11727_s28 }
 0x1f5   :  { %v12848_v50 = vpop.permute.xlu1 %1970 }
 0x1f6   :  { %v12850_v52 = vpop.permute.xlu0 %1804 }
 0x1f7   :  { %2116 = vrot.lane.b32.xlu0 %v12837_v27, %s11731_s16  ;;  %1828 = vrot.lane.b32.xlu1 %v12837_v27, %s11728_s29 }
 0x1f9   :  { %v1803_v6 = vpop.permute.xlu1 %1802 }
 0x1fa   :  { %v1848_v55 = vsel %vm324_vm3, %v1803_v6, %v12850_v52  ;;  %v12860_v62 = vpop.permute.xlu0 %1683 }
 0x1fb   :  { %v1877_v26 = vsel %vm1750_vm9, %v1848_v55, 0  ;;  %1830 = vrot.lane.b32.xlu0 %v12856_v54, %s11728_s29  ;;  %1707 = vrot.lane.b32.xlu1 %v12837_v27, %s11727_s28 }
 0x1fc   :  { %v1444_v4 = vpop.f32.mrb[16].mxu1  ;;  %v2233_v58 = vrot.slane %v1877_v26, 4 }
 0x1fd   :  { %v1445_v8 = vadd.f32 %v1444_v4, %v12643_v14  ;;  %v1446_v11 = vpop.f32.mrb[17].mxu1  ;;  %v1682_v60 = vpop.permute.xlu1 %1681  ;;  %v1550_v4 = vmax.f32 %v1406_v38, 0.0 }
 0x1fe   :  { %v1727_v24 = vsel %vm197_vm4, %v1682_v60, %v12860_v62  ;;  %v1448_v19 = vpop.f32.mrb[18].mxu1  ;;  %v12870_v21 = vpop.permute.xlu0 %2088 }
 0x1ff   :  { %v1551_v18 = vmax.f32 %v1445_v8, 0.0  ;;  %v1449_v40 = vpop.f32.mrb[19].mxu1  ;;  %1709 = vrot.lane.b32.xlu0 %v12856_v54, %s11727_s28  ;;  %1998 = vrot.lane.b32.xlu1 %v12856_v54, %s11729_s11  ;;  %v1757_v59 = vsel %vm1750_vm9, %v1727_v24, 0  ;;  %v1447_v8 = vadd.f32 %v1446_v11, %v12643_v14  ;;  %v12897_v19 = vpack.c.bf16 %v1550_v4, %v1550_v4 }
 0x200   :  { %v2312_v41 = vsel %vm765_vm6, %v1757_v59, %v2233_v58  ;;  %v1749_v11 = vsel %vm197_vm4, 0, %v12819_v25  ;;  %v2014_v4 = vsel %vm471_vm5, %v12835_v37, %v1969_v44 }
 0x201   :  { %v12879_v47 = vpack.c.bf16 %v1551_v18, %v1551_v18  ;;  %2559 = vmatprep.subr.bf16.mxu1 %v2312_v41  ;;  %v2087_v55 = vpop.permute.xlu1 %2086  ;;  %v2015_v18 = vsel %vm471_vm5, %v1969_v44, %v12848_v50  ;;  %v1552_v40 = vmax.f32 %v1447_v8, 0.0  ;;  %v1871_v41 = vsel %vm1750_vm9, %v1870_v56, 0 }
 0x202   :  { %v12881_v26 = vpop.permute.xlu0 %2092  ;;  %v2042_v8 = vsel %vm1750_vm9, %v2015_v18, 0  ;;  %v2040_v44 = vsel %vm1750_vm9, %v2014_v4, 0 }
 0x203   :  { %1834 = vrot.lane.b32.xlu0 %v12879_v47, %s11728_s29  ;;  %2002 = vrot.lane.b32.xlu1 %v12879_v47, %s11729_s11  ;;  %v12918_v28 = vpack.c.bf16 %v1552_v40, %v1552_v40  ;;  %v2279_v29 = vrot.slane %v2042_v8, 4  ;;  %v2278_v4 = vrot.slane %v2040_v44, 4  ;;  %v1921_v44 = vsel %vm1750_vm9, %v12653_v32, 0 }
 0x205   :  { %v12888_v24 = vpop.permute.xlu1 %2090 }
 0x206   :  { %v12890_v58 = vpop.permute.xlu0 %1974  ;;  %v2135_v32 = vsel %vm594_vm7, %v12870_v21, %v12888_v24 }
 0x207   :  { %1713 = vrot.lane.b32.xlu0 %v12879_v47, %s11727_s28  ;;  %2118 = vrot.lane.b32.xlu1 %v12856_v54, %s11731_s16 }
 0x209   :  { %v1801_v59 = vpop.permute.xlu1 %1800 }
 0x20a   :  { %v1846_v38 = vsel %vm324_vm3, %v1799_v16, %v1801_v59  ;;  %v1847_v10 = vsel %vm324_vm3, %v1801_v59, %v1803_v6  ;;  %v12906_v20 = vpop.permute.xlu0 %1806  ;;  %v1751_v6 = vsel %vm1750_vm9, %v1749_v11, 0  ;;  %v2230_v59 = vrot.slane %v1871_v41, 4 }
 0x20b   :  { %v1873_v46 = vsel %vm1750_vm9, %v1846_v38, 0  ;;  %2000 = vrot.lane.b32.xlu0 %v12897_v19, %s11729_s11  ;;  %2122 = vrot.lane.b32.xlu1 %v12879_v47, %s11731_s16  ;;  %v1875_v56 = vsel %vm1750_vm9, %v1847_v10, 0 }
 0x20c   :  { %v1485_v16 = vpop.f32.mrb[20].mxu0  ;;  %v2231_v38 = vrot.slane %v1873_v46, 4  ;;  %v2232_v10 = vrot.slane %v1875_v56, 4 }
 0x20d   :  { %v12920_v33 = vpop.f32.mrb[21].mxu0  ;;  %v1680_v37 = vpop.permute.xlu1 %1679  ;;  %v1486_v8 = vadd.f32 %v1485_v16, %v12643_v14  ;;  %v2134_v16 = vsel %vm594_vm7, %v2087_v55, %v12870_v21  ;;  %v1919_v55 = vsel %vm1750_vm9, %v12647_v9, 0 }
 0x20e   :  { %v1725_v22 = vsel %vm197_vm4, %v12819_v25, %v1680_v37  ;;  %v1726_v57 = vsel %vm197_vm4, %v1680_v37, %v1682_v60  ;;  %v1489_v18 = vpop.f32.mrb[22].mxu0  ;;  %v12932_v41 = vpop.permute.xlu0 %1685  ;;  %v2303_v37 = vsel %vm765_vm6, %v1751_v6, %v2230_v59  ;;  %v2160_v21 = vsel %vm1750_vm9, %v2134_v16, 0 }
 0x20f   :  { %v1755_v1 = vsel %vm1750_vm9, %v1726_v57, 0  ;;  %v1526_v11 = vpop.f32.mrb[20].mxu1  ;;  %2004 = vrot.lane.b32.xlu0 %v12918_v28, %s11729_s11  ;;  %1832 = vrot.lane.b32.xlu1 %v12897_v19, %s11728_s29  ;;  %v1753_v40 = vsel %vm1750_vm9, %v1725_v22, 0  ;;  %v1490_v46 = vpop.f32.mrb[23].mxu0 }
 0x210   :  { %v12934_v25 = vpop.f32.mrb[21].mxu1  ;;  %v2306_v60 = vsel %vm765_vm6, %v1753_v40, %v2231_v38  ;;  %v2309_v57 = vsel %vm765_vm6, %v1755_v1, %v2232_v10  ;;  %v1553_v40 = vmax.f32 %v1486_v8, 0.0 }
 0x211   :  { %2516 = vmatprep.subr.bf16.mxu0 %v2306_v60  ;;  %v1973_v56 = vpop.permute.xlu1 %1972  ;;  %v1530_v18 = vpop.f32.mrb[22].mxu1  ;;  %2560 = vmatpush1.bf16.msra.mxu1 %v2309_v57 }
 0x212   :  { %v2016_v22 = vsel %vm471_vm5, %v12848_v50, %v1973_v56  ;;  %v2017_v46 = vsel %vm471_vm5, %v1973_v56, %v12890_v58  ;;  %2517 = vmatpush1.bf16.msra.mxu0 %v2303_v37  ;;  %v1531_v38 = vpop.f32.mrb[23].mxu1  ;;  %v2378_v50 = vsel %vm765_vm6, %v1921_v44, %v2279_v29  ;;  %v2375_v56 = vsel %vm765_vm6, %v1919_v55, %v2278_v4 }
 0x213   :  { %v2044_v1 = vsel %vm1750_vm9, %v2016_v22, 0  ;;  %v2046_v6 = vsel %vm1750_vm9, %v2017_v46, 0  ;;  %2120 = vrot.lane.b32.xlu0 %v12897_v19, %s11731_s16  ;;  %1711 = vrot.lane.b32.xlu1 %v12897_v19, %s11727_s28  ;;  %v1925_v29 = vsel %vm1750_vm9, %v12663_v5, 0  ;;  %v1923_v37 = vsel %vm1750_vm9, %v12661_v7, 0  ;;  %v12993_v38 = vld [vmem:[%s18259_s3] sm:$0xff]  }
 0x214   :  { %v2280_v59 = vrot.slane %v2044_v1, 4  ;;  %v2281_v10 = vrot.slane %v2046_v6, 4  ;;  %2518 = vmatprep.subr.bf16.mxu0 %v2378_v50  ;;  %v2136_v18 = vsel %vm594_vm7, %v12888_v24, %v12881_v26  ;;  %v2162_v5 = vsel %vm1750_vm9, %v2135_v32, 0 }
 0x215   :  { %v12960_v60 = vpop.permute.xlu0 %1810  ;;  %v12962_v57 = vpop.permute.xlu1 %1978  ;;  %v12981_v7 = vpack.c.bf16 %v1553_v40, %v1553_v40  ;;  %v1527_v24 = vadd.f32 %v1526_v11, %v12643_v14  ;;  %v2468_v46 = vsel %vm765_vm6, %v2160_v21, 0  ;;  %v2164_v44 = vsel %vm1750_vm9, %v2136_v18, 0 }
 0x216   :  { %2519 = vmatpush1.bf16.msra.mxu0 %v2375_v56  ;;  %v2384_v9 = vsel %vm765_vm6, %v1925_v29, %v2281_v10  ;;  %v2381_v8 = vsel %vm765_vm6, %v1923_v37, %v2280_v59  ;;  %v2472_v1 = vsel %vm765_vm6, %v2164_v44, 0  ;;  %v18273_v50 = vlaneseq }
 0x217   :  { %2124 = vrot.lane.b32.xlu0 %v12918_v28, %s11731_s16  ;;  %1836 = vrot.lane.b32.xlu1 %v12918_v28, %s11728_s29  ;;  %v1555_v6 = vmax.f32 %v1527_v24, 0.0  ;;  %v1849_v10 = vsel %vm324_vm3, %v12850_v52, %v12906_v20  ;;  %v1488_v55 = vadd.f32 %v12920_v33, %v12643_v14  ;;  %v1728_v52 = vsel %vm197_vm4, %v12860_v62, %v12932_v41 }
 0x218   :  { %10533 = vmatprep.subr.msk.bf16.mxu0 %vm765_vm6, %v2162_v5  ;;  %2561 = vmatprep.subr.bf16.mxu1 %v2384_v9  ;;  %v29_v56 = vand.u32 127, %v18273_v50  ;;  %v1879_v33 = vsel %vm1750_vm9, %v1849_v10, 0  ;;  %v1759_v62 = vsel %vm1750_vm9, %v1728_v52, 0 }
 0x219   :  { %2562 = vmatpush1.bf16.msra.mxu1 %v2381_v8  ;;  %v12984_v4 = vpop.permute.xlu0 %1689  ;;  %v12986_v22 = vpop.permute.xlu1 %2094  ;;  %v13021_v40 = vpack.c.bf16 %v1555_v6, %v1555_v6  ;;  %v1554_v24 = vmax.f32 %v1488_v55, 0.0 }
 0x21a   :  { %v2137_v16 = vsel %vm594_vm7, %v12881_v26, %v12986_v22  ;;  %2521 = vmatpush1.bf16.msra.mxu0 %v2468_v46  ;;  %v18394_v26 = vmov 0   ;;  %v13044_v46 = vadd.s32 2944, %v29_v56 }
 0x21b   :  { %1838 = vrot.lane.b32.xlu0 %v12981_v7, %s11728_s29  ;;  %1715 = vrot.lane.b32.xlu1 %v12918_v28, %s11727_s28  ;;  %v2166_v11 = vsel %vm1750_vm9, %v2137_v16, 0  ;;  %v2234_v16 = vrot.slane %v1879_v33, 4  ;;  %v13058_v55 = vpack.c.bf16 %v1554_v24, %v1554_v24 }
 0x21c   :  { %10535 = vmatprep.subr.msk.bf16.mxu1 %vm765_vm6, %v2166_v11  ;;  %18395 = vst [vmem:[#allocation14_spill] sm:$0xff] %v13044_v46  ;;  %vm76_vm10 = vcmp.lt.s32.totalorder %v13044_v46, 3000 }
 0x21d   :  { %v1977_v32 = vpop.permute.xlu0 %1976  ;;  %2564 = vmatpush1.bf16.msra.mxu1 %v2472_v1  ;;  %v13005_v59 = vpop.permute.xlu1 %2098  ;;  %10534 = vmatmul.mubr.msk.bf16.vlgmr.msra.gmra.mrb[24].mxu0 %vm965_vm8, %v12993_v38 }
 0x21e   :  { %2634 = vmatprep.mubr.bf16.mxu0 %v18394_v26  ;;  %v2019_v29 = vsel %vm471_vm5, %v1977_v32, %v12962_v57  ;;  %v2018_v9 = vsel %vm471_vm5, %v12890_v58, %v1977_v32 }
 0x21f   :  { %1717 = vrot.lane.b32.xlu0 %v12981_v7, %s11727_s28  ;;  %2006 = vrot.lane.b32.xlu1 %v12981_v7, %s11729_s11  ;;  %v2050_v5 = vsel %vm1750_vm9, %v2019_v29, 0  ;;  %v2048_v11 = vsel %vm1750_vm9, %v2018_v9, 0  ;;  %v1929_v9 = vsel %vm1750_vm9, %v12711_v13, 0 }
 0x220   :  { %10536 = vmatmul.mubr.msk.bf16.vlgmr.msra.gmra.mrb[24].mxu1 %vm965_vm8, %v12993_v38  ;;  %v2283_v32 = vrot.slane %v2050_v5, 4  ;;  %v2282_v29 = vrot.slane %v2048_v11, 4 }
 0x221   :  { %v13026_v37 = vpop.permute.xlu0 %1980  ;;  %v1809_v21 = vpop.permute.xlu1 %1808  ;;  %2677 = vmatprep.mubr.bf16.mxu1 %v18394_v26 }
 0x222   :  { %v1850_v18 = vsel %vm324_vm3, %v12906_v20, %v1809_v21  ;;  %v1529_v20 = vadd.f32 %v12934_v25, %v12643_v14  ;;  %v2315_v25 = vsel %vm765_vm6, %v1759_v62, %v2234_v16 }
 0x223   :  { %v1881_v8 = vsel %vm1750_vm9, %v1850_v18, 0  ;;  %1842 = vrot.lane.b32.xlu0 %v13021_v40, %s11728_s29  ;;  %2010 = vrot.lane.b32.xlu1 %v13021_v40, %s11729_s11 }
 0x224   :  { %v2235_v1 = vrot.slane %v1881_v8, 4  ;;  %v1556_v56 = vmax.f32 %v1529_v20, 0.0  ;;  %v2020_v20 = vsel %vm471_vm5, %v12962_v57, %v13026_v37 }
 0x225   :  { %v2097_v44 = vpop.permute.xlu0 %2096  ;;  %v1688_v58 = vpop.permute.xlu1 %1687 }
 0x226   :  { %v1729_v6 = vsel %vm197_vm4, %v12932_v41, %v1688_v58  ;;  %v1851_v41 = vsel %vm324_vm3, %v1809_v21, %v12960_v60  ;;  %v2138_v8 = vsel %vm594_vm7, %v12986_v22, %v2097_v44  ;;  %v1730_v21 = vsel %vm197_vm4, %v1688_v58, %v12984_v4 }
 0x227   :  { %1721 = vrot.lane.b32.xlu0 %v13021_v40, %s11727_s28  ;;  %2126 = vrot.lane.b32.xlu1 %v12981_v7, %s11731_s16  ;;  %v1761_v10 = vsel %vm1750_vm9, %v1729_v6, 0  ;;  %v1883_v24 = vsel %vm1750_vm9, %v1851_v41, 0  ;;  %v2139_v13 = vsel %vm594_vm7, %v2097_v44, %v13005_v59  ;;  %v1927_v22 = vsel %vm1750_vm9, %v12682_v3, 0 }
 0x228   :  { %v2318_v14 = vsel %vm765_vm6, %v1761_v10, %v2235_v1  ;;  %v1628_v62 = vsel %vm76_vm10, %v1556_v56, 0.0  ;;  %v2387_v11 = vsel %vm765_vm6, %v1927_v22, %v2282_v29  ;;  %v1763_v1 = vsel %vm1750_vm9, %v1730_v21, 0 }
 0x229   :  { %v13062_v52 = vpop.permute.xlu0 %2100  ;;  %v13064_v18 = vpop.permute.xlu1 %1812  ;;  %2602 = vmatprep.subr.bf16.mxu0 %v2318_v14  ;;  %v2168_v6 = vsel %vm1750_vm9, %v2138_v8, 0  ;;  %v2170_v57 = vsel %vm1750_vm9, %v2139_v13, 0  ;;  %v2052_v14 = vsel %vm1750_vm9, %v2020_v20, 0  ;;  %v1933_v13 = vsel %vm1750_vm9, %v12717_v23, 0 }
 0x22a   :  { %v1852_v33 = vsel %vm324_vm3, %v12960_v60, %v13064_v18  ;;  %2603 = vmatpush1.bf16.msra.mxu0 %v2315_v25  ;;  %v2390_v60 = vsel %vm765_vm6, %v1929_v9, %v2283_v32  ;;  %v2236_v32 = vrot.slane %v1883_v24, 4  ;;  %v13111_v25 = vpack.c.bf16 %v1628_v62, %v1628_v62 }
 0x22b   :  { %v1885_v5 = vsel %vm1750_vm9, %v1852_v33, 0  ;;  %2130 = vrot.lane.b32.xlu0 %v13021_v40, %s11731_s16  ;;  %1840 = vrot.lane.b32.xlu1 %v13058_v55, %s11728_s29  ;;  %v2476_v41 = vsel %vm765_vm6, %v2168_v6, 0  ;;  %v2284_v8 = vrot.slane %v2052_v14, 4  ;;  %v1931_v62 = vsel %vm1750_vm9, %v12700_v15, 0 }
 0x22c   :  { %2604 = vmatprep.subr.bf16.mxu0 %v2390_v60  ;;  %v2237_v44 = vrot.slane %v1885_v5, 4  ;;  %v2321_v33 = vsel %vm765_vm6, %v1763_v1, %v2236_v32 }
 0x22d   :  { %v13092_v58 = vpop.permute.xlu0 %1814  ;;  %v13094_v16 = vpop.permute.xlu1 %1691  ;;  %v2393_v23 = vsel %vm765_vm6, %v1931_v62, %v2284_v8 }
 0x22e   :  { %v1731_v3 = vsel %vm197_vm4, %v12984_v4, %v13094_v16  ;;  %2605 = vmatpush1.bf16.msra.mxu0 %v2387_v11 }
 0x22f   :  { %2008 = vrot.lane.b32.xlu0 %v13058_v55, %s11729_s11  ;;  %1719 = vrot.lane.b32.xlu1 %v13058_v55, %s11727_s28  ;;  %v1765_v10 = vsel %vm1750_vm9, %v1731_v3, 0 }
 0x230   :  { %10537 = vmatprep.subr.msk.bf16.mxu0 %vm765_vm6, %v2170_v57  ;;  %v2324_v4 = vsel %vm765_vm6, %v1765_v10, %v2237_v44  ;;  %v1853_v10 = vsel %vm324_vm3, %v13064_v18, %v13092_v58 }
 0x231   :  { %v13113_v56 = vpop.permute.xlu0 %1693  ;;  %2645 = vmatprep.subr.bf16.mxu1 %v2324_v4  ;;  %v1983_v29 = vpop.permute.xlu1 %1982  ;;  %v1887_v18 = vsel %vm1750_vm9, %v1853_v10, 0  ;;  %v1937_v10 = vsel %vm1750_vm9, %v12761_v49, 0 }
 0x232   :  { %v2021_v9 = vsel %vm471_vm5, %v13026_v37, %v1983_v29  ;;  %2607 = vmatpush1.bf16.msra.mxu0 %v2476_v41  ;;  %2646 = vmatpush1.bf16.msra.mxu1 %v2321_v33  ;;  %v2140_v37 = vsel %vm594_vm7, %v13005_v59, %v13062_v52  ;;  %v1732_v41 = vsel %vm197_vm4, %v13094_v16, %v13113_v56 }
 0x233   :  { %v2054_v21 = vsel %vm1750_vm9, %v2021_v9, 0  ;;  %2128 = vrot.lane.b32.xlu1 %v13058_v55, %s11731_s16  ;;  %2012 = vrot.lane.b32.xlu0 %v13111_v25, %s11729_s11  ;;  %v2172_v11 = vsel %vm1750_vm9, %v2140_v37, 0 }
 0x234   :  { %v2285_v5 = vrot.slane %v2054_v21, 4  ;;  %v2480_v44 = vsel %vm765_vm6, %v2172_v11, 0 }
 0x235   :  { %v13124_v60 = vpop.permute.xlu0 %1818  ;;  %v13126_v24 = vpop.permute.xlu1 %1986  ;;  %10538 = vmatmul.mubr.msk.bf16.vlgmr.msra.gmra.mrb[28].mxu0 %vm965_vm8, %v12993_v38 }
 0x236   :  { %v2396_v22 = vsel %vm765_vm6, %v1933_v13, %v2285_v5  ;;  %2720 = vmatprep.mubr.bf16.mxu0 %v18394_v26  ;;  %v1767_v5 = vsel %vm1750_vm9, %v1732_v41, 0 }
 0x237   :  { %2647 = vmatprep.subr.bf16.mxu1 %v2396_v22  ;;  %2132 = vrot.lane.b32.xlu0 %v13111_v25, %s11731_s16 }
 0x238   :  { %1844 = vrot.lane.b32.xlu1 %v13111_v25, %s11728_s29  ;;  %2648 = vmatpush1.bf16.msra.mxu1 %v2393_v23  ;;  %v2238_v23 = vrot.slane %v1887_v18, 4 }
 0x239   :  { %v13144_v20 = vpop.permute.xlu0 %1697  ;;  %v2103_v59 = vpop.permute.xlu1 %2102 }
 0x23a   :  { %v2141_v15 = vsel %vm594_vm7, %v13062_v52, %v2103_v59  ;;  %v10562_v52 = vld [vmem:[%s18256_s0 + $0xe8] sm:$0x1f] }
 0x23b   :  { %4271 = vrot.lane.b32.xlu0 %v12306_v39, %s11731_s16  ;;  %v2174_v1 = vsel %vm1750_vm9, %v2141_v15, 0  ;;  %v13167_v57 = vpack.c.bf16 %v10562_v52, %v10562_v52 }
 0x23c   :  { %1723 = vrot.lane.b32.xlu1 %v13111_v25, %s11727_s28  ;;  %10539 = vmatprep.subr.msk.bf16.mxu1 %vm765_vm6, %v2174_v1 }
 0x23d   :  { %v1985_v3 = vpop.permute.xlu0 %1984  ;;  %2650 = vmatpush1.bf16.msra.mxu1 %v2480_v44  ;;  %v13156_v6 = vpop.permute.xlu1 %2106 }
 0x23e   :  { %v2023_v32 = vsel %vm471_vm5, %v1985_v3, %v13126_v24  ;;  %v2022_v9 = vsel %vm471_vm5, %v1983_v29, %v1985_v3 }
 0x23f   :  { %4011 = vrot.lane.b32.xlu0 %v12446_v2, %s11728_s29  ;;  %v2058_v8 = vsel %vm1750_vm9, %v2023_v32, 0  ;;  %v2056_v29 = vsel %vm1750_vm9, %v2022_v9, 0  ;;  %v2327_v32 = vsel %vm765_vm6, %v1767_v5, %v2238_v23 }
 0x240   :  { %4273 = vrot.lane.b32.xlu1 %v12337_v53, %s11731_s16  ;;  %10540 = vmatmul.mubr.msk.bf16.vlgmr.msra.gmra.mrb[28].mxu1 %vm965_vm8, %v12993_v38  ;;  %v2287_v37 = vrot.slane %v2058_v8, 4  ;;  %v2286_v44 = vrot.slane %v2056_v29, 4 }
 0x241   :  { %v13174_v14 = vpop.permute.xlu0 %1988  ;;  %v1817_v4 = vpop.permute.xlu1 %1816  ;;  %2763 = vmatprep.mubr.bf16.mxu1 %v18394_v26 }
 0x242   :  { %v1854_v33 = vsel %vm324_vm3, %v13092_v58, %v1817_v4  ;;  %v10563_v58 = vld [vmem:[%s18256_s0 + $0xf0] sm:$0x1f]  ;;  %v1855_v3 = vsel %vm324_vm3, %v1817_v4, %v13124_v60  ;;  %v2402_v4 = vsel %vm765_vm6, %v1937_v10, %v2287_v37 }
 0x243   :  { %v1889_v21 = vsel %vm1750_vm9, %v1854_v33, 0  ;;  %3890 = vrot.lane.b32.xlu0 %v12446_v2, %s11727_s28  ;;  %v13203_v1 = vpack.c.bf16 %v10563_v58, %v10563_v58  ;;  %v1891_v49 = vsel %vm1750_vm9, %v1855_v3, 0  ;;  %v10564_v58 = vld [vmem:[%s18256_s0 + $0xf8] sm:$0x1f] }
 0x244   :  { %4013 = vrot.lane.b32.xlu1 %v13167_v57, %s11728_s29  ;;  %v2239_v22 = vrot.slane %v1889_v21, 4 }
 0x245   :  { %v2105_v16 = vpop.permute.xlu0 %2104  ;;  %v1696_v13 = vpop.permute.xlu1 %1695 }
 0x246   :  { %v1733_v62 = vsel %vm197_vm4, %v13113_v56, %v1696_v13  ;;  %v1734_v41 = vsel %vm197_vm4, %v1696_v13, %v13144_v20  ;;  %v2142_v9 = vsel %vm594_vm7, %v2103_v59, %v2105_v16  ;;  %v2143_v8 = vsel %vm594_vm7, %v2105_v16, %v13156_v6 }
 0x247   :  { %4158 = vrot.lane.b32.xlu0 %v13167_v57, %s11729_s11  ;;  %v1769_v11 = vsel %vm1750_vm9, %v1733_v62, 0  ;;  %v2024_v59 = vsel %vm471_vm5, %v13126_v24, %v13174_v14  ;;  %v1771_v18 = vsel %vm1750_vm9, %v1734_v41, 0  ;;  %v2178_v24 = vsel %vm1750_vm9, %v2143_v8, 0 }
 0x248   :  { %3892 = vrot.lane.b32.xlu1 %v13167_v57, %s11727_s28  ;;  %v2330_v15 = vsel %vm765_vm6, %v1769_v11, %v2239_v22  ;;  %v2176_v37 = vsel %vm1750_vm9, %v2142_v9, 0  ;;  %v2240_v22 = vrot.slane %v1891_v49, 4  ;;  %v2060_v23 = vsel %vm1750_vm9, %v2024_v59, 0 }
 0x249   :  { %v13207_v52 = vpop.permute.xlu0 %2108  ;;  %v13209_v56 = vpop.permute.xlu1 %1820  ;;  %2688 = vmatprep.subr.bf16.mxu0 %v2330_v15  ;;  %v13256_v11 = vpack.c.bf16 %v10564_v58, %v10564_v58  ;;  %v2484_v3 = vsel %vm765_vm6, %v2176_v37, 0  ;;  %v2288_v41 = vrot.slane %v2060_v23, 4  ;;  %v1939_v59 = vsel %vm1750_vm9, %v12744_v42, 0 }
 0x24a   :  { %v1856_v33 = vsel %vm324_vm3, %v13124_v60, %v13209_v56  ;;  %2689 = vmatpush1.bf16.msra.mxu0 %v2327_v32  ;;  %v1935_v60 = vsel %vm1750_vm9, %v12732_v35, 0  ;;  %v2333_v32 = vsel %vm765_vm6, %v1771_v18, %v2240_v22  ;;  %v2144_v49 = vsel %vm594_vm7, %v13156_v6, %v13207_v52 }
 0x24b   :  { %v1893_v21 = vsel %vm1750_vm9, %v1856_v33, 0  ;;  %2690 = vmatprep.subr.bf16.mxu0 %v2402_v4  ;;  %4275 = vrot.lane.b32.xlu0 %v12361_v61, %s11731_s16  ;;  %v2399_v13 = vsel %vm765_vm6, %v1935_v60, %v2286_v44  ;;  %v2180_v58 = vsel %vm1750_vm9, %v2144_v49, 0 }
 0x24c   :  { %4160 = vrot.lane.b32.xlu1 %v13203_v1, %s11729_s11  ;;  %v2241_v29 = vrot.slane %v1893_v21, 4  ;;  %v1941_v21 = vsel %vm1750_vm9, %v12769_v30, 0  ;;  %v2405_v30 = vsel %vm765_vm6, %v1939_v59, %v2288_v41 }
 0x24d   :  { %v13235_v5 = vpop.permute.xlu0 %1822  ;;  %v13237_v16 = vpop.permute.xlu1 %1699 }
 0x24e   :  { %v1735_v35 = vsel %vm197_vm4, %v13144_v20, %v13237_v16  ;;  %2691 = vmatpush1.bf16.msra.mxu0 %v2399_v13  ;;  %v1857_v23 = vsel %vm324_vm3, %v13209_v56, %v13235_v5 }
 0x24f   :  { %10541 = vmatprep.subr.msk.bf16.mxu0 %vm765_vm6, %v2178_v24  ;;  %4015 = vrot.lane.b32.xlu0 %v13203_v1, %s11728_s29  ;;  %v1773_v62 = vsel %vm1750_vm9, %v1735_v35, 0  ;;  %v2488_v35 = vsel %vm765_vm6, %v2180_v58, 0  ;;  %v1895_v56 = vsel %vm1750_vm9, %v1857_v23, 0  ;;  %v1945_v23 = vsel %vm1750_vm9, %v12827_v31, 0 }
 0x250   :  { %4277 = vrot.lane.b32.xlu1 %v12446_v2, %s11731_s16  ;;  %v2336_v20 = vsel %vm765_vm6, %v1773_v62, %v2241_v29 }
 0x251   :  { %v13258_v15 = vpop.permute.xlu0 %1701  ;;  %2731 = vmatprep.subr.bf16.mxu1 %v2336_v20  ;;  %v1991_v44 = vpop.permute.xlu1 %1990 }
 0x252   :  { %v2025_v10 = vsel %vm471_vm5, %v13174_v14, %v1991_v44  ;;  %2693 = vmatpush1.bf16.msra.mxu0 %v2484_v3  ;;  %2732 = vmatpush1.bf16.msra.mxu1 %v2333_v32  ;;  %v10565_v14 = vld [vmem:[%s18256_s0 + $0x100] sm:$0x1f]  ;;  %v1736_v32 = vsel %vm197_vm4, %v13237_v16, %v13258_v15 }
 0x253   :  { %v2062_v33 = vsel %vm1750_vm9, %v2025_v10, 0  ;;  %3894 = vrot.lane.b32.xlu0 %v13203_v1, %s11727_s28  ;;  %v13292_v18 = vpack.c.bf16 %v10565_v14, %v10565_v14 }
 0x254   :  { %v2289_v4 = vrot.slane %v2062_v33, 4  ;;  %4017 = vrot.lane.b32.xlu1 %v13256_v11, %s11728_s29 }
 0x255   :  { %v13269_v9 = vpop.permute.xlu0 %1826  ;;  %v13271_v8 = vpop.permute.xlu1 %1994  ;;  %10542 = vmatmul.mubr.msk.bf16.vlgmr.msra.gmra.mrb[32].mxu0 %vm965_vm8, %v12993_v38 }
 0x256   :  { %v2408_v60 = vsel %vm765_vm6, %v1941_v21, %v2289_v4  ;;  %2806 = vmatprep.mubr.bf16.mxu0 %v18394_v26  ;;  %v1775_v21 = vsel %vm1750_vm9, %v1736_v32, 0 }
 0x257   :  { %2733 = vmatprep.subr.bf16.mxu1 %v2408_v60  ;;  %4162 = vrot.lane.b32.xlu0 %v13256_v11, %s11729_s11 }
 0x258   :  { %3896 = vrot.lane.b32.xlu1 %v13256_v11, %s11727_s28  ;;  %2734 = vmatpush1.bf16.msra.mxu1 %v2405_v30  ;;  %v2242_v30 = vrot.slane %v1895_v56, 4 }
 0x259   :  { %v13294_v6 = vpop.permute.xlu0 %1705  ;;  %v2111_v13 = vpop.permute.xlu1 %2110 }
 0x25a   :  { %v2145_v42 = vsel %vm594_vm7, %v13207_v52, %v2111_v13  ;;  %v10566_v52 = vld [vmem:[%s18256_s0 + $0x108] sm:$0x1f] }
 0x25b   :  { %4279 = vrot.lane.b32.xlu0 %v13167_v57, %s11731_s16  ;;  %v2182_v29 = vsel %vm1750_vm9, %v2145_v42, 0  ;;  %v13317_v62 = vpack.c.bf16 %v10566_v52, %v10566_v52 }
 0x25c   :  { %4164 = vrot.lane.b32.xlu1 %v13292_v18, %s11729_s11  ;;  %10543 = vmatprep.subr.msk.bf16.mxu1 %vm765_vm6, %v2182_v29 }
 0x25d   :  { %v1993_v24 = vpop.permute.xlu0 %1992  ;;  %2736 = vmatpush1.bf16.msra.mxu1 %v2488_v35  ;;  %v13306_v37 = vpop.permute.xlu1 %2114 }
 0x25e   :  { %v2027_v22 = vsel %vm471_vm5, %v1993_v24, %v13271_v8  ;;  %v2026_v41 = vsel %vm471_vm5, %v1991_v44, %v1993_v24 }
 0x25f   :  { %4019 = vrot.lane.b32.xlu0 %v13292_v18, %s11728_s29  ;;  %v2066_v33 = vsel %vm1750_vm9, %v2027_v22, 0  ;;  %v2064_v44 = vsel %vm1750_vm9, %v2026_v41, 0  ;;  %v2339_v22 = vsel %vm765_vm6, %v1775_v21, %v2242_v30 }
 0x260   :  { %4281 = vrot.lane.b32.xlu1 %v13203_v1, %s11731_s16  ;;  %10544 = vmatmul.mubr.msk.bf16.vlgmr.msra.gmra.mrb[32].mxu1 %vm965_vm8, %v12993_v38  ;;  %v2291_v49 = vrot.slane %v2066_v33, 4  ;;  %v2290_v35 = vrot.slane %v2064_v44, 4 }
 0x261   :  { %v13324_v20 = vpop.permute.xlu0 %1996  ;;  %v1825_v3 = vpop.permute.xlu1 %1824  ;;  %2849 = vmatprep.mubr.bf16.mxu1 %v18394_v26 }
 0x262   :  { %v1858_v10 = vsel %vm324_vm3, %v13235_v5, %v1825_v3  ;;  %v10567_v5 = vld [vmem:[%s18256_s0 + $0x110] sm:$0x1f]  ;;  %v1859_v24 = vsel %vm324_vm3, %v1825_v3, %v13269_v9  ;;  %v2414_v3 = vsel %vm765_vm6, %v1945_v23, %v2291_v49 }
 0x263   :  { %v1897_v4 = vsel %vm1750_vm9, %v1858_v10, 0  ;;  %3898 = vrot.lane.b32.xlu0 %v13292_v18, %s11727_s28  ;;  %v13353_v29 = vpack.c.bf16 %v10567_v5, %v10567_v5  ;;  %v1899_v31 = vsel %vm1750_vm9, %v1859_v24, 0  ;;  %v10568_v5 = vld [vmem:[%s18256_s0 + $0x118] sm:$0x1f] }
 0x264   :  { %4021 = vrot.lane.b32.xlu1 %v13317_v62, %s11728_s29  ;;  %v2243_v60 = vrot.slane %v1897_v4, 4 }
 0x265   :  { %v2113_v16 = vpop.permute.xlu0 %2112  ;;  %v1704_v14 = vpop.permute.xlu1 %1703 }
 0x266   :  { %v1737_v59 = vsel %vm197_vm4, %v13258_v15, %v1704_v14  ;;  %v1738_v32 = vsel %vm197_vm4, %v1704_v14, %v13294_v6  ;;  %v2146_v41 = vsel %vm594_vm7, %v2111_v13, %v2113_v16  ;;  %v2147_v33 = vsel %vm594_vm7, %v2113_v16, %v13306_v37 }
 0x267   :  { %4166 = vrot.lane.b32.xlu0 %v13317_v62, %s11729_s11  ;;  %v1777_v58 = vsel %vm1750_vm9, %v1737_v59, 0  ;;  %v2028_v13 = vsel %vm471_vm5, %v13271_v8, %v13324_v20  ;;  %v1779_v56 = vsel %vm1750_vm9, %v1738_v32, 0  ;;  %v2186_v8 = vsel %vm1750_vm9, %v2147_v33, 0 }
 0x268   :  { %3900 = vrot.lane.b32.xlu1 %v13317_v62, %s11727_s28  ;;  %v2342_v42 = vsel %vm765_vm6, %v1777_v58, %v2243_v60  ;;  %v2184_v49 = vsel %vm1750_vm9, %v2146_v41, 0  ;;  %v2244_v60 = vrot.slane %v1899_v31, 4  ;;  %v2068_v30 = vsel %vm1750_vm9, %v2028_v13, 0 }
 0x269   :  { %v13357_v52 = vpop.permute.xlu0 %2116  ;;  %v13359_v15 = vpop.permute.xlu1 %1828  ;;  %2774 = vmatprep.subr.bf16.mxu0 %v2342_v42  ;;  %v13406_v58 = vpack.c.bf16 %v10568_v5, %v10568_v5  ;;  %v2492_v24 = vsel %vm765_vm6, %v2184_v49, 0  ;;  %v2292_v32 = vrot.slane %v2068_v30, 4  ;;  %v1947_v13 = vsel %vm1750_vm9, %v12810_v17, 0 }
 0x26a   :  { %v1860_v10 = vsel %vm324_vm3, %v13269_v9, %v13359_v15  ;;  %2775 = vmatpush1.bf16.msra.mxu0 %v2339_v22  ;;  %v1943_v9 = vsel %vm1750_vm9, %v12792_v0, 0  ;;  %v2345_v22 = vsel %vm765_vm6, %v1779_v56, %v2244_v60  ;;  %v2148_v31 = vsel %vm594_vm7, %v13306_v37, %v13357_v52 }
 0x26b   :  { %v1901_v4 = vsel %vm1750_vm9, %v1860_v10, 0  ;;  %2776 = vmatprep.subr.bf16.mxu0 %v2414_v3  ;;  %4283 = vrot.lane.b32.xlu0 %v13256_v11, %s11731_s16  ;;  %v2411_v14 = vsel %vm765_vm6, %v1943_v9, %v2290_v35  ;;  %v2188_v5 = vsel %vm1750_vm9, %v2148_v31, 0 }
 0x26c   :  { %4168 = vrot.lane.b32.xlu1 %v13353_v29, %s11729_s11  ;;  %v2245_v44 = vrot.slane %v1901_v4, 4  ;;  %v1949_v4 = vsel %vm1750_vm9, %v12837_v27, 0  ;;  %v2417_v27 = vsel %vm765_vm6, %v1947_v13, %v2292_v32 }
 0x26d   :  { %v13385_v21 = vpop.permute.xlu0 %1830  ;;  %v13387_v16 = vpop.permute.xlu1 %1707 }
 0x26e   :  { %v1739_v0 = vsel %vm197_vm4, %v13294_v6, %v13387_v16  ;;  %2777 = vmatpush1.bf16.msra.mxu0 %v2411_v14  ;;  %v1861_v30 = vsel %vm324_vm3, %v13359_v15, %v13385_v21 }
 0x26f   :  { %10545 = vmatprep.subr.msk.bf16.mxu0 %vm765_vm6, %v2186_v8  ;;  %4023 = vrot.lane.b32.xlu0 %v13353_v29, %s11728_s29  ;;  %v1781_v59 = vsel %vm1750_vm9, %v1739_v0, 0  ;;  %v2496_v0 = vsel %vm765_vm6, %v2188_v5, 0  ;;  %v1903_v15 = vsel %vm1750_vm9, %v1861_v30, 0  ;;  %v1953_v30 = vsel %vm1750_vm9, %v12897_v19, 0 }
 0x270   :  { %4285 = vrot.lane.b32.xlu1 %v13292_v18, %s11731_s16  ;;  %v2348_v6 = vsel %vm765_vm6, %v1781_v59, %v2245_v44 }
 0x271   :  { %v13408_v42 = vpop.permute.xlu0 %1709  ;;  %2817 = vmatprep.subr.bf16.mxu1 %v2348_v6  ;;  %v1999_v35 = vpop.permute.xlu1 %1998 }
 0x272   :  { %v2029_v23 = vsel %vm471_vm5, %v13324_v20, %v1999_v35  ;;  %2779 = vmatpush1.bf16.msra.mxu0 %v2492_v24  ;;  %2818 = vmatpush1.bf16.msra.mxu1 %v2345_v22  ;;  %v10569_v20 = vld [vmem:[%s18256_s0 + $0x120] sm:$0x1f]  ;;  %v1740_v22 = vsel %vm197_vm4, %v13387_v16, %v13408_v42 }
 0x273   :  { %v2070_v10 = vsel %vm1750_vm9, %v2029_v23, 0  ;;  %3902 = vrot.lane.b32.xlu0 %v13353_v29, %s11727_s28  ;;  %v13442_v56 = vpack.c.bf16 %v10569_v20, %v10569_v20 }
 0x274   :  { %v2293_v3 = vrot.slane %v2070_v10, 4  ;;  %4025 = vrot.lane.b32.xlu1 %v13406_v58, %s11728_s29 }
 0x275   :  { %v13419_v41 = vpop.permute.xlu0 %1834  ;;  %v13421_v33 = vpop.permute.xlu1 %2002  ;;  %10546 = vmatmul.mubr.msk.bf16.vlgmr.msra.gmra.mrb[36].mxu0 %vm965_vm8, %v12993_v38 }
 0x276   :  { %v2420_v9 = vsel %vm765_vm6, %v1949_v4, %v2293_v3  ;;  %2892 = vmatprep.mubr.bf16.mxu0 %v18394_v26  ;;  %v1783_v4 = vsel %vm1750_vm9, %v1740_v22, 0 }
 0x277   :  { %2819 = vmatprep.subr.bf16.mxu1 %v2420_v9  ;;  %4170 = vrot.lane.b32.xlu0 %v13406_v58, %s11729_s11 }
 0x278   :  { %3904 = vrot.lane.b32.xlu1 %v13406_v58, %s11727_s28  ;;  %2820 = vmatpush1.bf16.msra.mxu1 %v2417_v27  ;;  %v2246_v27 = vrot.slane %v1903_v15, 4 }
 0x279   :  { %v13444_v37 = vpop.permute.xlu0 %1713  ;;  %v2119_v14 = vpop.permute.xlu1 %2118 }
 0x27a   :  { %v2149_v17 = vsel %vm594_vm7, %v13357_v52, %v2119_v14  ;;  %v10570_v52 = vld [vmem:[%s18256_s0 + $0x128] sm:$0x1f] }
 0x27b   :  { %4287 = vrot.lane.b32.xlu0 %v13317_v62, %s11731_s16  ;;  %v2190_v44 = vsel %vm1750_vm9, %v2149_v17, 0  ;;  %v13467_v59 = vpack.c.bf16 %v10570_v52, %v10570_v52 }
 0x27c   :  { %4172 = vrot.lane.b32.xlu1 %v13442_v56, %s11729_s11  ;;  %10547 = vmatprep.subr.msk.bf16.mxu1 %vm765_vm6, %v2190_v44 }
 0x27d   :  { %v2001_v8 = vpop.permute.xlu0 %2000  ;;  %2822 = vmatpush1.bf16.msra.mxu1 %v2496_v0  ;;  %v13456_v49 = vpop.permute.xlu1 %2122 }
 0x27e   :  { %v2031_v60 = vsel %vm471_vm5, %v2001_v8, %v13421_v33  ;;  %v2030_v32 = vsel %vm471_vm5, %v1999_v35, %v2001_v8 }
 0x27f   :  { %4027 = vrot.lane.b32.xlu0 %v13442_v56, %s11728_s29  ;;  %v2074_v10 = vsel %vm1750_vm9, %v2031_v60, 0  ;;  %v2072_v35 = vsel %vm1750_vm9, %v2030_v32, 0  ;;  %v2351_v60 = vsel %vm765_vm6, %v1783_v4, %v2246_v27 }
 0x280   :  { %4289 = vrot.lane.b32.xlu1 %v13353_v29, %s11731_s16  ;;  %10548 = vmatmul.mubr.msk.bf16.vlgmr.msra.gmra.mrb[36].mxu1 %vm965_vm8, %v12993_v38  ;;  %v2295_v31 = vrot.slane %v2074_v10, 4  ;;  %v2294_v0 = vrot.slane %v2072_v35, 4 }
 0x281   :  { %v13474_v6 = vpop.permute.xlu0 %2004  ;;  %v1833_v24 = vpop.permute.xlu1 %1832  ;;  %2935 = vmatprep.mubr.bf16.mxu1 %v18394_v26 }
 0x282   :  { %v1862_v23 = vsel %vm324_vm3, %v13385_v21, %v1833_v24  ;;  %v10571_v21 = vld [vmem:[%s18256_s0 + $0x130] sm:$0x1f]  ;;  %v1863_v8 = vsel %vm324_vm3, %v1833_v24, %v13419_v41  ;;  %v2426_v24 = vsel %vm765_vm6, %v1953_v30, %v2295_v31 }
 0x283   :  { %v1905_v3 = vsel %vm1750_vm9, %v1862_v23, 0  ;;  %3906 = vrot.lane.b32.xlu0 %v13442_v56, %s11727_s28  ;;  %v13503_v44 = vpack.c.bf16 %v10571_v21, %v10571_v21  ;;  %v1907_v19 = vsel %vm1750_vm9, %v1863_v8, 0  ;;  %v10572_v21 = vld [vmem:[%s18256_s0 + $0x138] sm:$0x1f] }
 0x284   :  { %4029 = vrot.lane.b32.xlu1 %v13467_v59, %s11728_s29  ;;  %v2247_v9 = vrot.slane %v1905_v3, 4 }
 0x285   :  { %v2121_v16 = vpop.permute.xlu0 %2120  ;;  %v1712_v20 = vpop.permute.xlu1 %1711 }
 0x286   :  { %v1741_v13 = vsel %vm197_vm4, %v13408_v42, %v1712_v20  ;;  %v1742_v22 = vsel %vm197_vm4, %v1712_v20, %v13444_v37  ;;  %v2150_v32 = vsel %vm594_vm7, %v2119_v14, %v2121_v16  ;;  %v2151_v10 = vsel %vm594_vm7, %v2121_v16, %v13456_v49 }
 0x287   :  { %4174 = vrot.lane.b32.xlu0 %v13467_v59, %s11729_s11  ;;  %v1785_v5 = vsel %vm1750_vm9, %v1741_v13, 0  ;;  %v2032_v14 = vsel %vm471_vm5, %v13421_v33, %v13474_v6  ;;  %v1787_v15 = vsel %vm1750_vm9, %v1742_v22, 0  ;;  %v2248_v33 = vrot.slane %v1907_v19, 4 }
 0x288   :  { %3908 = vrot.lane.b32.xlu1 %v13467_v59, %s11727_s28  ;;  %v2354_v17 = vsel %vm765_vm6, %v1785_v5, %v2247_v9  ;;  %v2192_v9 = vsel %vm1750_vm9, %v2150_v32, 0  ;;  %v2076_v27 = vsel %vm1750_vm9, %v2032_v14, 0  ;;  %v13551_v5 = vpack.c.bf16 %v10572_v21, %v10572_v21 }
 0x289   :  { %v13507_v52 = vpop.permute.xlu0 %2124  ;;  %v13509_v42 = vpop.permute.xlu1 %1836  ;;  %2860 = vmatprep.subr.bf16.mxu0 %v2354_v17  ;;  %v2500_v8 = vsel %vm765_vm6, %v2192_v9, 0  ;;  %v2296_v22 = vrot.slane %v2076_v27, 4  ;;  %v1955_v14 = vsel %vm1750_vm9, %v12879_v47, 0 }
 0x28a   :  { %v1864_v23 = vsel %vm324_vm3, %v13419_v41, %v13509_v42  ;;  %2861 = vmatpush1.bf16.msra.mxu0 %v2351_v60  ;;  %v1951_v41 = vsel %vm1750_vm9, %v12856_v54, 0  ;;  %v2194_v54 = vsel %vm1750_vm9, %v2151_v10, 0  ;;  %v2357_v60 = vsel %vm765_vm6, %v1787_v15, %v2248_v33 }
 0x28b   :  { %v1909_v3 = vsel %vm1750_vm9, %v1864_v23, 0  ;;  %2862 = vmatprep.subr.bf16.mxu0 %v2426_v24  ;;  %4291 = vrot.lane.b32.xlu0 %v13406_v58, %s11731_s16  ;;  %v2423_v20 = vsel %vm765_vm6, %v1951_v41, %v2294_v0  ;;  %v2152_v19 = vsel %vm594_vm7, %v13456_v49, %v13507_v52 }
 0x28c   :  { %4176 = vrot.lane.b32.xlu1 %v13503_v44, %s11729_s11  ;;  %v2249_v35 = vrot.slane %v1909_v3, 4  ;;  %v1957_v3 = vsel %vm1750_vm9, %v12918_v28, 0  ;;  %v2429_v28 = vsel %vm765_vm6, %v1955_v14, %v2296_v22  ;;  %v2196_v21 = vsel %vm1750_vm9, %v2152_v19, 0 }
 0x28d   :  { %v1839_v4 = vpop.permute.xlu0 %1838  ;;  %v1716_v16 = vpop.permute.xlu1 %1715  ;;  %v4098_v14 = vsel %vm324_vm3, 0, %v12753_v45 }
 0x28e   :  { %v1743_v31 = vsel %vm197_vm4, %v13444_v37, %v1716_v16  ;;  %2863 = vmatpush1.bf16.msra.mxu0 %v2423_v20 }
 0x28f   :  { %10549 = vmatprep.subr.msk.bf16.mxu0 %vm765_vm6, %v2194_v54  ;;  %4031 = vrot.lane.b32.xlu0 %v13503_v44, %s11728_s29  ;;  %v1789_v13 = vsel %vm1750_vm9, %v1743_v31, 0  ;;  %v2504_v31 = vsel %vm765_vm6, %v2196_v21, 0  ;;  %v1865_v54 = vsel %vm324_vm3, %v13509_v42, %v1839_v4 }
 0x290   :  { %4293 = vrot.lane.b32.xlu1 %v13442_v56, %s11731_s16  ;;  %v2360_v37 = vsel %vm765_vm6, %v1789_v13, %v2249_v35 }
 0x291   :  { %v1718_v17 = vpop.permute.xlu0 %1717  ;;  %2903 = vmatprep.subr.bf16.mxu1 %v2360_v37  ;;  %v2007_v0 = vpop.permute.xlu1 %2006 }
 0x292   :  { %v2033_v30 = vsel %vm471_vm5, %v13474_v6, %v2007_v0  ;;  %2865 = vmatpush1.bf16.msra.mxu0 %v2500_v8  ;;  %2904 = vmatpush1.bf16.msra.mxu1 %v2357_v60  ;;  %v10573_v6 = vld [vmem:[%s18256_s0 + $0x140] sm:$0x1f]  ;;  %v1744_v13 = vsel %vm197_vm4, %v1716_v16, %v1718_v17  ;;  %v1911_v8 = vsel %vm1750_vm9, %v1865_v54, 0  ;;  %v4051_v16 = vsel %vm324_vm3, %v12753_v45, %v12746_v43 }
 0x293   :  { %v2078_v23 = vsel %vm1750_vm9, %v2033_v30, 0  ;;  %3910 = vrot.lane.b32.xlu0 %v13503_v44, %s11727_s28  ;;  %v13585_v15 = vpack.c.bf16 %v10573_v6, %v10573_v6  ;;  %v2250_v6 = vrot.slane %v1911_v8, 4  ;;  %v4101_v54 = vsel %vm11980_vm2, %v4051_v16, 0 }
 0x294   :  { %v2297_v24 = vrot.slane %v2078_v23, 4  ;;  %4033 = vrot.lane.b32.xlu1 %v13551_v5, %s11728_s29  ;;  %v4196_v45 = vsel %vm471_vm5, %v12786_v63, %v12778_v12  ;;  %v3930_v63 = vsel %vm197_vm4, %v12763_v51, %v12759_v48 }
 0x295   :  { %v13562_v32 = vpop.permute.xlu0 %1842  ;;  %v13564_v10 = vpop.permute.xlu1 %2010  ;;  %10550 = vmatmul.mubr.msk.bf16.vlgmr.msra.gmra.mrb[40].mxu0 %vm965_vm8, %v12993_v38 }
 0x296   :  { %v2432_v41 = vsel %vm765_vm6, %v1957_v3, %v2297_v24  ;;  %2978 = vmatprep.mubr.bf16.mxu0 %v18394_v26 }
 0x297   :  { %2905 = vmatprep.subr.bf16.mxu1 %v2432_v41  ;;  %4178 = vrot.lane.b32.xlu0 %v13551_v5, %s11729_s11 }
 0x298   :  { %3912 = vrot.lane.b32.xlu1 %v13551_v5, %s11727_s28  ;;  %2906 = vmatpush1.bf16.msra.mxu1 %v2429_v28 }
 0x299   :  { %v13587_v49 = vpop.permute.xlu0 %1721  ;;  %v2127_v20 = vpop.permute.xlu1 %2126 }
 0x29a   :  { %v2153_v47 = vsel %vm594_vm7, %v13507_v52, %v2127_v20  ;;  %v10574_v52 = vld [vmem:[%s18256_s0 + $0x148] sm:$0x1f] }
 0x29b   :  { %4295 = vrot.lane.b32.xlu0 %v13467_v59, %s11731_s16  ;;  %v2198_v35 = vsel %vm1750_vm9, %v2153_v47, 0  ;;  %v13614_v42 = vpack.c.bf16 %v10574_v52, %v10574_v52  ;;  %v1961_v52 = vsel %vm1750_vm9, %v13058_v55, 0  ;;  %v4197_v55 = vsel %vm471_vm5, %v12778_v12, %v12771_v36 }
 0x29c   :  { %4180 = vrot.lane.b32.xlu1 %v13585_v15, %s11729_s11  ;;  %10551 = vmatprep.subr.msk.bf16.mxu1 %vm765_vm6, %v2198_v35 }
 0x29d   :  { %v13601_v9 = vpop.permute.xlu0 %2130  ;;  %2908 = vmatpush1.bf16.msra.mxu1 %v2504_v31  ;;  %v1841_v33 = vpop.permute.xlu1 %1840  ;;  %v10575_v31 = vld [vmem:[%s18256_s0 + $0x150] sm:$0x1f] }
 0x29e   :  { %v1866_v27 = vsel %vm324_vm3, %v1839_v4, %v1841_v33  ;;  %v1791_v4 = vsel %vm1750_vm9, %v1744_v13, 0  ;;  %v4100_v13 = vsel %vm11980_vm2, %v4098_v14, 0  ;;  %v13666_v16 = vpack.c.bf16 %v10575_v31, %v10575_v31 }
 0x29f   :  { %v1913_v37 = vsel %vm1750_vm9, %v1866_v27, 0  ;;  %4035 = vrot.lane.b32.xlu0 %v13585_v15, %s11728_s29  ;;  %v2363_v35 = vsel %vm765_vm6, %v1791_v4, %v2250_v6  ;;  %v3977_v4 = vsel %vm197_vm4, 0, %v12763_v51  ;;  %v4414_v51 = vrot.slane %v4100_v13, 4 }
 0x2a0   :  { %4297 = vrot.lane.b32.xlu1 %v13503_v44, %s11731_s16  ;;  %10552 = vmatmul.mubr.msk.bf16.vlgmr.msra.gmra.mrb[40].mxu1 %vm965_vm8, %v12993_v38  ;;  %v2251_v22 = vrot.slane %v1913_v37, 4  ;;  %v3979_v14 = vsel %vm11980_vm2, %v3977_v4, 0  ;;  %v4125_v13 = vsel %vm11980_vm2, %v12306_v39, 0  ;;  %v18397_v39 = vld [vmem:[#allocation6_spill] sm:$0xff] }
 0x2a1   :  { %v2009_v60 = vpop.permute.xlu0 %2008  ;;  %v1720_v30 = vpop.permute.xlu1 %1719  ;;  %3021 = vmatprep.mubr.bf16.mxu1 %v18394_v26  ;;  %v4124_v4 = vsel %vm11980_vm2, %v18397_v39, 0 }
 0x2a2   :  { %v2034_v23 = vsel %vm471_vm5, %v2007_v0, %v2009_v60  ;;  %v2035_v24 = vsel %vm471_vm5, %v2009_v60, %v13564_v10  ;;  %v1745_v3 = vsel %vm197_vm4, %v1718_v17, %v1720_v30  ;;  %v4415_v60 = vrot.slane %v4101_v54, 4 }
 0x2a3   :  { %v2080_v38 = vsel %vm1750_vm9, %v2034_v23, 0  ;;  %v2082_v19 = vsel %vm1750_vm9, %v2035_v24, 0  ;;  %3914 = vrot.lane.b32.xlu0 %v13585_v15, %s11727_s28  ;;  %v1793_v41 = vsel %vm1750_vm9, %v1745_v3, 0  ;;  %v1867_v24 = vsel %vm324_vm3, %v1841_v33, %v13562_v32 }
 0x2a4   :  { %v2299_v28 = vrot.slane %v2082_v19, 4  ;;  %4037 = vrot.lane.b32.xlu1 %v13614_v42, %s11728_s29  ;;  %v2366_v0 = vsel %vm765_vm6, %v1793_v41, %v2251_v22  ;;  %v2298_v17 = vrot.slane %v2080_v38, 4  ;;  %v4245_v22 = vsel %vm11980_vm2, %v4196_v45, 0  ;;  %v18396_v45 = vld [vmem:[#allocation9_spill] sm:$0xff] }
 0x2a5   :  { %v2129_v21 = vpop.permute.xlu1 %2128  ;;  %2946 = vmatprep.subr.bf16.mxu0 %v2366_v0  ;;  %v2013_v47 = vpop.permute.xlu0 %2012  ;;  %v4246_v19 = vsel %vm11980_vm2, %v4197_v55, 0  ;;  %v3980_v33 = vsel %vm11980_vm2, %v3930_v63, 0 }
 0x2a6   :  { %2947 = vmatpush1.bf16.msra.mxu0 %v2363_v35  ;;  %v2154_v27 = vsel %vm594_vm7, %v2127_v20, %v2129_v21  ;;  %v2155_v37 = vsel %vm594_vm7, %v2129_v21, %v13601_v9  ;;  %v2438_v8 = vsel %vm765_vm6, %v1961_v52, %v2299_v28  ;;  %v1959_v20 = vsel %vm1750_vm9, %v12981_v7, 0 }
 0x2a7   :  { %4182 = vrot.lane.b32.xlu0 %v13614_v42, %s11729_s11  ;;  %2948 = vmatprep.subr.bf16.mxu0 %v2438_v8  ;;  %v2435_v12 = vsel %vm765_vm6, %v1959_v20, %v2298_v17  ;;  %v2038_v3 = vsel %vm471_vm5, %v2013_v47, 0  ;;  %v2202_v7 = vsel %vm1750_vm9, %v2155_v37, 0  ;;  %v2200_v38 = vsel %vm1750_vm9, %v2154_v27, 0 }
 0x2a8   :  { %3916 = vrot.lane.b32.xlu1 %v13614_v42, %s11727_s28  ;;  %v1746_v28 = vsel %vm197_vm4, %v1720_v30, %v13587_v49  ;;  %v2036_v0 = vsel %vm471_vm5, %v13564_v10, %v2013_v47  ;;  %v1915_v21 = vsel %vm1750_vm9, %v1867_v24, 0  ;;  %v2085_v35 = vsel %vm1750_vm9, %v2038_v3, 0 }
 0x2a9   :  { %v13672_v23 = vpop.permute.xlu0 %2132  ;;  %v2508_v54 = vsel %vm765_vm6, %v2200_v38, 0  ;;  %v13704_v30 = vsel %vm324_vm3, %v12746_v43, %v18396_v45  ;;  %v4463_v52 = vrot.slane %v4246_v19, 4  ;;  %v4492_v47 = vsel %vm765_vm6, %v3980_v33, %v4415_v60  ;;  %v18399_v38 = vld [vmem:[#allocation11_spill] sm:$0xff] }
 0x2aa   :  { %v1845_v6 = vpop.permute.xlu1 %1844  ;;  %2949 = vmatpush1.bf16.msra.mxu0 %v2435_v12  ;;  %v1795_v27 = vsel %vm1750_vm9, %v1746_v28, 0  ;;  %v2084_v37 = vsel %vm1750_vm9, %v2036_v0, 0  ;;  %v2252_v43 = vrot.slane %v1915_v21, 4  ;;  %v2301_v55 = vrot.slane %v2085_v35, 4  ;;  %v13731_v12 = vld [vmem:[%s18259_s3] sm:$0xff]  }
 0x2ab   :  { %v1868_v41 = vsel %vm324_vm3, %v13562_v32, %v1845_v6  ;;  %10553 = vmatprep.subr.msk.bf16.mxu0 %vm765_vm6, %v2202_v7  ;;  %4299 = vrot.lane.b32.xlu0 %v13551_v5, %s11731_s16  ;;  %v4462_v32 = vrot.slane %v4245_v22, 4  ;;  %v4102_v60 = vsel %vm11980_vm2, %v13704_v30, 0  ;;  %v4488_v6 = vsel %vm765_vm6, %v3979_v14, %v4414_v51  ;;  %v10576_v7 = vld [vmem:[%s18256_s0 + $0x158] sm:$0x1f]  ;;  %v18402_v30 = vld [vmem:[#allocation10_spill] sm:$0xff] }
 0x2ac   :  { %v1917_v17 = vsel %vm1750_vm9, %v1868_v41, 0  ;;  %4184 = vrot.lane.b32.xlu1 %v13666_v16, %s11729_s11  ;;  %v13743_v19 = vsel %vm197_vm4, %v12759_v48, %v18399_v38  ;;  %v2300_v41 = vrot.slane %v2084_v37, 4  ;;  %v2369_v28 = vsel %vm765_vm6, %v1795_v27, %v2252_v43 }
 0x2ad   :  { %v4272_v31 = vpop.permute.xlu0 %4271  ;;  %v2253_v8 = vrot.slane %v1917_v17, 4  ;;  %v4588_v0 = vsel %vm765_vm6, %v4125_v13, %v4463_v52  ;;  %v18400_v17 = vld [vmem:[#allocation13_spill] sm:$0xff]  ;;  %v1965_v48 = vsel %vm1750_vm9, %v13111_v25, 0  ;;  %v4584_v21 = vsel %vm765_vm6, %v4124_v4, %v4462_v32  ;;  %v18401_v25 = vld [vmem:[#allocation8_spill] sm:$0xff] }
 0x2ae   :  { %v1724_v10 = vpop.permute.xlu1 %1723  ;;  %2951 = vmatpush1.bf16.msra.mxu0 %v2508_v54  ;;  %v4317_v51 = vsel %vm594_vm7, %v18400_v17, %v4272_v31  ;;  %v2156_v54 = vsel %vm594_vm7, %v13601_v9, %v13672_v23  ;;  %v3932_v32 = vsel %vm197_vm4, %v18399_v38, %v18401_v25  ;;  %v18403_v52 = vld [vmem:[#allocation12_spill] sm:$0xff]  ;;  %v2158_v9 = vsel %vm594_vm7, %v13672_v23, 0  ;;  %v10577_v38 = vld [vmem:[%s18256_s0 + $0x160] sm:$0x1f] }
 0x2af   :  { %v1747_v63 = vsel %vm197_vm4, %v13587_v49, %v1724_v10  ;;  %4760 = vmatprep.subr.bf16.mxu0 %v4492_v47  ;;  %4303 = vrot.lane.b32.xlu0 %v13614_v42, %s11731_s16  ;;  %v18398_v49 = vld [vmem:[#allocation7_spill] sm:$0xff]  ;;  %v4199_v10 = vsel %vm471_vm5, %v18403_v52, %v18402_v30  ;;  %v1963_v13 = vsel %vm1750_vm9, %v13021_v40, 0  ;;  %v4366_v23 = vsel %vm11980_vm2, %v4317_v51, 0 }
 0x2b0   :  { %v1797_v20 = vsel %vm1750_vm9, %v1747_v63, 0  ;;  %4301 = vrot.lane.b32.xlu1 %v13585_v15, %s11731_s16  ;;  %v4053_v22 = vsel %vm324_vm3, %v18396_v45, %v18398_v49  ;;  %v13766_v45 = vpack.c.bf16 %v10576_v7, %v10576_v7  ;;  %v4198_v40 = vsel %vm471_vm5, %v12771_v36, %v18403_v52 }
 0x2b1   :  { %10554 = vmatmul.mubr.msk.bf16.vlgmr.msra.gmra.mrb[44].mxu0 %vm965_vm8, %v13731_v12  ;;  %v4012_v24 = vpop.permute.xlu0 %4011  ;;  %v2372_v3 = vsel %vm765_vm6, %v1797_v20, %v2253_v8  ;;  %v4103_v35 = vsel %vm11980_vm2, %v4053_v22, 0  ;;  %v2441_v8 = vsel %vm765_vm6, %v1963_v13, %v2300_v41  ;;  %v2204_v20 = vsel %vm1750_vm9, %v2156_v54, 0 }
 0x2b2   :  { %2989 = vmatprep.subr.bf16.mxu1 %v2372_v3  ;;  %v13745_v33 = vpop.permute.xlu1 %4273  ;;  %4761 = vmatpush1.bf16.msra.mxu0 %v4488_v6  ;;  %v4054_v27 = vsel %vm324_vm3, %v18398_v49, %v4012_v24  ;;  %v4417_v43 = vrot.slane %v4103_v35, 4  ;;  %v4248_v39 = vsel %vm11980_vm2, %v4199_v10, 0  ;;  %v2205_v36 = vsel %vm1750_vm9, %v2158_v9, 0 }
 0x2b3   :  { %v4318_v14 = vsel %vm594_vm7, %v4272_v31, %v13745_v33  ;;  %2990 = vmatpush1.bf16.msra.mxu1 %v2369_v28  ;;  %4762 = vmatprep.subr.bf16.mxu0 %v4588_v0  ;;  %v2444_v31 = vsel %vm765_vm6, %v1965_v48, %v2301_v55  ;;  %v4104_v22 = vsel %vm11980_vm2, %v4054_v27, 0  ;;  %v4689_v6 = vsel %vm765_vm6, %v4366_v23, 0 }
 0x2b4   :  { %4039 = vrot.lane.b32.xlu0 %v13666_v16, %s11728_s29  ;;  %4305 = vrot.lane.b32.xlu1 %v13666_v16, %s11731_s16  ;;  %v4367_v63 = vsel %vm11980_vm2, %v4318_v14, 0  ;;  %v3982_v7 = vsel %vm11980_vm2, %v3932_v32, 0  ;;  %v4416_v41 = vrot.slane %v4102_v60, 4  ;;  %v3981_v28 = vsel %vm11980_vm2, %v13743_v19, 0  ;;  %v13826_v14 = vld [vmem:[%s18257_s1] sm:$0x3] }
 0x2b5   :  { %2991 = vmatprep.subr.bf16.mxu1 %v2444_v31  ;;  %v3891_v47 = vpop.permute.xlu0 %3890  ;;  %4792 = vmatprep.mubr.bf16.mxu0 %v18394_v26  ;;  %v4247_v0 = vsel %vm11980_vm2, %v4198_v40, 0  ;;  %v2512_v51 = vsel %vm765_vm6, %v2204_v20, 0  ;;  %v4465_v48 = vrot.slane %v4248_v39, 4  ;;  %v4418_v35 = vrot.slane %v4104_v22, 4 }
 0x2b6   :  { %v13781_v37 = vpop.permute.xlu1 %4013  ;;  %4763 = vmatpush1.bf16.msra.mxu0 %v4584_v21  ;;  %v3933_v4 = vsel %vm197_vm4, %v18401_v25, %v3891_v47  ;;  %v4500_v54 = vsel %vm765_vm6, %v3982_v7, %v4417_v43  ;;  %v13841_v25 = vpack.c.bf16 %v10577_v38, %v10577_v38  ;;  %v4127_v52 = vsel %vm11980_vm2, %v12361_v61, 0 }
 0x2b7   :  { %v4055_v55 = vsel %vm324_vm3, %v4012_v24, %v13781_v37  ;;  %2992 = vmatpush1.bf16.msra.mxu1 %v2441_v8  ;;  %10581 = vmatprep.subr.msk.bf16.mxu0 %vm765_vm6, %v4367_v63  ;;  %v3983_v60 = vsel %vm11980_vm2, %v3933_v4, 0  ;;  %v4464_v10 = vrot.slane %v4247_v0, 4  ;;  %v4496_v13 = vsel %vm765_vm6, %v3981_v28, %v4416_v41 }
 0x2b8   :  { %v4105_v49 = vsel %vm11980_vm2, %v4055_v55, 0  ;;  %3918 = vrot.lane.b32.xlu0 %v13666_v16, %s11727_s28  ;;  %4041 = vrot.lane.b32.xlu1 %v13766_v45, %s11728_s29  ;;  %v4504_v27 = vsel %vm765_vm6, %v3983_v60, %v4418_v35  ;;  %v4126_v61 = vsel %vm11980_vm2, %v12337_v53, 0  ;;  %v4129_v43 = vsel %vm11980_vm2, %v13167_v57, 0  ;;  %v10579_v60 = vld [vmem:[%s18256_s0 + $0x170] sm:$0x1f] }
 0x2b9   :  { %v4419_v24 = vrot.slane %v4105_v49, 4  ;;  %10555 = vmatprep.subr.msk.bf16.mxu1 %vm765_vm6, %v2205_v36  ;;  %v4159_v3 = vpop.permute.xlu0 %4158  ;;  %v4592_v39 = vsel %vm765_vm6, %v4126_v61, %v4464_v10  ;;  %v4128_v4 = vsel %vm11980_vm2, %v12446_v2, 0  ;;  %v4131_v61 = vsel %vm11980_vm2, %v13256_v11, 0 }
 0x2ba   :  { %v13820_v17 = vpop.permute.xlu1 %3892  ;;  %4765 = vmatpush1.bf16.msra.mxu0 %v4689_v6  ;;  %v4200_v19 = vsel %vm471_vm5, %v18402_v30, %v4159_v3 }
 0x2bb   :  { %v3934_v21 = vsel %vm197_vm4, %v3891_v47, %v13820_v17  ;;  %2994 = vmatpush1.bf16.msra.mxu1 %v2512_v51  ;;  %v4249_v9 = vsel %vm11980_vm2, %v4200_v19, 0 }
 0x2bc   :  { %4186 = vrot.lane.b32.xlu0 %v13766_v45, %s11729_s11  ;;  %3920 = vrot.lane.b32.xlu1 %v13766_v45, %s11727_s28  ;;  %v3984_v31 = vsel %vm11980_vm2, %v3934_v21, 0  ;;  %v4466_v40 = vrot.slane %v4249_v9, 4 }
 0x2bd   :  { %4801 = vmatprep.subr.bf16.mxu1 %v4500_v54  ;;  %v4276_v32 = vpop.permute.xlu0 %4275  ;;  %10582 = vmatmul.mubr.msk.bf16.vlgmr.msra.gmra.mrb[48].mxu0 %vm965_vm8, %v13826_v14  ;;  %v4508_v30 = vsel %vm765_vm6, %v3984_v31, %v4419_v24 }
 0x2be   :  { %4842 = vmatprep.subr.bf16.mxu0 %v4508_v30  ;;  %v4161_v47 = vpop.permute.xlu1 %4160  ;;  %10556 = vmatmul.mubr.msk.bf16.vlgmr.msra.gmra.mrb[44].mxu1 %vm965_vm8, %v13731_v12  ;;  %v4319_v63 = vsel %vm594_vm7, %v13745_v33, %v4276_v32  ;;  %v4596_v12 = vsel %vm765_vm6, %v4127_v52, %v4465_v48  ;;  %v10578_v33 = vld [vmem:[%s18256_s0 + $0x168] sm:$0x1f]  ;;  %v4600_v24 = vsel %vm765_vm6, %v4128_v4, %v4466_v40 }
 0x2bf   :  { %v4201_v8 = vsel %vm471_vm5, %v4159_v3, %v4161_v47  ;;  %4802 = vmatpush1.bf16.msra.mxu1 %v4496_v13  ;;  %4843 = vmatpush1.bf16.msra.mxu0 %v4504_v27  ;;  %v4368_v36 = vsel %vm11980_vm2, %v4319_v63, 0  ;;  %v13890_v2 = vpack.c.bf16 %v10578_v33, %v10578_v33 }
 0x2c0   :  { %v4250_v23 = vsel %vm11980_vm2, %v4201_v8, 0  ;;  %4307 = vrot.lane.b32.xlu0 %v13766_v45, %s11731_s16  ;;  %4188 = vrot.lane.b32.xlu1 %v13841_v25, %s11729_s11  ;;  %v4695_v38 = vsel %vm765_vm6, %v4368_v36, 0 }
 0x2c1   :  { %v4467_v53 = vrot.slane %v4250_v23, 4  ;;  %4803 = vmatprep.subr.bf16.mxu1 %v4596_v12  ;;  %v4016_v55 = vpop.permute.xlu0 %4015  ;;  %4833 = vmatprep.mubr.bf16.mxu1 %v18394_v26 }
 0x2c2   :  { %v4278_v20 = vpop.permute.xlu1 %4277  ;;  %4874 = vmatprep.mubr.bf16.mxu0 %v18394_v26  ;;  %v4056_v6 = vsel %vm324_vm3, %v13781_v37, %v4016_v55 }
 0x2c3   :  { %v4320_v57 = vsel %vm594_vm7, %v4276_v32, %v4278_v20  ;;  %4804 = vmatpush1.bf16.msra.mxu1 %v4592_v39  ;;  %v4604_v49 = vsel %vm765_vm6, %v4129_v43, %v4467_v53  ;;  %v4106_v37 = vsel %vm11980_vm2, %v4056_v6, 0  ;;  %v13924_v32 = vpack.c.bf16 %v10579_v60, %v10579_v60  ;;  %v10580_v43 = vld [vmem:[%s18256_s0 + $0x178] sm:$0x1f] }
 0x2c4   :  { %4043 = vrot.lane.b32.xlu0 %v13841_v25, %s11728_s29  ;;  %4309 = vrot.lane.b32.xlu1 %v13841_v25, %s11731_s16  ;;  %v4369_v22 = vsel %vm11980_vm2, %v4320_v57, 0  ;;  %v4420_v54 = vrot.slane %v4106_v37, 4  ;;  %v4130_v53 = vsel %vm11980_vm2, %v13203_v1, 0  ;;  %v13957_v39 = vpack.c.bf16 %v10580_v43, %v10580_v43 }
 0x2c5   :  { %4844 = vmatprep.subr.bf16.mxu0 %v4604_v49  ;;  %v3895_v3 = vpop.permute.xlu0 %3894  ;;  %10583 = vmatprep.subr.msk.bf16.mxu1 %vm765_vm6, %v4369_v22 }
 0x2c6   :  { %4845 = vmatpush1.bf16.msra.mxu0 %v4600_v24  ;;  %v4018_v7 = vpop.permute.xlu1 %4017  ;;  %v3935_v28 = vsel %vm197_vm4, %v13820_v17, %v3895_v3 }
 0x2c7   :  { %v4057_v41 = vsel %vm324_vm3, %v4016_v55, %v4018_v7  ;;  %4806 = vmatpush1.bf16.msra.mxu1 %v4695_v38  ;;  %v3985_v17 = vsel %vm11980_vm2, %v3935_v28, 0 }
 0x2c8   :  { %v4107_v0 = vsel %vm11980_vm2, %v4057_v41, 0  ;;  %3922 = vrot.lane.b32.xlu0 %v13841_v25, %s11727_s28  ;;  %4045 = vrot.lane.b32.xlu1 %v13890_v2, %s11728_s29 }
 0x2c9   :  { %v4421_v51 = vrot.slane %v4107_v0, 4  ;;  %v4163_v48 = vpop.permute.xlu0 %4162 }
 0x2ca   :  { %v3897_v19 = vpop.permute.xlu1 %3896  ;;  %10584 = vmatmul.mubr.msk.bf16.vlgmr.msra.gmra.mrb[48].mxu1 %vm965_vm8, %v13826_v14  ;;  %v4202_v21 = vsel %vm471_vm5, %v4161_v47, %v4163_v48  ;;  %v4512_v47 = vsel %vm765_vm6, %v3985_v17, %v4420_v54 }
 0x2cb   :  { %v3936_v35 = vsel %vm197_vm4, %v3895_v3, %v3897_v19  ;;  %4915 = vmatprep.mubr.bf16.mxu1 %v18394_v26  ;;  %v4251_v10 = vsel %vm11980_vm2, %v4202_v21, 0  ;;  %v4679_v21 = vld [vmem:[%s18258_s2] sm:$0xf] }
 0x2cc   :  { %4190 = vrot.lane.b32.xlu0 %v13890_v2, %s11729_s11  ;;  %3924 = vrot.lane.b32.xlu1 %v13890_v2, %s11727_s28  ;;  %v3986_v31 = vsel %vm11980_vm2, %v3936_v35, 0  ;;  %v4468_v63 = vrot.slane %v4251_v10, 4 }
 0x2cd   :  { %v4280_v30 = vpop.permute.xlu0 %4279  ;;  %v4516_v52 = vsel %vm765_vm6, %v3986_v31, %v4421_v51 }
 0x2ce   :  { %v4165_v9 = vpop.permute.xlu1 %4164  ;;  %4883 = vmatprep.subr.bf16.mxu1 %v4516_v52  ;;  %v4321_v13 = vsel %vm594_vm7, %v4278_v20, %v4280_v30  ;;  %v4608_v1 = vsel %vm765_vm6, %v4130_v53, %v4468_v63 }
 0x2cf   :  { %v4203_v27 = vsel %vm471_vm5, %v4163_v48, %v4165_v9  ;;  %4884 = vmatpush1.bf16.msra.mxu1 %v4512_v47  ;;  %v4370_v55 = vsel %vm11980_vm2, %v4321_v13, 0 }
 0x2d0   :  { %v4252_v8 = vsel %vm11980_vm2, %v4203_v27, 0  ;;  %4311 = vrot.lane.b32.xlu0 %v13890_v2, %s11731_s16  ;;  %4192 = vrot.lane.b32.xlu1 %v13924_v32, %s11729_s11  ;;  %v4701_v57 = vsel %vm765_vm6, %v4370_v55, 0  ;;  %v4132_v27 = vsel %vm11980_vm2, %v13292_v18, 0 }
 0x2d1   :  { %v4469_v23 = vrot.slane %v4252_v8, 4  ;;  %v4020_v12 = vpop.permute.xlu0 %4019 }
 0x2d2   :  { %v4282_v40 = vpop.permute.xlu1 %4281  ;;  %v4058_v49 = vsel %vm324_vm3, %v4018_v7, %v4020_v12 }
 0x2d3   :  { %v4322_v33 = vsel %vm594_vm7, %v4280_v30, %v4282_v40  ;;  %v4612_v20 = vsel %vm765_vm6, %v4131_v61, %v4469_v23  ;;  %v4108_v6 = vsel %vm11980_vm2, %v4058_v49, 0 }
 0x2d4   :  { %4047 = vrot.lane.b32.xlu0 %v13924_v32, %s11728_s29  ;;  %4313 = vrot.lane.b32.xlu1 %v13924_v32, %s11731_s16  ;;  %v4371_v11 = vsel %vm11980_vm2, %v4322_v33, 0  ;;  %v4422_v51 = vrot.slane %v4108_v6, 4 }
 0x2d5   :  { %4885 = vmatprep.subr.bf16.mxu1 %v4612_v20  ;;  %10585 = vmatprep.subr.msk.bf16.mxu0 %vm765_vm6, %v4371_v11  ;;  %v3899_v4 = vpop.permute.xlu0 %3898 }
 0x2d6   :  { %4886 = vmatpush1.bf16.msra.mxu1 %v4608_v1  ;;  %4847 = vmatpush1.bf16.msra.mxu0 %v4701_v57  ;;  %v4022_v36 = vpop.permute.xlu1 %4021  ;;  %v3937_v24 = vsel %vm197_vm4, %v3897_v19, %v3899_v4 }
 0x2d7   :  { %v4059_v22 = vsel %vm324_vm3, %v4020_v12, %v4022_v36  ;;  %v3987_v0 = vsel %vm11980_vm2, %v3937_v24, 0 }
 0x2d8   :  { %v4109_v3 = vsel %vm11980_vm2, %v4059_v22, 0  ;;  %3926 = vrot.lane.b32.xlu0 %v13924_v32, %s11727_s28  ;;  %4049 = vrot.lane.b32.xlu1 %v13957_v39, %s11728_s29  ;;  %v4520_v54 = vsel %vm765_vm6, %v3987_v0, %v4422_v51 }
 0x2d9   :  { %v4423_v7 = vrot.slane %v4109_v3, 4  ;;  %10586 = vmatmul.mubr.msk.bf16.vlgmr.msra.gmra.mrb[52].mxu0 %vm965_vm8, %v13826_v14  ;;  %v4167_v38 = vpop.permute.xlu0 %4166 }
 0x2da   :  { %v4204_v41 = vsel %vm471_vm5, %v4165_v9, %v4167_v38  ;;  %v3901_v28 = vpop.permute.xlu1 %3900  ;;  %4956 = vmatprep.mubr.bf16.mxu0 %v18394_v26  ;;  %v4133_v9 = vsel %vm11980_vm2, %v13317_v62, 0 }
 0x2db   :  { %v3938_v37 = vsel %vm197_vm4, %v3899_v4, %v3901_v28  ;;  %v4253_v60 = vsel %vm11980_vm2, %v4204_v41, 0 }
 0x2dc   :  { %4194 = vrot.lane.b32.xlu0 %v13957_v39, %s11729_s11  ;;  %3928 = vrot.lane.b32.xlu1 %v13957_v39, %s11727_s28  ;;  %v3988_v48 = vsel %vm11980_vm2, %v3938_v37, 0  ;;  %v4470_v52 = vrot.slane %v4253_v60, 4  ;;  %v4135_v60 = vsel %vm11980_vm2, %v13406_v58, 0 }
 0x2dd   :  { %v4284_v19 = vpop.permute.xlu0 %4283  ;;  %v4524_v17 = vsel %vm765_vm6, %v3988_v48, %v4423_v7 }
 0x2de   :  { %4924 = vmatprep.subr.bf16.mxu0 %v4524_v17  ;;  %v4169_v35 = vpop.permute.xlu1 %4168  ;;  %v4323_v31 = vsel %vm594_vm7, %v4282_v40, %v4284_v19  ;;  %v4616_v12 = vsel %vm765_vm6, %v4132_v27, %v4470_v52 }
 0x2df   :  { %v4205_v30 = vsel %vm471_vm5, %v4167_v38, %v4169_v35  ;;  %4925 = vmatpush1.bf16.msra.mxu0 %v4520_v54  ;;  %v4372_v61 = vsel %vm11980_vm2, %v4323_v31, 0 }
 0x2e0   :  { %v4254_v10 = vsel %vm11980_vm2, %v4205_v30, 0  ;;  %4682 = vperm.xlu0 %11120, %v4679_v21   ;;  %4315 = vrot.lane.b32.xlu1 %v13957_v39, %s11731_s16  ;;  %v4707_v18 = vsel %vm765_vm6, %v4372_v61, 0 }
 0x2e1   :  { %v4471_v47 = vrot.slane %v4254_v10, 4  ;;  %v4024_v13 = vpop.permute.xlu0 %4023 }
 0x2e2   :  { %v4286_v8 = vpop.permute.xlu1 %4285  ;;  %v4060_v40 = vsel %vm324_vm3, %v4022_v36, %v4024_v13 }
 0x2e3   :  { %v4324_v63 = vsel %vm594_vm7, %v4284_v19, %v4286_v8  ;;  %v4620_v23 = vsel %vm765_vm6, %v4133_v9, %v4471_v47  ;;  %v4110_v11 = vsel %vm11980_vm2, %v4060_v40, 0 }
 0x2e4   :  { %4926 = vmatprep.subr.bf16.mxu0 %v4620_v23  ;;  %v4373_v62 = vsel %vm11980_vm2, %v4324_v63, 0  ;;  %v4424_v24 = vrot.slane %v4110_v11, 4 }
 0x2e5   :  { %10587 = vmatprep.subr.msk.bf16.mxu1 %vm765_vm6, %v4373_v62  ;;  %4927 = vmatpush1.bf16.msra.mxu0 %v4616_v12  ;;  %v3903_v43 = vpop.permute.xlu0 %3902 }
 0x2e6   :  { %v4026_v53 = vpop.permute.xlu1 %4025  ;;  %4888 = vmatpush1.bf16.msra.mxu1 %v4707_v18  ;;  %v3939_v33 = vsel %vm197_vm4, %v3901_v28, %v3903_v43 }
 0x2e7   :  { %v4061_v55 = vsel %vm324_vm3, %v4024_v13, %v4026_v53  ;;  %v3989_v36 = vsel %vm11980_vm2, %v3939_v33, 0 }
 0x2e8   :  { %v4111_v20 = vsel %vm11980_vm2, %v4061_v55, 0  ;;  %v4528_v28 = vsel %vm765_vm6, %v3989_v36, %v4424_v24 }
 0x2e9   :  { %v4425_v1 = vrot.slane %v4111_v20, 4  ;;  %10588 = vmatmul.mubr.msk.bf16.vlgmr.msra.gmra.mrb[52].mxu1 %vm965_vm8, %v13826_v14  ;;  %v4171_v4 = vpop.permute.xlu0 %4170 }
 0x2ea   :  { %v4206_v57 = vsel %vm471_vm5, %v4169_v35, %v4171_v4  ;;  %v3905_v49 = vpop.permute.xlu1 %3904  ;;  %4997 = vmatprep.mubr.bf16.mxu1 %v18394_v26  ;;  %v4134_v35 = vsel %vm11980_vm2, %v13353_v29, 0 }
 0x2eb   :  { %v3940_v22 = vsel %vm197_vm4, %v3903_v43, %v3905_v49  ;;  %v4255_v6 = vsel %vm11980_vm2, %v4206_v57, 0 }
 0x2ec   :  { %v3990_v3 = vsel %vm11980_vm2, %v3940_v22, 0  ;;  %v4472_v51 = vrot.slane %v4255_v6, 4 }
 0x2ed   :  { %v4288_v7 = vpop.permute.xlu0 %4287  ;;  %v4532_v38 = vsel %vm765_vm6, %v3990_v3, %v4425_v1 }
 0x2ee   :  { %v4173_v41 = vpop.permute.xlu1 %4172  ;;  %4965 = vmatprep.subr.bf16.mxu1 %v4532_v38  ;;  %v4325_v0 = vsel %vm594_vm7, %v4286_v8, %v4288_v7  ;;  %v4624_v13 = vsel %vm765_vm6, %v4134_v35, %v4472_v51 }
 0x2ef   :  { %v4207_v37 = vsel %vm471_vm5, %v4171_v4, %v4173_v41  ;;  %4966 = vmatpush1.bf16.msra.mxu1 %v4528_v28  ;;  %v4374_v30 = vsel %vm11980_vm2, %v4325_v0, 0  ;;  %v4137_v0 = vsel %vm11980_vm2, %v13467_v59, 0 }
 0x2f0   :  { %v4256_v48 = vsel %vm11980_vm2, %v4207_v37, 0  ;;  %v14041_v19 = vpop.f32.mrb[24].mxu0  ;;  %v4713_v61 = vsel %vm765_vm6, %v4374_v30, 0 }
 0x2f1   :  { %v4473_v17 = vrot.slane %v4256_v48, 4  ;;  %v4028_v21 = vpop.permute.xlu0 %4027  ;;  %v14046_v54 = vpop.f32.mrb[25].mxu0  ;;  %v4136_v48 = vsel %vm11980_vm2, %v13442_v56, 0 }
 0x2f2   :  { %v4290_v31 = vpop.permute.xlu1 %4289  ;;  %v14050_v52 = vpop.f32.mrb[26].mxu0  ;;  %v4062_v23 = vsel %vm324_vm3, %v4026_v53, %v4028_v21 }
 0x2f3   :  { %v4326_v10 = vsel %vm594_vm7, %v4288_v7, %v4290_v31  ;;  %v4628_v58 = vsel %vm765_vm6, %v4135_v60, %v4473_v17  ;;  %v14054_v9 = vpop.f32.mrb[27].mxu0  ;;  %v14056_v47 = vpop.f32.mrb[24].mxu1  ;;  %v4112_v55 = vsel %vm11980_vm2, %v4062_v23, 0 }
 0x2f4   :  { %4967 = vmatprep.subr.bf16.mxu1 %v4628_v58  ;;  %v4375_v29 = vsel %vm11980_vm2, %v4326_v10, 0  ;;  %v14061_v27 = vpop.f32.mrb[25].mxu1  ;;  %v4426_v57 = vrot.slane %v4112_v55, 4 }
 0x2f5   :  { %10589 = vmatprep.subr.msk.bf16.mxu0 %vm765_vm6, %v4375_v29  ;;  %4968 = vmatpush1.bf16.msra.mxu1 %v4624_v13  ;;  %v3907_v8 = vpop.permute.xlu0 %3906  ;;  %v14065_v63 = vpop.f32.mrb[26].mxu1 }
 0x2f6   :  { %4929 = vmatpush1.bf16.msra.mxu0 %v4713_v61  ;;  %v4030_v62 = vpop.permute.xlu1 %4029  ;;  %v14068_v12 = vpop.f32.mrb[27].mxu1  ;;  %v3941_v18 = vsel %vm197_vm4, %v3905_v49, %v3907_v8 }
 0x2f7   :  { %v4063_v43 = vsel %vm324_vm3, %v4028_v21, %v4030_v62  ;;  %v3991_v1 = vsel %vm11980_vm2, %v3941_v18, 0 }
 0x2f8   :  { %v4113_v40 = vsel %vm11980_vm2, %v4063_v43, 0  ;;  %v4536_v6 = vsel %vm765_vm6, %v3991_v1, %v4426_v57 }
 0x2f9   :  { %v4427_v33 = vrot.slane %v4113_v40, 4  ;;  %10590 = vmatmul.mubr.msk.bf16.vlgmr.msra.gmra.mrb[56].mxu0 %vm965_vm8, %v13826_v14  ;;  %v4175_v20 = vpop.permute.xlu0 %4174 }
 0x2fa   :  { %v4208_v53 = vsel %vm471_vm5, %v4173_v41, %v4175_v20  ;;  %v3909_v11 = vpop.permute.xlu1 %3908  ;;  %5038 = vmatprep.mubr.bf16.mxu0 %v18394_v26 }
 0x2fb   :  { %v3942_v4 = vsel %vm197_vm4, %v3907_v8, %v3909_v11  ;;  %v4257_v36 = vsel %vm11980_vm2, %v4208_v53, 0 }
 0x2fc   :  { %v3992_v49 = vsel %vm11980_vm2, %v3942_v4, 0  ;;  %v4474_v41 = vrot.slane %v4257_v36, 4 }
 0x2fd   :  { %v4292_v22 = vpop.permute.xlu0 %4291  ;;  %v4540_v24 = vsel %vm765_vm6, %v3992_v49, %v4427_v33 }
 0x2fe   :  { %5006 = vmatprep.subr.bf16.mxu0 %v4540_v24  ;;  %v4177_v3 = vpop.permute.xlu1 %4176  ;;  %v4327_v7 = vsel %vm594_vm7, %v4290_v31, %v4292_v22  ;;  %v4632_v59 = vsel %vm765_vm6, %v4136_v48, %v4474_v41  ;;  %v4139_v41 = vsel %vm11980_vm2, %v13551_v5, 0 }
 0x2ff   :  { %v4209_v38 = vsel %vm471_vm5, %v4175_v20, %v4177_v3  ;;  %5007 = vmatpush1.bf16.msra.mxu0 %v4536_v6  ;;  %v4376_v17 = vsel %vm11980_vm2, %v4327_v7, 0 }
 0x300   :  { %v4258_v28 = vsel %vm11980_vm2, %v4209_v38, 0  ;;  %v4719_v56 = vsel %vm765_vm6, %v4376_v17, 0 }
 0x301   :  { %v4475_v37 = vrot.slane %v4258_v28, 4  ;;  %v4032_v51 = vpop.permute.xlu0 %4031 }
 0x302   :  { %v4294_v60 = vpop.permute.xlu1 %4293  ;;  %v4064_v10 = vsel %vm324_vm3, %v4030_v62, %v4032_v51 }
 0x303   :  { %v4328_v21 = vsel %vm594_vm7, %v4292_v22, %v4294_v60  ;;  %v4636_v35 = vsel %vm765_vm6, %v4137_v0, %v4475_v37  ;;  %v4114_v23 = vsel %vm11980_vm2, %v4064_v10, 0  ;;  %v4138_v37 = vsel %vm11980_vm2, %v13503_v44, 0 }
 0x304   :  { %5008 = vmatprep.subr.bf16.mxu0 %v4636_v35  ;;  %v4377_v31 = vsel %vm11980_vm2, %v4328_v21, 0  ;;  %v4428_v1 = vrot.slane %v4114_v23, 4 }
 0x305   :  { %10591 = vmatprep.subr.msk.bf16.mxu1 %vm765_vm6, %v4377_v31  ;;  %5009 = vmatpush1.bf16.msra.mxu0 %v4632_v59  ;;  %v3911_v30 = vpop.permute.xlu0 %3910 }
 0x306   :  { %v4034_v58 = vpop.permute.xlu1 %4033  ;;  %4970 = vmatpush1.bf16.msra.mxu1 %v4719_v56  ;;  %v3943_v13 = vsel %vm197_vm4, %v3909_v11, %v3911_v30 }
 0x307   :  { %v4065_v29 = vsel %vm324_vm3, %v4032_v51, %v4034_v58  ;;  %v3993_v20 = vsel %vm11980_vm2, %v3943_v13, 0 }
 0x308   :  { %v4115_v8 = vsel %vm11980_vm2, %v4065_v29, 0  ;;  %v14113_v61 = vpop.f32.mrb[28].mxu0  ;;  %v4544_v24 = vsel %vm765_vm6, %v3993_v20, %v4428_v1 }
 0x309   :  { %v4429_v43 = vrot.slane %v4115_v8, 4  ;;  %10592 = vmatmul.mubr.msk.bf16.vlgmr.msra.gmra.mrb[56].mxu1 %vm965_vm8, %v13826_v14  ;;  %v4179_v18 = vpop.permute.xlu0 %4178  ;;  %v14119_v62 = vpop.f32.mrb[29].mxu0 }
 0x30a   :  { %v4210_v40 = vsel %vm471_vm5, %v4177_v3, %v4179_v18  ;;  %v3913_v55 = vpop.permute.xlu1 %3912  ;;  %5079 = vmatprep.mubr.bf16.mxu1 %v18394_v26  ;;  %v14123_v33 = vpop.f32.mrb[30].mxu0 }
 0x30b   :  { %v3944_v53 = vsel %vm197_vm4, %v3911_v30, %v3913_v55  ;;  %v14128_v11 = vpop.f32.mrb[31].mxu0  ;;  %v4259_v57 = vsel %vm11980_vm2, %v4210_v40, 0 }
 0x30c   :  { %v3994_v4 = vsel %vm11980_vm2, %v3944_v53, 0  ;;  %v4476_v7 = vrot.slane %v4259_v57, 4 }
 0x30d   :  { %v4296_v49 = vpop.permute.xlu0 %4295  ;;  %v4548_v36 = vsel %vm765_vm6, %v3994_v4, %v4429_v43 }
 0x30e   :  { %v4181_v22 = vpop.permute.xlu1 %4180  ;;  %5047 = vmatprep.subr.bf16.mxu1 %v4548_v36  ;;  %v4329_v3 = vsel %vm594_vm7, %v4294_v60, %v4296_v49  ;;  %v4640_v35 = vsel %vm765_vm6, %v4138_v37, %v4476_v7  ;;  %v4140_v37 = vsel %vm11980_vm2, %v13585_v15, 0 }
 0x30f   :  { %v4211_v6 = vsel %vm471_vm5, %v4179_v18, %v4181_v22  ;;  %5048 = vmatpush1.bf16.msra.mxu1 %v4544_v24  ;;  %v4378_v48 = vsel %vm11980_vm2, %v4329_v3, 0 }
 0x310   :  { %v4260_v38 = vsel %vm11980_vm2, %v4211_v6, 0  ;;  %v4725_v59 = vsel %vm765_vm6, %v4378_v48, 0 }
 0x311   :  { %v4477_v28 = vrot.slane %v4260_v38, 4  ;;  %v4036_v0 = vpop.permute.xlu0 %4035 }
 0x312   :  { %v4298_v51 = vpop.permute.xlu1 %4297  ;;  %v4066_v56 = vsel %vm324_vm3, %v4034_v58, %v4036_v0 }
 0x313   :  { %v4330_v60 = vsel %vm594_vm7, %v4296_v49, %v4298_v51  ;;  %v4644_v17 = vsel %vm765_vm6, %v4139_v41, %v4477_v28  ;;  %v14150_v21 = vpop.f32.mrb[28].mxu1  ;;  %v4116_v43 = vsel %vm11980_vm2, %v4066_v56, 0  ;;  %v4141_v41 = vsel %vm11980_vm2, %v13614_v42, 0 }
 0x314   :  { %18404 = vst [vmem:[#allocation9_spill] sm:$0xff] %v14150_v21  ;;  %5049 = vmatprep.subr.bf16.mxu1 %v4644_v17  ;;  %v4379_v5 = vsel %vm11980_vm2, %v4330_v60, 0  ;;  %v14155_v31 = vpop.f32.mrb[29].mxu1  ;;  %v4430_v1 = vrot.slane %v4116_v43, 4 }
 0x315   :  { %18405 = vst [vmem:[#allocation6_spill] sm:$0xff] %v14155_v31  ;;  %10593 = vmatprep.subr.msk.bf16.mxu0 %vm765_vm6, %v4379_v5  ;;  %5050 = vmatpush1.bf16.msra.mxu1 %v4640_v35  ;;  %v3915_v44 = vpop.permute.xlu0 %3914  ;;  %v14159_v30 = vpop.f32.mrb[30].mxu1 }
 0x316   :  { %18406 = vst [vmem:[#allocation7_spill] sm:$0xff] %v14159_v30  ;;  %5011 = vmatpush1.bf16.msra.mxu0 %v4725_v59  ;;  %v4038_v10 = vpop.permute.xlu1 %4037  ;;  %v14162_v29 = vpop.f32.mrb[31].mxu1  ;;  %v3945_v8 = vsel %vm197_vm4, %v3913_v55, %v3915_v44 }
 0x317   :  { %18407 = vst [vmem:[#allocation11_spill] sm:$0xff] %v14162_v29  ;;  %v4067_v13 = vsel %vm324_vm3, %v4036_v0, %v4038_v10  ;;  %v3995_v53 = vsel %vm11980_vm2, %v3945_v8, 0 }
 0x318   :  { %v4117_v23 = vsel %vm11980_vm2, %v4067_v13, 0  ;;  %v4552_v24 = vsel %vm765_vm6, %v3995_v53, %v4430_v1 }
 0x319   :  { %v4431_v18 = vrot.slane %v4117_v23, 4  ;;  %10594 = vmatmul.mubr.msk.bf16.vlgmr.msra.gmra.mrb[60].mxu0 %vm965_vm8, %v13826_v14  ;;  %v4183_v40 = vpop.permute.xlu0 %4182 }
 0x31a   :  { %v4212_v58 = vsel %vm471_vm5, %v4181_v22, %v4183_v40  ;;  %v3917_v20 = vpop.permute.xlu1 %3916  ;;  %5120 = vmatprep.mubr.bf16.mxu0 %v18394_v26 }
 0x31b   :  { %v3946_v55 = vsel %vm197_vm4, %v3915_v44, %v3917_v20  ;;  %v4261_v57 = vsel %vm11980_vm2, %v4212_v58, 0 }
 0x31c   :  { %v3996_v4 = vsel %vm11980_vm2, %v3946_v55, 0  ;;  %v4478_v7 = vrot.slane %v4261_v57, 4 }
 0x31d   :  { %v4300_v49 = vpop.permute.xlu0 %4299  ;;  %v4556_v36 = vsel %vm765_vm6, %v3996_v4, %v4431_v18 }
 0x31e   :  { %5088 = vmatprep.subr.bf16.mxu0 %v4556_v36  ;;  %v4185_v22 = vpop.permute.xlu1 %4184  ;;  %v4331_v3 = vsel %vm594_vm7, %v4298_v51, %v4300_v49  ;;  %v4648_v35 = vsel %vm765_vm6, %v4140_v37, %v4478_v7 }
 0x31f   :  { %v4213_v6 = vsel %vm471_vm5, %v4183_v40, %v4185_v22  ;;  %5089 = vmatpush1.bf16.msra.mxu0 %v4552_v24  ;;  %v4380_v51 = vsel %vm11980_vm2, %v4331_v3, 0 }
 0x320   :  { %v4262_v38 = vsel %vm11980_vm2, %v4213_v6, 0  ;;  %v4731_v15 = vsel %vm765_vm6, %v4380_v51, 0 }
 0x321   :  { %v4479_v28 = vrot.slane %v4262_v38, 4  ;;  %v4304_v0 = vpop.permute.xlu0 %4303 }
 0x322   :  { %v4302_v48 = vpop.permute.xlu1 %4301 }
 0x323   :  { %v4332_v60 = vsel %vm594_vm7, %v4300_v49, %v4302_v48  ;;  %v4333_v17 = vsel %vm594_vm7, %v4302_v48, %v4304_v0  ;;  %v4652_v5 = vsel %vm765_vm6, %v4141_v41, %v4479_v28 }
 0x324   :  { %5090 = vmatprep.subr.bf16.mxu0 %v4652_v5  ;;  %v4381_v42 = vsel %vm11980_vm2, %v4332_v60, 0  ;;  %v4382_v56 = vsel %vm11980_vm2, %v4333_v17, 0 }
 0x325   :  { %10595 = vmatprep.subr.msk.bf16.mxu1 %vm765_vm6, %v4381_v42  ;;  %5091 = vmatpush1.bf16.msra.mxu0 %v4648_v35  ;;  %v4737_v43 = vsel %vm765_vm6, %v4382_v56, 0  ;;  %v4143_v42 = vsel %vm11980_vm2, %v13766_v45, 0 }
 0x326   :  { %v4040_v44 = vpop.permute.xlu0 %4039  ;;  %v4306_v59 = vpop.permute.xlu1 %4305  ;;  %5052 = vmatpush1.bf16.msra.mxu1 %v4731_v15 }
 0x327   :  { %v4334_v13 = vsel %vm594_vm7, %v4304_v0, %v4306_v59  ;;  %v4068_v40 = vsel %vm324_vm3, %v4038_v10, %v4040_v44 }
 0x328   :  { %v4383_v8 = vsel %vm11980_vm2, %v4334_v13, 0  ;;  %v14208_v23 = vpop.f32.mrb[32].mxu0  ;;  %v4118_v36 = vsel %vm11980_vm2, %v4068_v40, 0 }
 0x329   :  { %18408 = vst [vmem:[#allocation13_spill] sm:$0xff] %v14208_v23  ;;  %10596 = vmatmul.mubr.msk.bf16.vlgmr.msra.gmra.mrb[60].mxu1 %vm965_vm8, %v13826_v14  ;;  %10597 = vmatprep.subr.msk.bf16.mxu0 %vm765_vm6, %v4383_v8  ;;  %v14214_v18 = vpop.f32.mrb[33].mxu0  ;;  %v4432_v38 = vrot.slane %v4118_v36, 4 }
 0x32a   :  { %18409 = vst [vmem:[#allocation8_spill] sm:$0xff] %v14214_v18  ;;  %v3919_v58 = vpop.permute.xlu0 %3918  ;;  %5093 = vmatpush1.bf16.msra.mxu0 %v4737_v43  ;;  %v4042_v53 = vpop.permute.xlu1 %4041  ;;  %5161 = vmatprep.mubr.bf16.mxu1 %v18394_v26 }
 0x32b   :  { %v4069_v55 = vsel %vm324_vm3, %v4040_v44, %v4042_v53  ;;  %v14219_v1 = vpop.f32.mrb[34].mxu0  ;;  %v3947_v4 = vsel %vm197_vm4, %v3917_v20, %v3919_v58  ;;  %v4142_v44 = vsel %vm11980_vm2, %v13666_v16, 0 }
 0x32c   :  { %18410 = vst [vmem:[#allocation10_spill] sm:$0xff] %v14219_v1  ;;  %v4119_v57 = vsel %vm11980_vm2, %v4069_v55, 0  ;;  %v14224_v49 = vpop.f32.mrb[35].mxu0  ;;  %v3997_v6 = vsel %vm11980_vm2, %v3947_v4, 0 }
 0x32d   :  { %18411 = vst [vmem:[#allocation12_spill] sm:$0xff] %v14224_v49  ;;  %v4433_v10 = vrot.slane %v4119_v57, 4  ;;  %10598 = vmatmul.mubr.msk.bf16.vlgmr.msra.gmra.mrb[64].mxu0 %vm965_vm8, %v13826_v14  ;;  %v4560_v51 = vsel %vm765_vm6, %v3997_v6, %v4432_v38 }
 0x32e   :  { %v4187_v24 = vpop.permute.xlu0 %4186  ;;  %v3921_v3 = vpop.permute.xlu1 %3920  ;;  %5202 = vmatprep.mubr.bf16.mxu0 %v18394_v26 }
 0x32f   :  { %v4214_v20 = vsel %vm471_vm5, %v4185_v22, %v4187_v24  ;;  %v3948_v7 = vsel %vm197_vm4, %v3919_v58, %v3921_v3 }
 0x330   :  { %v3998_v41 = vsel %vm11980_vm2, %v3948_v7, 0  ;;  %v4263_v28 = vsel %vm11980_vm2, %v4214_v20, 0 }
 0x331   :  { %v4564_v0 = vsel %vm765_vm6, %v3998_v41, %v4433_v10  ;;  %v4480_v17 = vrot.slane %v4263_v28, 4 }
 0x332   :  { %v4308_v37 = vpop.permute.xlu0 %4307  ;;  %v4189_v48 = vpop.permute.xlu1 %4188  ;;  %5129 = vmatprep.subr.bf16.mxu1 %v4564_v0 }
 0x333   :  { %v4215_v60 = vsel %vm471_vm5, %v4187_v24, %v4189_v48  ;;  %5130 = vmatpush1.bf16.msra.mxu1 %v4560_v51  ;;  %v14242_v22 = vpop.f32.mrb[32].mxu1  ;;  %v4335_v13 = vsel %vm594_vm7, %v4306_v59, %v4308_v37  ;;  %v4656_v4 = vsel %vm765_vm6, %v4142_v44, %v4480_v17 }
 0x334   :  { %18412 = vst [vmem:[#allocation15_spill] sm:$0xff] %v14242_v22  ;;  %v4264_v5 = vsel %vm11980_vm2, %v4215_v60, 0  ;;  %v14249_v35 = vpop.f32.mrb[33].mxu1  ;;  %v4384_v59 = vsel %vm11980_vm2, %v4335_v13, 0  ;;  %v4144_v13 = vsel %vm11980_vm2, %v13841_v25, 0 }
 0x335   :  { %v4481_v15 = vrot.slane %v4264_v5, 4  ;;  %v14254_v56 = vpop.f32.mrb[34].mxu1  ;;  %v4743_v7 = vsel %vm765_vm6, %v4384_v59, 0 }
 0x336   :  { %18413 = vst [vmem:[#allocation16_spill] sm:$0xff] %v14254_v56  ;;  %v4310_v8 = vpop.permute.xlu1 %4309  ;;  %v4044_v43 = vpop.permute.xlu0 %4043 }
 0x337   :  { %v4336_v40 = vsel %vm594_vm7, %v4308_v37, %v4310_v8  ;;  %v4070_v58 = vsel %vm324_vm3, %v4042_v53, %v4044_v43  ;;  %v4660_v55 = vsel %vm765_vm6, %v4143_v42, %v4481_v15  ;;  %v14260_v45 = vpop.f32.mrb[35].mxu1 }
 0x338   :  { %5131 = vmatprep.subr.bf16.mxu1 %v4660_v55  ;;  %v4385_v16 = vsel %vm11980_vm2, %v4336_v40, 0  ;;  %v4120_v57 = vsel %vm11980_vm2, %v4070_v58, 0  ;;  %v4145_v58 = vsel %vm11980_vm2, %v13890_v2, 0 }
 0x339   :  { %5132 = vmatpush1.bf16.msra.mxu1 %v4656_v4  ;;  %v4434_v6 = vrot.slane %v4120_v57, 4 }
 0x33a   :  { %v4046_v36 = vpop.permute.xlu1 %4045  ;;  %v3923_v10 = vpop.permute.xlu0 %3922  ;;  %10599 = vmatprep.subr.msk.bf16.mxu1 %vm765_vm6, %v4385_v16 }
 0x33b   :  { %v4071_v53 = vsel %vm324_vm3, %v4044_v43, %v4046_v36  ;;  %v3949_v24 = vsel %vm197_vm4, %v3921_v3, %v3923_v10 }
 0x33c   :  { %v4121_v20 = vsel %vm11980_vm2, %v4071_v53, 0  ;;  %v3999_v41 = vsel %vm11980_vm2, %v3949_v24, 0 }
 0x33d   :  { %v4435_v38 = vrot.slane %v4121_v20, 4  ;;  %5134 = vmatpush1.bf16.msra.mxu1 %v4743_v7  ;;  %v4568_v17 = vsel %vm765_vm6, %v3999_v41, %v4434_v6 }
 0x33e   :  { %v3925_v28 = vpop.permute.xlu1 %3924  ;;  %v4191_v0 = vpop.permute.xlu0 %4190 }
 0x33f   :  { %v3950_v37 = vsel %vm197_vm4, %v3923_v10, %v3925_v28  ;;  %v4216_v51 = vsel %vm471_vm5, %v4189_v48, %v4191_v0 }
 0x340   :  { %v4265_v3 = vsel %vm11980_vm2, %v4216_v51, 0  ;;  %10600 = vmatmul.mubr.msk.bf16.vlgmr.msra.gmra.mrb[64].mxu1 %vm965_vm8, %v13826_v14  ;;  %v4000_v60 = vsel %vm11980_vm2, %v3950_v37, 0 }
 0x341   :  { %v4572_v5 = vsel %vm765_vm6, %v4000_v60, %v4435_v38  ;;  %5243 = vmatprep.mubr.bf16.mxu1 %v18394_v26  ;;  %v4482_v42 = vrot.slane %v4265_v3, 4 }
 0x342   :  { %v4193_v15 = vpop.permute.xlu1 %4192  ;;  %v4312_v44 = vpop.permute.xlu0 %4311  ;;  %5170 = vmatprep.subr.bf16.mxu0 %v4572_v5 }
 0x343   :  { %v4217_v48 = vsel %vm471_vm5, %v4191_v0, %v4193_v15  ;;  %5171 = vmatpush1.bf16.msra.mxu0 %v4568_v17  ;;  %v4337_v40 = vsel %vm594_vm7, %v4310_v8, %v4312_v44  ;;  %v4664_v57 = vsel %vm765_vm6, %v4144_v13, %v4482_v42  ;;  %v4147_v13 = vsel %vm11980_vm2, %v13957_v39, 0 }
 0x344   :  { %v4266_v43 = vsel %vm11980_vm2, %v4217_v48, 0  ;;  %v4386_v53 = vsel %vm11980_vm2, %v4337_v40, 0  ;;  %v4146_v39 = vsel %vm11980_vm2, %v13924_v32, 0 }
 0x345   :  { %v4483_v55 = vrot.slane %v4266_v43, 4 }
 0x346   :  { %v4314_v4 = vpop.permute.xlu1 %4313  ;;  %v4048_v16 = vpop.permute.xlu0 %4047 }
 0x347   :  { %v4338_v59 = vsel %vm594_vm7, %v4312_v44, %v4314_v4  ;;  %v4072_v10 = vsel %vm324_vm3, %v4046_v36, %v4048_v16  ;;  %v4668_v25 = vsel %vm765_vm6, %v4145_v58, %v4483_v55  ;;  %v4749_v36 = vsel %vm765_vm6, %v4386_v53, 0 }
 0x348   :  { %5172 = vmatprep.subr.bf16.mxu0 %v4668_v25  ;;  %v4387_v8 = vsel %vm11980_vm2, %v4338_v59, 0  ;;  %v14306_v24 = vpop.f32.mrb[36].mxu0  ;;  %v4122_v2 = vsel %vm11980_vm2, %v4072_v10, 0 }
 0x349   :  { %5173 = vmatpush1.bf16.msra.mxu0 %v4664_v57  ;;  %v14310_v6 = vpop.f32.mrb[37].mxu0  ;;  %v4436_v37 = vrot.slane %v4122_v2, 4 }
 0x34a   :  { %v4050_v20 = vpop.permute.xlu1 %4049  ;;  %v3927_v7 = vpop.permute.xlu0 %3926  ;;  %10601 = vmatprep.subr.msk.bf16.mxu0 %vm765_vm6, %v4387_v8 }
 0x34b   :  { %v4073_v38 = vsel %vm324_vm3, %v4048_v16, %v4050_v20  ;;  %v3951_v41 = vsel %vm197_vm4, %v3925_v28, %v3927_v7  ;;  %v14316_v0 = vpop.f32.mrb[38].mxu0 }
 0x34c   :  { %v4123_v51 = vsel %vm11980_vm2, %v4073_v38, 0  ;;  %v14320_v3 = vpop.f32.mrb[39].mxu0  ;;  %v4001_v17 = vsel %vm11980_vm2, %v3951_v41, 0 }
 0x34d   :  { %v4437_v60 = vrot.slane %v4123_v51, 4  ;;  %5175 = vmatpush1.bf16.msra.mxu0 %v4749_v36 }
 0x34e   :  { %v3929_v5 = vpop.permute.xlu1 %3928  ;;  %v4195_v42 = vpop.permute.xlu0 %4194 }
 0x34f   :  { %v3952_v44 = vsel %vm197_vm4, %v3927_v7, %v3929_v5  ;;  %v4218_v48 = vsel %vm471_vm5, %v4193_v15, %v4195_v42  ;;  %v4243_v28 = vsel %vm471_vm5, %v4195_v42, 0  ;;  %v4576_v15 = vsel %vm765_vm6, %v4001_v17, %v4436_v37 }
 0x350   :  { %v4002_v43 = vsel %vm11980_vm2, %v3952_v44, 0  ;;  %v4267_v40 = vsel %vm11980_vm2, %v4218_v48, 0  ;;  %v4268_v58 = vsel %vm11980_vm2, %v4243_v28, 0  ;;  %10602 = vmatmul.mubr.msk.bf16.vlgmr.msra.gmra.mrb[68].mxu0 %vm965_vm8, %v13826_v14 }
 0x351   :  { %v4484_v55 = vrot.slane %v4267_v40, 4  ;;  %v4485_v16 = vrot.slane %v4268_v58, 4  ;;  %v4580_v57 = vsel %vm765_vm6, %v4002_v43, %v4437_v60  ;;  %6218 = vmatprep.mubr.bf16.mxu0 %v18394_v26 }
 0x352   :  { %5211 = vmatprep.subr.bf16.mxu1 %v4580_v57  ;;  %v4316_v59 = vpop.permute.xlu1 %4315 }
 0x353   :  { %5212 = vmatpush1.bf16.msra.mxu1 %v4576_v15  ;;  %v4676_v10 = vsel %vm765_vm6, %v4147_v13, %v4485_v16  ;;  %v4339_v25 = vsel %vm594_vm7, %v4314_v4, %v4316_v59  ;;  %v4364_v53 = vsel %vm594_vm7, %v4316_v59, 0  ;;  %v14347_v8 = vpop.f32.mrb[36].mxu1  ;;  %v4672_v2 = vsel %vm765_vm6, %v4146_v39, %v4484_v55 }
 0x354   :  { %5213 = vmatprep.subr.bf16.mxu1 %v4676_v10  ;;  %v14350_v20 = vpop.f32.mrb[37].mxu1  ;;  %v4389_v32 = vsel %vm11980_vm2, %v4364_v53, 0  ;;  %v4388_v7 = vsel %vm11980_vm2, %v4339_v25, 0 }
 0x355   :  { %v14356_v36 = vpop.f32.mrb[38].mxu1  ;;  %v4755_v4 = vsel %vm765_vm6, %v4388_v7, 0 }
 0x356   :  { %v14358_v38 = vpop.f32.mrb[39].mxu1 }
 0x357   :  { %5214 = vmatpush1.bf16.msra.mxu1 %v4672_v2 }
 0x358   :  { %10603 = vmatprep.subr.msk.bf16.mxu1 %vm765_vm6, %v4389_v32 }
 0x35b   :  { %5216 = vmatpush1.bf16.msra.mxu1 %v4755_v4 }
 0x35e   :  { %10604 = vmatmul.mubr.msk.bf16.vlgmr.msra.gmra.mrb[68].mxu1 %vm965_vm8, %v13826_v14 }
 0x35f   :  { %6261 = vmatprep.mubr.bf16.mxu1 %v18394_v26  ;;  %v14389_v13 = vpop.permute.xlu0 %4682 }
 0x368   :  { %v14365_v41 = vpop.f32.mrb[40].mxu0 }
 0x369   :  { %v14367_v37 = vpop.f32.mrb[41].mxu0 }
 0x36a   :  { %v14369_v34 = vpop.f32.mrb[42].mxu0 }
 0x36b   :  { %v14371_v51 = vpop.f32.mrb[43].mxu0 }
 0x373   :  { %v14373_v60 = vpop.f32.mrb[40].mxu1 }
 0x374   :  { %18414 = vst [vmem:[#allocation17_spill] sm:$0xff] %v14373_v60  ;;  %v14375_v17 = vpop.f32.mrb[41].mxu1 }
 0x375   :  { %18415 = vst [vmem:[#allocation18_spill] sm:$0xff] %v14375_v17  ;;  %v14377_v5 = vpop.f32.mrb[42].mxu1 }
 0x376   :  { %18416 = vst [vmem:[#allocation19_spill] sm:$0xff] %v14377_v5  ;;  %v14379_v42 = vpop.f32.mrb[43].mxu1 }
 0x377   :  { %18417 = vst [vmem:[#allocation20_spill] sm:$0xff] %v14379_v42 }
 0x384   :  { %v14381_v44 = vpop.f32.mrb[44].mxu0 }
 0x385   :  { %18418 = vst [vmem:[#allocation21_spill] sm:$0xff] %v14381_v44  ;;  %v14383_v14 = vpop.f32.mrb[45].mxu0 }
 0x386   :  { %18419 = vst [vmem:[#allocation22_spill] sm:$0xff] %v14383_v14  ;;  %v14385_v48 = vpop.f32.mrb[46].mxu0 }
 0x387   :  { %18420 = vst [vmem:[#allocation23_spill] sm:$0xff] %v14385_v48  ;;  %v14387_v28 = vpop.f32.mrb[47].mxu0 }
 0x388   :  { %18421 = vst [vmem:[#allocation24_spill] sm:$0xff] %v14387_v28 }
 0x390   :  { %v4794_v43 = vpop.f32.mrb[48].mxu0 }
 0x391   :  { %v14391_v40 = vpop.f32.mrb[44].mxu1  ;;  %v4795_v58 = vadd.f32 %v4794_v43, %v14389_v13  ;;  %v4796_v15 = vpop.f32.mrb[49].mxu0 }
 0x392   :  { %18422 = vst [vmem:[#allocation25_spill] sm:$0xff] %v14391_v40  ;;  %v14394_v55 = vpop.f32.mrb[45].mxu1  ;;  %v4797_v16 = vadd.f32 %v4796_v15, %v14389_v13  ;;  %v4798_v57 = vpop.f32.mrb[50].mxu0 }
 0x393   :  { %18423 = vst [vmem:[#allocation26_spill] sm:$0xff] %v14394_v55  ;;  %v5252_v39 = vmax.f32 %v4795_v58, 0.0  ;;  %v14397_v59 = vpop.f32.mrb[46].mxu1  ;;  %v4799_v10 = vpop.f32.mrb[51].mxu0 }
 0x394   :  { %18424 = vst [vmem:[#allocation27_spill] sm:$0xff] %v14397_v59  ;;  %v14399_v25 = vpop.f32.mrb[47].mxu1  ;;  %v5253_v2 = vmax.f32 %v4797_v16, 0.0 }
 0x395   :  { %18425 = vst [vmem:[#allocation28_spill] sm:$0xff] %v14399_v25  ;;  %v14401_v53 = vpack.c.bf16 %v5252_v39, %v5252_v39 }
 0x396   :  { %v14407_v32 = vpack.c.bf16 %v5253_v2, %v5253_v2 }
 0x397   :  { %5756 = vrot.lane.b32.xlu0 %v14401_v53, %s11731_s16  ;;  %5468 = vrot.lane.b32.xlu1 %v14401_v53, %s11728_s29 }
 0x39b   :  { %5470 = vrot.lane.b32.xlu0 %v14407_v32, %s11728_s29  ;;  %5348 = vrot.lane.b32.xlu1 %v14401_v53, %s11727_s28 }
 0x39d   :  { %v4835_v7 = vpop.f32.mrb[48].mxu1 }
 0x39e   :  { %v4836_v4 = vadd.f32 %v4835_v7, %v14389_v13  ;;  %v4837_v43 = vpop.f32.mrb[49].mxu1 }
 0x39f   :  { %v4839_v58 = vpop.f32.mrb[50].mxu1  ;;  %5350 = vrot.lane.b32.xlu0 %v14407_v32, %s11727_s28  ;;  %5636 = vrot.lane.b32.xlu1 %v14401_v53, %s11729_s11  ;;  %v4838_v39 = vadd.f32 %v4837_v43, %v14389_v13 }
 0x3a0   :  { %v5254_v15 = vmax.f32 %v4836_v4, 0.0  ;;  %v4840_v16 = vpop.f32.mrb[51].mxu1 }
 0x3a1   :  { %v5255_v10 = vmax.f32 %v4838_v39, 0.0 }
 0x3a2   :  { %v14418_v57 = vpack.c.bf16 %v5254_v15, %v5254_v15 }
 0x3a3   :  { %5638 = vrot.lane.b32.xlu1 %v14407_v32, %s11729_s11  ;;  %v14429_v2 = vpack.c.bf16 %v5255_v10, %v5255_v10 }
 0x3a4   :  { %5640 = vrot.lane.b32.xlu0 %v14418_v57, %s11729_s11 }
 0x3a7   :  { %5758 = vrot.lane.b32.xlu1 %v14407_v32, %s11731_s16 }
 0x3a8   :  { %5760 = vrot.lane.b32.xlu0 %v14418_v57, %s11731_s16 }
 0x3ab   :  { %5472 = vrot.lane.b32.xlu1 %v14418_v57, %s11728_s29 }
 0x3ac   :  { %v4876_v7 = vpop.f32.mrb[52].mxu0  ;;  %5474 = vrot.lane.b32.xlu0 %v14429_v2, %s11728_s29 }
 0x3ad   :  { %v4877_v4 = vadd.f32 %v4876_v7, %v14389_v13  ;;  %v4878_v43 = vpop.f32.mrb[53].mxu0 }
 0x3ae   :  { %v4880_v58 = vpop.f32.mrb[54].mxu0  ;;  %v4879_v39 = vadd.f32 %v4878_v43, %v14389_v13 }
 0x3af   :  { %5352 = vrot.lane.b32.xlu1 %v14418_v57, %s11727_s28  ;;  %v4881_v15 = vpop.f32.mrb[55].mxu0  ;;  %v5256_v16 = vmax.f32 %v4877_v4, 0.0 }
 0x3b0   :  { %5354 = vrot.lane.b32.xlu0 %v14429_v2, %s11727_s28  ;;  %v5257_v7 = vmax.f32 %v4879_v39, 0.0 }
 0x3b1   :  { %v14445_v10 = vpack.c.bf16 %v5256_v16, %v5256_v16 }
 0x3b2   :  { %v14451_v58 = vpack.c.bf16 %v5257_v7, %v5257_v7 }
 0x3b3   :  { %5762 = vrot.lane.b32.xlu1 %v14429_v2, %s11731_s16 }
 0x3b4   :  { %5642 = vrot.lane.b32.xlu0 %v14429_v2, %s11729_s11 }
 0x3b7   :  { %5644 = vrot.lane.b32.xlu1 %v14445_v10, %s11729_s11 }
 0x3b8   :  { %5764 = vrot.lane.b32.xlu0 %v14445_v10, %s11731_s16 }
 0x3bb   :  { %5476 = vrot.lane.b32.xlu1 %v14445_v10, %s11728_s29 }
 0x3bc   :  { %v4917_v4 = vpop.f32.mrb[52].mxu1  ;;  %5478 = vrot.lane.b32.xlu0 %v14451_v58, %s11728_s29 }
 0x3bd   :  { %v4918_v43 = vadd.f32 %v4917_v4, %v14389_v13  ;;  %v4919_v15 = vpop.f32.mrb[53].mxu1 }
 0x3be   :  { %v4921_v16 = vpop.f32.mrb[54].mxu1  ;;  %v4920_v46 = vadd.f32 %v4919_v15, %v14389_v13 }
 0x3bf   :  { %v5258_v39 = vmax.f32 %v4918_v43, 0.0  ;;  %v4922_v50 = vpop.f32.mrb[55].mxu1  ;;  %5356 = vrot.lane.b32.xlu1 %v14445_v10, %s11727_s28 }
 0x3c0   :  { %5358 = vrot.lane.b32.xlu0 %v14451_v58, %s11727_s28  ;;  %v5259_v4 = vmax.f32 %v4920_v46, 0.0 }
 0x3c1   :  { %v14462_v7 = vpack.c.bf16 %v5258_v39, %v5258_v39 }
 0x3c2   :  { %v14473_v50 = vpack.c.bf16 %v5259_v4, %v5259_v4 }
 0x3c3   :  { %5646 = vrot.lane.b32.xlu1 %v14451_v58, %s11729_s11 }
 0x3c4   :  { %5648 = vrot.lane.b32.xlu0 %v14462_v7, %s11729_s11 }
 0x3c7   :  { %5766 = vrot.lane.b32.xlu1 %v14451_v58, %s11731_s16 }
 0x3c8   :  { %5768 = vrot.lane.b32.xlu0 %v14462_v7, %s11731_s16 }
 0x3cb   :  { %5480 = vrot.lane.b32.xlu1 %v14462_v7, %s11728_s29 }
 0x3cc   :  { %v4958_v43 = vpop.f32.mrb[56].mxu0  ;;  %5482 = vrot.lane.b32.xlu0 %v14473_v50, %s11728_s29 }
 0x3cd   :  { %v4959_v15 = vadd.f32 %v4958_v43, %v14389_v13  ;;  %v4960_v16 = vpop.f32.mrb[57].mxu0 }
 0x3ce   :  { %v4962_v39 = vpop.f32.mrb[58].mxu0  ;;  %v4961_v55 = vadd.f32 %v4960_v16, %v14389_v13 }
 0x3cf   :  { %v5260_v46 = vmax.f32 %v4959_v15, 0.0  ;;  %v4963_v25 = vpop.f32.mrb[59].mxu0  ;;  %5360 = vrot.lane.b32.xlu1 %v14462_v7, %s11727_s28 }
 0x3d0   :  { %5362 = vrot.lane.b32.xlu0 %v14473_v50, %s11727_s28  ;;  %v5261_v43 = vmax.f32 %v4961_v55, 0.0 }
 0x3d1   :  { %v14484_v4 = vpack.c.bf16 %v5260_v46, %v5260_v46 }
 0x3d2   :  { %v14495_v25 = vpack.c.bf16 %v5261_v43, %v5261_v43 }
 0x3d3   :  { %5650 = vrot.lane.b32.xlu1 %v14473_v50, %s11729_s11 }
 0x3d4   :  { %5652 = vrot.lane.b32.xlu0 %v14484_v4, %s11729_s11 }
 0x3d7   :  { %5770 = vrot.lane.b32.xlu1 %v14473_v50, %s11731_s16 }
 0x3d8   :  { %5772 = vrot.lane.b32.xlu0 %v14484_v4, %s11731_s16 }
 0x3db   :  { %5484 = vrot.lane.b32.xlu1 %v14484_v4, %s11728_s29 }
 0x3dc   :  { %v4999_v15 = vpop.f32.mrb[56].mxu1  ;;  %5486 = vrot.lane.b32.xlu0 %v14495_v25, %s11728_s29 }
 0x3dd   :  { %v5000_v16 = vadd.f32 %v4999_v15, %v14389_v13  ;;  %v5001_v39 = vpop.f32.mrb[57].mxu1 }
 0x3de   :  { %v5003_v46 = vpop.f32.mrb[58].mxu1  ;;  %v5002_v40 = vadd.f32 %v5001_v39, %v14389_v13 }
 0x3df   :  { %v5262_v55 = vmax.f32 %v5000_v16, 0.0  ;;  %v5004_v59 = vpop.f32.mrb[59].mxu1  ;;  %5364 = vrot.lane.b32.xlu1 %v14484_v4, %s11727_s28 }
 0x3e0   :  { %5366 = vrot.lane.b32.xlu0 %v14495_v25, %s11727_s28  ;;  %v5263_v15 = vmax.f32 %v5002_v40, 0.0 }
 0x3e1   :  { %v14506_v43 = vpack.c.bf16 %v5262_v55, %v5262_v55 }
 0x3e2   :  { %v14517_v59 = vpack.c.bf16 %v5263_v15, %v5263_v15 }
 0x3e3   :  { %5654 = vrot.lane.b32.xlu1 %v14495_v25, %s11729_s11 }
 0x3e4   :  { %5656 = vrot.lane.b32.xlu0 %v14506_v43, %s11729_s11 }
 0x3e7   :  { %5774 = vrot.lane.b32.xlu1 %v14495_v25, %s11731_s16 }
 0x3e8   :  { %5776 = vrot.lane.b32.xlu0 %v14506_v43, %s11731_s16 }
 0x3eb   :  { %5488 = vrot.lane.b32.xlu1 %v14506_v43, %s11728_s29 }
 0x3ec   :  { %v5040_v16 = vpop.f32.mrb[60].mxu0  ;;  %5490 = vrot.lane.b32.xlu0 %v14517_v59, %s11728_s29 }
 0x3ed   :  { %v5041_v39 = vadd.f32 %v5040_v16, %v14389_v13  ;;  %v5042_v46 = vpop.f32.mrb[61].mxu0 }
 0x3ee   :  { %v5044_v55 = vpop.f32.mrb[62].mxu0  ;;  %v5043_v22 = vadd.f32 %v5042_v46, %v14389_v13 }
 0x3ef   :  { %v5264_v40 = vmax.f32 %v5041_v39, 0.0  ;;  %v5045_v56 = vpop.f32.mrb[63].mxu0  ;;  %5368 = vrot.lane.b32.xlu1 %v14506_v43, %s11727_s28 }
 0x3f0   :  { %5370 = vrot.lane.b32.xlu0 %v14517_v59, %s11727_s28  ;;  %v5265_v16 = vmax.f32 %v5043_v22, 0.0 }
 0x3f1   :  { %v14528_v15 = vpack.c.bf16 %v5264_v40, %v5264_v40 }
 0x3f2   :  { %v14539_v56 = vpack.c.bf16 %v5265_v16, %v5265_v16 }
 0x3f3   :  { %5658 = vrot.lane.b32.xlu1 %v14517_v59, %s11729_s11 }
 0x3f4   :  { %5660 = vrot.lane.b32.xlu0 %v14528_v15, %s11729_s11 }
 0x3f7   :  { %5778 = vrot.lane.b32.xlu1 %v14517_v59, %s11731_s16 }
 0x3f8   :  { %5780 = vrot.lane.b32.xlu0 %v14528_v15, %s11731_s16 }
 0x3fb   :  { %5492 = vrot.lane.b32.xlu1 %v14528_v15, %s11728_s29 }
 0x3fc   :  { %v5081_v39 = vpop.f32.mrb[60].mxu1  ;;  %5494 = vrot.lane.b32.xlu0 %v14539_v56, %s11728_s29 }
 0x3fd   :  { %v5082_v46 = vadd.f32 %v5081_v39, %v14389_v13  ;;  %v5083_v55 = vpop.f32.mrb[61].mxu1 }
 0x3fe   :  { %v5084_v22 = vadd.f32 %v5083_v55, %v14389_v13  ;;  %v5085_v40 = vpop.f32.mrb[62].mxu1 }
 0x3ff   :  { %v5266_v28 = vmax.f32 %v5082_v46, 0.0  ;;  %v5086_v14 = vpop.f32.mrb[63].mxu1  ;;  %5372 = vrot.lane.b32.xlu1 %v14528_v15, %s11727_s28 }
 0x400   :  { %v5122_v16 = vpop.f32.mrb[64].mxu0  ;;  %5374 = vrot.lane.b32.xlu0 %v14539_v56, %s11727_s28  ;;  %v5267_v48 = vmax.f32 %v5084_v22, 0.0 }
 0x401   :  { %v14551_v49 = vpack.c.bf16 %v5266_v28, %v5266_v28  ;;  %v14553_v18 = vpop.f32.mrb[65].mxu0  ;;  %v5123_v46 = vadd.f32 %v5122_v16, %v14389_v13 }
 0x402   :  { %v5126_v44 = vpop.f32.mrb[66].mxu0  ;;  %v14559_v14 = vpack.c.bf16 %v5267_v48, %v5267_v48 }
 0x403   :  { %5662 = vrot.lane.b32.xlu1 %v14539_v56, %s11729_s11  ;;  %v5127_v39 = vpop.f32.mrb[67].mxu0  ;;  %v5268_v44 = vmax.f32 %v5123_v46, 0.0 }
 0x404   :  { %5664 = vrot.lane.b32.xlu0 %v14551_v49, %s11729_s11 }
 0x405   :  { %v14571_v16 = vpack.c.bf16 %v5268_v44, %v5268_v44 }
 0x407   :  { %5496 = vrot.lane.b32.xlu1 %v14551_v49, %s11728_s29  ;;  %18426 = vst [vmem:[#allocation29_spill] sm:$0xff] %v14571_v16 }
 0x408   :  { %5498 = vrot.lane.b32.xlu0 %v14559_v14, %s11728_s29 }
 0x409   :  { %v5757_v28 = vpop.permute.xlu0 %5756  ;;  %v5469_v55 = vpop.permute.xlu1 %5468 }
 0x40a   :  { %v5540_v48 = vsel %vm324_vm3, 0, %v5469_v55 }
 0x40b   :  { %5376 = vrot.lane.b32.xlu1 %v14551_v49, %s11727_s28  ;;  %v5541_v46 = vsel %vm1750_vm9, %v5540_v48, 0 }
 0x40c   :  { %5378 = vrot.lane.b32.xlu0 %v14559_v14, %s11727_s28 }
 0x40d   :  { %v5471_v22 = vpop.permute.xlu0 %5470  ;;  %v5349_v40 = vpop.permute.xlu1 %5348 }
 0x40e   :  { %v5516_v39 = vsel %vm324_vm3, %v5469_v55, %v5471_v22  ;;  %v5420_v23 = vsel %vm197_vm4, 0, %v5349_v40  ;;  %v5900_v55 = vrot.slane %v5541_v46, 4 }
 0x40f   :  { %v5543_v1 = vsel %vm1750_vm9, %v5516_v39, 0  ;;  %5666 = vrot.lane.b32.xlu1 %v14559_v14, %s11729_s11  ;;  %v5421_v44 = vsel %vm1750_vm9, %v5420_v23, 0 }
 0x410   :  { %5668 = vrot.lane.b32.xlu0 %v14571_v16, %s11729_s11  ;;  %v5901_v29 = vrot.slane %v5543_v1, 4  ;;  %v5973_v23 = vsel %vm765_vm6, %v5421_v44, %v5900_v55 }
 0x411   :  { %v5351_v42 = vpop.permute.xlu0 %5350  ;;  %v5637_v17 = vpop.permute.xlu1 %5636 }
 0x412   :  { %v5396_v31 = vsel %vm197_vm4, %v5349_v40, %v5351_v42 }
 0x413   :  { %v14583_v5 = vpop.f32.mrb[64].mxu1  ;;  %5782 = vrot.lane.b32.xlu1 %v14539_v56, %s11731_s16  ;;  %v5423_v39 = vsel %vm1750_vm9, %v5396_v31, 0 }
 0x414   :  { %18427 = vst [vmem:[#allocation30_spill] sm:$0xff] %v14583_v5  ;;  %v14588_v60 = vpop.f32.mrb[65].mxu1  ;;  %5784 = vrot.lane.b32.xlu0 %v14551_v49, %s11731_s16  ;;  %v5976_v48 = vsel %vm765_vm6, %v5423_v39, %v5901_v29  ;;  %v5589_v39 = vsel %vm1750_vm9, %v14401_v53, 0 }
 0x415   :  { %18428 = vst [vmem:[#allocation31_spill] sm:$0xff] %v14588_v60  ;;  %6186 = vmatprep.subr.bf16.mxu0 %v5976_v48  ;;  %v5639_v1 = vpop.permute.xlu1 %5638  ;;  %v5167_v40 = vpop.f32.mrb[66].mxu1 }
 0x416   :  { %v5684_v46 = vsel %vm471_vm5, %v5637_v17, %v5639_v1  ;;  %v5641_v5 = vpop.permute.xlu0 %5640  ;;  %6187 = vmatpush1.bf16.msra.mxu0 %v5973_v23  ;;  %v5168_v30 = vpop.f32.mrb[67].mxu1  ;;  %v2448_v17 = vld [vmem:[%s18260_s4] sm:$0xff] }
 0x417   :  { %v5710_v21 = vsel %vm1750_vm9, %v5684_v46, 0  ;;  %v5685_v31 = vsel %vm471_vm5, %v5639_v1, %v5641_v5  ;;  %5786 = vrot.lane.b32.xlu1 %v14559_v14, %s11731_s16  ;;  %v2449_v30 = vld [vmem:[%s18260_s4 + $0x8] sm:$0xff]  ;;  %v5591_v1 = vsel %vm1750_vm9, %v14407_v32, 0 }
 0x418   :  { %v5948_v60 = vrot.slane %v5710_v21, 4  ;;  %v5712_v29 = vsel %vm1750_vm9, %v5685_v31, 0  ;;  %5788 = vrot.lane.b32.xlu0 %v14571_v16, %s11731_s16 }
 0x419   :  { %v5949_v44 = vrot.slane %v5712_v29, 4  ;;  %v5759_v55 = vpop.permute.xlu1 %5758 }
 0x41a   :  { %v5804_v21 = vsel %vm594_vm7, %v5757_v28, %v5759_v55  ;;  %v5761_v48 = vpop.permute.xlu0 %5760  ;;  %v6045_v23 = vsel %vm765_vm6, %v5589_v39, %v5948_v60 }
 0x41b   :  { %v5805_v40 = vsel %vm594_vm7, %v5759_v55, %v5761_v48  ;;  %v6048_v46 = vsel %vm765_vm6, %v5591_v1, %v5949_v44  ;;  %2452 = vperm.xlu1 %11121, %v2448_v17   ;;  %v5830_v53 = vsel %vm1750_vm9, %v5804_v21, 0  ;;  %v14627_v1 = vld [vmem:[%s18259_s3] sm:$0xff]  }
 0x41c   :  { %2457 = vperm.xlu0 %11120, %v2449_v30   ;;  %6188 = vmatprep.subr.bf16.mxu0 %v6048_v46  ;;  %v5832_v31 = vsel %vm1750_vm9, %v5805_v40, 0  ;;  %v6138_v39 = vsel %vm765_vm6, %v5830_v53, 0 }
 0x41d   :  { %6189 = vmatpush1.bf16.msra.mxu0 %v6045_v23  ;;  %v5473_v29 = vpop.permute.xlu1 %5472 }
 0x41e   :  { %10606 = vmatprep.subr.msk.bf16.mxu0 %vm765_vm6, %v5832_v31  ;;  %v5475_v28 = vpop.permute.xlu0 %5474  ;;  %v5517_v32 = vsel %vm324_vm3, %v5471_v22, %v5473_v29 }
 0x41f   :  { %v5518_v60 = vsel %vm324_vm3, %v5473_v29, %v5475_v28  ;;  %v5545_v55 = vsel %vm1750_vm9, %v5517_v32, 0  ;;  %6122 = vperm.xlu1 %11121, %v2448_v17  }
 0x420   :  { %v5547_v44 = vsel %vm1750_vm9, %v5518_v60, 0  ;;  %6127 = vperm.xlu0 %11120, %v2449_v30   ;;  %v5902_v23 = vrot.slane %v5545_v55, 4 }
 0x421   :  { %6191 = vmatpush1.bf16.msra.mxu0 %v6138_v39  ;;  %v5353_v21 = vpop.permute.xlu1 %5352  ;;  %v5903_v46 = vrot.slane %v5547_v44, 4 }
 0x422   :  { %v5355_v40 = vpop.permute.xlu0 %5354  ;;  %v5397_v22 = vsel %vm197_vm4, %v5351_v42, %v5353_v21 }
 0x423   :  { %v5398_v31 = vsel %vm197_vm4, %v5353_v21, %v5355_v40  ;;  %v5425_v17 = vsel %vm1750_vm9, %v5397_v22, 0  ;;  %v14632_v29 = vpop.f32.mrb[68].mxu0 }
 0x424   :  { %18429 = vst [vmem:[#allocation32_spill] sm:$0xff] %v14632_v29  ;;  %v14634_v30 = vpop.f32.mrb[69].mxu0  ;;  %10607 = vmatmul.mubr.msk.bf16.vlgmr.msra.gmra.mrb[72].mxu0 %vm965_vm8, %v14627_v1  ;;  %v5427_v53 = vsel %vm1750_vm9, %v5398_v31, 0  ;;  %v5979_v32 = vsel %vm765_vm6, %v5425_v17, %v5902_v23 }
 0x425   :  { %18430 = vst [vmem:[#allocation33_spill] sm:$0xff] %v14634_v30  ;;  %v5982_v60 = vsel %vm765_vm6, %v5427_v53, %v5903_v46  ;;  %v5763_v55 = vpop.permute.xlu1 %5762  ;;  %6304 = vmatprep.mubr.bf16.mxu0 %v18394_v26  ;;  %v5208_v42 = vpop.f32.mrb[70].mxu0 }
 0x426   :  { %v5643_v44 = vpop.permute.xlu0 %5642  ;;  %6229 = vmatprep.subr.bf16.mxu1 %v5982_v60  ;;  %v5209_v39 = vpop.f32.mrb[71].mxu0  ;;  %v5806_v17 = vsel %vm594_vm7, %v5761_v48, %v5763_v55  ;;  %v5595_v60 = vsel %vm1750_vm9, %v14429_v2, 0 }
 0x427   :  { %v5686_v21 = vsel %vm471_vm5, %v5641_v5, %v5643_v44  ;;  %6230 = vmatpush1.bf16.msra.mxu1 %v5979_v32 }
 0x428   :  { %v5714_v22 = vsel %vm1750_vm9, %v5686_v21, 0 }
 0x429   :  { %v5645_v30 = vpop.permute.xlu1 %5644  ;;  %v5950_v16 = vrot.slane %v5714_v22, 4 }
 0x42a   :  { %v5765_v29 = vpop.permute.xlu0 %5764  ;;  %v5687_v31 = vsel %vm471_vm5, %v5643_v44, %v5645_v30  ;;  %v5593_v44 = vsel %vm1750_vm9, %v14418_v57, 0 }
 0x42b   :  { %v5716_v23 = vsel %vm1750_vm9, %v5687_v31, 0  ;;  %v5807_v53 = vsel %vm594_vm7, %v5763_v55, %v5765_v29  ;;  %v6051_v48 = vsel %vm765_vm6, %v5593_v44, %v5950_v16  ;;  %v5834_v31 = vsel %vm1750_vm9, %v5806_v17, 0 }
 0x42c   :  { %v5951_v46 = vrot.slane %v5716_v23, 4  ;;  %v5836_v2 = vsel %vm1750_vm9, %v5807_v53, 0  ;;  %v6142_v53 = vsel %vm765_vm6, %v5834_v31, 0 }
 0x42d   :  { %v5477_v42 = vpop.permute.xlu1 %5476 }
 0x42e   :  { %v5479_v5 = vpop.permute.xlu0 %5478  ;;  %v5519_v32 = vsel %vm324_vm3, %v5475_v28, %v5477_v42  ;;  %v6054_v39 = vsel %vm765_vm6, %v5595_v60, %v5951_v46 }
 0x42f   :  { %v5520_v21 = vsel %vm324_vm3, %v5477_v42, %v5479_v5  ;;  %v5549_v22 = vsel %vm1750_vm9, %v5519_v32, 0  ;;  %6231 = vmatprep.subr.bf16.mxu1 %v6054_v39 }
 0x430   :  { %v5551_v55 = vsel %vm1750_vm9, %v5520_v21, 0  ;;  %6232 = vmatpush1.bf16.msra.mxu1 %v6051_v48  ;;  %v5904_v57 = vrot.slane %v5549_v22, 4 }
 0x431   :  { %v14660_v28 = vpop.f32.mrb[68].mxu1  ;;  %v5357_v23 = vpop.permute.xlu1 %5356  ;;  %10608 = vmatprep.subr.msk.bf16.mxu1 %vm765_vm6, %v5836_v2  ;;  %v5905_v32 = vrot.slane %v5551_v55, 4 }
 0x432   :  { %v14663_v46 = vpop.f32.mrb[69].mxu1  ;;  %v5359_v42 = vpop.permute.xlu0 %5358  ;;  %v5399_v60 = vsel %vm197_vm4, %v5355_v40, %v5357_v23 }
 0x433   :  { %18431 = vst [vmem:[#allocation34_spill] sm:$0xff] %v14663_v46  ;;  %v5400_v16 = vsel %vm197_vm4, %v5357_v23, %v5359_v42  ;;  %v5429_v39 = vsel %vm1750_vm9, %v5399_v60, 0  ;;  %v5249_v44 = vpop.f32.mrb[70].mxu1 }
 0x434   :  { %6234 = vmatpush1.bf16.msra.mxu1 %v6142_v53  ;;  %v5431_v17 = vsel %vm1750_vm9, %v5400_v16, 0  ;;  %v5985_v21 = vsel %vm765_vm6, %v5429_v39, %v5904_v57  ;;  %v5250_v48 = vpop.f32.mrb[71].mxu1  ;;  %v5597_v16 = vsel %vm1750_vm9, %v14445_v10, 0  ;;  %v5599_v53 = vsel %vm1750_vm9, %v14451_v58, 0 }
 0x435   :  { %v5988_v22 = vsel %vm765_vm6, %v5431_v17, %v5905_v32  ;;  %v5647_v2 = vpop.permute.xlu1 %5646 }
 0x436   :  { %v5649_v46 = vpop.permute.xlu0 %5648  ;;  %6272 = vmatprep.subr.bf16.mxu0 %v5988_v22  ;;  %v5688_v40 = vsel %vm471_vm5, %v5645_v30, %v5647_v2 }
 0x437   :  { %v5689_v55 = vsel %vm471_vm5, %v5647_v2, %v5649_v46  ;;  %v5718_v23 = vsel %vm1750_vm9, %v5688_v40, 0  ;;  %6273 = vmatpush1.bf16.msra.mxu0 %v5985_v21  ;;  %10609 = vmatmul.mubr.msk.bf16.vlgmr.msra.gmra.mrb[72].mxu1 %vm965_vm8, %v14627_v1 }
 0x438   :  { %v5720_v31 = vsel %vm1750_vm9, %v5689_v55, 0  ;;  %v5952_v60 = vrot.slane %v5718_v23, 4  ;;  %6347 = vmatprep.mubr.bf16.mxu1 %v18394_v26 }
 0x439   :  { %v5953_v57 = vrot.slane %v5720_v31, 4  ;;  %v5767_v32 = vpop.permute.xlu1 %5766 }
 0x43a   :  { %v5769_v39 = vpop.permute.xlu0 %5768  ;;  %v5808_v30 = vsel %vm594_vm7, %v5765_v29, %v5767_v32  ;;  %v6057_v44 = vsel %vm765_vm6, %v5597_v16, %v5952_v60 }
 0x43b   :  { %v5809_v17 = vsel %vm594_vm7, %v5767_v32, %v5769_v39  ;;  %v6060_v21 = vsel %vm765_vm6, %v5599_v53, %v5953_v57  ;;  %v5838_v2 = vsel %vm1750_vm9, %v5808_v30, 0 }
 0x43c   :  { %6274 = vmatprep.subr.bf16.mxu0 %v6060_v21  ;;  %v5840_v48 = vsel %vm1750_vm9, %v5809_v17, 0  ;;  %v6146_v23 = vsel %vm765_vm6, %v5838_v2, 0 }
 0x43d   :  { %6275 = vmatpush1.bf16.msra.mxu0 %v6057_v44  ;;  %v5481_v22 = vpop.permute.xlu1 %5480 }
 0x43e   :  { %v5483_v10 = vpop.permute.xlu0 %5482  ;;  %10610 = vmatprep.subr.msk.bf16.mxu0 %vm765_vm6, %v5840_v48  ;;  %v5521_v29 = vsel %vm324_vm3, %v5479_v5, %v5481_v22 }
 0x43f   :  { %v5522_v58 = vsel %vm324_vm3, %v5481_v22, %v5483_v10  ;;  %v5553_v40 = vsel %vm1750_vm9, %v5521_v29, 0 }
 0x440   :  { %v5555_v55 = vsel %vm1750_vm9, %v5522_v58, 0  ;;  %v5906_v60 = vrot.slane %v5553_v40, 4 }
 0x441   :  { %6277 = vmatpush1.bf16.msra.mxu0 %v6146_v23  ;;  %v5361_v31 = vpop.permute.xlu1 %5360  ;;  %v5907_v16 = vrot.slane %v5555_v55, 4  ;;  %v5601_v23 = vsel %vm1750_vm9, %v14462_v7, 0 }
 0x442   :  { %v5363_v57 = vpop.permute.xlu0 %5362  ;;  %v5401_v32 = vsel %vm197_vm4, %v5359_v42, %v5361_v31 }
 0x443   :  { %v5402_v30 = vsel %vm197_vm4, %v5361_v31, %v5363_v57  ;;  %v5433_v53 = vsel %vm1750_vm9, %v5401_v32, 0 }
 0x444   :  { %10611 = vmatmul.mubr.msk.bf16.vlgmr.msra.gmra.mrb[76].mxu0 %vm965_vm8, %v14627_v1  ;;  %v5435_v5 = vsel %vm1750_vm9, %v5402_v30, 0  ;;  %v5991_v44 = vsel %vm765_vm6, %v5433_v53, %v5906_v60 }
 0x445   :  { %v5651_v17 = vpop.permute.xlu1 %5650  ;;  %v5994_v21 = vsel %vm765_vm6, %v5435_v5, %v5907_v16  ;;  %6390 = vmatprep.mubr.bf16.mxu0 %v18394_v26 }
 0x446   :  { %v5653_v48 = vpop.permute.xlu0 %5652  ;;  %v5690_v42 = vsel %vm471_vm5, %v5649_v46, %v5651_v17  ;;  %6315 = vmatprep.subr.bf16.mxu1 %v5994_v21  ;;  %v5603_v46 = vsel %vm1750_vm9, %v14473_v50, 0 }
 0x447   :  { %v5691_v22 = vsel %vm471_vm5, %v5651_v17, %v5653_v48  ;;  %v5722_v2 = vsel %vm1750_vm9, %v5690_v42, 0  ;;  %6316 = vmatpush1.bf16.msra.mxu1 %v5991_v44 }
 0x448   :  { %v5724_v29 = vsel %vm1750_vm9, %v5691_v22, 0  ;;  %v5954_v58 = vrot.slane %v5722_v2, 4 }
 0x449   :  { %v5955_v40 = vrot.slane %v5724_v29, 4  ;;  %v5771_v55 = vpop.permute.xlu1 %5770 }
 0x44a   :  { %v5773_v31 = vpop.permute.xlu0 %5772  ;;  %v5810_v60 = vsel %vm594_vm7, %v5769_v39, %v5771_v55  ;;  %v6063_v32 = vsel %vm765_vm6, %v5601_v23, %v5954_v58 }
 0x44b   :  { %v5811_v16 = vsel %vm594_vm7, %v5771_v55, %v5773_v31  ;;  %v6066_v30 = vsel %vm765_vm6, %v5603_v46, %v5955_v40  ;;  %v5842_v44 = vsel %vm1750_vm9, %v5810_v60, 0 }
 0x44c   :  { %6317 = vmatprep.subr.bf16.mxu1 %v6066_v30  ;;  %v5844_v53 = vsel %vm1750_vm9, %v5811_v16, 0  ;;  %v6150_v42 = vsel %vm765_vm6, %v5842_v44, 0 }
 0x44d   :  { %6318 = vmatpush1.bf16.msra.mxu1 %v6063_v32  ;;  %v5485_v5 = vpop.permute.xlu1 %5484 }
 0x44e   :  { %v5487_v7 = vpop.permute.xlu0 %5486  ;;  %v5523_v17 = vsel %vm324_vm3, %v5483_v10, %v5485_v5  ;;  %10612 = vmatprep.subr.msk.bf16.mxu1 %vm765_vm6, %v5844_v53 }
 0x44f   :  { %v5524_v50 = vsel %vm324_vm3, %v5485_v5, %v5487_v7  ;;  %v5557_v39 = vsel %vm1750_vm9, %v5523_v17, 0 }
 0x450   :  { %v5559_v21 = vsel %vm1750_vm9, %v5524_v50, 0  ;;  %v5908_v2 = vrot.slane %v5557_v39, 4  ;;  %v5605_v39 = vsel %vm1750_vm9, %v14484_v4, 0 }
 0x451   :  { %6320 = vmatpush1.bf16.msra.mxu1 %v6150_v42  ;;  %v5365_v22 = vpop.permute.xlu1 %5364  ;;  %v5909_v40 = vrot.slane %v5559_v21, 4 }
 0x452   :  { %v5367_v29 = vpop.permute.xlu0 %5366  ;;  %v5403_v58 = vsel %vm197_vm4, %v5363_v57, %v5365_v22 }
 0x453   :  { %v5404_v55 = vsel %vm197_vm4, %v5365_v22, %v5367_v29  ;;  %v5437_v10 = vsel %vm1750_vm9, %v5403_v58, 0  ;;  %v5607_v22 = vsel %vm1750_vm9, %v14495_v25, 0 }
 0x454   :  { %10613 = vmatmul.mubr.msk.bf16.vlgmr.msra.gmra.mrb[76].mxu1 %vm965_vm8, %v14627_v1  ;;  %v5439_v23 = vsel %vm1750_vm9, %v5404_v55, 0  ;;  %v5997_v60 = vsel %vm765_vm6, %v5437_v10, %v5908_v2 }
 0x455   :  { %v6000_v46 = vsel %vm765_vm6, %v5439_v23, %v5909_v40  ;;  %v5655_v32 = vpop.permute.xlu1 %5654  ;;  %6433 = vmatprep.mubr.bf16.mxu1 %v18394_v26 }
 0x456   :  { %v5657_v16 = vpop.permute.xlu0 %5656  ;;  %6358 = vmatprep.subr.bf16.mxu0 %v6000_v46  ;;  %v5692_v57 = vsel %vm471_vm5, %v5653_v48, %v5655_v32 }
 0x457   :  { %v5693_v30 = vsel %vm471_vm5, %v5655_v32, %v5657_v16  ;;  %v5726_v53 = vsel %vm1750_vm9, %v5692_v57, 0  ;;  %6359 = vmatpush1.bf16.msra.mxu0 %v5997_v60 }
 0x458   :  { %v5728_v5 = vsel %vm1750_vm9, %v5693_v30, 0  ;;  %v5956_v44 = vrot.slane %v5726_v53, 4 }
 0x459   :  { %v5957_v17 = vrot.slane %v5728_v5, 4  ;;  %v5775_v50 = vpop.permute.xlu1 %5774 }
 0x45a   :  { %v5777_v21 = vpop.permute.xlu0 %5776  ;;  %v5812_v42 = vsel %vm594_vm7, %v5773_v31, %v5775_v50  ;;  %v6069_v48 = vsel %vm765_vm6, %v5605_v39, %v5956_v44 }
 0x45b   :  { %v5813_v2 = vsel %vm594_vm7, %v5775_v50, %v5777_v21  ;;  %v6072_v58 = vsel %vm765_vm6, %v5607_v22, %v5957_v17  ;;  %v5846_v10 = vsel %vm1750_vm9, %v5812_v42, 0 }
 0x45c   :  { %6360 = vmatprep.subr.bf16.mxu0 %v6072_v58  ;;  %v5848_v40 = vsel %vm1750_vm9, %v5813_v2, 0  ;;  %v6154_v46 = vsel %vm765_vm6, %v5846_v10, 0 }
 0x45d   :  { %6361 = vmatpush1.bf16.msra.mxu0 %v6069_v48  ;;  %v5489_v55 = vpop.permute.xlu1 %5488 }
 0x45e   :  { %v5491_v4 = vpop.permute.xlu0 %5490  ;;  %10614 = vmatprep.subr.msk.bf16.mxu0 %vm765_vm6, %v5848_v40  ;;  %v5525_v31 = vsel %vm324_vm3, %v5487_v7, %v5489_v55 }
 0x45f   :  { %v5526_v25 = vsel %vm324_vm3, %v5489_v55, %v5491_v4  ;;  %v5561_v23 = vsel %vm1750_vm9, %v5525_v31, 0  ;;  %v5609_v31 = vsel %vm1750_vm9, %v14506_v43, 0 }
 0x460   :  { %v5563_v60 = vsel %vm1750_vm9, %v5526_v25, 0  ;;  %v5910_v57 = vrot.slane %v5561_v23, 4 }
 0x461   :  { %6363 = vmatpush1.bf16.msra.mxu0 %v6154_v46  ;;  %v5369_v32 = vpop.permute.xlu1 %5368  ;;  %v5911_v5 = vrot.slane %v5563_v60, 4 }
 0x462   :  { %v5371_v30 = vpop.permute.xlu0 %5370  ;;  %v5405_v53 = vsel %vm197_vm4, %v5367_v29, %v5369_v32 }
 0x463   :  { %v5406_v44 = vsel %vm197_vm4, %v5369_v32, %v5371_v30  ;;  %v5441_v17 = vsel %vm1750_vm9, %v5405_v53, 0 }
 0x464   :  { %10615 = vmatmul.mubr.msk.bf16.vlgmr.msra.gmra.mrb[80].mxu0 %vm965_vm8, %v14627_v1  ;;  %v5443_v7 = vsel %vm1750_vm9, %v5406_v44, 0  ;;  %v6003_v50 = vsel %vm765_vm6, %v5441_v17, %v5910_v57 }
 0x465   :  { %v5659_v39 = vpop.permute.xlu1 %5658  ;;  %v6006_v42 = vsel %vm765_vm6, %v5443_v7, %v5911_v5  ;;  %6476 = vmatprep.mubr.bf16.mxu0 %v18394_v26 }
 0x466   :  { %v5661_v22 = vpop.permute.xlu0 %5660  ;;  %v5694_v29 = vsel %vm471_vm5, %v5657_v16, %v5659_v39  ;;  %6401 = vmatprep.subr.bf16.mxu1 %v6006_v42  ;;  %v5611_v16 = vsel %vm1750_vm9, %v14517_v59, 0 }
 0x467   :  { %v5695_v48 = vsel %vm471_vm5, %v5659_v39, %v5661_v22  ;;  %v5730_v2 = vsel %vm1750_vm9, %v5694_v29, 0  ;;  %6402 = vmatpush1.bf16.msra.mxu1 %v6003_v50 }
 0x468   :  { %v5732_v58 = vsel %vm1750_vm9, %v5695_v48, 0  ;;  %v5958_v40 = vrot.slane %v5730_v2, 4 }
 0x469   :  { %v5959_v55 = vrot.slane %v5732_v58, 4  ;;  %v5779_v10 = vpop.permute.xlu1 %5778 }
 0x46a   :  { %v14768_v25 = vpop.permute.xlu0 %5780  ;;  %v5814_v23 = vsel %vm594_vm7, %v5777_v21, %v5779_v10  ;;  %v6075_v60 = vsel %vm765_vm6, %v5609_v31, %v5958_v40 }
 0x46b   :  { %v5815_v46 = vsel %vm594_vm7, %v5779_v10, %v14768_v25  ;;  %v6078_v32 = vsel %vm765_vm6, %v5611_v16, %v5959_v55  ;;  %v5850_v43 = vsel %vm1750_vm9, %v5814_v23, 0 }
 0x46c   :  { %6403 = vmatprep.subr.bf16.mxu1 %v6078_v32  ;;  %v5852_v57 = vsel %vm1750_vm9, %v5815_v46, 0  ;;  %v6158_v7 = vsel %vm765_vm6, %v5850_v43, 0 }
 0x46d   :  { %6404 = vmatpush1.bf16.msra.mxu1 %v6075_v60  ;;  %v5493_v53 = vpop.permute.xlu1 %5492 }
 0x46e   :  { %v5495_v5 = vpop.permute.xlu0 %5494  ;;  %v5527_v21 = vsel %vm324_vm3, %v5491_v4, %v5493_v53  ;;  %10616 = vmatprep.subr.msk.bf16.mxu1 %vm765_vm6, %v5852_v57 }
 0x46f   :  { %v5528_v59 = vsel %vm324_vm3, %v5493_v53, %v5495_v5  ;;  %v5565_v44 = vsel %vm1750_vm9, %v5527_v21, 0  ;;  %v5613_v53 = vsel %vm1750_vm9, %v14528_v15, 0 }
 0x470   :  { %v5567_v17 = vsel %vm1750_vm9, %v5528_v59, 0  ;;  %v5912_v39 = vrot.slane %v5565_v44, 4 }
 0x471   :  { %6406 = vmatpush1.bf16.msra.mxu1 %v6158_v7  ;;  %v5373_v50 = vpop.permute.xlu1 %5372  ;;  %v5913_v48 = vrot.slane %v5567_v17, 4 }
 0x472   :  { %v5375_v42 = vpop.permute.xlu0 %5374  ;;  %v5407_v29 = vsel %vm197_vm4, %v5371_v30, %v5373_v50 }
 0x473   :  { %v5408_v2 = vsel %vm197_vm4, %v5373_v50, %v5375_v42  ;;  %v5445_v4 = vsel %vm1750_vm9, %v5407_v29, 0 }
 0x474   :  { %10617 = vmatmul.mubr.msk.bf16.vlgmr.msra.gmra.mrb[80].mxu1 %vm965_vm8, %v14627_v1  ;;  %v5447_v58 = vsel %vm1750_vm9, %v5408_v2, 0  ;;  %v6009_v40 = vsel %vm765_vm6, %v5445_v4, %v5912_v39 }
 0x475   :  { %v6012_v55 = vsel %vm765_vm6, %v5447_v58, %v5913_v48  ;;  %v5663_v10 = vpop.permute.xlu1 %5662  ;;  %6519 = vmatprep.mubr.bf16.mxu1 %v18394_v26 }
 0x476   :  { %v5665_v31 = vpop.permute.xlu0 %5664  ;;  %6444 = vmatprep.subr.bf16.mxu0 %v6012_v55  ;;  %v5696_v30 = vsel %vm471_vm5, %v5661_v22, %v5663_v10  ;;  %v5615_v22 = vsel %vm1750_vm9, %v14539_v56, 0 }
 0x477   :  { %v5697_v23 = vsel %vm471_vm5, %v5663_v10, %v5665_v31  ;;  %v5734_v16 = vsel %vm1750_vm9, %v5696_v30, 0  ;;  %6445 = vmatpush1.bf16.msra.mxu0 %v6009_v40 }
 0x478   :  { %v5736_v60 = vsel %vm1750_vm9, %v5697_v23, 0  ;;  %v5960_v46 = vrot.slane %v5734_v16, 4 }
 0x479   :  { %v5961_v32 = vrot.slane %v5736_v60, 4  ;;  %v5497_v57 = vpop.permute.xlu1 %5496 }
 0x47a   :  { %v14800_v43 = vpop.permute.xlu0 %5498  ;;  %v5529_v21 = vsel %vm324_vm3, %v5495_v5, %v5497_v57  ;;  %v6081_v59 = vsel %vm765_vm6, %v5613_v53, %v5960_v46 }
 0x47b   :  { %v5530_v44 = vsel %vm324_vm3, %v5497_v57, %v14800_v43  ;;  %v5569_v17 = vsel %vm1750_vm9, %v5529_v21, 0  ;;  %v6084_v7 = vsel %vm765_vm6, %v5615_v22, %v5961_v32  ;;  %v5617_v57 = vsel %vm1750_vm9, %v14551_v49, 0 }
 0x47c   :  { %v5571_v50 = vsel %vm1750_vm9, %v5530_v44, 0  ;;  %6446 = vmatprep.subr.bf16.mxu0 %v6084_v7  ;;  %v5914_v39 = vrot.slane %v5569_v17, 4 }
 0x47d   :  { %6447 = vmatpush1.bf16.msra.mxu0 %v6081_v59  ;;  %v5377_v15 = vpop.permute.xlu1 %5376  ;;  %v5915_v56 = vrot.slane %v5571_v50, 4 }
 0x47e   :  { %v14811_v29 = vpop.permute.xlu0 %5378  ;;  %v5409_v5 = vsel %vm197_vm4, %v5375_v42, %v5377_v15 }
 0x47f   :  { %v5410_v48 = vsel %vm197_vm4, %v5377_v15, %v14811_v29  ;;  %v5449_v2 = vsel %vm1750_vm9, %v5409_v5, 0 }
 0x480   :  { %v5451_v4 = vsel %vm1750_vm9, %v5410_v48, 0  ;;  %v6015_v58 = vsel %vm765_vm6, %v5449_v2, %v5914_v39  ;;  %v14857_v48 = vadd.f32 %v14553_v18, %v14389_v13 }
 0x481   :  { %v5667_v40 = vpop.permute.xlu1 %5666  ;;  %v6018_v55 = vsel %vm765_vm6, %v5451_v4, %v5915_v56 }
 0x482   :  { %v14820_v10 = vpop.permute.xlu0 %5668  ;;  %v5698_v30 = vsel %vm471_vm5, %v5665_v31, %v5667_v40  ;;  %6487 = vmatprep.subr.bf16.mxu1 %v6018_v55  ;;  %v5619_v31 = vsel %vm1750_vm9, %v14559_v14, 0 }
 0x483   :  { %v5699_v42 = vsel %vm471_vm5, %v5667_v40, %v14820_v10  ;;  %v5738_v23 = vsel %vm1750_vm9, %v5698_v30, 0  ;;  %6488 = vmatpush1.bf16.msra.mxu1 %v6015_v58 }
 0x484   :  { %v5740_v16 = vsel %vm1750_vm9, %v5699_v42, 0  ;;  %v5962_v60 = vrot.slane %v5738_v23, 4 }
 0x485   :  { %v5963_v46 = vrot.slane %v5740_v16, 4  ;;  %v5783_v32 = vpop.permute.xlu1 %5782 }
 0x486   :  { %v5785_v53 = vpop.permute.xlu0 %5784  ;;  %v5816_v21 = vsel %vm594_vm7, %v14768_v25, %v5783_v32  ;;  %v6087_v22 = vsel %vm765_vm6, %v5617_v57, %v5962_v60 }
 0x487   :  { %v5817_v59 = vsel %vm594_vm7, %v5783_v32, %v5785_v53  ;;  %v6090_v44 = vsel %vm765_vm6, %v5619_v31, %v5963_v46  ;;  %v5854_v17 = vsel %vm1750_vm9, %v5816_v21, 0 }
 0x488   :  { %6489 = vmatprep.subr.bf16.mxu1 %v6090_v44  ;;  %v5856_v7 = vsel %vm1750_vm9, %v5817_v59, 0  ;;  %v6162_v49 = vsel %vm765_vm6, %v5854_v17, 0 }
 0x489   :  { %10618 = vmatprep.subr.msk.bf16.mxu0 %vm765_vm6, %v5856_v7  ;;  %6490 = vmatpush1.bf16.msra.mxu1 %v6087_v22  ;;  %v5787_v25 = vpop.permute.xlu1 %5786 }
 0x48a   :  { %v14840_v50 = vpop.permute.xlu0 %5788  ;;  %6449 = vmatpush1.bf16.msra.mxu0 %v6162_v49  ;;  %v5818_v14 = vsel %vm594_vm7, %v5785_v53, %v5787_v25 }
 0x48b   :  { %v5819_v15 = vsel %vm594_vm7, %v5787_v25, %v14840_v50  ;;  %v5858_v39 = vsel %vm1750_vm9, %v5818_v14, 0 }
 0x48c   :  { %v5860_v5 = vsel %vm1750_vm9, %v5819_v15, 0  ;;  %v6166_v56 = vsel %vm765_vm6, %v5858_v39, 0 }
 0x48d   :  { %10619 = vmatmul.mubr.msk.bf16.vlgmr.msra.gmra.mrb[84].mxu0 %vm965_vm8, %v14627_v1  ;;  %10620 = vmatprep.subr.msk.bf16.mxu1 %vm765_vm6, %v5860_v5 }
 0x48e   :  { %6492 = vmatpush1.bf16.msra.mxu1 %v6166_v56  ;;  %6562 = vmatprep.mubr.bf16.mxu0 %v18394_v26 }
 0x491   :  { %10621 = vmatmul.mubr.msk.bf16.vlgmr.msra.gmra.mrb[84].mxu1 %vm965_vm8, %v14627_v1 }
 0x492   :  { %6605 = vmatprep.mubr.bf16.mxu1 %v18394_v26 }
 0x49a   :  { %v14859_v2 = vpop.permute.xlu1 %2452 }
 0x49b   :  { %v14861_v4 = vpop.permute.xlu0 %2457  ;;  %v2553_v58 = vadd.f32 %v14046_v54, %v14859_v2  ;;  %v2551_v40 = vadd.f32 %v14041_v19, %v14859_v2  ;;  %v2811_v55 = vadd.f32 %v14310_v6, %v14859_v2  ;;  %v2809_v1 = vadd.f32 %v14306_v24, %v14859_v2 }
 0x49c   :  { %v2557_v18 = vadd.f32 %v14054_v9, %v14861_v4  ;;  %v2555_v30 = vadd.f32 %v14050_v52, %v14861_v4  ;;  %v2815_v42 = vadd.f32 %v14320_v3, %v14861_v4  ;;  %v2813_v54 = vadd.f32 %v14316_v0, %v14861_v4 }
 0x49d   :  { %v3033_v23 = vmax.f32 %v2553_v58, 0.0  ;;  %v3032_v19 = vmax.f32 %v2551_v40, 0.0  ;;  %v3045_v16 = vmax.f32 %v2811_v55, 0.0  ;;  %v3044_v60 = vmax.f32 %v2809_v1, 0.0 }
 0x49e   :  { %v3057_v6 = vmax.f32 %v2557_v18, 0.0  ;;  %v3056_v46 = vmax.f32 %v2555_v30, 0.0  ;;  %v3069_v32 = vmax.f32 %v2815_v42, 0.0  ;;  %v3068_v24 = vmax.f32 %v2813_v54, 0.0 }
 0x49f   :  { %v2594_v9 = vadd.f32 %v14056_v47, %v14859_v2  ;;  %v2598_v52 = vadd.f32 %v14065_v63, %v14861_v4  ;;  %v2768_v3 = vadd.f32 %v14249_v35, %v14859_v2  ;;  %v2772_v0 = vadd.f32 %v14260_v45, %v14861_v4 }
 0x4a0   :  { %v14887_v57 = vpack.c.bf16 %v3057_v6, %v3033_v23  ;;  %v14889_v53 = vpack.c.bf16 %v3056_v46, %v3032_v19  ;;  %v14891_v21 = vpack.c.bf16 %v3069_v32, %v3045_v16  ;;  %v14893_v31 = vpack.c.bf16 %v3068_v24, %v3044_v60  ;;  %v18442_v6 = vld [vmem:[#allocation7_spill] sm:$0xff]  ;;  %v18443_v24 = vld [vmem:[#allocation17_spill] sm:$0xff] }
 0x4a1   :  { %v3034_v22 = vmax.f32 %v2594_v9, 0.0  ;;  %v3058_v59 = vmax.f32 %v2598_v52, 0.0  ;;  %v3043_v47 = vmax.f32 %v2768_v3, 0.0  ;;  %v3067_v44 = vmax.f32 %v2772_v0, 0.0  ;;  %v18444_v9 = vld [vmem:[#allocation19_spill] sm:$0xff] }
 0x4a2   :  { %18432 = vst [vmem:[#allocation35_spill] sm:$0xff] %v14889_v53  ;;  %18433 = vst [vmem:[#allocation36_spill] sm:$0xff] %v14893_v31  ;;  %v5269_v63 = vmax.f32 %v14857_v48, 0.0  ;;  %3178 = vrot.lane.b32.xlu0 %v14887_v57, %s11728_s29  ;;  %3176 = vrot.lane.b32.xlu1 %v14889_v53, %s11728_s29  ;;  %v2852_v35 = vadd.f32 %v14347_v8, %v14859_v2  ;;  %v2856_v45 = vadd.f32 %v14356_v36, %v14861_v4 }
 0x4a3   :  { %v2596_v17 = vadd.f32 %v14061_v27, %v14859_v2  ;;  %v14906_v7 = vpack.c.bf16 %v3058_v59, %v3034_v22  ;;  %v14908_v49 = vpack.c.bf16 %v3067_v44, %v3043_v47  ;;  %v2600_v25 = vadd.f32 %v14068_v12, %v14861_v4  ;;  %v18445_v59 = vld [vmem:[#allocation6_spill] sm:$0xff] }
 0x4a4   :  { %v2854_v14 = vadd.f32 %v14350_v20, %v14859_v2  ;;  %v3046_v15 = vmax.f32 %v2852_v35, 0.0  ;;  %v3070_v39 = vmax.f32 %v2856_v45, 0.0  ;;  %v2858_v8 = vadd.f32 %v14358_v38, %v14861_v4 }
 0x4a5   :  { %18434 = vst [vmem:[#allocation37_spill] sm:$0xff] %v14906_v7  ;;  %18435 = vst [vmem:[#allocation38_spill] sm:$0xff] %v14908_v49  ;;  %v3035_v5 = vmax.f32 %v2596_v17, 0.0  ;;  %v3059_v36 = vmax.f32 %v2600_v25, 0.0  ;;  %v2895_v27 = vadd.f32 %v14365_v41, %v14859_v2  ;;  %v2899_v58 = vadd.f32 %v14369_v34, %v14861_v4  ;;  %v18447_v17 = vld [vmem:[#allocation11_spill] sm:$0xff] }
 0x4a6   :  { %v3047_v56 = vmax.f32 %v2854_v14, 0.0  ;;  %3202 = vrot.lane.b32.xlu0 %v14891_v21, %s11728_s29  ;;  %3200 = vrot.lane.b32.xlu1 %v14893_v31, %s11728_s29  ;;  %v14924_v12 = vpack.c.bf16 %v3070_v39, %v3046_v15  ;;  %v3071_v20 = vmax.f32 %v2858_v8, 0.0  ;;  %v2637_v38 = vadd.f32 %v14113_v61, %v14859_v2  ;;  %v18449_v39 = vld [vmem:[#allocation18_spill] sm:$0xff]  ;;  %v18450_v8 = vld [vmem:[#allocation20_spill] sm:$0xff] }
 0x4a7   :  { %v2641_v40 = vadd.f32 %v14123_v33, %v14861_v4  ;;  %v14930_v55 = vpack.c.bf16 %v3059_v36, %v3035_v5  ;;  %v3048_v41 = vmax.f32 %v2895_v27, 0.0  ;;  %v3072_v1 = vmax.f32 %v2899_v58, 0.0  ;;  %v18452_v58 = vld [vmem:[#allocation13_spill] sm:$0xff] }
 0x4a8   :  { %18436 = vst [vmem:[#allocation39_spill] sm:$0xff] %v14924_v12  ;;  %v2639_v34 = vadd.f32 %v14119_v62, %v14859_v2  ;;  %v14934_v18 = vpack.c.bf16 %v3071_v20, %v3047_v56  ;;  %v3036_v30 = vmax.f32 %v2637_v38, 0.0  ;;  %v2643_v54 = vadd.f32 %v14128_v11, %v14861_v4  ;;  %v18441_v11 = vld [vmem:[#allocation9_spill] sm:$0xff]  ;;  %v18453_v38 = vld [vmem:[#allocation10_spill] sm:$0xff] }
 0x4a9   :  { %18437 = vst [vmem:[#allocation40_spill] sm:$0xff] %v14930_v55  ;;  %v3060_v42 = vmax.f32 %v2641_v40, 0.0  ;;  %v14938_v23 = vpack.c.bf16 %v3072_v1, %v3048_v41  ;;  %v2897_v33 = vadd.f32 %v14367_v37, %v14859_v2  ;;  %v2901_v19 = vadd.f32 %v14371_v51, %v14861_v4 }
 0x4aa   :  { %18438 = vst [vmem:[#allocation41_spill] sm:$0xff] %v14934_v18  ;;  %v3037_v61 = vmax.f32 %v2639_v34, 0.0  ;;  %3301 = vrot.lane.b32.xlu0 %v14906_v7, %s11729_s11  ;;  %3299 = vrot.lane.b32.xlu1 %v14887_v57, %s11729_s11  ;;  %v3061_v16 = vmax.f32 %v2643_v54, 0.0  ;;  %v2680_v60 = vadd.f32 %v18441_v11, %v14859_v2  ;;  %v2684_v46 = vadd.f32 %v18442_v6, %v14861_v4  ;;  %v18454_v34 = vld [vmem:[#allocation21_spill] sm:$0xff] }
 0x4ab   :  { %18439 = vst [vmem:[#allocation42_spill] sm:$0xff] %v14938_v23  ;;  %v14948_v62 = vpack.c.bf16 %v3060_v42, %v3036_v30  ;;  %v3049_v32 = vmax.f32 %v2897_v33, 0.0  ;;  %v3073_v37 = vmax.f32 %v2901_v19, 0.0  ;;  %v2938_v51 = vadd.f32 %v18443_v24, %v14859_v2  ;;  %v18455_v42 = vld [vmem:[#allocation23_spill] sm:$0xff] }
 0x4ac   :  { %v2942_v52 = vadd.f32 %v18444_v9, %v14861_v4  ;;  %v14958_v3 = vpack.c.bf16 %v3061_v16, %v3037_v61  ;;  %v3038_v0 = vmax.f32 %v2680_v60, 0.0  ;;  %v3062_v22 = vmax.f32 %v2684_v46, 0.0  ;;  %v18457_v16 = vld [vmem:[#allocation8_spill] sm:$0xff]  ;;  %v18461_v9 = vld [vmem:[#allocation22_spill] sm:$0xff] }
 0x4ad   :  { %18440 = vst [vmem:[#allocation43_spill] sm:$0xff] %v14948_v62  ;;  %v2682_v47 = vadd.f32 %v18445_v59, %v14859_v2  ;;  %v14962_v44 = vpack.c.bf16 %v3073_v37, %v3049_v32  ;;  %v3050_v35 = vmax.f32 %v2938_v51, 0.0  ;;  %v2686_v25 = vadd.f32 %v18447_v17, %v14861_v4  ;;  %v18459_v32 = vld [vmem:[#allocation12_spill] sm:$0xff] }
 0x4ae   :  { %v3074_v45 = vmax.f32 %v2942_v52, 0.0  ;;  %3297 = vrot.lane.b32.xlu0 %v14889_v53, %s11729_s11  ;;  %3198 = vrot.lane.b32.xlu1 %v14908_v49, %s11728_s29  ;;  %v14970_v14 = vpack.c.bf16 %v3062_v22, %v3038_v0  ;;  %v2940_v5 = vadd.f32 %v18449_v39, %v14859_v2  ;;  %v2944_v36 = vadd.f32 %v18450_v8, %v14861_v4  ;;  %v18462_v0 = vld [vmem:[#allocation24_spill] sm:$0xff] }
 0x4af   :  { %18446 = vst [vmem:[#allocation9_spill] sm:$0xff] %v14962_v44  ;;  %v3039_v15 = vmax.f32 %v2682_v47, 0.0  ;;  %v3063_v27 = vmax.f32 %v2686_v25, 0.0  ;;  %v2723_v20 = vadd.f32 %v18452_v58, %v14859_v2  ;;  %v2727_v40 = vadd.f32 %v18453_v38, %v14861_v4  ;;  %v18465_v17 = vld [vmem:[#allocation16_spill] sm:$0xff] }
 0x4b0   :  { %18448 = vst [vmem:[#allocation7_spill] sm:$0xff] %v14970_v14  ;;  %v14976_v56 = vpack.c.bf16 %v3074_v45, %v3050_v35  ;;  %v3051_v41 = vmax.f32 %v2940_v5, 0.0  ;;  %v3075_v1 = vmax.f32 %v2944_v36, 0.0  ;;  %v2981_v30 = vadd.f32 %v18454_v34, %v14859_v2  ;;  %v18464_v35 = vld [vmem:[#allocation15_spill] sm:$0xff]  ;;  %v18466_v5 = vld [vmem:[#allocation25_spill] sm:$0xff] }
 0x4b1   :  { %v2985_v54 = vadd.f32 %v18455_v42, %v14861_v4  ;;  %v14986_v61 = vpack.c.bf16 %v3063_v27, %v3039_v15  ;;  %v3040_v33 = vmax.f32 %v2723_v20, 0.0  ;;  %v3064_v19 = vmax.f32 %v2727_v40, 0.0  ;;  %v18467_v36 = vld [vmem:[#allocation27_spill] sm:$0xff]  ;;  %v18469_v40 = vld [vmem:[#allocation26_spill] sm:$0xff]  ;;  %v18471_v42 = vld [vmem:[#allocation28_spill] sm:$0xff] }
 0x4b2   :  { %18451 = vst [vmem:[#allocation17_spill] sm:$0xff] %v14976_v56  ;;  %v2725_v11 = vadd.f32 %v18457_v16, %v14859_v2  ;;  %3325 = vrot.lane.b32.xlu0 %v14924_v12, %s11729_s11  ;;  %3323 = vrot.lane.b32.xlu1 %v14891_v21, %s11729_s11  ;;  %v14994_v60 = vpack.c.bf16 %v3075_v1, %v3051_v41  ;;  %v3052_v6 = vmax.f32 %v2981_v30, 0.0 }
 0x4b3   :  { %18456 = vst [vmem:[#allocation19_spill] sm:$0xff] %v14986_v61  ;;  %v3076_v46 = vmax.f32 %v2985_v54, 0.0  ;;  %v2729_v37 = vadd.f32 %v18459_v32, %v14861_v4  ;;  %v14998_v24 = vpack.c.bf16 %v3064_v19, %v3040_v33  ;;  %v2983_v52 = vadd.f32 %v18461_v9, %v14859_v2  ;;  %v18472_v19 = vld [vmem:[#allocation30_spill] sm:$0xff]  ;;  %v18475_v32 = vld [vmem:[#allocation29_spill] sm:$0xff] }
 0x4b4   :  { %18458 = vst [vmem:[#allocation6_spill] sm:$0xff] %v14994_v60  ;;  %v3041_v51 = vmax.f32 %v2725_v11, 0.0  ;;  %v2987_v22 = vadd.f32 %v18462_v0, %v14861_v4  ;;  %v2766_v45 = vadd.f32 %v18464_v35, %v14859_v2  ;;  %v2770_v25 = vadd.f32 %v18465_v17, %v14861_v4  ;;  %v18479_v35 = vld [vmem:[#allocation32_spill] sm:$0xff] }
 0x4b5   :  { %18460 = vst [vmem:[#allocation11_spill] sm:$0xff] %v14998_v24  ;;  %v15004_v59 = vpack.c.bf16 %v3076_v46, %v3052_v6  ;;  %v3065_v47 = vmax.f32 %v2729_v37, 0.0  ;;  %v3053_v15 = vmax.f32 %v2983_v52, 0.0  ;;  %v3024_v8 = vadd.f32 %v18466_v5, %v14859_v2  ;;  %v18478_v52 = vld [vmem:[#allocation31_spill] sm:$0xff] }
 0x4b6   :  { %v3077_v39 = vmax.f32 %v2987_v22, 0.0  ;;  %v3028_v27 = vadd.f32 %v18467_v36, %v14861_v4  ;;  %3422 = vrot.lane.b32.xlu0 %v14906_v7, %s11731_s16  ;;  %3420 = vrot.lane.b32.xlu1 %v14887_v57, %s11731_s16  ;;  %v3042_v20 = vmax.f32 %v2766_v45, 0.0  ;;  %v3066_v38 = vmax.f32 %v2770_v25, 0.0  ;;  %v15115_v25 = vpop.permute.xlu1 %6122  ;;  %v15120_v36 = vpop.permute.xlu0 %6127 }
 0x4b7   :  { %18463 = vst [vmem:[#allocation18_spill] sm:$0xff] %v15004_v59  ;;  %v15018_v58 = vpack.c.bf16 %v3065_v47, %v3041_v51  ;;  %v3026_v41 = vadd.f32 %v18469_v40, %v14859_v2  ;;  %v3054_v34 = vmax.f32 %v3024_v8, 0.0  ;;  %v3030_v54 = vadd.f32 %v18471_v42, %v14861_v4  ;;  %18480 = vst [vmem:[#allocation8_spill] sm:$0xff] %v15115_v25 }
 0x4b8   :  { %v15022_v1 = vpack.c.bf16 %v3077_v39, %v3053_v15  ;;  %v3078_v30 = vmax.f32 %v3028_v27, 0.0  ;;  %v15029_v33 = vpack.c.bf16 %v5269_v63, %v5269_v63  ;;  %v5164_v16 = vadd.f32 %v18472_v19, %v14389_v13  ;;  %18481 = vst [vmem:[#allocation12_spill] sm:$0xff] %v15120_v36 }
 0x4b9   :  { %18468 = vst [vmem:[#allocation20_spill] sm:$0xff] %v15018_v58  ;;  %v15033_v11 = vpack.c.bf16 %v3066_v38, %v3042_v20  ;;  %v3055_v6 = vmax.f32 %v3026_v41, 0.0  ;;  %v3079_v2 = vmax.f32 %v3030_v54, 0.0  ;;  %v5166_v0 = vadd.f32 %v18478_v52, %v14389_v13 }
 0x4ba   :  { %18470 = vst [vmem:[#allocation13_spill] sm:$0xff] %v15022_v1  ;;  %v15035_v46 = vpack.c.bf16 %v3078_v30, %v3054_v34  ;;  %5502 = vrot.lane.b32.xlu0 %v15029_v33, %s11728_s29  ;;  %5500 = vrot.lane.b32.xlu1 %v18475_v32, %s11728_s29  ;;  %v5270_v37 = vmax.f32 %v5164_v16, 0.0  ;;  %v5205_v45 = vadd.f32 %v18479_v35, %v14389_v13  ;;  %v18482_v34 = vld [vmem:[#allocation33_spill] sm:$0xff] }
 0x4bb   :  { %18473 = vst [vmem:[#allocation10_spill] sm:$0xff] %v15033_v11  ;;  %v3103_v48 = vsel %vm76_vm10, %v3055_v6, 0.0  ;;  %v3127_v63 = vsel %vm76_vm10, %v3079_v2, 0.0  ;;  %v5271_v22 = vmax.f32 %v5166_v0, 0.0  ;;  %v5207_v30 = vadd.f32 %v18482_v34, %v14389_v13  ;;  %v18483_v0 = vld [vmem:[#allocation34_spill] sm:$0xff] }
 0x4bc   :  { %18474 = vst [vmem:[#allocation21_spill] sm:$0xff] %v15035_v46  ;;  %v15045_v51 = vpack.c.bf16 %v3127_v63, %v3103_v48  ;;  %v15051_v9 = vpack.c.bf16 %v5270_v37, %v5270_v37  ;;  %v5272_v17 = vmax.f32 %v5205_v45, 0.0  ;;  %v5246_v37 = vadd.f32 %v14660_v28, %v14389_v13 }
 0x4bd   :  { %v15103_v47 = vpack.c.bf16 %v5271_v22, %v5271_v22  ;;  %v5273_v48 = vmax.f32 %v5207_v30, 0.0  ;;  %v5248_v22 = vadd.f32 %v18483_v0, %v14389_v13 }
 0x4be   :  { %18477 = vst [vmem:[#allocation23_spill] sm:$0xff] %v15045_v51  ;;  %5382 = vrot.lane.b32.xlu0 %v15029_v33, %s11727_s28  ;;  %5380 = vrot.lane.b32.xlu1 %v18475_v32, %s11727_s28  ;;  %v15117_v39 = vpack.c.bf16 %v5272_v17, %v5272_v17  ;;  %v5274_v52 = vmax.f32 %v5246_v37, 0.0 }
 0x4bf   :  { %v15143_v63 = vpack.c.bf16 %v5273_v48, %v5273_v48 }
 0x4c0   :  { %v15158_v17 = vpack.c.bf16 %v5274_v52, %v5274_v52 }
 0x4c2   :  { %5672 = vrot.lane.b32.xlu0 %v15051_v9, %s11729_s11  ;;  %5670 = vrot.lane.b32.xlu1 %v15029_v33, %s11729_s11 }
 0x4c6   :  { %5792 = vrot.lane.b32.xlu0 %v15051_v9, %s11731_s16  ;;  %3321 = vrot.lane.b32.xlu1 %v14893_v31, %s11729_s11 }
 0x4ca   :  { %3418 = vrot.lane.b32.xlu0 %v14889_v53, %s11731_s16  ;;  %5790 = vrot.lane.b32.xlu1 %v15029_v33, %s11731_s16 }
 0x4ce   :  { %3446 = vrot.lane.b32.xlu0 %v14924_v12, %s11731_s16  ;;  %3444 = vrot.lane.b32.xlu1 %v14891_v21, %s11731_s16 }
 0x4d2   :  { %3543 = vrot.lane.b32.xlu0 %v14906_v7, %s11732_s22  ;;  %3541 = vrot.lane.b32.xlu1 %v14887_v57, %s11732_s22 }
 0x4d6   :  { %3539 = vrot.lane.b32.xlu0 %v14889_v53, %s11732_s22  ;;  %3442 = vrot.lane.b32.xlu1 %v14893_v31, %s11731_s16 }
 0x4da   :  { %3567 = vrot.lane.b32.xlu0 %v14924_v12, %s11732_s22  ;;  %3565 = vrot.lane.b32.xlu1 %v14891_v21, %s11732_s22 }
 0x4de   :  { %3666 = vrot.lane.b32.xlu0 %v14906_v7, %s11733_s23  ;;  %3664 = vrot.lane.b32.xlu1 %v14887_v57, %s11733_s23 }
 0x4e2   :  { %3662 = vrot.lane.b32.xlu0 %v14889_v53, %s11733_s23  ;;  %3563 = vrot.lane.b32.xlu1 %v14893_v31, %s11732_s22 }
 0x4e6   :  { %3690 = vrot.lane.b32.xlu0 %v14924_v12, %s11733_s23  ;;  %3688 = vrot.lane.b32.xlu1 %v14891_v21, %s11733_s23 }
 0x4ea   :  { %3180 = vrot.lane.b32.xlu0 %v14906_v7, %s11728_s29  ;;  %3686 = vrot.lane.b32.xlu1 %v14893_v31, %s11733_s23 }
 0x4ee   :  { %3204 = vrot.lane.b32.xlu0 %v14924_v12, %s11728_s29  ;;  %3182 = vrot.lane.b32.xlu1 %v14930_v55, %s11728_s29 }
 0x4f2   :  { %5506 = vrot.lane.b32.xlu0 %v15103_v47, %s11728_s29  ;;  %3206 = vrot.lane.b32.xlu1 %v14934_v18, %s11728_s29 }
 0x4f6   :  { %5386 = vrot.lane.b32.xlu0 %v15103_v47, %s11727_s28  ;;  %5504 = vrot.lane.b32.xlu1 %v15051_v9, %s11728_s29 }
 0x4f7   :  { %v6220_v15 = vpop.f32.mrb[72].mxu0 }
 0x4f8   :  { %v6221_v5 = vadd.f32 %v6220_v15, %v15115_v25  ;;  %v6222_v8 = vpop.f32.mrb[73].mxu0 }
 0x4f9   :  { %v6223_v27 = vadd.f32 %v6222_v8, %v15115_v25  ;;  %v6224_v20 = vpop.f32.mrb[74].mxu0  ;;  %v5275_v8 = vmax.f32 %v5248_v22, 0.0 }
 0x4fa   :  { %v6225_v38 = vadd.f32 %v6224_v20, %v15120_v36  ;;  %v6226_v40 = vpop.f32.mrb[75].mxu0  ;;  %5676 = vrot.lane.b32.xlu0 %v15117_v39, %s11729_s11  ;;  %5384 = vrot.lane.b32.xlu1 %v15051_v9, %s11727_s28  ;;  %v6702_v42 = vmax.f32 %v6221_v5, 0.0 }
 0x4fb   :  { %v6227_v41 = vadd.f32 %v6226_v40, %v15120_v36  ;;  %v6703_v19 = vmax.f32 %v6223_v27, 0.0  ;;  %v5299_v30 = vsel %vm76_vm10, %v5275_v8, 0.0 }
 0x4fc   :  { %v6726_v54 = vmax.f32 %v6225_v38, 0.0 }
 0x4fd   :  { %v6727_v16 = vmax.f32 %v6227_v41, 0.0 }
 0x4fe   :  { %v15131_v6 = vpack.c.bf16 %v6726_v54, %v6702_v42  ;;  %5796 = vrot.lane.b32.xlu0 %v15117_v39, %s11731_s16  ;;  %5674 = vrot.lane.b32.xlu1 %v15103_v47, %s11729_s11 }
 0x4ff   :  { %v15137_v2 = vpack.c.bf16 %v6727_v16, %v6703_v19  ;;  %v15177_v19 = vpack.c.bf16 %v5299_v30, %v5299_v30 }
 0x502   :  { %5508 = vrot.lane.b32.xlu0 %v15117_v39, %s11728_s29  ;;  %5794 = vrot.lane.b32.xlu1 %v15103_v47, %s11731_s16 }
 0x506   :  { %5388 = vrot.lane.b32.xlu0 %v15117_v39, %s11727_s28  ;;  %5510 = vrot.lane.b32.xlu1 %v15143_v63, %s11728_s29 }
 0x50a   :  { %5798 = vrot.lane.b32.xlu0 %v15143_v63, %s11731_s16  ;;  %5390 = vrot.lane.b32.xlu1 %v15143_v63, %s11727_s28  ;;  %v6263_v35 = vpop.f32.mrb[72].mxu1 }
 0x50b   :  { %v6264_v45 = vadd.f32 %v6263_v35, %v15115_v25  ;;  %v6265_v28 = vpop.f32.mrb[73].mxu1 }
 0x50c   :  { %v6266_v15 = vadd.f32 %v6265_v28, %v15115_v25  ;;  %v6267_v5 = vpop.f32.mrb[74].mxu1 }
 0x50d   :  { %v6268_v27 = vadd.f32 %v6267_v5, %v15120_v36  ;;  %v6269_v20 = vpop.f32.mrb[75].mxu1  ;;  %v6704_v38 = vmax.f32 %v6264_v45, 0.0 }
 0x50e   :  { %5392 = vrot.lane.b32.xlu0 %v15158_v17, %s11727_s28  ;;  %5678 = vrot.lane.b32.xlu1 %v15143_v63, %s11729_s11  ;;  %v6270_v13 = vadd.f32 %v6269_v20, %v15120_v36  ;;  %v6705_v41 = vmax.f32 %v6266_v15, 0.0 }
 0x50f   :  { %v6728_v40 = vmax.f32 %v6268_v27, 0.0 }
 0x510   :  { %v6729_v34 = vmax.f32 %v6270_v13, 0.0 }
 0x511   :  { %v15169_v42 = vpack.c.bf16 %v6728_v40, %v6704_v38 }
 0x512   :  { %v15171_v54 = vpack.c.bf16 %v6729_v34, %v6705_v41  ;;  %5680 = vrot.lane.b32.xlu0 %v15158_v17, %s11729_s11  ;;  %5512 = vrot.lane.b32.xlu1 %v15158_v17, %s11728_s29 }
 0x514   :  { %v15179_v16 = vpop.permute.xlu0 %3178  ;;  %v15181_v48 = vpop.permute.xlu1 %3176 }
 0x516   :  { %5800 = vrot.lane.b32.xlu0 %v15158_v17, %s11731_s16  ;;  %5394 = vrot.lane.b32.xlu1 %v15177_v19, %s11727_s28 }
 0x517   :  { %v6306_v37 = vpop.f32.mrb[76].mxu0 }
 0x518   :  { %v6307_v52 = vadd.f32 %v6306_v37, %v15115_v25  ;;  %v6308_v0 = vpop.f32.mrb[77].mxu0  ;;  %v15188_v22 = vpop.permute.xlu0 %3202 }
 0x519   :  { %v6309_v35 = vadd.f32 %v6308_v0, %v15115_v25  ;;  %v15191_v45 = vpop.permute.xlu1 %3200  ;;  %v6310_v28 = vpop.f32.mrb[78].mxu0 }
 0x51a   :  { %v6311_v15 = vadd.f32 %v6310_v28, %v15120_v36  ;;  %v6312_v5 = vpop.f32.mrb[79].mxu0  ;;  %5514 = vrot.lane.b32.xlu0 %v15177_v19, %s11728_s29  ;;  %5682 = vrot.lane.b32.xlu1 %v15177_v19, %s11729_s11  ;;  %v6706_v27 = vmax.f32 %v6307_v52, 0.0 }
 0x51b   :  { %v6313_v8 = vadd.f32 %v6312_v5, %v15120_v36  ;;  %v6707_v38 = vmax.f32 %v6309_v35, 0.0 }
 0x51c   :  { %v6730_v20 = vmax.f32 %v6311_v15, 0.0  ;;  %v15199_v13 = vpop.permute.xlu0 %3301 }
 0x51d   :  { %v6731_v40 = vmax.f32 %v6313_v8, 0.0  ;;  %v15201_v41 = vpop.permute.xlu1 %3299 }
 0x51e   :  { %v15203_v34 = vpack.c.bf16 %v6730_v20, %v6706_v27  ;;  %3303 = vrot.lane.b32.xlu0 %v14930_v55, %s11729_s11  ;;  %5802 = vrot.lane.b32.xlu1 %v15177_v19, %s11731_s16 }
 0x51f   :  { %v15209_v30 = vpack.c.bf16 %v6731_v40, %v6707_v38 }
 0x520   :  { %18484 = vst [vmem:[#allocation22_spill] sm:$0xff] %v15203_v34  ;;  %v15211_v37 = vpop.permute.xlu0 %3297 }
 0x521   :  { %18485 = vst [vmem:[#allocation24_spill] sm:$0xff] %v15209_v30  ;;  %18486 = vst [vmem:[#allocation15_spill] sm:$0xff] %v15211_v37  ;;  %v15213_v52 = vpop.permute.xlu1 %3198 }
 0x522   :  { %18487 = vst [vmem:[#allocation16_spill] sm:$0xff] %v15213_v52  ;;  %3329 = vrot.lane.b32.xlu0 %v14938_v23, %s11729_s11  ;;  %3305 = vrot.lane.b32.xlu1 %v14948_v62, %s11729_s11 }
 0x524   :  { %v15219_v0 = vpop.permute.xlu0 %3325 }
 0x525   :  { %v15221_v35 = vpop.permute.xlu1 %3323 }
 0x526   :  { %3426 = vrot.lane.b32.xlu0 %v14948_v62, %s11731_s16  ;;  %3327 = vrot.lane.b32.xlu1 %v14934_v18, %s11729_s11 }
 0x527   :  { %v6349_v28 = vpop.f32.mrb[76].mxu1 }
 0x528   :  { %v6350_v15 = vadd.f32 %v6349_v28, %v15115_v25  ;;  %v15228_v5 = vpop.permute.xlu0 %3422  ;;  %v6351_v8 = vpop.f32.mrb[77].mxu1 }
 0x529   :  { %v15230_v27 = vpop.permute.xlu1 %3420  ;;  %v6352_v20 = vadd.f32 %v6351_v8, %v15115_v25  ;;  %v6353_v38 = vpop.f32.mrb[78].mxu1 }
 0x52a   :  { %v6354_v40 = vadd.f32 %v6353_v38, %v15120_v36  ;;  %3450 = vrot.lane.b32.xlu0 %v14938_v23, %s11731_s16  ;;  %3424 = vrot.lane.b32.xlu1 %v14930_v55, %s11731_s16  ;;  %v6355_v49 = vpop.f32.mrb[79].mxu1  ;;  %v6708_v28 = vmax.f32 %v6350_v15, 0.0 }
 0x52b   :  { %v6356_v51 = vadd.f32 %v6355_v49, %v15120_v36  ;;  %v6709_v11 = vmax.f32 %v6352_v20, 0.0 }
 0x52c   :  { %v6732_v46 = vmax.f32 %v6354_v40, 0.0  ;;  %v15239_v4 = vpop.permute.xlu0 %5502 }
 0x52d   :  { %v6733_v1 = vmax.f32 %v6356_v51, 0.0  ;;  %v5501_v58 = vpop.permute.xlu1 %5500 }
 0x52e   :  { %v15241_v8 = vpack.c.bf16 %v6732_v46, %v6708_v28  ;;  %v5531_v38 = vsel %vm324_vm3, %v14800_v43, %v5501_v58  ;;  %v5532_v12 = vsel %vm324_vm3, %v5501_v58, %v15239_v4  ;;  %3547 = vrot.lane.b32.xlu0 %v14948_v62, %s11732_s22  ;;  %3448 = vrot.lane.b32.xlu1 %v14934_v18, %s11731_s16 }
 0x52f   :  { %v15251_v49 = vpack.c.bf16 %v6733_v1, %v6709_v11  ;;  %v5573_v15 = vsel %vm1750_vm9, %v5531_v38, 0  ;;  %v5575_v51 = vsel %vm1750_vm9, %v5532_v12, 0 }
 0x530   :  { %18488 = vst [vmem:[#allocation25_spill] sm:$0xff] %v15241_v8  ;;  %v15255_v46 = vpop.permute.xlu0 %5382  ;;  %v5916_v40 = vrot.slane %v5573_v15, 4  ;;  %v5917_v43 = vrot.slane %v5575_v51, 4 }
 0x531   :  { %18489 = vst [vmem:[#allocation27_spill] sm:$0xff] %v15251_v49  ;;  %v5381_v20 = vpop.permute.xlu1 %5380 }
 0x532   :  { %v5411_v58 = vsel %vm197_vm4, %v14811_v29, %v5381_v20  ;;  %v5412_v28 = vsel %vm197_vm4, %v5381_v20, %v15255_v46  ;;  %3571 = vrot.lane.b32.xlu0 %v14938_v23, %s11732_s22  ;;  %3545 = vrot.lane.b32.xlu1 %v14930_v55, %s11732_s22 }
 0x533   :  { %v5453_v1 = vsel %vm1750_vm9, %v5411_v58, 0  ;;  %v5455_v12 = vsel %vm1750_vm9, %v5412_v28, 0 }
 0x534   :  { %v15267_v11 = vpop.permute.xlu0 %5672  ;;  %v6024_v38 = vsel %vm765_vm6, %v5455_v12, %v5917_v43  ;;  %v6021_v15 = vsel %vm765_vm6, %v5453_v1, %v5916_v40 }
 0x535   :  { %6530 = vmatprep.subr.bf16.mxu0 %v6024_v38  ;;  %v5671_v29 = vpop.permute.xlu1 %5670 }
 0x536   :  { %v5700_v51 = vsel %vm471_vm5, %v14820_v10, %v5671_v29  ;;  %v5701_v20 = vsel %vm471_vm5, %v5671_v29, %v15267_v11  ;;  %6531 = vmatpush1.bf16.msra.mxu0 %v6021_v15  ;;  %3670 = vrot.lane.b32.xlu0 %v14948_v62, %s11733_s23 }
 0x537   :  { %v5742_v58 = vsel %vm1750_vm9, %v5700_v51, 0  ;;  %v5744_v28 = vsel %vm1750_vm9, %v5701_v20, 0  ;;  %3569 = vrot.lane.b32.xlu1 %v14934_v18, %s11732_s22  ;;  %v6392_v40 = vpop.f32.mrb[80].mxu0  ;;  %v5623_v51 = vsel %vm1750_vm9, %v15029_v33, 0 }
 0x538   :  { %v5964_v43 = vrot.slane %v5742_v58, 4  ;;  %v5965_v1 = vrot.slane %v5744_v28, 4  ;;  %v6393_v12 = vadd.f32 %v6392_v40, %v15115_v25  ;;  %v6394_v10 = vpop.f32.mrb[81].mxu0  ;;  %v15282_v38 = vpop.permute.xlu0 %5792  ;;  %v5621_v28 = vsel %vm1750_vm9, %v18475_v32, 0 }
 0x539   :  { %v6395_v15 = vadd.f32 %v6394_v10, %v15115_v25  ;;  %v15285_v29 = vpop.permute.xlu1 %3321  ;;  %v6396_v7 = vpop.f32.mrb[82].mxu0 }
 0x53a   :  { %18490 = vst [vmem:[#allocation26_spill] sm:$0xff] %v15285_v29  ;;  %v6397_v20 = vadd.f32 %v6396_v7, %v15120_v36  ;;  %v6398_v49 = vpop.f32.mrb[83].mxu0  ;;  %3694 = vrot.lane.b32.xlu0 %v14938_v23, %s11733_s23  ;;  %v6096_v58 = vsel %vm765_vm6, %v5623_v51, %v5965_v1  ;;  %v6093_v10 = vsel %vm765_vm6, %v5621_v28, %v5964_v43  ;;  %v6710_v33 = vmax.f32 %v6393_v12, 0.0 }
 0x53b   :  { %v6399_v40 = vadd.f32 %v6398_v49, %v15120_v36  ;;  %3668 = vrot.lane.b32.xlu1 %v14930_v55, %s11733_s23  ;;  %6532 = vmatprep.subr.bf16.mxu0 %v6096_v58  ;;  %v6711_v53 = vmax.f32 %v6395_v15, 0.0 }
 0x53c   :  { %v6734_v59 = vmax.f32 %v6397_v20, 0.0  ;;  %6533 = vmatpush1.bf16.msra.mxu0 %v6093_v10  ;;  %v15299_v7 = vpop.permute.xlu0 %3418 }
 0x53d   :  { %18491 = vst [vmem:[#allocation28_spill] sm:$0xff] %v15299_v7  ;;  %v6735_v37 = vmax.f32 %v6399_v40, 0.0  ;;  %v5791_v24 = vpop.permute.xlu1 %5790 }
 0x53e   :  { %v15301_v1 = vpack.c.bf16 %v6734_v59, %v6710_v33  ;;  %v5820_v32 = vsel %vm594_vm7, %v14840_v50, %v5791_v24  ;;  %v5821_v49 = vsel %vm594_vm7, %v5791_v24, %v15282_v38  ;;  %3186 = vrot.lane.b32.xlu0 %v14958_v3, %s11728_s29 }
 0x53f   :  { %v15309_v43 = vpack.c.bf16 %v6735_v37, %v6711_v53  ;;  %3692 = vrot.lane.b32.xlu1 %v14934_v18, %s11733_s23  ;;  %v5864_v12 = vsel %vm1750_vm9, %v5821_v49, 0  ;;  %v5862_v15 = vsel %vm1750_vm9, %v5820_v32, 0  ;;  %v15328_v53 = vld [vmem:[%s18259_s3] sm:$0xff]  }
 0x540   :  { %18492 = vst [vmem:[#allocation30_spill] sm:$0xff] %v15301_v1  ;;  %10622 = vmatprep.subr.msk.bf16.mxu0 %vm765_vm6, %v5864_v12  ;;  %v15316_v59 = vpop.permute.xlu0 %3446  ;;  %v6170_v50 = vsel %vm765_vm6, %v5862_v15, 0 }
 0x541   :  { %18493 = vst [vmem:[#allocation29_spill] sm:$0xff] %v15309_v43  ;;  %18494 = vst [vmem:[#allocation31_spill] sm:$0xff] %v15316_v59  ;;  %6535 = vmatpush1.bf16.msra.mxu0 %v6170_v50  ;;  %v15319_v24 = vpop.permute.xlu1 %3444 }
 0x542   :  { %3210 = vrot.lane.b32.xlu0 %v14962_v44, %s11728_s29 }
 0x543   :  { %3184 = vrot.lane.b32.xlu1 %v14948_v62, %s11728_s29 }
 0x544   :  { %10623 = vmatmul.mubr.msk.bf16.vlgmr.msra.gmra.mrb[88].mxu0 %vm965_vm8, %v15328_v53  ;;  %v15332_v37 = vpop.permute.xlu0 %3543 }
 0x545   :  { %v15334_v51 = vpop.permute.xlu1 %3541  ;;  %6648 = vmatprep.mubr.bf16.mxu0 %v18394_v26 }
 0x546   :  { %3309 = vrot.lane.b32.xlu0 %v14970_v14, %s11729_s11 }
 0x547   :  { %3208 = vrot.lane.b32.xlu1 %v14938_v23, %s11728_s29  ;;  %v6435_v20 = vpop.f32.mrb[80].mxu1 }
 0x548   :  { %v6436_v58 = vadd.f32 %v6435_v20, %v15115_v25  ;;  %v15342_v28 = vpop.permute.xlu0 %3539  ;;  %v6437_v40 = vpop.f32.mrb[81].mxu1 }
 0x549   :  { %18495 = vst [vmem:[#allocation32_spill] sm:$0xff] %v15342_v28  ;;  %v15344_v10 = vpop.permute.xlu1 %3442  ;;  %v6438_v33 = vadd.f32 %v6437_v40, %v15115_v25  ;;  %v6439_v32 = vpop.f32.mrb[82].mxu1 }
 0x54a   :  { %18496 = vst [vmem:[#allocation33_spill] sm:$0xff] %v15344_v10  ;;  %v6440_v49 = vadd.f32 %v6439_v32, %v15120_v36  ;;  %3333 = vrot.lane.b32.xlu0 %v14976_v56, %s11729_s11  ;;  %v6441_v12 = vpop.f32.mrb[83].mxu1  ;;  %v6712_v50 = vmax.f32 %v6436_v58, 0.0 }
 0x54b   :  { %3307 = vrot.lane.b32.xlu1 %v14958_v3, %s11729_s11  ;;  %v6442_v15 = vadd.f32 %v6441_v12, %v15120_v36  ;;  %v6713_v43 = vmax.f32 %v6438_v33, 0.0 }
 0x54c   :  { %v6736_v20 = vmax.f32 %v6440_v49, 0.0  ;;  %v15353_v23 = vpop.permute.xlu0 %3567 }
 0x54d   :  { %18497 = vst [vmem:[#allocation34_spill] sm:$0xff] %v15353_v23  ;;  %v6737_v62 = vmax.f32 %v6442_v15, 0.0  ;;  %v15355_v1 = vpop.permute.xlu1 %3565 }
 0x54e   :  { %v15357_v40 = vpack.c.bf16 %v6736_v20, %v6712_v50  ;;  %3430 = vrot.lane.b32.xlu0 %v14970_v14, %s11731_s16 }
 0x54f   :  { %v15361_v32 = vpack.c.bf16 %v6737_v62, %v6713_v43  ;;  %3331 = vrot.lane.b32.xlu1 %v14962_v44, %s11729_s11 }
 0x550   :  { %18498 = vst [vmem:[#allocation44_spill] sm:$0xff] %v15357_v40  ;;  %v15365_v18 = vpop.permute.xlu0 %3666 }
 0x551   :  { %18499 = vst [vmem:[#allocation45_spill] sm:$0xff] %v15361_v32  ;;  %v15367_v58 = vpop.permute.xlu1 %3664 }
 0x552   :  { %3454 = vrot.lane.b32.xlu0 %v14976_v56, %s11731_s16 }
 0x553   :  { %3428 = vrot.lane.b32.xlu1 %v14958_v3, %s11731_s16 }
 0x554   :  { %v15373_v33 = vpop.permute.xlu0 %3662 }
 0x555   :  { %18500 = vst [vmem:[#allocation46_spill] sm:$0xff] %v15373_v33  ;;  %v15375_v49 = vpop.permute.xlu1 %3563 }
 0x556   :  { %18501 = vst [vmem:[#allocation47_spill] sm:$0xff] %v15375_v49  ;;  %3551 = vrot.lane.b32.xlu0 %v14970_v14, %s11732_s22 }
 0x557   :  { %3452 = vrot.lane.b32.xlu1 %v14962_v44, %s11731_s16 }
 0x558   :  { %v15381_v62 = vpop.permute.xlu0 %3690 }
 0x559   :  { %18502 = vst [vmem:[#allocation48_spill] sm:$0xff] %v15381_v62  ;;  %v15383_v43 = vpop.permute.xlu1 %3688 }
 0x55a   :  { %3575 = vrot.lane.b32.xlu0 %v14976_v56, %s11732_s22 }
 0x55b   :  { %3549 = vrot.lane.b32.xlu1 %v14958_v3, %s11732_s22 }
 0x55c   :  { %v15389_v12 = vpop.permute.xlu0 %3180 }
 0x55d   :  { %18503 = vst [vmem:[#allocation49_spill] sm:$0xff] %v15389_v12  ;;  %v15391_v15 = vpop.permute.xlu1 %3686 }
 0x55e   :  { %18504 = vst [vmem:[#allocation50_spill] sm:$0xff] %v15391_v15  ;;  %6846 = vrot.lane.b32.xlu0 %v15131_v6, %s11728_s29 }
 0x55f   :  { %3573 = vrot.lane.b32.xlu1 %v14962_v44, %s11732_s22 }
 0x560   :  { %v6478_v50 = vpop.f32.mrb[84].mxu0  ;;  %v15397_v20 = vpop.permute.xlu0 %3204 }
 0x561   :  { %18505 = vst [vmem:[#allocation51_spill] sm:$0xff] %v15397_v20  ;;  %v6479_v40 = vadd.f32 %v6478_v50, %v15115_v25  ;;  %v15400_v55 = vpop.permute.xlu1 %3182  ;;  %v6480_v33 = vpop.f32.mrb[85].mxu0 }
 0x562   :  { %18506 = vst [vmem:[#allocation52_spill] sm:$0xff] %v15400_v55  ;;  %v6481_v28 = vadd.f32 %v6480_v33, %v15115_v25  ;;  %v6482_v7 = vpop.f32.mrb[86].mxu0  ;;  %6969 = vrot.lane.b32.xlu0 %v15137_v2, %s11729_s11 }
 0x563   :  { %v6483_v12 = vadd.f32 %v6482_v7, %v15120_v36  ;;  %6967 = vrot.lane.b32.xlu1 %v15131_v6, %s11729_s11  ;;  %v6484_v60 = vpop.f32.mrb[87].mxu0  ;;  %v6714_v49 = vmax.f32 %v6479_v40, 0.0 }
 0x564   :  { %v6485_v15 = vadd.f32 %v6484_v60, %v15120_v36  ;;  %v15409_v20 = vpop.permute.xlu0 %5506  ;;  %v6521_v50 = vpop.f32.mrb[84].mxu1  ;;  %v6715_v29 = vmax.f32 %v6481_v28, 0.0 }
 0x565   :  { %v6738_v55 = vmax.f32 %v6483_v12, 0.0  ;;  %v15411_v10 = vpop.permute.xlu1 %3206  ;;  %v6522_v33 = vadd.f32 %v6521_v50, %v15115_v25  ;;  %v6523_v31 = vpop.f32.mrb[85].mxu1 }
 0x566   :  { %18507 = vst [vmem:[#allocation53_spill] sm:$0xff] %v15411_v10  ;;  %v6739_v61 = vmax.f32 %v6485_v15, 0.0  ;;  %v6524_v7 = vadd.f32 %v6523_v31, %v15115_v25  ;;  %7090 = vrot.lane.b32.xlu0 %v15137_v2, %s11731_s16  ;;  %v6525_v52 = vpop.f32.mrb[86].mxu1 }
 0x567   :  { %v15417_v8 = vpack.c.bf16 %v6738_v55, %v6714_v49  ;;  %7088 = vrot.lane.b32.xlu1 %v15131_v6, %s11731_s16  ;;  %v6526_v60 = vadd.f32 %v6525_v52, %v15120_v36  ;;  %v6527_v40 = vpop.f32.mrb[87].mxu1  ;;  %v6716_v15 = vmax.f32 %v6522_v33, 0.0 }
 0x568   :  { %v15422_v12 = vpack.c.bf16 %v6739_v61, %v6715_v29  ;;  %v6528_v50 = vadd.f32 %v6527_v40, %v15120_v36  ;;  %v5387_v28 = vpop.permute.xlu0 %5386  ;;  %v6717_v25 = vmax.f32 %v6524_v7, 0.0  ;;  %v18550_v36 = vld [vmem:[#allocation49_spill] sm:$0xff] }
 0x569   :  { %18508 = vst [vmem:[#allocation54_spill] sm:$0xff] %v15417_v8  ;;  %v6740_v10 = vmax.f32 %v6526_v60, 0.0  ;;  %v5505_v31 = vpop.permute.xlu1 %5504 }
 0x56a   :  { %18509 = vst [vmem:[#allocation55_spill] sm:$0xff] %v15422_v12  ;;  %v6741_v30 = vmax.f32 %v6528_v50, 0.0  ;;  %v5533_v55 = vsel %vm324_vm3, %v15239_v4, %v5505_v31  ;;  %v5534_v49 = vsel %vm324_vm3, %v5505_v31, %v15409_v20  ;;  %7211 = vrot.lane.b32.xlu0 %v15137_v2, %s11732_s22 }
 0x56b   :  { %v15431_v52 = vpack.c.bf16 %v6740_v10, %v6716_v15  ;;  %v5577_v61 = vsel %vm1750_vm9, %v5533_v55, 0  ;;  %v5579_v29 = vsel %vm1750_vm9, %v5534_v49, 0  ;;  %7209 = vrot.lane.b32.xlu1 %v15131_v6, %s11732_s22 }
 0x56c   :  { %v15437_v33 = vpack.c.bf16 %v6741_v30, %v6717_v25  ;;  %v15439_v7 = vpop.permute.xlu0 %5676  ;;  %v5918_v60 = vrot.slane %v5577_v61, 4  ;;  %v5919_v40 = vrot.slane %v5579_v29, 4 }
 0x56d   :  { %18510 = vst [vmem:[#allocation56_spill] sm:$0xff] %v15431_v52  ;;  %v5385_v4 = vpop.permute.xlu1 %5384 }
 0x56e   :  { %18511 = vst [vmem:[#allocation57_spill] sm:$0xff] %v15437_v33  ;;  %v5413_v50 = vsel %vm197_vm4, %v15255_v46, %v5385_v4  ;;  %v5414_v10 = vsel %vm197_vm4, %v5385_v4, %v5387_v28  ;;  %7332 = vrot.lane.b32.xlu0 %v15137_v2, %s11733_s23 }
 0x56f   :  { %v5457_v15 = vsel %vm1750_vm9, %v5413_v50, 0  ;;  %7330 = vrot.lane.b32.xlu1 %v15131_v6, %s11733_s23  ;;  %v5459_v25 = vsel %vm1750_vm9, %v5414_v10, 0 }
 0x570   :  { %v15450_v30 = vpop.permute.xlu0 %5796  ;;  %v6030_v31 = vsel %vm765_vm6, %v5459_v25, %v5919_v40  ;;  %v6027_v55 = vsel %vm765_vm6, %v5457_v15, %v5918_v60 }
 0x571   :  { %v5675_v49 = vpop.permute.xlu1 %5674  ;;  %6573 = vmatprep.subr.bf16.mxu1 %v6030_v31 }
 0x572   :  { %v5702_v46 = vsel %vm471_vm5, %v15267_v11, %v5675_v49  ;;  %v5703_v61 = vsel %vm471_vm5, %v5675_v49, %v15439_v7  ;;  %6574 = vmatpush1.bf16.msra.mxu1 %v6027_v55  ;;  %6852 = vrot.lane.b32.xlu0 %v15171_v54, %s11728_s29  ;;  %v5627_v11 = vsel %vm1750_vm9, %v15103_v47, 0  ;;  %v5625_v55 = vsel %vm1750_vm9, %v15051_v9, 0 }
 0x573   :  { %v5746_v29 = vsel %vm1750_vm9, %v5702_v46, 0  ;;  %v5748_v4 = vsel %vm1750_vm9, %v5703_v61, 0  ;;  %6848 = vrot.lane.b32.xlu1 %v15137_v2, %s11728_s29 }
 0x574   :  { %v5966_v60 = vrot.slane %v5746_v29, 4  ;;  %v5967_v40 = vrot.slane %v5748_v4, 4  ;;  %v5509_v50 = vpop.permute.xlu0 %5508 }
 0x575   :  { %v5795_v10 = vpop.permute.xlu1 %5794  ;;  %v5535_v61 = vsel %vm324_vm3, %v15409_v20, %v5509_v50 }
 0x576   :  { %v5822_v15 = vsel %vm594_vm7, %v15282_v38, %v5795_v10  ;;  %v5823_v25 = vsel %vm594_vm7, %v5795_v10, %v15450_v30  ;;  %v6102_v31 = vsel %vm765_vm6, %v5627_v11, %v5967_v40  ;;  %6975 = vrot.lane.b32.xlu0 %v15203_v34, %s11729_s11  ;;  %v6099_v47 = vsel %vm765_vm6, %v5625_v55, %v5966_v60 }
 0x577   :  { %6575 = vmatprep.subr.bf16.mxu1 %v6102_v31  ;;  %6971 = vrot.lane.b32.xlu1 %v15169_v42, %s11729_s11  ;;  %v5868_v49 = vsel %vm1750_vm9, %v5823_v25, 0  ;;  %v5866_v46 = vsel %vm1750_vm9, %v5822_v15, 0  ;;  %v5581_v10 = vsel %vm1750_vm9, %v5535_v61, 0 }
 0x578   :  { %6576 = vmatpush1.bf16.msra.mxu1 %v6099_v47  ;;  %v5389_v38 = vpop.permute.xlu0 %5388  ;;  %v6174_v40 = vsel %vm765_vm6, %v5866_v46, 0 }
 0x579   :  { %v5511_v29 = vpop.permute.xlu1 %5510  ;;  %10624 = vmatprep.subr.msk.bf16.mxu1 %vm765_vm6, %v5868_v49  ;;  %v5415_v4 = vsel %vm197_vm4, %v5387_v28, %v5389_v38  ;;  %v5920_v28 = vrot.slane %v5581_v10, 4 }
 0x57a   :  { %v5536_v9 = vsel %vm324_vm3, %v5509_v50, %v5511_v29  ;;  %7096 = vrot.lane.b32.xlu0 %v15203_v34, %s11731_s16  ;;  %v5461_v50 = vsel %vm1750_vm9, %v5415_v4, 0 }
 0x57b   :  { %v5583_v60 = vsel %vm1750_vm9, %v5536_v9, 0  ;;  %7092 = vrot.lane.b32.xlu1 %v15169_v42, %s11731_s16 }
 0x57c   :  { %6578 = vmatpush1.bf16.msra.mxu1 %v6174_v40  ;;  %v5799_v20 = vpop.permute.xlu0 %5798  ;;  %v5921_v15 = vrot.slane %v5583_v60, 4  ;;  %v3236_v60 = vsel %vm324_vm3, %v15191_v45, %v15188_v22 }
 0x57d   :  { %v15492_v11 = vpop.permute.xlu1 %5390 }
 0x57e   :  { %v5416_v25 = vsel %vm197_vm4, %v5389_v38, %v15492_v11  ;;  %7217 = vrot.lane.b32.xlu0 %v15203_v34, %s11732_s22  ;;  %v6033_v38 = vsel %vm765_vm6, %v5461_v50, %v5920_v28  ;;  %v3358_v50 = vsel %vm471_vm5, %v15221_v35, %v15219_v0  ;;  %v5631_v28 = vsel %vm1750_vm9, %v15143_v63, 0 }
 0x57f   :  { %10625 = vmatmul.mubr.msk.bf16.vlgmr.msra.gmra.mrb[88].mxu1 %vm965_vm8, %v15328_v53  ;;  %7213 = vrot.lane.b32.xlu1 %v15169_v42, %s11732_s22  ;;  %v5463_v31 = vsel %vm1750_vm9, %v5416_v25, 0 }
 0x580   :  { %v5393_v55 = vpop.permute.xlu0 %5392  ;;  %v6036_v47 = vsel %vm765_vm6, %v5463_v31, %v5921_v15  ;;  %6691 = vmatprep.mubr.bf16.mxu1 %v18394_v26  ;;  %v5824_v15 = vsel %vm594_vm7, %v15450_v30, %v5799_v20  ;;  %v5629_v31 = vsel %vm1750_vm9, %v15117_v39, 0  ;;  %v3479_v30 = vsel %vm594_vm7, %v15319_v24, %v15316_v59 }
 0x581   :  { %6616 = vmatprep.subr.bf16.mxu0 %v6036_v47  ;;  %v5679_v49 = vpop.permute.xlu1 %5678  ;;  %v3286_v47 = vmax.bf16 %v3236_v60, %v14891_v21  ;;  %v11126_v60 = vld [vmem:[%s18261_s5 + $0x604] ss:$8 sps:$4 sm:$0xff]  }
 0x582   :  { %v5704_v46 = vsel %vm471_vm5, %v15439_v7, %v5679_v49  ;;  %6617 = vmatpush1.bf16.msra.mxu0 %v6033_v38  ;;  %7338 = vrot.lane.b32.xlu0 %v15203_v34, %s11733_s23 }
 0x583   :  { %v5750_v61 = vsel %vm1750_vm9, %v5704_v46, 0  ;;  %7334 = vrot.lane.b32.xlu1 %v15169_v42, %s11733_s23  ;;  %v3407_v63 = vmax.bf16 %v3358_v50, %v3286_v47 }
 0x584   :  { %v5681_v9 = vpop.permute.xlu0 %5680  ;;  %v5968_v40 = vrot.slane %v5750_v61, 4 }
 0x585   :  { %v5705_v4 = vsel %vm471_vm5, %v5679_v49, %v5681_v9  ;;  %v5513_v26 = vpop.permute.xlu1 %5512 }
 0x586   :  { %v5752_v7 = vsel %vm1750_vm9, %v5705_v4, 0  ;;  %6868 = vrot.lane.b32.xlu0 %v15361_v32, %s11728_s29  ;;  %v5537_v49 = vsel %vm324_vm3, %v5511_v29, %v5513_v26  ;;  %v6105_v39 = vsel %vm765_vm6, %v5629_v31, %v5968_v40  ;;  %v5870_v29 = vsel %vm1750_vm9, %v5824_v15, 0  ;;  %v18521_v32 = vld [vmem:[#allocation25_spill] sm:$0xff] }
 0x587   :  { %v5969_v10 = vrot.slane %v5752_v7, 4  ;;  %6850 = vrot.lane.b32.xlu1 %v15169_v42, %s11728_s29  ;;  %v3528_v40 = vmax.bf16 %v3479_v30, %v3407_v63  ;;  %v3601_v7 = vsel %vm3587_vm11, %v15355_v1, %v15353_v23  ;;  %v18530_v23 = vld [vmem:[#allocation26_spill] sm:$0xff] }
 0x588   :  { %v15528_v25 = vpop.permute.xlu0 %5800  ;;  %v3357_v59 = vsel %vm471_vm5, %v18530_v23, %v15221_v35  ;;  %v18533_v35 = vld [vmem:[#allocation33_spill] sm:$0xff] }
 0x589   :  { %v5825_v38 = vsel %vm594_vm7, %v5799_v20, %v15528_v25  ;;  %v5395_v46 = vpop.permute.xlu1 %5394  ;;  %v6108_v61 = vsel %vm765_vm6, %v5631_v28, %v5969_v10  ;;  %v5585_v20 = vsel %vm1750_vm9, %v5537_v49, 0  ;;  %v6178_v49 = vsel %vm765_vm6, %v5870_v29, 0 }
 0x58a   :  { %6618 = vmatprep.subr.bf16.mxu0 %v6108_v61  ;;  %6870 = vrot.lane.b32.xlu0 %v15417_v8, %s11728_s29  ;;  %v5872_v21 = vsel %vm1750_vm9, %v5825_v38, 0  ;;  %v5418_v10 = vsel %vm197_vm4, %v5393_v55, %v5395_v46  ;;  %v5417_v38 = vsel %vm197_vm4, %v15492_v11, %v5393_v55  ;;  %v5922_v61 = vrot.slane %v5585_v20, 4  ;;  %v11124_v11 = vld [vmem:[%s18261_s5 + $0x600] ss:$8 sps:$4 sm:$0xff]  }
 0x58b   :  { %6973 = vrot.lane.b32.xlu1 %v15171_v54, %s11729_s11  ;;  %6619 = vmatpush1.bf16.msra.mxu0 %v6105_v39  ;;  %v3651_v55 = vmax.bf16 %v3601_v7, %v3528_v40  ;;  %v5635_v7 = vsel %vm1750_vm9, %v15177_v19, 0 }
 0x58c   :  { %v5515_v4 = vpop.permute.xlu0 %5514  ;;  %10626 = vmatprep.subr.msk.bf16.mxu0 %vm765_vm6, %v5872_v21 }
 0x58d   :  { %v5538_v50 = vsel %vm324_vm3, %v5513_v26, %v5515_v4  ;;  %v5683_v15 = vpop.permute.xlu1 %5682  ;;  %v5467_v26 = vsel %vm1750_vm9, %v5418_v10, 0  ;;  %v5465_v4 = vsel %vm1750_vm9, %v5417_v38, 0  ;;  %v11129_v10 = vld [vmem:[%s18261_s5 + $0x614] ss:$8 sps:$4 sm:$0xff]  }
 0x58e   :  { %v5587_v28 = vsel %vm1750_vm9, %v5538_v50, 0  ;;  %v5706_v31 = vsel %vm471_vm5, %v5681_v9, %v5683_v15  ;;  %v5708_v47 = vsel %vm471_vm5, %v5683_v15, 0  ;;  %6991 = vrot.lane.b32.xlu0 %v15417_v8, %s11729_s11  ;;  %v3724_v9 = vsel %vm3710_vm12, %v15383_v43, %v15381_v62  ;;  %v18528_v62 = vld [vmem:[#allocation19_spill] sm:$0xff] }
 0x58f   :  { %v5923_v30 = vrot.slane %v5587_v28, 4  ;;  %v5755_v46 = vsel %vm1750_vm9, %v5708_v47, 0  ;;  %7094 = vrot.lane.b32.xlu1 %v15171_v54, %s11731_s16  ;;  %6621 = vmatpush1.bf16.msra.mxu0 %v6178_v49  ;;  %v5754_v39 = vsel %vm1750_vm9, %v5706_v31, 0  ;;  %v3774_v40 = vmax.bf16 %v3724_v9, %v3651_v55  ;;  %v11127_v47 = vld [vmem:[%s18261_s5 + $0x610] ss:$8 sps:$4 sm:$0xff]  }
 0x590   :  { %v5971_v21 = vrot.slane %v5755_v46, 4  ;;  %v15575_v63 = vpop.permute.xlu0 %3303  ;;  %10157 = vmatprep.subr.bf16.mxu0 %v11126_v60  ;;  %v5970_v50 = vrot.slane %v5754_v39, 4  ;;  %v6039_v60 = vsel %vm765_vm6, %v5465_v4, %v5922_v61  ;;  %v3224_v15 = vsel %vm324_vm3, %v15181_v48, %v15179_v16  ;;  %v11132_v61 = vld [vmem:[%s18261_s5 + $0x624] ss:$8 sps:$4 sm:$0xff]  }
 0x591   :  { %v5803_v29 = vpop.permute.xlu1 %5802  ;;  %v6042_v20 = vsel %vm765_vm6, %v5467_v26, %v5923_v30  ;;  %v3346_v30 = vsel %vm471_vm5, %v15201_v41, %v15199_v13  ;;  %v5633_v46 = vsel %vm1750_vm9, %v15158_v17, 0  ;;  %v3467_v26 = vsel %vm594_vm7, %v15230_v27, %v15228_v5 }
 0x592   :  { %10627 = vmatmul.mubr.msk.bf16.vlgmr.msra.gmra.mrb[92].mxu0 %vm965_vm8, %v15328_v53  ;;  %6659 = vmatprep.subr.bf16.mxu1 %v6042_v20  ;;  %v6114_v31 = vsel %vm765_vm6, %v5635_v7, %v5971_v21  ;;  %v5826_v49 = vsel %vm594_vm7, %v15528_v25, %v5803_v29  ;;  %v5828_v38 = vsel %vm594_vm7, %v5803_v29, 0  ;;  %v3274_v25 = vmax.bf16 %v3224_v15, %v14887_v57  ;;  %v11130_v57 = vld [vmem:[%s18261_s5 + $0x620] ss:$8 sps:$4 sm:$0xff]   ;;  %v11135_v29 = vld [vmem:[%s18261_s5 + $0x4] ss:$8 sps:$4 sm:$0xff]  }
 0x593   :  { %7112 = vrot.lane.b32.xlu0 %v15417_v8, %s11731_s16  ;;  %7215 = vrot.lane.b32.xlu1 %v15171_v54, %s11732_s22  ;;  %v6111_v9 = vsel %vm765_vm6, %v5633_v46, %v5970_v50  ;;  %v5875_v17 = vsel %vm1750_vm9, %v5828_v38, 0  ;;  %v5874_v21 = vsel %vm1750_vm9, %v5826_v49, 0  ;;  %v11138_v20 = vld [vmem:[%s18261_s5 + $0x634] ss:$8 sps:$4 sm:$0xff]   ;;  %v3589_v4 = vsel %vm3587_vm11, %v15334_v51, %v15332_v37  ;;  %v11133_v7 = vld [vmem:[%s18261_s5] ss:$8 sps:$4 sm:$0xff]  }
 0x594   :  { %6660 = vmatpush1.bf16.msra.mxu1 %v6039_v60  ;;  %10158 = vmatpush1.bf16.msra.mxu0 %v11124_v11  ;;  %v15597_v28 = vpop.permute.xlu0 %3329  ;;  %v3395_v11 = vmax.bf16 %v3346_v30, %v3274_v25  ;;  %v6182_v50 = vsel %vm765_vm6, %v5874_v21, 0  ;;  %v3712_v60 = vsel %vm3710_vm12, %v15367_v58, %v15365_v18  ;;  %v11141_v49 = vld [vmem:[%s18261_s5 + $0x14] ss:$8 sps:$4 sm:$0xff]   ;;  %v11144_v38 = vld [vmem:[%s18261_s5 + $0x644] ss:$8 sps:$4 sm:$0xff]  }
 0x595   :  { %18512 = vst [vmem:[#allocation58_spill] sm:$0xff] %v15597_v28  ;;  %10189 = vmatprep.mubr.bf16.mxu0 %v3774_v40  ;;  %v15606_v19 = vpop.permute.xlu1 %3305  ;;  %6661 = vmatprep.subr.bf16.mxu1 %v6114_v31  ;;  %v11139_v46 = vld [vmem:[%s18261_s5 + $0x10] ss:$8 sps:$4 sm:$0xff]  }
 0x596   :  { %10159 = vmatprep.subr.bf16.mxu0 %v11129_v10  ;;  %v3516_v10 = vmax.bf16 %v3467_v26, %v3395_v11  ;;  %v11150_v26 = vld [vmem:[%s18261_s5 + $0x654] ss:$8 sps:$4 sm:$0xff]   ;;  %v11148_v11 = vld [vmem:[%s18261_s5 + $0x650] ss:$8 sps:$4 sm:$0xff]  }
 0x597   :  { %7233 = vrot.lane.b32.xlu0 %v15417_v8, %s11732_s22  ;;  %7336 = vrot.lane.b32.xlu1 %v15171_v54, %s11733_s23 }
 0x598   :  { %6662 = vmatpush1.bf16.msra.mxu1 %v6111_v9  ;;  %10160 = vmatpush1.bf16.msra.mxu0 %v11127_v47  ;;  %v15625_v39 = vpop.permute.xlu0 %3426  ;;  %v3639_v15 = vmax.bf16 %v3589_v4, %v3516_v10  ;;  %v11136_v47 = vld [vmem:[%s18261_s5 + $0x630] ss:$8 sps:$4 sm:$0xff]   ;;  %v11147_v9 = vld [vmem:[%s18261_s5 + $0x24] ss:$8 sps:$4 sm:$0xff]  }
 0x599   :  { %v15632_v55 = vpop.permute.xlu1 %3327  ;;  %10628 = vmatprep.subr.msk.bf16.mxu1 %vm765_vm6, %v5875_v17  ;;  %10161 = vmatprep.subr.bf16.mxu0 %v11132_v61  ;;  %v11151_v10 = vld [vmem:[%s18261_s5 + $0x30] ss:$8 sps:$4 sm:$0xff]  }
 0x59a   :  { %v3762_v61 = vmax.bf16 %v3712_v60, %v3639_v15  ;;  %v11154_v60 = vld [vmem:[%s18261_s5 + $0x660] ss:$8 sps:$4 sm:$0xff]   ;;  %v11162_v15 = vld [vmem:[%s18261_s5 + $0x674] ss:$8 sps:$4 sm:$0xff]  }
 0x59b   :  { %7354 = vrot.lane.b32.xlu0 %v15417_v8, %s11733_s23  ;;  %6872 = vrot.lane.b32.xlu1 %v15422_v12, %s11728_s29 }
 0x59c   :  { %6664 = vmatpush1.bf16.msra.mxu1 %v6182_v50  ;;  %10162 = vmatpush1.bf16.msra.mxu0 %v11130_v57  ;;  %v15652_v40 = vpop.permute.xlu0 %3450  ;;  %v11145_v57 = vld [vmem:[%s18261_s5 + $0x20] ss:$8 sps:$4 sm:$0xff]  }
 0x59d   :  { %18513 = vst [vmem:[#allocation59_spill] sm:$0xff] %v15652_v40  ;;  %v15657_v31 = vpop.permute.xlu1 %3424  ;;  %9839 = vmatprep.subr.bf16.mxu1 %v11135_v29  ;;  %10163 = vmatprep.subr.bf16.mxu0 %v11138_v20  ;;  %v11153_v29 = vld [vmem:[%s18261_s5 + $0x34] ss:$8 sps:$4 sm:$0xff]   ;;  %v11156_v20 = vld [vmem:[%s18261_s5 + $0x664] ss:$8 sps:$4 sm:$0xff]  }
 0x59f   :  { %10629 = vmatmul.mubr.msk.bf16.vlgmr.msra.gmra.mrb[92].mxu1 %vm965_vm8, %v15328_v53  ;;  %6993 = vrot.lane.b32.xlu0 %v15422_v12, %s11729_s11  ;;  %v11142_v53 = vld [vmem:[%s18261_s5 + $0x640] ss:$8 sps:$4 sm:$0xff]  }
 0x5a0   :  { %6995 = vrot.lane.b32.xlu1 %v15431_v52, %s11729_s11  ;;  %9840 = vmatpush1.bf16.msra.mxu1 %v11133_v7  ;;  %v15674_v30 = vpop.permute.xlu0 %3547  ;;  %v11159_v7 = vld [vmem:[%s18261_s5 + $0x44] ss:$8 sps:$4 sm:$0xff]  }
 0x5a1   :  { %9871 = vmatprep.mubr.bf16.mxu1 %v3762_v61  ;;  %10164 = vmatpush1.bf16.msra.mxu0 %v11136_v47  ;;  %v15679_v25 = vpop.permute.xlu1 %3448  ;;  %v11160_v61 = vld [vmem:[%s18261_s5 + $0x670] ss:$8 sps:$4 sm:$0xff]  }
 0x5a2   :  { %9841 = vmatprep.subr.bf16.mxu1 %v11141_v49  ;;  %10165 = vmatprep.subr.bf16.mxu0 %v11144_v38  ;;  %v11157_v49 = vld [vmem:[%s18261_s5 + $0x40] ss:$8 sps:$4 sm:$0xff]  }
 0x5a3   :  { %7114 = vrot.lane.b32.xlu0 %v15422_v12, %s11731_s16 }
 0x5a4   :  { %7116 = vrot.lane.b32.xlu1 %v15431_v52, %s11731_s16  ;;  %9842 = vmatpush1.bf16.msra.mxu1 %v11139_v46  ;;  %v15694_v17 = vpop.permute.xlu0 %3571  ;;  %v11165_v46 = vld [vmem:[%s18261_s5 + $0x54] ss:$8 sps:$4 sm:$0xff]  }
 0x5a5   :  { %18514 = vst [vmem:[#allocation60_spill] sm:$0xff] %v15694_v17  ;;  %10166 = vmatpush1.bf16.msra.mxu0 %v11142_v53  ;;  %v15699_v21 = vpop.permute.xlu1 %3545  ;;  %9843 = vmatprep.subr.bf16.mxu1 %v11147_v9  ;;  %v11168_v53 = vld [vmem:[%s18261_s5 + $0x684] ss:$8 sps:$4 sm:$0xff]  }
 0x5a6   :  { %10167 = vmatprep.subr.bf16.mxu0 %v11150_v26  ;;  %v11163_v26 = vld [vmem:[%s18261_s5 + $0x50] ss:$8 sps:$4 sm:$0xff]  }
 0x5a7   :  { %7235 = vrot.lane.b32.xlu0 %v15422_v12, %s11732_s22 }
 0x5a8   :  { %7237 = vrot.lane.b32.xlu1 %v15431_v52, %s11732_s22  ;;  %9844 = vmatpush1.bf16.msra.mxu1 %v11145_v57  ;;  %v15714_v4 = vpop.permute.xlu0 %3670 }
 0x5a9   :  { %10168 = vmatpush1.bf16.msra.mxu0 %v11148_v11  ;;  %v15719_v50 = vpop.permute.xlu1 %3569  ;;  %9845 = vmatprep.subr.bf16.mxu1 %v11153_v29  ;;  %v11166_v11 = vld [vmem:[%s18261_s5 + $0x680] ss:$8 sps:$4 sm:$0xff]   ;;  %v11171_v29 = vld [vmem:[%s18261_s5 + $0x64] ss:$8 sps:$4 sm:$0xff]  }
 0x5aa   :  { %10169 = vmatprep.subr.bf16.mxu0 %v11156_v20  ;;  %v11174_v20 = vld [vmem:[%s18261_s5 + $0x694] ss:$8 sps:$4 sm:$0xff]  }
 0x5ab   :  { %7356 = vrot.lane.b32.xlu0 %v15422_v12, %s11733_s23  ;;  %v3348_v12 = vsel %vm471_vm5, %v15575_v63, %v15606_v19 }
 0x5ac   :  { %7358 = vrot.lane.b32.xlu1 %v15431_v52, %s11733_s23  ;;  %9846 = vmatpush1.bf16.msra.mxu1 %v11151_v10  ;;  %v15734_v47 = vpop.permute.xlu0 %3694 }
 0x5ad   :  { %18515 = vst [vmem:[#allocation61_spill] sm:$0xff] %v15734_v47  ;;  %10170 = vmatpush1.bf16.msra.mxu0 %v11154_v60  ;;  %v15739_v38 = vpop.permute.xlu1 %3668  ;;  %9847 = vmatprep.subr.bf16.mxu1 %v11159_v7  ;;  %v11169_v60 = vld [vmem:[%s18261_s5 + $0x60] ss:$8 sps:$4 sm:$0xff]  }
 0x5ae   :  { %10171 = vmatprep.subr.bf16.mxu0 %v11162_v15  ;;  %v11172_v15 = vld [vmem:[%s18261_s5 + $0x690] ss:$8 sps:$4 sm:$0xff]  }
 0x5af   :  { %3674 = vrot.lane.b32.xlu0 %v14970_v14, %s11733_s23 }
 0x5b0   :  { %3672 = vrot.lane.b32.xlu1 %v14958_v3, %s11733_s23  ;;  %9848 = vmatpush1.bf16.msra.mxu1 %v11157_v49  ;;  %v15754_v9 = vpop.permute.xlu0 %3186  ;;  %v11177_v49 = vld [vmem:[%s18261_s5 + $0x74] ss:$8 sps:$4 sm:$0xff]  }
 0x5b1   :  { %18516 = vst [vmem:[#allocation62_spill] sm:$0xff] %v15754_v9  ;;  %10172 = vmatpush1.bf16.msra.mxu0 %v11160_v61  ;;  %v15759_v57 = vpop.permute.xlu1 %3692  ;;  %9849 = vmatprep.subr.bf16.mxu1 %v11165_v46  ;;  %v11180_v61 = vld [vmem:[%s18261_s5 + $0x6a4] ss:$8 sps:$4 sm:$0xff]   ;;  %v18518_v46 = vld [vmem:[#allocation24_spill] sm:$0xff] }
 0x5b2   :  { %10173 = vmatprep.subr.bf16.mxu0 %v11168_v53 }
 0x5b3   :  { %3698 = vrot.lane.b32.xlu0 %v14976_v56, %s11733_s23 }
 0x5b4   :  { %3696 = vrot.lane.b32.xlu1 %v14962_v44, %s11733_s23  ;;  %9850 = vmatpush1.bf16.msra.mxu1 %v11163_v26  ;;  %v15774_v10 = vpop.permute.xlu0 %3210  ;;  %v11175_v26 = vld [vmem:[%s18261_s5 + $0x70] ss:$8 sps:$4 sm:$0xff]  }
 0x5b5   :  { %18517 = vst [vmem:[#allocation63_spill] sm:$0xff] %v15774_v10  ;;  %10174 = vmatpush1.bf16.msra.mxu0 %v11166_v11  ;;  %v15779_v7 = vpop.permute.xlu1 %3184  ;;  %9851 = vmatprep.subr.bf16.mxu1 %v11171_v29  ;;  %v11178_v29 = vld [vmem:[%s18261_s5 + $0x6a0] ss:$8 sps:$4 sm:$0xff]   ;;  %v11195_v10 = vld [vmem:[%s18261_s5 + $0xa4] ss:$8 sps:$4 sm:$0xff]  }
 0x5b6   :  { %10175 = vmatprep.subr.bf16.mxu0 %v11174_v20  ;;  %v11183_v20 = vld [vmem:[%s18261_s5 + $0x84] ss:$8 sps:$4 sm:$0xff]  }
 0x5b7   :  { %6856 = vrot.lane.b32.xlu0 %v18518_v46, %s11728_s29 }
 0x5b8   :  { %6854 = vrot.lane.b32.xlu1 %v15203_v34, %s11728_s29  ;;  %9852 = vmatpush1.bf16.msra.mxu1 %v11169_v60  ;;  %v15794_v53 = vpop.permute.xlu0 %3309  ;;  %v11186_v60 = vld [vmem:[%s18261_s5 + $0x6b4] ss:$8 sps:$4 sm:$0xff]  }
 0x5b9   :  { %18519 = vst [vmem:[#allocation64_spill] sm:$0xff] %v15794_v53  ;;  %10176 = vmatpush1.bf16.msra.mxu0 %v11172_v15  ;;  %v15799_v11 = vpop.permute.xlu1 %3208  ;;  %9853 = vmatprep.subr.bf16.mxu1 %v11177_v49  ;;  %v11181_v49 = vld [vmem:[%s18261_s5 + $0x80] ss:$8 sps:$4 sm:$0xff]   ;;  %v11201_v34 = vld [vmem:[%s18261_s5 + $0xb4] ss:$8 sps:$4 sm:$0xff]  }
 0x5ba   :  { %18520 = vst [vmem:[#allocation65_spill] sm:$0xff] %v15799_v11  ;;  %10177 = vmatprep.subr.bf16.mxu0 %v11180_v61  ;;  %v11184_v61 = vld [vmem:[%s18261_s5 + $0x6b0] ss:$8 sps:$4 sm:$0xff]   ;;  %v11189_v11 = vld [vmem:[%s18261_s5 + $0x94] ss:$8 sps:$4 sm:$0xff]  }
 0x5bb   :  { %6979 = vrot.lane.b32.xlu0 %v18521_v32, %s11729_s11 }
 0x5bc   :  { %6977 = vrot.lane.b32.xlu1 %v18518_v46, %s11729_s11  ;;  %9854 = vmatpush1.bf16.msra.mxu1 %v11175_v26  ;;  %v15814_v15 = vpop.permute.xlu0 %3333  ;;  %v11192_v26 = vld [vmem:[%s18261_s5 + $0x6c4] ss:$8 sps:$4 sm:$0xff]  }
 0x5bd   :  { %18522 = vst [vmem:[#allocation66_spill] sm:$0xff] %v15814_v15  ;;  %10178 = vmatpush1.bf16.msra.mxu0 %v11178_v29  ;;  %v15819_v44 = vpop.permute.xlu1 %3307  ;;  %9855 = vmatprep.subr.bf16.mxu1 %v11183_v20  ;;  %v11187_v20 = vld [vmem:[%s18261_s5 + $0x90] ss:$8 sps:$4 sm:$0xff]  }
 0x5be   :  { %10179 = vmatprep.subr.bf16.mxu0 %v11186_v60  ;;  %v11190_v60 = vld [vmem:[%s18261_s5 + $0x6c0] ss:$8 sps:$4 sm:$0xff]  }
 0x5bf   :  { %7100 = vrot.lane.b32.xlu0 %v18521_v32, %s11731_s16 }
 0x5c0   :  { %7098 = vrot.lane.b32.xlu1 %v18518_v46, %s11731_s16  ;;  %9856 = vmatpush1.bf16.msra.mxu1 %v11181_v49  ;;  %v15834_v29 = vpop.permute.xlu0 %3430  ;;  %v11198_v49 = vld [vmem:[%s18261_s5 + $0x6d4] ss:$8 sps:$4 sm:$0xff]  }
 0x5c1   :  { %18523 = vst [vmem:[#allocation67_spill] sm:$0xff] %v15834_v29  ;;  %10180 = vmatpush1.bf16.msra.mxu0 %v11184_v61  ;;  %v15839_v15 = vpop.permute.xlu1 %3331  ;;  %9857 = vmatprep.subr.bf16.mxu1 %v11189_v11  ;;  %v11193_v61 = vld [vmem:[%s18261_s5 + $0xa0] ss:$8 sps:$4 sm:$0xff]   ;;  %v18549_v29 = vld [vmem:[#allocation52_spill] sm:$0xff] }
 0x5c2   :  { %18524 = vst [vmem:[#allocation68_spill] sm:$0xff] %v15839_v15  ;;  %10181 = vmatprep.subr.bf16.mxu0 %v11192_v26  ;;  %v11196_v26 = vld [vmem:[%s18261_s5 + $0x6d0] ss:$8 sps:$4 sm:$0xff]  }
 0x5c3   :  { %7221 = vrot.lane.b32.xlu0 %v18521_v32, %s11732_s22 }
 0x5c4   :  { %7219 = vrot.lane.b32.xlu1 %v18518_v46, %s11732_s22  ;;  %9858 = vmatpush1.bf16.msra.mxu1 %v11187_v20  ;;  %v15854_v11 = vpop.permute.xlu0 %3454  ;;  %v11204_v20 = vld [vmem:[%s18261_s5 + $0x6e4] ss:$8 sps:$4 sm:$0xff]  }
 0x5c5   :  { %18525 = vst [vmem:[#allocation69_spill] sm:$0xff] %v15854_v11  ;;  %10182 = vmatpush1.bf16.msra.mxu0 %v11190_v60  ;;  %v15859_v15 = vpop.permute.xlu1 %3428  ;;  %9859 = vmatprep.subr.bf16.mxu1 %v11195_v10  ;;  %v18527_v11 = vld [vmem:[#allocation16_spill] sm:$0xff] }
 0x5c6   :  { %18526 = vst [vmem:[#allocation70_spill] sm:$0xff] %v15859_v15  ;;  %10183 = vmatprep.subr.bf16.mxu0 %v11198_v49  ;;  %v3235_v60 = vsel %vm324_vm3, %v18527_v11, %v15191_v45  ;;  %v11199_v49 = vld [vmem:[%s18261_s5 + $0xb0] ss:$8 sps:$4 sm:$0xff]   ;;  %v11202_v45 = vld [vmem:[%s18261_s5 + $0x6e0] ss:$8 sps:$4 sm:$0xff]  }
 0x5c7   :  { %3190 = vrot.lane.b32.xlu0 %v18528_v62, %s11728_s29  ;;  %v18532_v11 = vld [vmem:[#allocation36_spill] sm:$0xff] }
 0x5c8   :  { %3188 = vrot.lane.b32.xlu1 %v14970_v14, %s11728_s29  ;;  %9860 = vmatpush1.bf16.msra.mxu1 %v11193_v61  ;;  %v15877_v10 = vpop.permute.xlu0 %3551  ;;  %v11207_v61 = vld [vmem:[%s18261_s5 + $0xc4] ss:$8 sps:$4 sm:$0xff]   ;;  %v3285_v14 = vmax.bf16 %v3235_v60, %v18532_v11  ;;  %v11205_v11 = vld [vmem:[%s18261_s5 + $0xc0] ss:$8 sps:$4 sm:$0xff]  }
 0x5c9   :  { %18529 = vst [vmem:[#allocation71_spill] sm:$0xff] %v15877_v10  ;;  %10184 = vmatpush1.bf16.msra.mxu0 %v11196_v26  ;;  %v15885_v15 = vpop.permute.xlu1 %3452  ;;  %9861 = vmatprep.subr.bf16.mxu1 %v11201_v34  ;;  %v11210_v10 = vld [vmem:[%s18261_s5 + $0x6f4] ss:$8 sps:$4 sm:$0xff]   ;;  %v3478_v26 = vsel %vm594_vm7, %v18533_v35, %v15319_v24  ;;  %v11231_v35 = vld [vmem:[%s18261_s5 + $0x704] ss:$8 sps:$4 sm:$0xff]  }
 0x5ca   :  { %18531 = vst [vmem:[#allocation72_spill] sm:$0xff] %v15885_v15  ;;  %10185 = vmatprep.subr.bf16.mxu0 %v11204_v20  ;;  %v3406_v34 = vmax.bf16 %v3357_v59, %v3285_v14  ;;  %v18535_v20 = vld [vmem:[#allocation47_spill] sm:$0xff]  ;;  %v11208_v14 = vld [vmem:[%s18261_s5 + $0x6f0] ss:$8 sps:$4 sm:$0xff]   ;;  %v11213_v59 = vld [vmem:[%s18261_s5 + $0xd4] ss:$8 sps:$4 sm:$0xff]  }
 0x5cb   :  { %7342 = vrot.lane.b32.xlu0 %v18521_v32, %s11733_s23  ;;  %v3600_v60 = vsel %vm3587_vm11, %v18535_v20, %v15355_v1  ;;  %v18537_v1 = vld [vmem:[#allocation50_spill] sm:$0xff] }
 0x5cc   :  { %7340 = vrot.lane.b32.xlu1 %v18518_v46, %s11733_s23  ;;  %9862 = vmatpush1.bf16.msra.mxu1 %v11199_v49  ;;  %v15904_v23 = vpop.permute.xlu0 %3575  ;;  %v3527_v49 = vmax.bf16 %v3478_v26, %v3406_v34  ;;  %v11211_v26 = vld [vmem:[%s18261_s5 + $0xd0] ss:$8 sps:$4 sm:$0xff]  }
 0x5cd   :  { %18534 = vst [vmem:[#allocation36_spill] sm:$0xff] %v15904_v23  ;;  %10186 = vmatpush1.bf16.msra.mxu0 %v11202_v45  ;;  %v15912_v24 = vpop.permute.xlu1 %3549  ;;  %9863 = vmatprep.subr.bf16.mxu1 %v11207_v61  ;;  %v3723_v45 = vsel %vm3710_vm12, %v18537_v1, %v15383_v43  ;;  %v18538_v61 = vld [vmem:[#allocation6_spill] sm:$0xff]  ;;  %v18542_v1 = vld [vmem:[#allocation35_spill] sm:$0xff]  ;;  %v11219_v23 = vld [vmem:[%s18261_s5 + $0xf4] ss:$8 sps:$4 sm:$0xff]  }
 0x5ce   :  { %18536 = vst [vmem:[#allocation73_spill] sm:$0xff] %v15912_v24  ;;  %10187 = vmatprep.subr.bf16.mxu0 %v11210_v10  ;;  %v3650_v20 = vmax.bf16 %v3600_v60, %v3527_v49  ;;  %v11229_v43 = vld [vmem:[%s18261_s5 + $0x700] ss:$8 sps:$4 sm:$0xff]   ;;  %v11216_v60 = vld [vmem:[%s18261_s5 + $0xe4] ss:$8 sps:$4 sm:$0xff]  }
 0x5cf   :  { %3214 = vrot.lane.b32.xlu0 %v18538_v61, %s11728_s29  ;;  %v18540_v49 = vld [vmem:[#allocation11_spill] sm:$0xff]  ;;  %v11271_v24 = vld [vmem:[%s18261_s5 + $0x770] ss:$8 sps:$4 sm:$0xff]  }
 0x5d0   :  { %3212 = vrot.lane.b32.xlu1 %v14976_v56, %s11728_s29  ;;  %9864 = vmatpush1.bf16.msra.mxu1 %v11205_v11  ;;  %v15930_v15 = vpop.permute.xlu0 %6846  ;;  %v3773_v34 = vmax.bf16 %v3723_v45, %v3650_v20  ;;  %v11237_v11 = vld [vmem:[%s18261_s5 + $0x714] ss:$8 sps:$4 sm:$0xff]  }
 0x5d1   :  { %10188 = vmatpush1.bf16.msra.mxu0 %v11208_v14  ;;  %v15932_v10 = vpop.permute.xlu1 %3573  ;;  %9865 = vmatprep.subr.bf16.mxu1 %v11213_v59  ;;  %v3271_v14 = vsel %vm324_vm3, 0, %v15181_v48  ;;  %v18541_v59 = vld [vmem:[#allocation15_spill] sm:$0xff] }
 0x5d2   :  { %18539 = vst [vmem:[#allocation74_spill] sm:$0xff] %v15932_v10  ;;  %10210 = vmatprep.subr.bf16.mxu0 %v11231_v35  ;;  %v3345_v35 = vsel %vm471_vm5, %v18541_v59, %v15201_v41  ;;  %v11214_v48 = vld [vmem:[%s18261_s5 + $0xe0] ss:$8 sps:$4 sm:$0xff]   ;;  %v3273_v10 = vmax.bf16 %v3271_v14, %v18542_v1  ;;  %v11243_v41 = vld [vmem:[%s18261_s5 + $0x724] ss:$8 sps:$4 sm:$0xff]  }
 0x5d3   :  { %3313 = vrot.lane.b32.xlu0 %v18540_v49, %s11729_s11  ;;  %v18544_v59 = vld [vmem:[#allocation18_spill] sm:$0xff] }
 0x5d4   :  { %10190 = vmatmul.mubr.bf16.vlgmr.msra.gmra.mrb[96].mxu0 %v3773_v34  ;;  %3311 = vrot.lane.b32.xlu1 %v18528_v62, %s11729_s11  ;;  %v15952_v20 = vpop.permute.xlu0 %6969  ;;  %v11235_v34 = vld [vmem:[%s18261_s5 + $0x710] ss:$8 sps:$4 sm:$0xff]   ;;  %v3394_v56 = vmax.bf16 %v3345_v35, %v3273_v10  ;;  %v11241_v10 = vld [vmem:[%s18261_s5 + $0x720] ss:$8 sps:$4 sm:$0xff]  }
 0x5d5   :  { %9866 = vmatpush1.bf16.msra.mxu1 %v11211_v26  ;;  %v15957_v45 = vpop.permute.xlu1 %6967  ;;  %10211 = vmatpush1.bf16.msra.mxu0 %v11229_v43  ;;  %v18543_v26 = vld [vmem:[#allocation28_spill] sm:$0xff] }
 0x5d6   :  { %9867 = vmatprep.subr.bf16.mxu1 %v11216_v60  ;;  %10212 = vmatprep.subr.bf16.mxu0 %v11237_v11  ;;  %v3466_v43 = vsel %vm594_vm7, %v18543_v26, %v15230_v27  ;;  %v18545_v60 = vld [vmem:[#allocation32_spill] sm:$0xff]  ;;  %v11222_v26 = vld [vmem:[%s18261_s5 + $0x104] ss:$8 sps:$4 sm:$0xff]   ;;  %v7015_v49 = vsel %vm471_vm5, %v15957_v45, %v15952_v20  ;;  %v11277_v45 = vld [vmem:[%s18261_s5 + $0x780] ss:$8 sps:$4 sm:$0xff]  }
 0x5d7   :  { %3337 = vrot.lane.b32.xlu0 %v18544_v59, %s11729_s11  ;;  %v3588_v11 = vsel %vm3587_vm11, %v18545_v60, %v15334_v51  ;;  %v11217_v27 = vld [vmem:[%s18261_s5 + $0xf0] ss:$8 sps:$4 sm:$0xff]   ;;  %v3515_v35 = vmax.bf16 %v3466_v43, %v3394_v56  ;;  %v11249_v51 = vld [vmem:[%s18261_s5 + $0x734] ss:$8 sps:$4 sm:$0xff]  }
 0x5d8   :  { %3335 = vrot.lane.b32.xlu1 %v18538_v61, %s11729_s11  ;;  %v15979_v1 = vpop.permute.xlu0 %7090 }
 0x5d9   :  { %9868 = vmatpush1.bf16.msra.mxu1 %v11214_v48  ;;  %v15984_v14 = vpop.permute.xlu1 %7088  ;;  %10213 = vmatpush1.bf16.msra.mxu0 %v11235_v34  ;;  %v18546_v48 = vld [vmem:[#allocation46_spill] sm:$0xff]  ;;  %v3638_v34 = vmax.bf16 %v3588_v11, %v3515_v35  ;;  %v11225_v11 = vld [vmem:[%s18261_s5 + $0x114] ss:$8 sps:$4 sm:$0xff]  }
 0x5da   :  { %9869 = vmatprep.subr.bf16.mxu1 %v11219_v23  ;;  %10214 = vmatprep.subr.bf16.mxu0 %v11243_v41  ;;  %v3711_v60 = vsel %vm3710_vm12, %v18546_v48, %v15367_v58  ;;  %v11220_v41 = vld [vmem:[%s18261_s5 + $0x100] ss:$8 sps:$4 sm:$0xff]   ;;  %v11247_v58 = vld [vmem:[%s18261_s5 + $0x730] ss:$8 sps:$4 sm:$0xff]   ;;  %v11228_v48 = vld [vmem:[%s18261_s5 + $0x124] ss:$8 sps:$4 sm:$0xff]  }
 0x5db   :  { %6876 = vrot.lane.b32.xlu0 %v15437_v33, %s11728_s29  ;;  %v3761_v43 = vmax.bf16 %v3711_v60, %v3638_v34  ;;  %v11261_v60 = vld [vmem:[%s18261_s5 + $0x754] ss:$8 sps:$4 sm:$0xff]  }
 0x5dc   :  { %6874 = vrot.lane.b32.xlu1 %v15431_v52, %s11728_s29  ;;  %v16005_v23 = vpop.permute.xlu0 %7211  ;;  %v11240_v52 = vld [vmem:[%s18261_s5 + $0x144] ss:$8 sps:$4 sm:$0xff]  }
 0x5dd   :  { %9870 = vmatpush1.bf16.msra.mxu1 %v11217_v27  ;;  %v16007_v56 = vpop.permute.xlu1 %7209  ;;  %10215 = vmatpush1.bf16.msra.mxu0 %v11241_v10  ;;  %v11255_v27 = vld [vmem:[%s18261_s5 + $0x744] ss:$8 sps:$4 sm:$0xff]  }
 0x5de   :  { %9892 = vmatprep.subr.bf16.mxu1 %v11222_v26  ;;  %10216 = vmatprep.subr.bf16.mxu0 %v11249_v51  ;;  %v11223_v26 = vld [vmem:[%s18261_s5 + $0x110] ss:$8 sps:$4 sm:$0xff]   ;;  %v11253_v51 = vld [vmem:[%s18261_s5 + $0x740] ss:$8 sps:$4 sm:$0xff]  }
 0x5e0   :  { %9872 = vmatmul.mubr.bf16.vlgmr.msra.gmra.mrb[96].mxu1 %v3761_v43  ;;  %6997 = vrot.lane.b32.xlu1 %v15437_v33, %s11729_s11  ;;  %v16023_v10 = vpop.permute.xlu0 %7332  ;;  %v11259_v43 = vld [vmem:[%s18261_s5 + $0x750] ss:$8 sps:$4 sm:$0xff]  }
 0x5e1   :  { %9893 = vmatpush1.bf16.msra.mxu1 %v11220_v41  ;;  %v16025_v35 = vpop.permute.xlu1 %7330  ;;  %10217 = vmatpush1.bf16.msra.mxu0 %v11247_v58  ;;  %v11226_v58 = vld [vmem:[%s18261_s5 + $0x120] ss:$8 sps:$4 sm:$0xff]  }
 0x5e2   :  { %9894 = vmatprep.subr.bf16.mxu1 %v11225_v11  ;;  %10218 = vmatprep.subr.bf16.mxu0 %v11255_v27  ;;  %v11234_v11 = vld [vmem:[%s18261_s5 + $0x134] ss:$8 sps:$4 sm:$0xff]   ;;  %v11267_v27 = vld [vmem:[%s18261_s5 + $0x764] ss:$8 sps:$4 sm:$0xff]  }
 0x5e4   :  { %7118 = vrot.lane.b32.xlu1 %v15437_v33, %s11731_s16  ;;  %v16041_v34 = vpop.permute.xlu0 %6852 }
 0x5e5   :  { %9895 = vmatpush1.bf16.msra.mxu1 %v11223_v26  ;;  %v16043_v41 = vpop.permute.xlu1 %6848  ;;  %10219 = vmatpush1.bf16.msra.mxu0 %v11253_v51 }
 0x5e6   :  { %9896 = vmatprep.subr.bf16.mxu1 %v11228_v48  ;;  %10220 = vmatprep.subr.bf16.mxu0 %v11261_v60  ;;  %v11232_v48 = vld [vmem:[%s18261_s5 + $0x130] ss:$8 sps:$4 sm:$0xff]   ;;  %v11265_v60 = vld [vmem:[%s18261_s5 + $0x760] ss:$8 sps:$4 sm:$0xff]   ;;  %v6894_v46 = vsel %vm324_vm3, %v15930_v15, %v16043_v41 }
 0x5e8   :  { %7239 = vrot.lane.b32.xlu1 %v15437_v33, %s11732_s22  ;;  %v16059_v26 = vpop.permute.xlu0 %6975 }
 0x5e9   :  { %9897 = vmatpush1.bf16.msra.mxu1 %v11226_v58  ;;  %v16061_v51 = vpop.permute.xlu1 %6971  ;;  %10221 = vmatpush1.bf16.msra.mxu0 %v11259_v43  ;;  %v11273_v58 = vld [vmem:[%s18261_s5 + $0x774] ss:$8 sps:$4 sm:$0xff]  }
 0x5ea   :  { %18547 = vst [vmem:[#allocation15_spill] sm:$0xff] %v16061_v51  ;;  %9898 = vmatprep.subr.bf16.mxu1 %v11234_v11  ;;  %10222 = vmatprep.subr.bf16.mxu0 %v11267_v27  ;;  %v6941_v11 = vsel %vm324_vm3, 0, %v15930_v15  ;;  %v11238_v27 = vld [vmem:[%s18261_s5 + $0x140] ss:$8 sps:$4 sm:$0xff]   ;;  %v7016_v15 = vsel %vm471_vm5, %v15952_v20, %v16061_v51  ;;  %v18552_v51 = vld [vmem:[#allocation40_spill] sm:$0xff] }
 0x5ec   :  { %7360 = vrot.lane.b32.xlu1 %v15437_v33, %s11733_s23  ;;  %v16080_v43 = vpop.permute.xlu0 %7096  ;;  %v3226_v33 = vsel %vm324_vm3, %v18550_v36, %v18549_v29  ;;  %v6944_v29 = vmax.bf16 %v6894_v46, %v15137_v2  ;;  %v7136_v2 = vsel %vm594_vm7, %v15984_v14, %v15979_v1 }
 0x5ed   :  { %18548 = vst [vmem:[#allocation35_spill] sm:$0xff] %v16080_v43  ;;  %9899 = vmatpush1.bf16.msra.mxu1 %v11232_v48  ;;  %v16084_v59 = vpop.permute.xlu1 %7092  ;;  %10223 = vmatpush1.bf16.msra.mxu0 %v11265_v60  ;;  %v11246_v48 = vld [vmem:[%s18261_s5 + $0x154] ss:$8 sps:$4 sm:$0xff]   ;;  %v11279_v60 = vld [vmem:[%s18261_s5 + $0x784] ss:$8 sps:$4 sm:$0xff]   ;;  %v3276_v8 = vmax.bf16 %v3226_v33, %v18552_v51  ;;  %v3469_v33 = vsel %vm594_vm7, %v15657_v31, %v15625_v39 }
 0x5ee   :  { %9900 = vmatprep.subr.bf16.mxu1 %v11240_v52  ;;  %10224 = vmatprep.subr.bf16.mxu0 %v11273_v58  ;;  %v6943_v52 = vmax.bf16 %v6941_v11, %v15131_v6  ;;  %v7137_v58 = vsel %vm594_vm7, %v15979_v1, %v16084_v59  ;;  %v7065_v46 = vmax.bf16 %v7016_v15, %v6944_v29  ;;  %v11244_v6 = vld [vmem:[%s18261_s5 + $0x150] ss:$8 sps:$4 sm:$0xff]   ;;  %v11252_v1 = vld [vmem:[%s18261_s5 + $0x164] ss:$8 sps:$4 sm:$0xff]  }
 0x5ef   :  { %v3397_v14 = vmax.bf16 %v3348_v12, %v3276_v8  ;;  %v7257_v11 = vsel %vm3587_vm11, %v16007_v56, %v16005_v23  ;;  %v7378_v8 = vsel %vm3710_vm12, %v16025_v35, %v16023_v10  ;;  %v3714_v56 = vsel %vm3710_vm12, %v15739_v38, %v15714_v4  ;;  %v11258_v35 = vld [vmem:[%s18261_s5 + $0x174] ss:$8 sps:$4 sm:$0xff]  }
 0x5f0   :  { %3432 = vrot.lane.b32.xlu1 %v18528_v62, %s11731_s16  ;;  %v16117_v43 = vpop.permute.xlu0 %7217  ;;  %v7064_v51 = vmax.bf16 %v7015_v49, %v6943_v52  ;;  %v7186_v49 = vmax.bf16 %v7137_v58, %v7065_v46 }
 0x5f1   :  { %18551 = vst [vmem:[#allocation28_spill] sm:$0xff] %v16117_v43  ;;  %9901 = vmatpush1.bf16.msra.mxu1 %v11238_v27  ;;  %v16123_v20 = vpop.permute.xlu1 %7213  ;;  %10225 = vmatpush1.bf16.msra.mxu0 %v11271_v24  ;;  %v11285_v24 = vld [vmem:[%s18261_s5 + $0x794] ss:$8 sps:$4 sm:$0xff]   ;;  %v3591_v27 = vsel %vm3587_vm11, %v15699_v21, %v15674_v30 }
 0x5f2   :  { %v7258_v29 = vsel %vm3587_vm11, %v16005_v23, %v16123_v20  ;;  %9902 = vmatprep.subr.bf16.mxu1 %v11246_v48  ;;  %10226 = vmatprep.subr.bf16.mxu0 %v11279_v60  ;;  %v7185_v15 = vmax.bf16 %v7136_v2, %v7064_v51  ;;  %v3518_v60 = vmax.bf16 %v3469_v33, %v3397_v14  ;;  %v11250_v23 = vld [vmem:[%s18261_s5 + $0x160] ss:$8 sps:$4 sm:$0xff]   ;;  %v11264_v14 = vld [vmem:[%s18261_s5 + $0x184] ss:$8 sps:$4 sm:$0xff]  }
 0x5f3   :  { %v7307_v12 = vmax.bf16 %v7258_v29, %v7186_v49 }
 0x5f4   :  { %3456 = vrot.lane.b32.xlu1 %v18538_v61, %s11731_s16  ;;  %v16151_v48 = vpop.permute.xlu0 %7338  ;;  %v7306_v58 = vmax.bf16 %v7257_v11, %v7185_v15  ;;  %v3641_v46 = vmax.bf16 %v3591_v27, %v3518_v60  ;;  %v11289_v11 = vld [vmem:[%s18261_s5 + $0x7a0] ss:$8 sps:$4 sm:$0xff]   ;;  %v11297_v27 = vld [vmem:[%s18261_s5 + $0x7b4] ss:$8 sps:$4 sm:$0xff]  }
 0x5f5   :  { %9903 = vmatpush1.bf16.msra.mxu1 %v11244_v6  ;;  %v16156_v52 = vpop.permute.xlu1 %7334  ;;  %10227 = vmatpush1.bf16.msra.mxu0 %v11277_v45  ;;  %v11283_v45 = vld [vmem:[%s18261_s5 + $0x790] ss:$8 sps:$4 sm:$0xff]   ;;  %v11262_v60 = vld [vmem:[%s18261_s5 + $0x180] ss:$8 sps:$4 sm:$0xff]  }
 0x5f6   :  { %v7379_v2 = vsel %vm3710_vm12, %v16023_v10, %v16156_v52  ;;  %9904 = vmatprep.subr.bf16.mxu1 %v11252_v1  ;;  %10228 = vmatprep.subr.bf16.mxu0 %v11285_v24  ;;  %v7427_v33 = vmax.bf16 %v7378_v8, %v7306_v58  ;;  %v11291_v10 = vld [vmem:[%s18261_s5 + $0x7a4] ss:$8 sps:$4 sm:$0xff]   ;;  %v11256_v1 = vld [vmem:[%s18261_s5 + $0x170] ss:$8 sps:$4 sm:$0xff]   ;;  %v3764_v24 = vmax.bf16 %v3714_v56, %v3641_v46  ;;  %v11270_v8 = vld [vmem:[%s18261_s5 + $0x194] ss:$8 sps:$4 sm:$0xff]  }
 0x5f7   :  { %v7428_v6 = vmax.bf16 %v7379_v2, %v7307_v12  ;;  %v11295_v12 = vld [vmem:[%s18261_s5 + $0x7b0] ss:$8 sps:$4 sm:$0xff]   ;;  %v11303_v56 = vld [vmem:[%s18261_s5 + $0x7c4] ss:$8 sps:$4 sm:$0xff]   ;;  %v11301_v46 = vld [vmem:[%s18261_s5 + $0x7c0] ss:$8 sps:$4 sm:$0xff]  }
 0x5f8   :  { %3553 = vrot.lane.b32.xlu1 %v18528_v62, %s11732_s22  ;;  %v16175_v51 = vpop.permute.xlu0 %6868  ;;  %v11268_v2 = vld [vmem:[%s18261_s5 + $0x190] ss:$8 sps:$4 sm:$0xff]  }
 0x5f9   :  { %18553 = vst [vmem:[#allocation32_spill] sm:$0xff] %v16175_v51  ;;  %9905 = vmatpush1.bf16.msra.mxu1 %v11250_v23  ;;  %9881 = vmatprep.mubr.bf16.mxu1 %v7428_v6  ;;  %v16180_v29 = vpop.permute.xlu1 %6850  ;;  %v11309_v6 = vld [vmem:[%s18261_s5 + $0x7d4] ss:$8 sps:$4 sm:$0xff]  }
 0x5fa   :  { %9882 = vmatmul.mubr.bf16.gmra.mrb[100].mxu1 %v7427_v33  ;;  %9906 = vmatprep.subr.bf16.mxu1 %v11258_v35  ;;  %v11276_v35 = vld [vmem:[%s18261_s5 + $0x1a4] ss:$8 sps:$4 sm:$0xff]  }
 0x5fb   :  { %9924 = vmatprep.mubr.bf16.mxu1 %v3764_v24  ;;  %10229 = vmatpush1.bf16.msra.mxu0 %v11283_v45  ;;  %v11307_v24 = vld [vmem:[%s18261_s5 + $0x7d0] ss:$8 sps:$4 sm:$0xff]  }
 0x5fc   :  { %3577 = vrot.lane.b32.xlu1 %v18538_v61, %s11732_s22  ;;  %v16193_v49 = vpop.permute.xlu0 %6870  ;;  %10230 = vmatprep.subr.bf16.mxu0 %v11291_v10  ;;  %v11274_v10 = vld [vmem:[%s18261_s5 + $0x1a0] ss:$8 sps:$4 sm:$0xff]  }
 0x5fd   :  { %9907 = vmatpush1.bf16.msra.mxu1 %v11256_v1  ;;  %v16198_v15 = vpop.permute.xlu1 %6973  ;;  %v11282_v1 = vld [vmem:[%s18261_s5 + $0x1b4] ss:$8 sps:$4 sm:$0xff]  }
 0x5fe   :  { %9908 = vmatprep.subr.bf16.mxu1 %v11264_v14  ;;  %v11315_v14 = vld [vmem:[%s18261_s5 + $0x7e4] ss:$8 sps:$4 sm:$0xff]  }
 0x5ff   :  { %10231 = vmatpush1.bf16.msra.mxu0 %v11289_v11 }
 0x600   :  { %3676 = vrot.lane.b32.xlu1 %v18528_v62, %s11733_s23  ;;  %v16211_v23 = vpop.permute.xlu0 %6991  ;;  %10232 = vmatprep.subr.bf16.mxu0 %v11297_v27  ;;  %v3468_v62 = vsel %vm594_vm7, %v15228_v5, %v15657_v31  ;;  %v3590_v31 = vsel %vm3587_vm11, %v15332_v37, %v15699_v21  ;;  %v16323_v21 = vsel %vm3710_vm12, %v15365_v18, %v15739_v38 }
 0x601   :  { %18554 = vst [vmem:[#allocation46_spill] sm:$0xff] %v16211_v23  ;;  %9909 = vmatpush1.bf16.msra.mxu1 %v11262_v60  ;;  %v16216_v58 = vpop.permute.xlu1 %7094  ;;  %v11280_v60 = vld [vmem:[%s18261_s5 + $0x1b0] ss:$8 sps:$4 sm:$0xff]   ;;  %v16340_v18 = vsel %vm471_vm5, %v15219_v0, %v15632_v55 }
 0x602   :  { %9910 = vmatprep.subr.bf16.mxu1 %v11270_v8  ;;  %v3225_v8 = vsel %vm324_vm3, %v15179_v16, %v18550_v36  ;;  %v18559_v36 = vld [vmem:[#allocation27_spill] sm:$0xff]  ;;  %v11321_v16 = vld [vmem:[%s18261_s5 + $0x7f4] ss:$8 sps:$4 sm:$0xff]  }
 0x603   :  { %10233 = vmatpush1.bf16.msra.mxu0 %v11295_v12  ;;  %v11288_v12 = vld [vmem:[%s18261_s5 + $0x1c4] ss:$8 sps:$4 sm:$0xff]  }
 0x604   :  { %3700 = vrot.lane.b32.xlu1 %v18538_v61, %s11733_s23  ;;  %10234 = vmatprep.subr.bf16.mxu0 %v11303_v56  ;;  %v18557_v56 = vld [vmem:[#allocation53_spill] sm:$0xff] }
 0x605   :  { %9911 = vmatpush1.bf16.msra.mxu1 %v11268_v2  ;;  %v16232_v45 = vpop.permute.xlu0 %7112  ;;  %v16234_v33 = vpop.permute.xlu1 %7215  ;;  %v18558_v2 = vld [vmem:[#allocation51_spill] sm:$0xff] }
 0x606   :  { %18555 = vst [vmem:[#allocation49_spill] sm:$0xff] %v16232_v45  ;;  %9912 = vmatprep.subr.bf16.mxu1 %v11276_v35  ;;  %v3238_v35 = vsel %vm324_vm3, %v18558_v2, %v18557_v56 }
 0x607   :  { %10235 = vmatpush1.bf16.msra.mxu0 %v11301_v46  ;;  %v11313_v46 = vld [vmem:[%s18261_s5 + $0x7e0] ss:$8 sps:$4 sm:$0xff]  }
 0x608   :  { %6858 = vrot.lane.b32.xlu1 %v18521_v32, %s11728_s29  ;;  %10236 = vmatprep.subr.bf16.mxu0 %v11309_v6  ;;  %v3347_v6 = vsel %vm471_vm5, %v15199_v13, %v15575_v63  ;;  %v11286_v13 = vld [vmem:[%s18261_s5 + $0x1c0] ss:$8 sps:$4 sm:$0xff]   ;;  %v18563_v63 = vld [vmem:[#allocation41_spill] sm:$0xff] }
 0x609   :  { %9913 = vmatpush1.bf16.msra.mxu1 %v11274_v10  ;;  %v16250_v11 = vpop.permute.xlu0 %7233  ;;  %v16252_v27 = vpop.permute.xlu1 %7336  ;;  %v18560_v10 = vld [vmem:[#allocation37_spill] sm:$0xff] }
 0x60a   :  { %18556 = vst [vmem:[#allocation40_spill] sm:$0xff] %v16250_v11  ;;  %9914 = vmatprep.subr.bf16.mxu1 %v11282_v1  ;;  %v3275_v1 = vmax.bf16 %v3225_v8, %v18560_v10  ;;  %v11294_v8 = vld [vmem:[%s18261_s5 + $0x1d4] ss:$8 sps:$4 sm:$0xff]   ;;  %v3481_v10 = vsel %vm594_vm7, %v15679_v25, %v15652_v40 }
 0x60b   :  { %10237 = vmatpush1.bf16.msra.mxu0 %v11307_v24  ;;  %v3360_v24 = vsel %vm471_vm5, %v15632_v55, %v15597_v28  ;;  %v11319_v28 = vld [vmem:[%s18261_s5 + $0x7f0] ss:$8 sps:$4 sm:$0xff]  }
 0x60c   :  { %6981 = vrot.lane.b32.xlu1 %v18559_v36, %s11729_s11  ;;  %10238 = vmatprep.subr.bf16.mxu0 %v11315_v14  ;;  %v3288_v14 = vmax.bf16 %v3238_v35, %v18563_v63  ;;  %v16304_v35 = vsel %vm324_vm3, %v15188_v22, %v18558_v2  ;;  %v11292_v2 = vld [vmem:[%s18261_s5 + $0x1d0] ss:$8 sps:$4 sm:$0xff]   ;;  %v16347_v63 = vsel %vm324_vm3, %v16043_v41, %v16180_v29 }
 0x60d   :  { %9915 = vmatpush1.bf16.msra.mxu1 %v11280_v60  ;;  %v16281_v32 = vpop.permute.xlu0 %7354  ;;  %v16283_v61 = vpop.permute.xlu1 %6872  ;;  %v3396_v60 = vmax.bf16 %v3347_v6, %v3275_v1  ;;  %v3603_v6 = vsel %vm3587_vm11, %v15719_v50, %v15694_v17  ;;  %v11300_v1 = vld [vmem:[%s18261_s5 + $0x1e4] ss:$8 sps:$4 sm:$0xff]  }
 0x60e   :  { %18561 = vst [vmem:[#allocation51_spill] sm:$0xff] %v16281_v32  ;;  %18562 = vst [vmem:[#allocation37_spill] sm:$0xff] %v16283_v61  ;;  %9916 = vmatprep.subr.bf16.mxu1 %v11288_v12  ;;  %v3409_v5 = vmax.bf16 %v3360_v24, %v3288_v14  ;;  %v11366_v12 = vld [vmem:[%s18261_s5 + $0x804] ss:$8 sps:$4 sm:$0xff]   ;;  %v6906_v41 = vsel %vm324_vm3, %v16193_v49, %v16283_v61 }
 0x60f   :  { %10239 = vmatpush1.bf16.msra.mxu0 %v11313_v46  ;;  %v3517_v46 = vmax.bf16 %v3468_v62, %v3396_v60  ;;  %v16328_v62 = vsel %vm324_vm3, %v15779_v7, %v15754_v9  ;;  %v18565_v24 = vld [vmem:[#allocation39_spill] sm:$0xff]  ;;  %v6905_v60 = vsel %vm324_vm3, %v16175_v51, %v16193_v49 }
 0x610   :  { %7102 = vrot.lane.b32.xlu1 %v18559_v36, %s11731_s16  ;;  %10240 = vmatprep.subr.bf16.mxu0 %v11321_v16  ;;  %v3530_v37 = vmax.bf16 %v3481_v10, %v3409_v5  ;;  %v11298_v10 = vld [vmem:[%s18261_s5 + $0x1e0] ss:$8 sps:$4 sm:$0xff]   ;;  %v16377_v5 = vsel %vm471_vm5, %v15819_v44, %v15794_v53 }
 0x611   :  { %9917 = vmatpush1.bf16.msra.mxu1 %v11286_v13  ;;  %v6994_v22 = vpop.permute.xlu0 %6993  ;;  %v16342_v38 = vmax.bf16 %v3590_v31, %v3517_v46  ;;  %v6945_v31 = vmax.bf16 %v16347_v63, %v15169_v42  ;;  %v18568_v42 = vld [vmem:[#allocation15_spill] sm:$0xff] }
 0x612   :  { %v16330_v16 = vpop.permute.xlu1 %6995  ;;  %9918 = vmatprep.subr.bf16.mxu1 %v11294_v8  ;;  %v16349_v14 = vmax.bf16 %v3603_v6, %v3530_v37  ;;  %v6896_v8 = vsel %vm324_vm3, %v16180_v29, %v16041_v34  ;;  %v7027_v49 = vsel %vm471_vm5, %v16211_v23, %v6994_v22  ;;  %v11306_v6 = vld [vmem:[%s18261_s5 + $0x1f4] ss:$8 sps:$4 sm:$0xff]   ;;  %v18567_v37 = vld [vmem:[#allocation54_spill] sm:$0xff]  ;;  %v7017_v63 = vsel %vm471_vm5, %v18568_v42, %v16198_v15  ;;  %v18569_v23 = vld [vmem:[#allocation35_spill] sm:$0xff] }
 0x613   :  { %18564 = vst [vmem:[#allocation41_spill] sm:$0xff] %v16330_v16  ;;  %10241 = vmatpush1.bf16.msra.mxu0 %v11319_v28  ;;  %v16364_v28 = vsel %vm3710_vm12, %v15759_v57, %v15734_v47  ;;  %v6955_v13 = vmax.bf16 %v6905_v60, %v18567_v37  ;;  %v7028_v55 = vsel %vm471_vm5, %v6994_v22, %v16330_v16  ;;  %v18570_v51 = vld [vmem:[#allocation55_spill] sm:$0xff] }
 0x614   :  { %7223 = vrot.lane.b32.xlu1 %v18559_v36, %s11732_s22  ;;  %10263 = vmatprep.subr.bf16.mxu0 %v11366_v12  ;;  %v7018_v12 = vsel %vm471_vm5, %v16198_v15, %v16059_v26  ;;  %v6956_v53 = vmax.bf16 %v6906_v41, %v18570_v51  ;;  %v18572_v60 = vld [vmem:[#allocation11_spill] sm:$0xff]  ;;  %v11304_v51 = vld [vmem:[%s18261_s5 + $0x1f0] ss:$8 sps:$4 sm:$0xff]  }
 0x615   :  { %9919 = vmatpush1.bf16.msra.mxu1 %v11292_v2  ;;  %v7115_v29 = vpop.permute.xlu0 %7114  ;;  %v6946_v2 = vmax.bf16 %v6896_v8, %v15171_v54  ;;  %v18571_v54 = vld [vmem:[#allocation8_spill] sm:$0xff]  ;;  %v7076_v42 = vmax.bf16 %v7027_v49, %v6955_v13 }
 0x616   :  { %v16386_v46 = vpop.permute.xlu1 %7116  ;;  %9920 = vmatprep.subr.bf16.mxu1 %v11300_v1  ;;  %v7139_v1 = vsel %vm594_vm7, %v16216_v58, %v18569_v23  ;;  %v7148_v9 = vsel %vm594_vm7, %v16232_v45, %v7115_v29  ;;  %v7077_v41 = vmax.bf16 %v7028_v55, %v6956_v53  ;;  %v18573_v45 = vld [vmem:[#allocation12_spill] sm:$0xff] }
 0x617   :  { %18566 = vst [vmem:[#allocation39_spill] sm:$0xff] %v16386_v46  ;;  %v6564_v0 = vpop.f32.mrb[88].mxu0  ;;  %v7067_v15 = vmax.bf16 %v7018_v12, %v6946_v2  ;;  %v7149_v22 = vsel %vm594_vm7, %v7115_v29, %v16386_v46 }
 0x618   :  { %v6565_v8 = vadd.f32 %v6564_v0, %v18571_v54  ;;  %3192 = vrot.lane.b32.xlu1 %v18572_v60, %s11728_s29  ;;  %v6566_v37 = vpop.f32.mrb[89].mxu0  ;;  %v7260_v0 = vsel %vm3587_vm11, %v16234_v33, %v16117_v43  ;;  %v7198_v55 = vmax.bf16 %v7149_v22, %v7077_v41  ;;  %v18578_v41 = vmax.bf16 %v16323_v21, %v16342_v38  ;;  %v18581_v38 = vld [vmem:[#allocation71_spill] sm:$0xff] }
 0x619   :  { %v6567_v47 = vadd.f32 %v6566_v37, %v18571_v54  ;;  %9921 = vmatpush1.bf16.msra.mxu1 %v11298_v10  ;;  %v6568_v17 = vpop.f32.mrb[90].mxu0  ;;  %v7236_v40 = vpop.permute.xlu0 %7235  ;;  %v11312_v10 = vld [vmem:[%s18261_s5 + $0x204] ss:$8 sps:$4 sm:$0xff]   ;;  %v7188_v2 = vmax.bf16 %v7139_v1, %v7067_v15  ;;  %v7197_v37 = vmax.bf16 %v7148_v9, %v7076_v42  ;;  %v7138_v9 = vsel %vm594_vm7, %v16084_v59, %v16216_v58  ;;  %v11318_v58 = vld [vmem:[%s18261_s5 + $0x214] ss:$8 sps:$4 sm:$0xff]  }
 0x61a   :  { %v6569_v12 = vadd.f32 %v6568_v17, %v18573_v45  ;;  %v7269_v13 = vsel %vm3587_vm11, %v16250_v11, %v7236_v40  ;;  %v16419_v29 = vpop.permute.xlu1 %7237  ;;  %v6570_v49 = vpop.f32.mrb[91].mxu0  ;;  %9922 = vmatprep.subr.bf16.mxu1 %v11306_v6  ;;  %v7381_v17 = vsel %vm3710_vm12, %v16252_v27, %v16151_v48  ;;  %v6718_v11 = vmax.f32 %v6565_v8, 0.0 }
 0x61b   :  { %v7270_v56 = vsel %vm3587_vm11, %v7236_v40, %v16419_v29  ;;  %v6571_v53 = vadd.f32 %v6570_v49, %v18573_v45  ;;  %v7309_v16 = vmax.bf16 %v7260_v0, %v7188_v2  ;;  %v6719_v6 = vmax.f32 %v6567_v47, 0.0  ;;  %v11310_v47 = vld [vmem:[%s18261_s5 + $0x200] ss:$8 sps:$4 sm:$0xff]   ;;  %v11324_v2 = vld [vmem:[%s18261_s5 + $0x224] ss:$8 sps:$4 sm:$0xff]  }
 0x61c   :  { %v6742_v46 = vmax.f32 %v6569_v12, 0.0  ;;  %v7318_v61 = vmax.bf16 %v7269_v13, %v7197_v37  ;;  %v7319_v1 = vmax.bf16 %v7270_v56, %v7198_v55  ;;  %v18577_v56 = vld [vmem:[#allocation70_spill] sm:$0xff]  ;;  %v7066_v0 = vmax.bf16 %v7017_v63, %v6945_v31  ;;  %v18582_v63 = vld [vmem:[#allocation73_spill] sm:$0xff] }
 0x61d   :  { %v6743_v43 = vmax.f32 %v6571_v53, 0.0  ;;  %9923 = vmatpush1.bf16.msra.mxu1 %v11304_v51  ;;  %v7357_v23 = vpop.permute.xlu0 %7356  ;;  %v7430_v51 = vmax.bf16 %v7381_v17, %v7309_v16  ;;  %v18580_v16 = vmax.bf16 %v16328_v62, %v14958_v3  ;;  %v7259_v31 = vsel %vm3587_vm11, %v16123_v20, %v16234_v33  ;;  %v11316_v62 = vld [vmem:[%s18261_s5 + $0x210] ss:$8 sps:$4 sm:$0xff]   ;;  %v18584_v37 = vld [vmem:[#allocation34_spill] sm:$0xff] }
 0x61e   :  { %v16433_v40 = vpack.c.bf16 %v6742_v46, %v6718_v11  ;;  %v7390_v15 = vsel %vm3710_vm12, %v16281_v32, %v7357_v23  ;;  %v16437_v42 = vpop.permute.xlu1 %7358  ;;  %9945 = vmatprep.subr.bf16.mxu1 %v11312_v10  ;;  %v18576_v11 = vld [vmem:[#allocation67_spill] sm:$0xff]  ;;  %v3593_v13 = vsel %vm3587_vm11, %v18582_v63, %v18581_v38  ;;  %v3776_v20 = vmax.bf16 %v16364_v28, %v16349_v14 }
 0x61f   :  { %v16442_v8 = vpack.c.bf16 %v6743_v43, %v6719_v6  ;;  %v7391_v22 = vsel %vm3710_vm12, %v7357_v23, %v16437_v42  ;;  %v7439_v59 = vmax.bf16 %v7390_v15, %v7318_v61  ;;  %v3471_v46 = vsel %vm594_vm7, %v18577_v56, %v18576_v11  ;;  %v18579_v23 = vld [vmem:[#allocation31_spill] sm:$0xff]  ;;  %v11369_v15 = vld [vmem:[%s18261_s5 + $0x814] ss:$8 sps:$4 sm:$0xff]  }
 0x620   :  { %18574 = vst [vmem:[#allocation54_spill] sm:$0xff] %v16433_v40  ;;  %9925 = vmatmul.mubr.bf16.vlgmr.msra.gmra.mrb[96].mxu1 %v18578_v41  ;;  %6999 = vrot.lane.b32.xlu0 %v16433_v40, %s11729_s11  ;;  %v7440_v43 = vmax.bf16 %v7391_v22, %v7319_v1  ;;  %v3480_v61 = vsel %vm594_vm7, %v18579_v23, %v15679_v25  ;;  %v11322_v17 = vld [vmem:[%s18261_s5 + $0x220] ss:$8 sps:$4 sm:$0xff]   ;;  %v11325_v22 = vld [vmem:[%s18261_s5 + $0x230] ss:$8 sps:$4 sm:$0xff]  }
 0x621   :  { %18575 = vst [vmem:[#allocation15_spill] sm:$0xff] %v16442_v8  ;;  %v3399_v12 = vmax.bf16 %v16377_v5, %v18580_v16  ;;  %6878 = vrot.lane.b32.xlu1 %v16433_v40, %s11728_s29  ;;  %9934 = vmatprep.mubr.bf16.mxu1 %v7430_v51  ;;  %v16469_v21 = vpop.permute.xlu0 %3674  ;;  %v7187_v25 = vmax.bf16 %v7138_v9, %v7066_v0  ;;  %v11327_v9 = vld [vmem:[%s18261_s5 + $0x234] ss:$8 sps:$4 sm:$0xff]   ;;  %v11330_v51 = vld [vmem:[%s18261_s5 + $0x244] ss:$8 sps:$4 sm:$0xff]  }
 0x622   :  { %9946 = vmatpush1.bf16.msra.mxu1 %v11310_v47  ;;  %10199 = vmatprep.mubr.bf16.mxu0 %v7440_v43  ;;  %v16474_v3 = vpop.permute.xlu1 %3672  ;;  %v18583_v33 = vmax.bf16 %v16304_v35, %v18565_v24  ;;  %v7380_v10 = vsel %vm3710_vm12, %v16156_v52, %v16252_v27  ;;  %v3602_v14 = vsel %vm3587_vm11, %v18584_v37, %v15719_v50  ;;  %v18585_v24 = vld [vmem:[#allocation48_spill] sm:$0xff]  ;;  %v11328_v0 = vld [vmem:[%s18261_s5 + $0x240] ss:$8 sps:$4 sm:$0xff]  }
 0x623   :  { %v3520_v49 = vmax.bf16 %v3471_v46, %v3399_v12  ;;  %10200 = vmatmul.mubr.bf16.gmra.mrb[100].mxu0 %v7439_v59  ;;  %9947 = vmatprep.subr.bf16.mxu1 %v11318_v58  ;;  %v7308_v28 = vmax.bf16 %v7259_v31, %v7187_v25  ;;  %v3716_v35 = vsel %vm3710_vm12, %v16474_v3, %v16469_v21  ;;  %v11367_v59 = vld [vmem:[%s18261_s5 + $0x810] ss:$8 sps:$4 sm:$0xff]   ;;  %v11372_v58 = vld [vmem:[%s18261_s5 + $0x824] ss:$8 sps:$4 sm:$0xff]   ;;  %v11333_v41 = vld [vmem:[%s18261_s5 + $0x254] ss:$8 sps:$4 sm:$0xff]  }
 0x624   :  { %v3408_v5 = vmax.bf16 %v16340_v18, %v18583_v33  ;;  %10242 = vmatprep.mubr.bf16.mxu0 %v3776_v20  ;;  %7120 = vrot.lane.b32.xlu0 %v16433_v40, %s11731_s16  ;;  %v3725_v18 = vsel %vm3710_vm12, %v18585_v24, %v15759_v57  ;;  %v11364_v57 = vld [vmem:[%s18261_s5 + $0x800] ss:$8 sps:$4 sm:$0xff]   ;;  %v11375_v23 = vld [vmem:[%s18261_s5 + $0x834] ss:$8 sps:$4 sm:$0xff]   ;;  %v11331_v16 = vld [vmem:[%s18261_s5 + $0x250] ss:$8 sps:$4 sm:$0xff]  }
 0x625   :  { %v3643_v27 = vmax.bf16 %v3593_v13, %v3520_v49  ;;  %7001 = vrot.lane.b32.xlu1 %v16442_v8, %s11729_s11  ;;  %v7429_v53 = vmax.bf16 %v7380_v10, %v7308_v28  ;;  %v11370_v43 = vld [vmem:[%s18261_s5 + $0x820] ss:$8 sps:$4 sm:$0xff]   ;;  %v11336_v12 = vld [vmem:[%s18261_s5 + $0x264] ss:$8 sps:$4 sm:$0xff]   ;;  %v11373_v13 = vld [vmem:[%s18261_s5 + $0x830] ss:$8 sps:$4 sm:$0xff]  }
 0x626   :  { %v3529_v52 = vmax.bf16 %v3480_v61, %v3408_v5  ;;  %9948 = vmatpush1.bf16.msra.mxu1 %v11316_v62  ;;  %v16504_v50 = vpop.permute.xlu1 %3696  ;;  %v18586_v31 = vld [vmem:[#allocation18_spill] sm:$0xff]  ;;  %v16576_v62 = vpop.permute.xlu0 %3698  ;;  %v11339_v5 = vld [vmem:[%s18261_s5 + $0x274] ss:$8 sps:$4 sm:$0xff]   ;;  %v11337_v37 = vld [vmem:[%s18261_s5 + $0x270] ss:$8 sps:$4 sm:$0xff]  }
 0x627   :  { %9949 = vmatprep.subr.bf16.mxu1 %v11324_v2  ;;  %v3766_v6 = vmax.bf16 %v3716_v35, %v3643_v27  ;;  %v11381_v25 = vld [vmem:[%s18261_s5 + $0x844] ss:$8 sps:$4 sm:$0xff]   ;;  %v11334_v33 = vld [vmem:[%s18261_s5 + $0x260] ss:$8 sps:$4 sm:$0xff]   ;;  %v11387_v10 = vld [vmem:[%s18261_s5 + $0x854] ss:$8 sps:$4 sm:$0xff]  }
 0x628   :  { %v3652_v55 = vmax.bf16 %v3602_v14, %v3529_v52  ;;  %9935 = vmatmul.mubr.bf16.gmra.mrb[100].mxu1 %v7429_v53  ;;  %7241 = vrot.lane.b32.xlu0 %v16433_v40, %s11732_s22  ;;  %v11379_v49 = vld [vmem:[%s18261_s5 + $0x840] ss:$8 sps:$4 sm:$0xff]   ;;  %v11342_v14 = vld [vmem:[%s18261_s5 + $0x284] ss:$8 sps:$4 sm:$0xff]   ;;  %v11385_v35 = vld [vmem:[%s18261_s5 + $0x850] ss:$8 sps:$4 sm:$0xff]  }
 0x629   :  { %7122 = vrot.lane.b32.xlu1 %v16442_v8, %s11731_s16  ;;  %9977 = vmatprep.mubr.bf16.mxu1 %v3766_v6  ;;  %v18587_v52 = vld [vmem:[#allocation20_spill] sm:$0xff]  ;;  %v11393_v27 = vld [vmem:[%s18261_s5 + $0x864] ss:$8 sps:$4 sm:$0xff]  }
 0x62a   :  { %v3775_v1 = vmax.bf16 %v3725_v18, %v3652_v55  ;;  %9950 = vmatpush1.bf16.msra.mxu1 %v11322_v17  ;;  %v16522_v47 = vpop.permute.xlu1 %6854  ;;  %v16604_v28 = vpop.permute.xlu0 %6856  ;;  %v11340_v18 = vld [vmem:[%s18261_s5 + $0x280] ss:$8 sps:$4 sm:$0xff]   ;;  %v11345_v53 = vld [vmem:[%s18261_s5 + $0x294] ss:$8 sps:$4 sm:$0xff]  }
 0x62b   :  { %9951 = vmatprep.subr.bf16.mxu1 %v11327_v9  ;;  %v11391_v17 = vld [vmem:[%s18261_s5 + $0x860] ss:$8 sps:$4 sm:$0xff]   ;;  %v18588_v55 = vld [vmem:[#allocation13_spill] sm:$0xff] }
 0x62c   :  { %10243 = vmatmul.mubr.bf16.vlgmr.msra.gmra.mrb[96].mxu0 %v3775_v1  ;;  %7362 = vrot.lane.b32.xlu0 %v16433_v40, %s11733_s23  ;;  %v11399_v6 = vld [vmem:[%s18261_s5 + $0x874] ss:$8 sps:$4 sm:$0xff]   ;;  %v11343_v1 = vld [vmem:[%s18261_s5 + $0x290] ss:$8 sps:$4 sm:$0xff]   ;;  %v18625_v40 = vld [vmem:[#allocation23_spill] sm:$0xff] }
 0x62d   :  { %10264 = vmatpush1.bf16.msra.mxu0 %v11364_v57  ;;  %7243 = vrot.lane.b32.xlu1 %v16442_v8, %s11732_s22 }
 0x62e   :  { %10265 = vmatprep.subr.bf16.mxu0 %v11369_v15  ;;  %9952 = vmatpush1.bf16.msra.mxu1 %v11325_v22  ;;  %v16540_v46 = vpop.permute.xlu1 %6977  ;;  %v16634_v9 = vpop.permute.xlu0 %6979  ;;  %v11348_v15 = vld [vmem:[%s18261_s5 + $0x2a4] ss:$8 sps:$4 sm:$0xff]   ;;  %v11397_v22 = vld [vmem:[%s18261_s5 + $0x870] ss:$8 sps:$4 sm:$0xff]  }
 0x62f   :  { %9953 = vmatprep.subr.bf16.mxu1 %v11330_v51  ;;  %18589 = vst [vmem:[#allocation55_spill] sm:$0xff] %v16634_v9  ;;  %v11405_v51 = vld [vmem:[%s18261_s5 + $0x884] ss:$8 sps:$4 sm:$0xff]  }
 0x630   :  { %3434 = vrot.lane.b32.xlu0 %v18572_v60, %s11731_s16 }
 0x631   :  { %10266 = vmatpush1.bf16.msra.mxu0 %v11367_v59  ;;  %7364 = vrot.lane.b32.xlu1 %v16442_v8, %s11733_s23 }
 0x632   :  { %10267 = vmatprep.subr.bf16.mxu0 %v11372_v58  ;;  %9954 = vmatpush1.bf16.msra.mxu1 %v11328_v0  ;;  %v16558_v61 = vpop.permute.xlu1 %7098  ;;  %v11346_v58 = vld [vmem:[%s18261_s5 + $0x2a0] ss:$8 sps:$4 sm:$0xff]   ;;  %v11351_v0 = vld [vmem:[%s18261_s5 + $0x2b4] ss:$8 sps:$4 sm:$0xff]  }
 0x633   :  { %9955 = vmatprep.subr.bf16.mxu1 %v11333_v41  ;;  %v16662_v41 = vpop.permute.xlu0 %7100 }
 0x634   :  { %3458 = vrot.lane.b32.xlu0 %v18586_v31, %s11731_s16  ;;  %18590 = vst [vmem:[#allocation8_spill] sm:$0xff] %v16662_v41 }
 0x635   :  { %10268 = vmatpush1.bf16.msra.mxu0 %v11370_v43  ;;  %7344 = vrot.lane.b32.xlu1 %v18559_v36, %s11733_s23  ;;  %v11403_v43 = vld [vmem:[%s18261_s5 + $0x880] ss:$8 sps:$4 sm:$0xff]  }
 0x636   :  { %10269 = vmatprep.subr.bf16.mxu0 %v11375_v23  ;;  %9956 = vmatpush1.bf16.msra.mxu1 %v11331_v16  ;;  %v16578_v20 = vpop.permute.xlu1 %7219  ;;  %v11411_v23 = vld [vmem:[%s18261_s5 + $0x894] ss:$8 sps:$4 sm:$0xff]  }
 0x637   :  { %9957 = vmatprep.subr.bf16.mxu1 %v11336_v12  ;;  %v11349_v12 = vld [vmem:[%s18261_s5 + $0x2b0] ss:$8 sps:$4 sm:$0xff]  }
 0x638   :  { %3555 = vrot.lane.b32.xlu0 %v18572_v60, %s11732_s22 }
 0x639   :  { %10270 = vmatpush1.bf16.msra.mxu0 %v11373_v13  ;;  %3216 = vrot.lane.b32.xlu1 %v18586_v31, %s11728_s29  ;;  %v11354_v13 = vld [vmem:[%s18261_s5 + $0x2c4] ss:$8 sps:$4 sm:$0xff]  }
 0x63a   :  { %10271 = vmatprep.subr.bf16.mxu0 %v11381_v25  ;;  %9958 = vmatpush1.bf16.msra.mxu1 %v11334_v33  ;;  %v16596_v2 = vpop.permute.xlu1 %3188  ;;  %v18591_v25 = vld [vmem:[#allocation30_spill] sm:$0xff]  ;;  %v11409_v33 = vld [vmem:[%s18261_s5 + $0x890] ss:$8 sps:$4 sm:$0xff]  }
 0x63b   :  { %9959 = vmatprep.subr.bf16.mxu1 %v11339_v5  ;;  %v11417_v5 = vld [vmem:[%s18261_s5 + $0x8a4] ss:$8 sps:$4 sm:$0xff]  }
 0x63c   :  { %3579 = vrot.lane.b32.xlu0 %v18586_v31, %s11732_s22 }
 0x63d   :  { %10272 = vmatpush1.bf16.msra.mxu0 %v11379_v49  ;;  %3315 = vrot.lane.b32.xlu1 %v18587_v52, %s11729_s11  ;;  %v16692_v49 = vpop.permute.xlu0 %7221 }
 0x63e   :  { %10273 = vmatprep.subr.bf16.mxu0 %v11387_v10  ;;  %9960 = vmatpush1.bf16.msra.mxu1 %v11337_v37  ;;  %v16616_v24 = vpop.permute.xlu1 %7340  ;;  %18592 = vst [vmem:[#allocation11_spill] sm:$0xff] %v16692_v49  ;;  %v11352_v37 = vld [vmem:[%s18261_s5 + $0x2c0] ss:$8 sps:$4 sm:$0xff]  }
 0x63f   :  { %9961 = vmatprep.subr.bf16.mxu1 %v11342_v14  ;;  %v11357_v14 = vld [vmem:[%s18261_s5 + $0x2d4] ss:$8 sps:$4 sm:$0xff]  }
 0x640   :  { %3678 = vrot.lane.b32.xlu0 %v18572_v60, %s11733_s23 }
 0x641   :  { %10274 = vmatpush1.bf16.msra.mxu0 %v11385_v35  ;;  %3339 = vrot.lane.b32.xlu1 %v18588_v55, %s11729_s11  ;;  %v11415_v35 = vld [vmem:[%s18261_s5 + $0x8a0] ss:$8 sps:$4 sm:$0xff]  }
 0x642   :  { %10275 = vmatprep.subr.bf16.mxu0 %v11393_v27  ;;  %9962 = vmatpush1.bf16.msra.mxu1 %v11340_v18  ;;  %v16636_v57 = vpop.permute.xlu1 %3212  ;;  %v11423_v27 = vld [vmem:[%s18261_s5 + $0x8b4] ss:$8 sps:$4 sm:$0xff]  }
 0x643   :  { %9963 = vmatprep.subr.bf16.mxu1 %v11345_v53 }
 0x644   :  { %3702 = vrot.lane.b32.xlu0 %v18586_v31, %s11733_s23 }
 0x645   :  { %10276 = vmatpush1.bf16.msra.mxu0 %v11391_v17  ;;  %3436 = vrot.lane.b32.xlu1 %v18587_v52, %s11731_s16  ;;  %v11355_v17 = vld [vmem:[%s18261_s5 + $0x2d0] ss:$8 sps:$4 sm:$0xff]  }
 0x646   :  { %10277 = vmatprep.subr.bf16.mxu0 %v11399_v6  ;;  %9964 = vmatpush1.bf16.msra.mxu1 %v11343_v1  ;;  %v16654_v59 = vpop.permute.xlu1 %3311 }
 0x647   :  { %9965 = vmatprep.subr.bf16.mxu1 %v11348_v15  ;;  %v11360_v15 = vld [vmem:[%s18261_s5 + $0x2e4] ss:$8 sps:$4 sm:$0xff]  }
 0x648   :  { %6860 = vrot.lane.b32.xlu0 %v18559_v36, %s11728_s29 }
 0x649   :  { %10278 = vmatpush1.bf16.msra.mxu0 %v11397_v22  ;;  %3460 = vrot.lane.b32.xlu1 %v18588_v55, %s11731_s16  ;;  %v18593_v22 = vld [vmem:[#allocation52_spill] sm:$0xff] }
 0x64a   :  { %10279 = vmatprep.subr.bf16.mxu0 %v11405_v51  ;;  %9966 = vmatpush1.bf16.msra.mxu1 %v11346_v58  ;;  %v16674_v16 = vpop.permute.xlu1 %3335  ;;  %v3227_v51 = vsel %vm324_vm3, %v18593_v22, %v15779_v7  ;;  %v16724_v58 = vpop.permute.xlu0 %3190 }
 0x64b   :  { %9967 = vmatprep.subr.bf16.mxu1 %v11351_v0 }
 0x64c   :  { %6983 = vrot.lane.b32.xlu0 %v18591_v25, %s11729_s11 }
 0x64d   :  { %10280 = vmatpush1.bf16.msra.mxu0 %v11403_v43  ;;  %3557 = vrot.lane.b32.xlu1 %v18587_v52, %s11732_s22 }
 0x64e   :  { %10281 = vmatprep.subr.bf16.mxu0 %v11411_v23  ;;  %9968 = vmatpush1.bf16.msra.mxu1 %v11349_v12  ;;  %v16694_v10 = vpop.permute.xlu1 %6874  ;;  %v11421_v23 = vld [vmem:[%s18261_s5 + $0x8b0] ss:$8 sps:$4 sm:$0xff]   ;;  %v6898_v12 = vsel %vm324_vm3, %v16522_v47, %v16604_v28 }
 0x64f   :  { %9969 = vmatprep.subr.bf16.mxu1 %v11354_v13 }
 0x650   :  { %7104 = vrot.lane.b32.xlu0 %v18591_v25, %s11731_s16 }
 0x651   :  { %10282 = vmatpush1.bf16.msra.mxu0 %v11409_v33  ;;  %3581 = vrot.lane.b32.xlu1 %v18588_v55, %s11732_s22  ;;  %v11429_v33 = vld [vmem:[%s18261_s5 + $0x8c4] ss:$8 sps:$4 sm:$0xff]  }
 0x652   :  { %10283 = vmatprep.subr.bf16.mxu0 %v11417_v5  ;;  %9970 = vmatpush1.bf16.msra.mxu1 %v11352_v37  ;;  %v16712_v18 = vpop.permute.xlu1 %6997  ;;  %v6607_v53 = vpop.f32.mrb[88].mxu1  ;;  %v3349_v5 = vsel %vm471_vm5, %v15606_v19, %v15819_v44  ;;  %v11363_v44 = vld [vmem:[%s18261_s5 + $0x2f4] ss:$8 sps:$4 sm:$0xff]   ;;  %v3470_v19 = vsel %vm594_vm7, %v15625_v39, %v18577_v56  ;;  %v3592_v56 = vsel %vm3587_vm11, %v15674_v30, %v18582_v63  ;;  %v11378_v30 = vld [vmem:[%s18261_s5 + $0x304] ss:$8 sps:$4 sm:$0xff]  }
 0x653   :  { %v6608_v6 = vadd.f32 %v6607_v53, %v18571_v54  ;;  %v6609_v1 = vpop.f32.mrb[89].mxu1  ;;  %9971 = vmatprep.subr.bf16.mxu1 %v11357_v14  ;;  %v18594_v53 = vld [vmem:[#allocation43_spill] sm:$0xff]  ;;  %v11435_v39 = vld [vmem:[%s18261_s5 + $0x8d4] ss:$8 sps:$4 sm:$0xff]  }
 0x654   :  { %v6610_v0 = vadd.f32 %v6609_v1, %v18571_v54  ;;  %v6611_v43 = vpop.f32.mrb[90].mxu1  ;;  %7225 = vrot.lane.b32.xlu0 %v18591_v25, %s11732_s22  ;;  %v3277_v1 = vmax.bf16 %v3227_v51, %v18594_v53  ;;  %v7141_v51 = vsel %vm594_vm7, %v16558_v61, %v16662_v41  ;;  %v7262_v53 = vsel %vm3587_vm11, %v16578_v20, %v16692_v49 }
 0x655   :  { %10284 = vmatpush1.bf16.msra.mxu0 %v11415_v35  ;;  %v6612_v13 = vadd.f32 %v6611_v43, %v18573_v45  ;;  %3680 = vrot.lane.b32.xlu1 %v18587_v52, %s11733_s23  ;;  %v6613_v7 = vpop.f32.mrb[91].mxu1  ;;  %v11358_v35 = vld [vmem:[%s18261_s5 + $0x2e0] ss:$8 sps:$4 sm:$0xff]   ;;  %v6720_v22 = vmax.f32 %v6608_v6, 0.0 }
 0x656   :  { %10285 = vmatprep.subr.bf16.mxu0 %v11423_v27  ;;  %9972 = vmatpush1.bf16.msra.mxu1 %v11355_v17  ;;  %v6614_v37 = vadd.f32 %v6613_v7, %v18573_v45  ;;  %v16745_v14 = vpop.permute.xlu1 %7118  ;;  %v7020_v27 = vsel %vm471_vm5, %v16540_v46, %v16634_v9  ;;  %v18595_v17 = vld [vmem:[#allocation24_spill] sm:$0xff]  ;;  %v6721_v32 = vmax.f32 %v6610_v0, 0.0  ;;  %v11427_v6 = vld [vmem:[%s18261_s5 + $0x8c0] ss:$8 sps:$4 sm:$0xff]  }
 0x657   :  { %v6744_v43 = vmax.f32 %v6612_v13, 0.0  ;;  %9973 = vmatprep.subr.bf16.mxu1 %v11360_v15  ;;  %v6948_v7 = vmax.bf16 %v6898_v12, %v18595_v17  ;;  %v3398_v15 = vmax.bf16 %v3349_v5, %v3277_v1  ;;  %v18624_v9 = vld [vmem:[#allocation56_spill] sm:$0xff] }
 0x658   :  { %v6745_v36 = vmax.f32 %v6614_v37, 0.0  ;;  %3194 = vrot.lane.b32.xlu0 %v18587_v52, %s11728_s29 }
 0x659   :  { %10286 = vmatpush1.bf16.msra.mxu0 %v11421_v23  ;;  %v16769_v13 = vpack.c.bf16 %v6744_v43, %v6720_v22  ;;  %3704 = vrot.lane.b32.xlu1 %v18588_v55, %s11733_s23  ;;  %v7069_v0 = vmax.bf16 %v7020_v27, %v6948_v7  ;;  %v16779_v23 = vpop.permute.xlu0 %7342  ;;  %v3519_v37 = vmax.bf16 %v3470_v19, %v3398_v15  ;;  %v18597_v43 = vld [vmem:[#allocation22_spill] sm:$0xff]  ;;  %v11384_v19 = vld [vmem:[%s18261_s5 + $0x314] ss:$8 sps:$4 sm:$0xff]  }
 0x65a   :  { %10287 = vmatprep.subr.bf16.mxu0 %v11429_v33  ;;  %18596 = vst [vmem:[#allocation12_spill] sm:$0xff] %v16779_v23  ;;  %v16781_v12 = vpack.c.bf16 %v6745_v36, %v6721_v32  ;;  %9974 = vmatpush1.bf16.msra.mxu1 %v11358_v35  ;;  %v16783_v5 = vpop.permute.xlu1 %7239  ;;  %v11361_v33 = vld [vmem:[%s18261_s5 + $0x2f0] ss:$8 sps:$4 sm:$0xff]   ;;  %v3715_v32 = vsel %vm3710_vm12, %v15714_v4, %v16474_v3 }
 0x65b   :  { %9975 = vmatprep.subr.bf16.mxu1 %v11363_v44  ;;  %v6897_v36 = vsel %vm324_vm3, %v16041_v34, %v16522_v47  ;;  %v7190_v63 = vmax.bf16 %v7141_v51, %v7069_v0  ;;  %v11433_v35 = vld [vmem:[%s18261_s5 + $0x8d0] ss:$8 sps:$4 sm:$0xff]   ;;  %v3642_v1 = vmax.bf16 %v3592_v56, %v3519_v37  ;;  %v7383_v27 = vsel %vm3710_vm12, %v16616_v24, %v16779_v23  ;;  %v11376_v47 = vld [vmem:[%s18261_s5 + $0x300] ss:$8 sps:$4 sm:$0xff]   ;;  %v11447_v51 = vld [vmem:[%s18261_s5 + $0x8f4] ss:$8 sps:$4 sm:$0xff]  }
 0x65c   :  { %6880 = vrot.lane.b32.xlu0 %v16442_v8, %s11728_s29  ;;  %v7019_v4 = vsel %vm471_vm5, %v16059_v26, %v16540_v46  ;;  %v6947_v44 = vmax.bf16 %v6897_v36, %v18597_v43  ;;  %v11441_v26 = vld [vmem:[%s18261_s5 + $0x8e4] ss:$8 sps:$4 sm:$0xff]   ;;  %v11382_v0 = vld [vmem:[%s18261_s5 + $0x310] ss:$8 sps:$4 sm:$0xff]  }
 0x65d   :  { %10288 = vmatpush1.bf16.msra.mxu0 %v11427_v6  ;;  %6862 = vrot.lane.b32.xlu1 %v18591_v25, %s11728_s29  ;;  %v7311_v34 = vmax.bf16 %v7262_v53, %v7190_v63  ;;  %v3765_v22 = vmax.bf16 %v3715_v32, %v3642_v1  ;;  %v18598_v46 = vld [vmem:[#allocation35_spill] sm:$0xff]  ;;  %v7382_v53 = vsel %vm3710_vm12, %v16151_v48, %v16616_v24 }
 0x65e   :  { %10289 = vmatprep.subr.bf16.mxu0 %v11435_v39  ;;  %9976 = vmatpush1.bf16.msra.mxu1 %v11361_v33  ;;  %v16813_v3 = vpop.permute.xlu1 %7360  ;;  %v7140_v17 = vsel %vm594_vm7, %v18598_v46, %v16558_v61  ;;  %v11439_v6 = vld [vmem:[%s18261_s5 + $0x8e0] ss:$8 sps:$4 sm:$0xff]   ;;  %v7068_v15 = vmax.bf16 %v7019_v4, %v6947_v44  ;;  %v18599_v61 = vld [vmem:[#allocation28_spill] sm:$0xff]  ;;  %v11390_v37 = vld [vmem:[%s18261_s5 + $0x324] ss:$8 sps:$4 sm:$0xff]  }
 0x65f   :  { %9998 = vmatprep.subr.bf16.mxu1 %v11378_v30  ;;  %v7432_v7 = vmax.bf16 %v7383_v27, %v7311_v34  ;;  %v7261_v39 = vsel %vm3587_vm11, %v18599_v61, %v16578_v20  ;;  %v11445_v20 = vld [vmem:[%s18261_s5 + $0x8f0] ss:$8 sps:$4 sm:$0xff]   ;;  %v11388_v48 = vld [vmem:[%s18261_s5 + $0x320] ss:$8 sps:$4 sm:$0xff]   ;;  %v11453_v24 = vld [vmem:[%s18261_s5 + $0x904] ss:$8 sps:$4 sm:$0xff]  }
 0x660   :  { %7003 = vrot.lane.b32.xlu0 %v16769_v13, %s11729_s11  ;;  %v7189_v33 = vmax.bf16 %v7140_v17, %v7068_v15  ;;  %v11396_v34 = vld [vmem:[%s18261_s5 + $0x334] ss:$8 sps:$4 sm:$0xff]   ;;  %v11394_v46 = vld [vmem:[%s18261_s5 + $0x330] ss:$8 sps:$4 sm:$0xff]  }
 0x661   :  { %10290 = vmatpush1.bf16.msra.mxu0 %v11433_v35  ;;  %9978 = vmatmul.mubr.bf16.vlgmr.msra.gmra.mrb[96].mxu1 %v3765_v22 }
 0x662   :  { %6882 = vrot.lane.b32.xlu1 %v16769_v13, %s11728_s29  ;;  %9987 = vmatprep.mubr.bf16.mxu1 %v7432_v7  ;;  %v16841_v56 = vpop.permute.xlu1 %3432  ;;  %v7310_v30 = vmax.bf16 %v7261_v39, %v7189_v33  ;;  %v11400_v33 = vld [vmem:[%s18261_s5 + $0x340] ss:$8 sps:$4 sm:$0xff]  }
 0x663   :  { %9999 = vmatpush1.bf16.msra.mxu1 %v11376_v47  ;;  %10291 = vmatprep.subr.bf16.mxu0 %v11441_v26 }
 0x664   :  { %10000 = vmatprep.subr.bf16.mxu1 %v11384_v19  ;;  %7124 = vrot.lane.b32.xlu0 %v16769_v13, %s11731_s16  ;;  %v7431_v27 = vmax.bf16 %v7382_v53, %v7310_v30  ;;  %v18602_v30 = vld [vmem:[#allocation17_spill] sm:$0xff] }
 0x665   :  { %10292 = vmatpush1.bf16.msra.mxu0 %v11439_v6  ;;  %v6650_v32 = vpop.f32.mrb[92].mxu0  ;;  %v11402_v6 = vld [vmem:[%s18261_s5 + $0x344] ss:$8 sps:$4 sm:$0xff]  }
 0x666   :  { %7005 = vrot.lane.b32.xlu1 %v16781_v12, %s11729_s11  ;;  %10293 = vmatprep.subr.bf16.mxu0 %v11447_v51  ;;  %v16859_v36 = vpop.permute.xlu1 %3456  ;;  %v6651_v63 = vadd.f32 %v6650_v32, %v18571_v54  ;;  %v6652_v35 = vpop.f32.mrb[93].mxu0  ;;  %v18600_v51 = vld [vmem:[#allocation63_spill] sm:$0xff] }
 0x667   :  { %10001 = vmatpush1.bf16.msra.mxu1 %v11382_v0  ;;  %v6653_v1 = vadd.f32 %v6652_v35, %v18571_v54  ;;  %v6654_v4 = vpop.f32.mrb[94].mxu0  ;;  %v3241_v61 = vsel %vm324_vm3, %v18600_v51, %v16636_v57 }
 0x668   :  { %10002 = vmatprep.subr.bf16.mxu1 %v11390_v37  ;;  %v6655_v47 = vadd.f32 %v6654_v4, %v18573_v45  ;;  %7245 = vrot.lane.b32.xlu0 %v16769_v13, %s11732_s22  ;;  %v6656_v22 = vpop.f32.mrb[95].mxu0  ;;  %v6722_v44 = vmax.f32 %v6651_v63, 0.0  ;;  %v18601_v37 = vld [vmem:[#allocation66_spill] sm:$0xff]  ;;  %v3291_v32 = vmax.bf16 %v3241_v61, %v18602_v30  ;;  %v18603_v63 = vld [vmem:[#allocation69_spill] sm:$0xff]  ;;  %v18604_v4 = vld [vmem:[#allocation36_spill] sm:$0xff] }
 0x669   :  { %10294 = vmatpush1.bf16.msra.mxu0 %v11445_v20  ;;  %9988 = vmatmul.mubr.bf16.gmra.mrb[100].mxu1 %v7431_v27  ;;  %v6657_v43 = vadd.f32 %v6656_v22, %v18573_v45  ;;  %v6723_v17 = vmax.f32 %v6653_v1, 0.0  ;;  %v3363_v53 = vsel %vm471_vm5, %v18601_v37, %v16674_v16  ;;  %v11408_v20 = vld [vmem:[%s18261_s5 + $0x354] ss:$8 sps:$4 sm:$0xff]   ;;  %v3484_v35 = vsel %vm594_vm7, %v18603_v63, %v16859_v36  ;;  %v11406_v27 = vld [vmem:[%s18261_s5 + $0x350] ss:$8 sps:$4 sm:$0xff]  }
 0x66a   :  { %7126 = vrot.lane.b32.xlu1 %v16781_v12, %s11731_s16  ;;  %v6746_v19 = vmax.f32 %v6655_v47, 0.0  ;;  %v16878_v26 = vpop.permute.xlu1 %3553  ;;  %10316 = vmatprep.subr.bf16.mxu0 %v11453_v24 }
 0x66b   :  { %10003 = vmatpush1.bf16.msra.mxu1 %v11388_v48  ;;  %v6747_v7 = vmax.f32 %v6657_v43, 0.0  ;;  %v3412_v48 = vmax.bf16 %v3363_v53, %v3291_v32  ;;  %v11414_v43 = vld [vmem:[%s18261_s5 + $0x364] ss:$8 sps:$4 sm:$0xff]  }
 0x66c   :  { %10004 = vmatprep.subr.bf16.mxu1 %v11396_v34  ;;  %v16886_v15 = vpack.c.bf16 %v6746_v19, %v6722_v44  ;;  %7366 = vrot.lane.b32.xlu0 %v16769_v13, %s11733_s23 }
 0x66d   :  { %v16893_v39 = vpack.c.bf16 %v6747_v7, %v6723_v17  ;;  %v3533_v44 = vmax.bf16 %v3484_v35, %v3412_v48  ;;  %v18605_v7 = vld [vmem:[#allocation29_spill] sm:$0xff] }
 0x66e   :  { %7247 = vrot.lane.b32.xlu1 %v16781_v12, %s11732_s22  ;;  %v16897_v0 = vpop.permute.xlu1 %3577  ;;  %v11420_v48 = vld [vmem:[%s18261_s5 + $0x374] ss:$8 sps:$4 sm:$0xff]  }
 0x66f   :  { %10005 = vmatpush1.bf16.msra.mxu1 %v11394_v46  ;;  %v3606_v34 = vsel %vm3587_vm11, %v18604_v4, %v16897_v0 }
 0x670   :  { %10006 = vmatprep.subr.bf16.mxu1 %v11402_v6  ;;  %7346 = vrot.lane.b32.xlu0 %v18591_v25, %s11733_s23  ;;  %v16934_v61 = vmax.bf16 %v3606_v34, %v3533_v44 }
 0x672   :  { %7368 = vrot.lane.b32.xlu1 %v16781_v12, %s11733_s23  ;;  %v16916_v24 = vpop.permute.xlu1 %3676  ;;  %v6693_v1 = vpop.f32.mrb[92].mxu1  ;;  %18606 = vst [vmem:[#allocation67_spill] sm:$0xff] %v16934_v61 }
 0x673   :  { %10007 = vmatpush1.bf16.msra.mxu1 %v11400_v33  ;;  %v6694_v47 = vadd.f32 %v6693_v1, %v18571_v54  ;;  %v6695_v22 = vpop.f32.mrb[93].mxu1 }
 0x674   :  { %10008 = vmatprep.subr.bf16.mxu1 %v11408_v20  ;;  %v6696_v19 = vadd.f32 %v6695_v22, %v18571_v54  ;;  %v6697_v46 = vpop.f32.mrb[94].mxu1  ;;  %3218 = vrot.lane.b32.xlu0 %v18588_v55, %s11728_s29  ;;  %v11412_v54 = vld [vmem:[%s18261_s5 + $0x360] ss:$8 sps:$4 sm:$0xff]   ;;  %v18618_v55 = vld [vmem:[#allocation37_spill] sm:$0xff] }
 0x675   :  { %v6698_v17 = vadd.f32 %v6697_v46, %v18573_v45  ;;  %v6699_v6 = vpop.f32.mrb[95].mxu1  ;;  %v6724_v30 = vmax.f32 %v6694_v47, 0.0  ;;  %v11438_v47 = vld [vmem:[%s18261_s5 + $0x3a4] ss:$8 sps:$4 sm:$0xff]  }
 0x676   :  { %6985 = vrot.lane.b32.xlu1 %v18605_v7, %s11729_s11  ;;  %v6725_v33 = vmax.f32 %v6696_v19, 0.0  ;;  %v6700_v53 = vadd.f32 %v6699_v6, %v18573_v45  ;;  %v16937_v20 = vpop.permute.xlu1 %3700  ;;  %v11418_v19 = vld [vmem:[%s18261_s5 + $0x370] ss:$8 sps:$4 sm:$0xff]   ;;  %v16972_v6 = vpop.permute.xlu0 %3214 }
 0x677   :  { %10009 = vmatpush1.bf16.msra.mxu1 %v11406_v27  ;;  %v6748_v32 = vmax.f32 %v6698_v17, 0.0  ;;  %v16945_v35 = vsel %vm3710_vm12, %v16576_v62, %v16937_v20  ;;  %v18608_v27 = vld [vmem:[#allocation10_spill] sm:$0xff] }
 0x678   :  { %18607 = vst [vmem:[#allocation70_spill] sm:$0xff] %v16945_v35  ;;  %10010 = vmatprep.subr.bf16.mxu1 %v11414_v43  ;;  %v6749_v45 = vmax.f32 %v6700_v53, 0.0  ;;  %3317 = vrot.lane.b32.xlu0 %v18608_v27, %s11729_s11  ;;  %v6773_v22 = vsel %vm76_vm10, %v6725_v33, 0.0  ;;  %v11426_v17 = vld [vmem:[%s18261_s5 + $0x384] ss:$8 sps:$4 sm:$0xff]   ;;  %v18612_v33 = vld [vmem:[#allocation21_spill] sm:$0xff] }
 0x679   :  { %v16954_v34 = vpack.c.bf16 %v6748_v32, %v6724_v30  ;;  %v11432_v30 = vld [vmem:[%s18261_s5 + $0x394] ss:$8 sps:$4 sm:$0xff]  }
 0x67a   :  { %7106 = vrot.lane.b32.xlu1 %v18605_v7, %s11731_s16  ;;  %v6797_v43 = vsel %vm76_vm10, %v6749_v45, 0.0  ;;  %v16962_v44 = vpop.permute.xlu1 %6858  ;;  %v16990_v32 = vpop.permute.xlu0 %3313  ;;  %v18620_v35 = vld [vmem:[#allocation65_spill] sm:$0xff] }
 0x67b   :  { %18609 = vst [vmem:[#allocation31_spill] sm:$0xff] %v16954_v34  ;;  %10011 = vmatpush1.bf16.msra.mxu1 %v11412_v54  ;;  %v16967_v46 = vpack.c.bf16 %v6797_v43, %v6773_v22  ;;  %v11424_v54 = vld [vmem:[%s18261_s5 + $0x380] ss:$8 sps:$4 sm:$0xff]   ;;  %v11444_v43 = vld [vmem:[%s18261_s5 + $0x3b4] ss:$8 sps:$4 sm:$0xff]   ;;  %v3240_v25 = vsel %vm324_vm3, %v18620_v35, %v18600_v51 }
 0x67c   :  { %10012 = vmatprep.subr.bf16.mxu1 %v11420_v48  ;;  %3341 = vrot.lane.b32.xlu0 %v18612_v33, %s11729_s11  ;;  %v11430_v48 = vld [vmem:[%s18261_s5 + $0x390] ss:$8 sps:$4 sm:$0xff]   ;;  %v11436_v22 = vld [vmem:[%s18261_s5 + $0x3a0] ss:$8 sps:$4 sm:$0xff]  }
 0x67d   :  { %18611 = vst [vmem:[#allocation71_spill] sm:$0xff] %v16967_v46  ;;  %v6907_v46 = vsel %vm324_vm3, %v18618_v55, %v16694_v10  ;;  %v11468_v55 = vld [vmem:[%s18261_s5 + $0x3f4] ss:$8 sps:$4 sm:$0xff]  }
 0x67e   :  { %6886 = vrot.lane.b32.xlu1 %v16886_v15, %s11728_s29  ;;  %v16978_v53 = vpop.permute.xlu1 %6981  ;;  %v18623_v51 = vld [vmem:[#allocation68_spill] sm:$0xff] }
 0x67f   :  { %18613 = vst [vmem:[#allocation73_spill] sm:$0xff] %v16978_v53  ;;  %10013 = vmatpush1.bf16.msra.mxu1 %v11418_v19  ;;  %v17010_v19 = vpop.permute.xlu0 %3337  ;;  %v6957_v53 = vmax.bf16 %v6907_v46, %v18624_v9  ;;  %v11466_v9 = vld [vmem:[%s18261_s5 + $0x3f0] ss:$8 sps:$4 sm:$0xff]  }
 0x680   :  { %10014 = vmatprep.subr.bf16.mxu1 %v11426_v17  ;;  %3438 = vrot.lane.b32.xlu0 %v18608_v27, %s11731_s16 }
 0x682   :  { %7009 = vrot.lane.b32.xlu1 %v16893_v39, %s11729_s11  ;;  %v16995_v45 = vpop.permute.xlu1 %7102 }
 0x683   :  { %10015 = vmatpush1.bf16.msra.mxu1 %v11424_v54  ;;  %18614 = vst [vmem:[#allocation34_spill] sm:$0xff] %v16995_v45  ;;  %v11442_v54 = vld [vmem:[%s18261_s5 + $0x3b0] ss:$8 sps:$4 sm:$0xff]   ;;  %v3362_v45 = vsel %vm471_vm5, %v18623_v51, %v18601_v37 }
 0x684   :  { %10016 = vmatprep.subr.bf16.mxu1 %v11432_v30  ;;  %3462 = vrot.lane.b32.xlu0 %v18612_v33, %s11731_s16  ;;  %v11450_v30 = vld [vmem:[%s18261_s5 + $0x3c4] ss:$8 sps:$4 sm:$0xff]   ;;  %v18628_v37 = vld [vmem:[#allocation72_spill] sm:$0xff] }
 0x685   :  { %v3483_v46 = vsel %vm594_vm7, %v18628_v37, %v18603_v63 }
 0x686   :  { %7130 = vrot.lane.b32.xlu1 %v16893_v39, %s11731_s16  ;;  %v17014_v17 = vpop.permute.xlu1 %7223 }
 0x687   :  { %10017 = vmatpush1.bf16.msra.mxu1 %v11430_v48  ;;  %18615 = vst [vmem:[#allocation48_spill] sm:$0xff] %v17014_v17  ;;  %v17028_v48 = vpop.permute.xlu0 %6876  ;;  %v18622_v17 = vld [vmem:[#allocation41_spill] sm:$0xff] }
 0x688   :  { %10018 = vmatprep.subr.bf16.mxu1 %v11438_v47  ;;  %3559 = vrot.lane.b32.xlu0 %v18608_v27, %s11732_s22  ;;  %v11448_v47 = vld [vmem:[%s18261_s5 + $0x3c0] ss:$8 sps:$4 sm:$0xff]   ;;  %v7029_v41 = vsel %vm471_vm5, %v18622_v17, %v16712_v18 }
 0x68a   :  { %7227 = vrot.lane.b32.xlu1 %v18605_v7, %s11732_s22 }
 0x68b   :  { %10019 = vmatpush1.bf16.msra.mxu1 %v11436_v22  ;;  %v17033_v22 = vpop.permute.xlu1 %3192 }
 0x68c   :  { %10020 = vmatprep.subr.bf16.mxu1 %v11444_v43  ;;  %3583 = vrot.lane.b32.xlu0 %v18612_v33, %s11732_s22  ;;  %v11456_v43 = vld [vmem:[%s18261_s5 + $0x3d4] ss:$8 sps:$4 sm:$0xff]  }
 0x68e   :  { %3196 = vrot.lane.b32.xlu1 %v18608_v27, %s11728_s29 }
 0x68f   :  { %10021 = vmatpush1.bf16.msra.mxu1 %v11442_v54  ;;  %v11454_v54 = vld [vmem:[%s18261_s5 + $0x3d0] ss:$8 sps:$4 sm:$0xff]  }
 0x690   :  { %10022 = vmatprep.subr.bf16.mxu1 %v11450_v30  ;;  %3682 = vrot.lane.b32.xlu0 %v18608_v27, %s11733_s23  ;;  %v11462_v30 = vld [vmem:[%s18261_s5 + $0x3e4] ss:$8 sps:$4 sm:$0xff]   ;;  %v6908_v27 = vsel %vm324_vm3, %v16694_v10, %v17028_v48  ;;  %v18621_v10 = vld [vmem:[#allocation57_spill] sm:$0xff] }
 0x692   :  { %7253 = vrot.lane.b32.xlu1 %v16954_v34, %s11732_s22  ;;  %v17042_v1 = vpop.permute.xlu0 %6999 }
 0x693   :  { %18616 = vst [vmem:[#allocation18_spill] sm:$0xff] %v17042_v1  ;;  %10023 = vmatpush1.bf16.msra.mxu1 %v11448_v47  ;;  %v17047_v52 = vpop.permute.xlu1 %6878  ;;  %v18617_v47 = vld [vmem:[#allocation44_spill] sm:$0xff]  ;;  %v7030_v23 = vsel %vm471_vm5, %v16712_v18, %v17042_v1  ;;  %v18627_v18 = vld [vmem:[#allocation39_spill] sm:$0xff] }
 0x694   :  { %10024 = vmatprep.subr.bf16.mxu1 %v11456_v43  ;;  %3706 = vrot.lane.b32.xlu0 %v18612_v33, %s11733_s23  ;;  %v11460_v43 = vld [vmem:[%s18261_s5 + $0x3e0] ss:$8 sps:$4 sm:$0xff]   ;;  %v7150_v17 = vsel %vm594_vm7, %v18627_v18, %v16745_v14 }
 0x696   :  { %7350 = vrot.lane.b32.xlu1 %v18617_v47, %s11733_s23  ;;  %v17062_v61 = vpop.permute.xlu0 %7120 }
 0x697   :  { %18619 = vst [vmem:[#allocation52_spill] sm:$0xff] %v17062_v61  ;;  %10025 = vmatpush1.bf16.msra.mxu1 %v11454_v54  ;;  %v17073_v49 = vpop.permute.xlu1 %7001  ;;  %v6958_v54 = vmax.bf16 %v6908_v27, %v18621_v10  ;;  %v18626_v27 = vld [vmem:[#allocation9_spill] sm:$0xff] }
 0x698   :  { %10026 = vmatprep.subr.bf16.mxu1 %v11462_v30  ;;  %6864 = vrot.lane.b32.xlu0 %v18605_v7, %s11728_s29  ;;  %v7151_v30 = vsel %vm594_vm7, %v16745_v14, %v17062_v61  ;;  %v3290_v10 = vmax.bf16 %v3240_v25, %v18626_v27  ;;  %v7078_v61 = vmax.bf16 %v7029_v41, %v6957_v53  ;;  %v11486_v14 = vld [vmem:[%s18261_s5 + $0x404] ss:$8 sps:$4 sm:$0xff]  }
 0x699   :  { %v7079_v8 = vmax.bf16 %v7030_v23, %v6958_v54  ;;  %v18629_v41 = vld [vmem:[#allocation74_spill] sm:$0xff] }
 0x69a   :  { %3222 = vrot.lane.b32.xlu1 %v18625_v40, %s11728_s29  ;;  %v17097_v1 = vpop.permute.xlu0 %7241  ;;  %v3411_v23 = vmax.bf16 %v3362_v45, %v3290_v10  ;;  %v3605_v63 = vsel %vm3587_vm11, %v18629_v41, %v18604_v4  ;;  %v7199_v53 = vmax.bf16 %v7150_v17, %v7078_v61  ;;  %v3728_v4 = vsel %vm3710_vm12, %v16504_v50, %v16576_v62 }
 0x69b   :  { %10027 = vmatpush1.bf16.msra.mxu1 %v11460_v43  ;;  %v7272_v25 = vsel %vm3587_vm11, %v16783_v5, %v17097_v1  ;;  %v17108_v27 = vpop.permute.xlu1 %7122  ;;  %v7271_v43 = vsel %vm3587_vm11, %v16419_v29, %v16783_v5  ;;  %v7200_v54 = vmax.bf16 %v7151_v30, %v7079_v8  ;;  %v7392_v29 = vsel %vm3710_vm12, %v16437_v42, %v16813_v3 }
 0x69c   :  { %10028 = vmatprep.subr.bf16.mxu1 %v11468_v55  ;;  %6884 = vrot.lane.b32.xlu0 %v16781_v12, %s11728_s29  ;;  %v18630_v55 = vld [vmem:[#allocation53_spill] sm:$0xff]  ;;  %v3532_v10 = vmax.bf16 %v3483_v46, %v3411_v23  ;;  %v7320_v61 = vmax.bf16 %v7271_v43, %v7199_v53  ;;  %v18632_v46 = vld [vmem:[#allocation42_spill] sm:$0xff] }
 0x69d   :  { %v3239_v45 = vsel %vm324_vm3, %v18630_v55, %v18620_v35  ;;  %v7321_v8 = vmax.bf16 %v7272_v25, %v7200_v54  ;;  %v18631_v35 = vld [vmem:[#allocation58_spill] sm:$0xff] }
 0x69e   :  { %7372 = vrot.lane.b32.xlu1 %v16893_v39, %s11733_s23  ;;  %v17129_v5 = vpop.permute.xlu0 %7362  ;;  %v3361_v42 = vsel %vm471_vm5, %v18631_v35, %v18623_v51  ;;  %v3655_v17 = vmax.bf16 %v3605_v63, %v3532_v10  ;;  %v3289_v25 = vmax.bf16 %v3239_v45, %v18632_v46  ;;  %v7441_v62 = vmax.bf16 %v7392_v29, %v7320_v61  ;;  %v18634_v63 = vld [vmem:[#allocation60_spill] sm:$0xff]  ;;  %v18637_v46 = vld [vmem:[#allocation19_spill] sm:$0xff] }
 0x69f   :  { %10029 = vmatpush1.bf16.msra.mxu1 %v11466_v9  ;;  %v7393_v30 = vsel %vm3710_vm12, %v16813_v3, %v17129_v5  ;;  %v17137_v18 = vpop.permute.xlu1 %7243  ;;  %v18633_v3 = vld [vmem:[#allocation59_spill] sm:$0xff]  ;;  %v3604_v53 = vsel %vm3587_vm11, %v18634_v63, %v18629_v41  ;;  %v3230_v61 = vsel %vm324_vm3, %v16596_v2, %v16724_v58 }
 0x6a0   :  { %10051 = vmatprep.subr.bf16.mxu1 %v11486_v14  ;;  %7007 = vrot.lane.b32.xlu0 %v16886_v15, %s11729_s11  ;;  %v7442_v9 = vmax.bf16 %v7393_v30, %v7321_v8  ;;  %v3482_v23 = vsel %vm594_vm7, %v18633_v3, %v18628_v37  ;;  %v3778_v43 = vmax.bf16 %v3728_v4, %v3655_v17  ;;  %v18635_v37 = vld [vmem:[#allocation61_spill] sm:$0xff]  ;;  %v11451_v41 = vld [vmem:[%s18261_s5 + $0x900] ss:$8 sps:$4 sm:$0xff]   ;;  %v18638_v3 = vld [vmem:[#allocation64_spill] sm:$0xff] }
 0x6a1   :  { %v3410_v51 = vmax.bf16 %v3361_v42, %v3289_v25  ;;  %v3727_v45 = vsel %vm3710_vm12, %v18635_v37, %v16504_v50  ;;  %v11459_v50 = vld [vmem:[%s18261_s5 + $0x914] ss:$8 sps:$4 sm:$0xff]   ;;  %v18636_v30 = vld [vmem:[#allocation62_spill] sm:$0xff]  ;;  %v3352_v17 = vsel %vm471_vm5, %v16654_v59, %v16990_v32  ;;  %v3280_v25 = vmax.bf16 %v3230_v61, %v18637_v46 }
 0x6a2   :  { %3343 = vrot.lane.b32.xlu1 %v18625_v40, %s11729_s11  ;;  %v17150_v14 = vpop.permute.xlu0 %3434  ;;  %10252 = vmatprep.mubr.bf16.mxu0 %v7442_v9  ;;  %v3229_v35 = vsel %vm324_vm3, %v18636_v30, %v16596_v2  ;;  %v11457_v2 = vld [vmem:[%s18261_s5 + $0x910] ss:$8 sps:$4 sm:$0xff]   ;;  %v18640_v37 = vld [vmem:[#allocation6_spill] sm:$0xff] }
 0x6a3   :  { %v17152_v54 = vpop.permute.xlu1 %7364  ;;  %10253 = vmatmul.mubr.bf16.gmra.mrb[100].mxu0 %v7441_v62  ;;  %v3531_v55 = vmax.bf16 %v3482_v23, %v3410_v51  ;;  %v3242_v62 = vsel %vm324_vm3, %v16636_v57, %v16972_v6  ;;  %v3351_v23 = vsel %vm471_vm5, %v18638_v3, %v16654_v59  ;;  %v3473_v63 = vsel %vm594_vm7, %v16841_v56, %v17150_v14  ;;  %v11465_v57 = vld [vmem:[%s18261_s5 + $0x924] ss:$8 sps:$4 sm:$0xff]  }
 0x6a4   :  { %7128 = vrot.lane.b32.xlu0 %v16886_v15, %s11731_s16  ;;  %10295 = vmatprep.mubr.bf16.mxu0 %v3778_v43  ;;  %v18639_v43 = vld [vmem:[#allocation7_spill] sm:$0xff]  ;;  %v3401_v59 = vmax.bf16 %v3352_v17, %v3280_v25 }
 0x6a5   :  { %v3654_v29 = vmax.bf16 %v3604_v53, %v3531_v55  ;;  %v3279_v51 = vmax.bf16 %v3229_v35, %v18639_v43  ;;  %v3472_v53 = vsel %vm594_vm7, %v18576_v11, %v16841_v56 }
 0x6a6   :  { %3464 = vrot.lane.b32.xlu1 %v18625_v40, %s11731_s16  ;;  %v17164_v10 = vpop.permute.xlu0 %3458  ;;  %v3522_v11 = vmax.bf16 %v3473_v63, %v3401_v59  ;;  %v11474_v63 = vld [vmem:[%s18261_s5 + $0x944] ss:$8 sps:$4 sm:$0xff]   ;;  %v11484_v59 = vld [vmem:[%s18261_s5 + $0x400] ss:$8 sps:$4 sm:$0xff]  }
 0x6a7   :  { %v17166_v8 = vpop.permute.xlu1 %7344  ;;  %v3777_v4 = vmax.bf16 %v3727_v45, %v3654_v29  ;;  %v3292_v45 = vmax.bf16 %v3242_v62, %v18640_v37  ;;  %v3400_v29 = vmax.bf16 %v3351_v23, %v3279_v51  ;;  %v3485_v35 = vsel %vm594_vm7, %v16859_v36, %v17164_v10 }
 0x6a8   :  { %7249 = vrot.lane.b32.xlu0 %v16886_v15, %s11732_s22 }
 0x6a9   :  { %v3521_v30 = vmax.bf16 %v3472_v53, %v3400_v29  ;;  %v18648_v29 = vld [vmem:[#allocation55_spill] sm:$0xff] }
 0x6aa   :  { %3585 = vrot.lane.b32.xlu1 %v18625_v40, %s11732_s22  ;;  %v17184_v42 = vpop.permute.xlu0 %3555 }
 0x6ab   :  { %v17189_v9 = vpop.permute.xlu1 %3216  ;;  %10296 = vmatmul.mubr.bf16.vlgmr.msra.gmra.mrb[96].mxu0 %v3777_v4  ;;  %v3595_v4 = vsel %vm3587_vm11, %v16878_v26, %v17184_v42 }
 0x6ac   :  { %10317 = vmatpush1.bf16.msra.mxu0 %v11451_v41  ;;  %7370 = vrot.lane.b32.xlu0 %v16886_v15, %s11733_s23  ;;  %v3364_v41 = vsel %vm471_vm5, %v16674_v16, %v17010_v19  ;;  %v3243_v56 = vsel %vm324_vm3, %v16972_v6, %v17189_v9  ;;  %v11463_v16 = vld [vmem:[%s18261_s5 + $0x920] ss:$8 sps:$4 sm:$0xff]   ;;  %v3717_v6 = vsel %vm3710_vm12, %v16469_v21, %v16916_v24 }
 0x6ad   :  { %10318 = vmatprep.subr.bf16.mxu0 %v11459_v50  ;;  %v3594_v50 = vsel %vm3587_vm11, %v18581_v38, %v16878_v26  ;;  %v11471_v38 = vld [vmem:[%s18261_s5 + $0x934] ss:$8 sps:$4 sm:$0xff]   ;;  %v3413_v26 = vmax.bf16 %v3364_v41, %v3292_v45  ;;  %v3645_v17 = vmax.bf16 %v3595_v4, %v3522_v11  ;;  %v3293_v62 = vmax.bf16 %v3243_v56, %v18586_v31  ;;  %v11469_v31 = vld [vmem:[%s18261_s5 + $0x930] ss:$8 sps:$4 sm:$0xff]   ;;  %v11472_v41 = vld [vmem:[%s18261_s5 + $0x940] ss:$8 sps:$4 sm:$0xff]  }
 0x6ae   :  { %6866 = vrot.lane.b32.xlu1 %v18617_v47, %s11728_s29  ;;  %v17215_v55 = vpop.permute.xlu0 %3579  ;;  %v3644_v25 = vmax.bf16 %v3594_v50, %v3521_v30  ;;  %v11492_v45 = vld [vmem:[%s18261_s5 + $0x414] ss:$8 sps:$4 sm:$0xff]   ;;  %v11490_v50 = vld [vmem:[%s18261_s5 + $0x410] ss:$8 sps:$4 sm:$0xff]   ;;  %v11498_v56 = vld [vmem:[%s18261_s5 + $0x424] ss:$8 sps:$4 sm:$0xff]  }
 0x6af   :  { %v17224_v61 = vpop.permute.xlu1 %3315  ;;  %v3607_v36 = vsel %vm3587_vm11, %v16897_v0, %v17215_v55  ;;  %v11475_v30 = vld [vmem:[%s18261_s5 + $0x950] ss:$8 sps:$4 sm:$0xff]  }
 0x6b0   :  { %10319 = vmatpush1.bf16.msra.mxu0 %v11457_v2  ;;  %6987 = vrot.lane.b32.xlu0 %v18617_v47, %s11729_s11  ;;  %v3534_v2 = vmax.bf16 %v3485_v35, %v3413_v26  ;;  %v3767_v0 = vmax.bf16 %v3717_v6, %v3644_v25  ;;  %v11496_v6 = vld [vmem:[%s18261_s5 + $0x420] ss:$8 sps:$4 sm:$0xff]   ;;  %v11504_v25 = vld [vmem:[%s18261_s5 + $0x434] ss:$8 sps:$4 sm:$0xff]  }
 0x6b1   :  { %10320 = vmatprep.subr.bf16.mxu0 %v11465_v57 }
 0x6b2   :  { %6890 = vrot.lane.b32.xlu1 %v16954_v34, %s11728_s29  ;;  %v17248_v46 = vpop.permute.xlu0 %3678 }
 0x6b3   :  { %v3718_v3 = vsel %vm3710_vm12, %v16916_v24, %v17248_v46  ;;  %v17257_v23 = vpop.permute.xlu1 %3339  ;;  %v18641_v24 = vld [vmem:[#allocation45_spill] sm:$0xff] }
 0x6b4   :  { %v3768_v43 = vmax.bf16 %v3718_v3, %v3645_v17  ;;  %v3365_v21 = vsel %vm471_vm5, %v17010_v19, %v17257_v23  ;;  %10321 = vmatpush1.bf16.msra.mxu0 %v11463_v16  ;;  %7108 = vrot.lane.b32.xlu0 %v18617_v47, %s11731_s16  ;;  %v17274_v19 = vmax.bf16 %v3607_v36, %v3534_v2  ;;  %v11483_v3 = vld [vmem:[%s18261_s5 + $0x974] ss:$8 sps:$4 sm:$0xff]  }
 0x6b5   :  { %v17267_v51 = vmax.bf16 %v3365_v21, %v3293_v62  ;;  %10322 = vmatprep.subr.bf16.mxu0 %v11471_v38  ;;  %v11480_v38 = vld [vmem:[%s18261_s5 + $0x964] ss:$8 sps:$4 sm:$0xff]   ;;  %v3353_v62 = vsel %vm471_vm5, %v16990_v32, %v17224_v61 }
 0x6b6   :  { %6989 = vrot.lane.b32.xlu1 %v18641_v24, %s11729_s11  ;;  %v17276_v57 = vpop.permute.xlu0 %3702  ;;  %10030 = vmatprep.mubr.bf16.mxu1 %v3768_v43  ;;  %v11502_v43 = vld [vmem:[%s18261_s5 + $0x430] ss:$8 sps:$4 sm:$0xff]  }
 0x6b7   :  { %v17284_v53 = vsel %vm3710_vm12, %v16937_v20, %v17276_v57  ;;  %v17286_v37 = vpop.permute.xlu1 %3436  ;;  %10031 = vmatmul.mubr.bf16.vlgmr.msra.gmra.mrb[96].mxu1 %v3767_v0  ;;  %v11477_v20 = vld [vmem:[%s18261_s5 + $0x954] ss:$8 sps:$4 sm:$0xff]  }
 0x6b8   :  { %10323 = vmatpush1.bf16.msra.mxu0 %v11469_v31  ;;  %6888 = vrot.lane.b32.xlu0 %v16893_v39, %s11728_s29  ;;  %v3474_v32 = vsel %vm594_vm7, %v17150_v14, %v17286_v37  ;;  %v11510_v31 = vld [vmem:[%s18261_s5 + $0x444] ss:$8 sps:$4 sm:$0xff]  }
 0x6b9   :  { %10324 = vmatprep.subr.bf16.mxu0 %v11474_v63  ;;  %10052 = vmatpush1.bf16.msra.mxu1 %v11484_v59 }
 0x6ba   :  { %7110 = vrot.lane.b32.xlu1 %v18641_v24, %s11731_s16  ;;  %v17303_v4 = vpop.permute.xlu0 %6860  ;;  %10053 = vmatprep.subr.bf16.mxu1 %v11492_v45 }
 0x6bb   :  { %v17308_v11 = vpop.permute.xlu1 %3460 }
 0x6bc   :  { %v3486_v16 = vsel %vm594_vm7, %v17164_v10, %v17308_v11  ;;  %10325 = vmatpush1.bf16.msra.mxu0 %v11472_v41  ;;  %7011 = vrot.lane.b32.xlu0 %v16954_v34, %s11729_s11  ;;  %v3231_v10 = vsel %vm324_vm3, %v16724_v58, %v17033_v22  ;;  %v11478_v58 = vld [vmem:[%s18261_s5 + $0x960] ss:$8 sps:$4 sm:$0xff]  }
 0x6bd   :  { %v3535_v35 = vmax.bf16 %v3486_v16, %v17267_v51  ;;  %10326 = vmatprep.subr.bf16.mxu0 %v11477_v20  ;;  %10054 = vmatpush1.bf16.msra.mxu1 %v11490_v50  ;;  %v3281_v36 = vmax.bf16 %v3231_v10, %v18572_v60  ;;  %v11481_v51 = vld [vmem:[%s18261_s5 + $0x970] ss:$8 sps:$4 sm:$0xff]   ;;  %v11516_v50 = vld [vmem:[%s18261_s5 + $0x454] ss:$8 sps:$4 sm:$0xff]   ;;  %v11487_v16 = vld [vmem:[%s18261_s5 + $0x980] ss:$8 sps:$4 sm:$0xff]  }
 0x6be   :  { %7231 = vrot.lane.b32.xlu1 %v18641_v24, %s11732_s22  ;;  %v17330_v26 = vpop.permute.xlu0 %6983  ;;  %10055 = vmatprep.subr.bf16.mxu1 %v11498_v56 }
 0x6bf   :  { %v17335_v17 = vpop.permute.xlu1 %3557  ;;  %v3402_v60 = vmax.bf16 %v3353_v62, %v3281_v36  ;;  %v11493_v62 = vld [vmem:[%s18261_s5 + $0x990] ss:$8 sps:$4 sm:$0xff]   ;;  %v11501_v36 = vld [vmem:[%s18261_s5 + $0x9a4] ss:$8 sps:$4 sm:$0xff]  }
 0x6c0   :  { %10327 = vmatpush1.bf16.msra.mxu0 %v11475_v30  ;;  %7132 = vrot.lane.b32.xlu0 %v16954_v34, %s11731_s16  ;;  %v3596_v0 = vsel %vm3587_vm11, %v17184_v42, %v17335_v17  ;;  %v11489_v42 = vld [vmem:[%s18261_s5 + $0x984] ss:$8 sps:$4 sm:$0xff]   ;;  %v6900_v30 = vsel %vm324_vm3, %v16962_v44, %v17303_v4 }
 0x6c1   :  { %10328 = vmatprep.subr.bf16.mxu0 %v11480_v38  ;;  %10056 = vmatpush1.bf16.msra.mxu1 %v11496_v6  ;;  %v3523_v63 = vmax.bf16 %v3474_v32, %v3402_v60  ;;  %v11522_v6 = vld [vmem:[%s18261_s5 + $0x464] ss:$8 sps:$4 sm:$0xff]  }
 0x6c2   :  { %7352 = vrot.lane.b32.xlu1 %v18641_v24, %s11733_s23  ;;  %v17357_v2 = vpop.permute.xlu0 %7104  ;;  %10057 = vmatprep.subr.bf16.mxu1 %v11504_v25 }
 0x6c3   :  { %v17362_v21 = vpop.permute.xlu1 %3581  ;;  %v17388_v41 = vmax.bf16 %v3596_v0, %v3523_v63  ;;  %v11507_v0 = vld [vmem:[%s18261_s5 + $0x9b4] ss:$8 sps:$4 sm:$0xff]  }
 0x6c4   :  { %v3608_v14 = vsel %vm3587_vm11, %v17215_v55, %v17362_v21  ;;  %10329 = vmatpush1.bf16.msra.mxu0 %v11478_v58  ;;  %7229 = vrot.lane.b32.xlu0 %v18617_v47, %s11732_s22  ;;  %v11508_v55 = vld [vmem:[%s18261_s5 + $0x440] ss:$8 sps:$4 sm:$0xff]  }
 0x6c5   :  { %v17378_v59 = vmax.bf16 %v3608_v14, %v3535_v35  ;;  %10330 = vmatprep.subr.bf16.mxu0 %v11483_v3  ;;  %10058 = vmatpush1.bf16.msra.mxu1 %v11502_v43  ;;  %v11495_v35 = vld [vmem:[%s18261_s5 + $0x994] ss:$8 sps:$4 sm:$0xff]  }
 0x6c6   :  { %v17383_v45 = vpop.permute.xlu0 %7225  ;;  %10059 = vmatprep.subr.bf16.mxu1 %v11510_v31  ;;  %v11528_v43 = vld [vmem:[%s18261_s5 + $0x474] ss:$8 sps:$4 sm:$0xff]   ;;  %v11499_v31 = vld [vmem:[%s18261_s5 + $0x9a0] ss:$8 sps:$4 sm:$0xff]  }
 0x6c7   :  { %v17390_v20 = vpop.permute.xlu1 %3680 }
 0x6c8   :  { %v17398_v56 = vsel %vm3710_vm12, %v17248_v46, %v17390_v20  ;;  %10331 = vmatpush1.bf16.msra.mxu0 %v11481_v51  ;;  %7251 = vrot.lane.b32.xlu0 %v16893_v39, %s11732_s22  ;;  %v11514_v46 = vld [vmem:[%s18261_s5 + $0x450] ss:$8 sps:$4 sm:$0xff]  }
 0x6c9   :  { %10332 = vmatprep.subr.bf16.mxu0 %v11489_v42  ;;  %10060 = vmatpush1.bf16.msra.mxu1 %v11508_v55  ;;  %v11526_v51 = vld [vmem:[%s18261_s5 + $0x470] ss:$8 sps:$4 sm:$0xff]   ;;  %v11534_v42 = vld [vmem:[%s18261_s5 + $0x484] ss:$8 sps:$4 sm:$0xff]  }
 0x6ca   :  { %v17410_v38 = vpop.permute.xlu0 %3194  ;;  %10061 = vmatprep.subr.bf16.mxu1 %v11516_v50  ;;  %v18642_v50 = vld [vmem:[#allocation38_spill] sm:$0xff] }
 0x6cb   :  { %v17415_v10 = vpop.permute.xlu1 %3704 }
 0x6cc   :  { %v17423_v25 = vsel %vm3710_vm12, %v17276_v57, %v17415_v10  ;;  %10333 = vmatpush1.bf16.msra.mxu0 %v11487_v16  ;;  %7348 = vrot.lane.b32.xlu0 %v18605_v7, %s11733_s23  ;;  %v11520_v57 = vld [vmem:[%s18261_s5 + $0x460] ss:$8 sps:$4 sm:$0xff]   ;;  %v11505_v16 = vld [vmem:[%s18261_s5 + $0x9b0] ss:$8 sps:$4 sm:$0xff]  }
 0x6cd   :  { %10334 = vmatprep.subr.bf16.mxu0 %v11495_v35  ;;  %10062 = vmatpush1.bf16.msra.mxu1 %v11514_v46  ;;  %v11513_v46 = vld [vmem:[%s18261_s5 + $0x9c4] ss:$8 sps:$4 sm:$0xff]  }
 0x6ce   :  { %v6881_v3 = vpop.permute.xlu0 %6880  ;;  %10063 = vmatprep.subr.bf16.mxu1 %v11522_v6  ;;  %v6909_v6 = vsel %vm324_vm3, %v17028_v48, %v17047_v52  ;;  %v18643_v48 = vld [vmem:[#allocation18_spill] sm:$0xff] }
 0x6cf   :  { %v17438_v32 = vpop.permute.xlu1 %6862  ;;  %v6910_v35 = vsel %vm324_vm3, %v17047_v52, %v6881_v3  ;;  %v11540_v52 = vld [vmem:[%s18261_s5 + $0x494] ss:$8 sps:$4 sm:$0xff]  }
 0x6d0   :  { %v17446_v60 = vsel %vm324_vm3, %v17303_v4, %v17438_v32  ;;  %10335 = vmatpush1.bf16.msra.mxu0 %v11493_v62  ;;  %3220 = vrot.lane.b32.xlu0 %v18612_v33, %s11728_s29 }
 0x6d1   :  { %10336 = vmatprep.subr.bf16.mxu0 %v11501_v36  ;;  %10064 = vmatpush1.bf16.msra.mxu1 %v11520_v57  ;;  %v11532_v36 = vld [vmem:[%s18261_s5 + $0x480] ss:$8 sps:$4 sm:$0xff]   ;;  %v6899_v57 = vsel %vm324_vm3, %v16604_v28, %v16962_v44 }
 0x6d2   :  { %v7004_v14 = vpop.permute.xlu0 %7003  ;;  %10065 = vmatprep.subr.bf16.mxu1 %v11528_v43 }
 0x6d4   :  { %v17459_v63 = vpop.permute.xlu1 %6882  ;;  %10337 = vmatpush1.bf16.msra.mxu0 %v11499_v31  ;;  %3319 = vrot.lane.b32.xlu0 %v18642_v50, %s11729_s11 }
 0x6d5   :  { %v6911_v55 = vsel %vm324_vm3, %v6881_v3, %v17459_v63  ;;  %10338 = vmatprep.subr.bf16.mxu0 %v11507_v0  ;;  %10066 = vmatpush1.bf16.msra.mxu1 %v11526_v51  ;;  %v7032_v3 = vsel %vm471_vm5, %v17073_v49, %v7004_v14  ;;  %v7031_v0 = vsel %vm471_vm5, %v18643_v48, %v17073_v49  ;;  %v18644_v51 = vld [vmem:[#allocation15_spill] sm:$0xff] }
 0x6d6   :  { %v7125_v62 = vpop.permute.xlu0 %7124  ;;  %v6961_v43 = vmax.bf16 %v6911_v55, %v16769_v13  ;;  %10067 = vmatprep.subr.bf16.mxu1 %v11534_v42  ;;  %v6960_v58 = vmax.bf16 %v6910_v35, %v18644_v51  ;;  %v11511_v13 = vld [vmem:[%s18261_s5 + $0x9c0] ss:$8 sps:$4 sm:$0xff]   ;;  %v18647_v51 = vld [vmem:[#allocation73_spill] sm:$0xff] }
 0x6d7   :  { %v18645_v42 = vld [vmem:[#allocation54_spill] sm:$0xff]  ;;  %v7153_v49 = vsel %vm594_vm7, %v17108_v27, %v7125_v62 }
 0x6d8   :  { %v17488_v31 = vpop.permute.xlu1 %7005  ;;  %10339 = vmatpush1.bf16.msra.mxu0 %v11505_v16  ;;  %7374 = vrot.lane.b32.xlu0 %v16954_v34, %s11733_s23  ;;  %v6959_v55 = vmax.bf16 %v6909_v6, %v18645_v42  ;;  %v18646_v16 = vld [vmem:[#allocation25_spill] sm:$0xff]  ;;  %v7021_v34 = vsel %vm471_vm5, %v18648_v29, %v18647_v51  ;;  %v18649_v6 = vld [vmem:[#allocation52_spill] sm:$0xff]  ;;  %v7081_v44 = vmax.bf16 %v7032_v3, %v6960_v58  ;;  %v11546_v58 = vld [vmem:[%s18261_s5 + $0x4a4] ss:$8 sps:$4 sm:$0xff]  }
 0x6d9   :  { %v7033_v28 = vsel %vm471_vm5, %v7004_v14, %v17488_v31  ;;  %10340 = vmatprep.subr.bf16.mxu0 %v11513_v46  ;;  %v11519_v14 = vld [vmem:[%s18261_s5 + $0x9d4] ss:$8 sps:$4 sm:$0xff]   ;;  %v6949_v48 = vmax.bf16 %v6899_v57, %v18646_v16  ;;  %v7152_v42 = vsel %vm594_vm7, %v18649_v6, %v17108_v27  ;;  %10068 = vmatpush1.bf16.msra.mxu1 %v11532_v36  ;;  %v11538_v46 = vld [vmem:[%s18261_s5 + $0x490] ss:$8 sps:$4 sm:$0xff]   ;;  %v18650_v36 = vld [vmem:[#allocation27_spill] sm:$0xff] }
 0x6da   :  { %v7082_v35 = vmax.bf16 %v7033_v28, %v6961_v43  ;;  %v7246_v4 = vpop.permute.xlu0 %7245  ;;  %v7080_v43 = vmax.bf16 %v7031_v0, %v6959_v55  ;;  %v7273_v57 = vsel %vm3587_vm11, %v17097_v1, %v17137_v18  ;;  %v7022_v29 = vsel %vm471_vm5, %v18647_v51, %v17330_v26  ;;  %10069 = vmatprep.subr.bf16.mxu1 %v11540_v52  ;;  %v18651_v16 = vld [vmem:[#allocation34_spill] sm:$0xff] }
 0x6db   :  { %v7274_v28 = vsel %vm3587_vm11, %v17137_v18, %v7246_v4  ;;  %v6950_v3 = vmax.bf16 %v6900_v30, %v18650_v36  ;;  %v7202_v0 = vmax.bf16 %v7153_v49, %v7081_v44  ;;  %v11517_v18 = vld [vmem:[%s18261_s5 + $0x9d0] ss:$8 sps:$4 sm:$0xff]   ;;  %v7070_v55 = vmax.bf16 %v7021_v34, %v6949_v48  ;;  %v11525_v30 = vld [vmem:[%s18261_s5 + $0x9e4] ss:$8 sps:$4 sm:$0xff]  }
 0x6dc   :  { %v17531_v27 = vpop.permute.xlu1 %7126  ;;  %10341 = vmatpush1.bf16.msra.mxu0 %v11511_v13  ;;  %3440 = vrot.lane.b32.xlu0 %v18642_v50, %s11731_s16  ;;  %v7201_v52 = vmax.bf16 %v7152_v42, %v7080_v43  ;;  %v7143_v51 = vsel %vm594_vm7, %v18651_v16, %v17357_v2  ;;  %v7394_v49 = vsel %vm3710_vm12, %v17129_v5, %v17152_v54  ;;  %v18654_v44 = vld [vmem:[#allocation11_spill] sm:$0xff] }
 0x6dd   :  { %v7154_v1 = vsel %vm594_vm7, %v7125_v62, %v17531_v27  ;;  %10342 = vmatprep.subr.bf16.mxu0 %v11519_v14  ;;  %v18652_v62 = vld [vmem:[#allocation8_spill] sm:$0xff]  ;;  %v7071_v34 = vmax.bf16 %v7022_v29, %v6950_v3  ;;  %v7323_v48 = vmax.bf16 %v7274_v28, %v7202_v0  ;;  %10070 = vmatpush1.bf16.msra.mxu1 %v11538_v46 }
 0x6de   :  { %v7203_v6 = vmax.bf16 %v7154_v1, %v7082_v35  ;;  %v7142_v13 = vsel %vm594_vm7, %v18652_v62, %v18651_v16  ;;  %v7367_v42 = vpop.permute.xlu0 %7366  ;;  %v11544_v35 = vld [vmem:[%s18261_s5 + $0x4a0] ss:$8 sps:$4 sm:$0xff]   ;;  %v18653_v14 = vld [vmem:[#allocation48_spill] sm:$0xff]  ;;  %v7322_v36 = vmax.bf16 %v7273_v57, %v7201_v52  ;;  %10071 = vmatprep.subr.bf16.mxu1 %v11546_v58 }
 0x6df   :  { %v7263_v43 = vsel %vm3587_vm11, %v18654_v44, %v18653_v14  ;;  %v7264_v1 = vsel %vm3587_vm11, %v18653_v14, %v17383_v45  ;;  %v7395_v5 = vsel %vm3710_vm12, %v17152_v54, %v7367_v42  ;;  %v11552_v46 = vld [vmem:[%s18261_s5 + $0x4b4] ss:$8 sps:$4 sm:$0xff]   ;;  %v7192_v28 = vmax.bf16 %v7143_v51, %v7071_v34  ;;  %v11523_v54 = vld [vmem:[%s18261_s5 + $0x9e0] ss:$8 sps:$4 sm:$0xff]  }
 0x6e0   :  { %v17567_v29 = vpop.permute.xlu1 %7247  ;;  %v7444_v3 = vmax.bf16 %v7395_v5, %v7323_v48  ;;  %10343 = vmatpush1.bf16.msra.mxu0 %v11517_v18  ;;  %3561 = vrot.lane.b32.xlu0 %v18642_v50, %s11732_s22  ;;  %v7191_v57 = vmax.bf16 %v7142_v13, %v7070_v55  ;;  %v7443_v52 = vmax.bf16 %v7394_v49, %v7322_v36  ;;  %v11531_v16 = vld [vmem:[%s18261_s5 + $0x9f4] ss:$8 sps:$4 sm:$0xff]   ;;  %v11550_v55 = vld [vmem:[%s18261_s5 + $0x4b0] ss:$8 sps:$4 sm:$0xff]   ;;  %v11558_v49 = vld [vmem:[%s18261_s5 + $0x4c4] ss:$8 sps:$4 sm:$0xff]  }
 0x6e1   :  { %v7275_v0 = vsel %vm3587_vm11, %v7246_v4, %v17567_v29  ;;  %10344 = vmatprep.subr.bf16.mxu0 %v11525_v30  ;;  %v18655_v51 = vld [vmem:[#allocation12_spill] sm:$0xff]  ;;  %v7313_v18 = vmax.bf16 %v7264_v1, %v7192_v28  ;;  %10072 = vmatpush1.bf16.msra.mxu1 %v11544_v35  ;;  %v18656_v44 = vmax.bf16 %v17284_v53, %v17274_v19  ;;  %v11556_v36 = vld [vmem:[%s18261_s5 + $0x4c0] ss:$8 sps:$4 sm:$0xff]  }
 0x6e2   :  { %v17579_v58 = vmax.bf16 %v7275_v0, %v7203_v6  ;;  %v7384_v4 = vsel %vm3710_vm12, %v18655_v51, %v17166_v8  ;;  %v17587_v62 = vpop.permute.xlu0 %7346  ;;  %10305 = vmatprep.mubr.bf16.mxu0 %v7444_v3  ;;  %v7312_v6 = vmax.bf16 %v7263_v43, %v7191_v57  ;;  %10073 = vmatprep.subr.bf16.mxu1 %v11552_v46  ;;  %v18657_v1 = vld [vmem:[#allocation30_spill] sm:$0xff]  ;;  %v11564_v19 = vld [vmem:[%s18261_s5 + $0x4d4] ss:$8 sps:$4 sm:$0xff]  }
 0x6e3   :  { %v7385_v30 = vsel %vm3710_vm12, %v17166_v8, %v17587_v62  ;;  %10306 = vmatmul.mubr.bf16.gmra.mrb[100].mxu0 %v7443_v52  ;;  %v11529_v8 = vld [vmem:[%s18261_s5 + $0x9f0] ss:$8 sps:$4 sm:$0xff]   ;;  %v6951_v5 = vmax.bf16 %v17446_v60, %v18657_v1  ;;  %v11535_v60 = vld [vmem:[%s18261_s5 + $0xa00] ss:$8 sps:$4 sm:$0xff]   ;;  %v11543_v3 = vld [vmem:[%s18261_s5 + $0xa14] ss:$8 sps:$4 sm:$0xff]  }
 0x6e4   :  { %v17595_v13 = vpop.permute.xlu1 %7368  ;;  %v7434_v34 = vmax.bf16 %v7385_v30, %v7313_v18  ;;  %10345 = vmatpush1.bf16.msra.mxu0 %v11523_v54  ;;  %3684 = vrot.lane.b32.xlu0 %v18642_v50, %s11733_s23  ;;  %v7433_v35 = vmax.bf16 %v7384_v4, %v7312_v6  ;;  %v18658_v52 = vld [vmem:[#allocation70_spill] sm:$0xff] }
 0x6e5   :  { %v17602_v48 = vsel %vm3710_vm12, %v7367_v42, %v17595_v13  ;;  %10348 = vmatprep.mubr.bf16.mxu0 %v18656_v44  ;;  %10346 = vmatprep.subr.bf16.mxu0 %v11531_v16  ;;  %v11537_v42 = vld [vmem:[%s18261_s5 + $0xa04] ss:$8 sps:$4 sm:$0xff]   ;;  %v11547_v1 = vld [vmem:[%s18261_s5 + $0xa20] ss:$8 sps:$4 sm:$0xff]  }
 0x6e6   :  { %v7445_v14 = vmax.bf16 %v17602_v48, %v17579_v58  ;;  %v17617_v43 = vpop.permute.xlu0 %3218  ;;  %10040 = vmatprep.mubr.bf16.mxu1 %v7434_v34  ;;  %10074 = vmatpush1.bf16.msra.mxu1 %v11550_v55  ;;  %v18659_v16 = vld [vmem:[#allocation67_spill] sm:$0xff]  ;;  %v11651_v48 = vld [vmem:[%s18261_s5 + $0x594] ss:$8 sps:$4 sm:$0xff]  }
 0x6e7   :  { %10041 = vmatmul.mubr.bf16.gmra.mrb[100].mxu1 %v7433_v35  ;;  %10075 = vmatprep.subr.bf16.mxu1 %v11558_v49  ;;  %v3244_v54 = vsel %vm324_vm3, %v17189_v9, %v17617_v43  ;;  %v18660_v51 = vmax.bf16 %v18658_v52, %v18659_v16  ;;  %v11570_v4 = vld [vmem:[%s18261_s5 + $0x4e4] ss:$8 sps:$4 sm:$0xff]   ;;  %v11541_v9 = vld [vmem:[%s18261_s5 + $0xa10] ss:$8 sps:$4 sm:$0xff]   ;;  %v11559_v52 = vld [vmem:[%s18261_s5 + $0xa40] ss:$8 sps:$4 sm:$0xff]   ;;  %v3232_v16 = vsel %vm324_vm3, %v17033_v22, %v17410_v38 }
 0x6e8   :  { %v17624_v46 = vpop.permute.xlu1 %6985  ;;  %10347 = vmatpush1.bf16.msra.mxu0 %v11529_v8  ;;  %3708 = vrot.lane.b32.xlu0 %v18625_v40, %s11733_s23  ;;  %v18661_v55 = vld [vmem:[#allocation71_spill] sm:$0xff]  ;;  %v18662_v49 = vld [vmem:[#allocation13_spill] sm:$0xff] }
 0x6e9   :  { %v7023_v53 = vsel %vm471_vm5, %v17330_v26, %v17624_v46  ;;  %10369 = vmatprep.subr.bf16.mxu0 %v11537_v42  ;;  %v11562_v26 = vld [vmem:[%s18261_s5 + $0x4d0] ss:$8 sps:$4 sm:$0xff]   ;;  %v11549_v30 = vld [vmem:[%s18261_s5 + $0xa24] ss:$8 sps:$4 sm:$0xff]   ;;  %v3294_v34 = vmax.bf16 %v3244_v54, %v18662_v49  ;;  %v11576_v42 = vld [vmem:[%s18261_s5 + $0x4f4] ss:$8 sps:$4 sm:$0xff]  }
 0x6ea   :  { %v17637_v28 = vmax.bf16 %v7023_v53, %v6951_v5  ;;  %v17642_v0 = vpop.permute.xlu0 %3317  ;;  %10076 = vmatpush1.bf16.msra.mxu1 %v11556_v36  ;;  %v11565_v22 = vld [vmem:[%s18261_s5 + $0xa50] ss:$8 sps:$4 sm:$0xff]  }
 0x6eb   :  { %10349 = vmatmul.mubr.bf16.vlgmr.msra.gmra.mrb[96].mxu0 %v18660_v51  ;;  %10077 = vmatprep.subr.bf16.mxu1 %v11564_v19  ;;  %v11574_v19 = vld [vmem:[%s18261_s5 + $0x4f0] ss:$8 sps:$4 sm:$0xff]   ;;  %v11567_v51 = vld [vmem:[%s18261_s5 + $0xa54] ss:$8 sps:$4 sm:$0xff]  }
 0x6ec   :  { %v17650_v57 = vpop.permute.xlu1 %7106  ;;  %10370 = vmatpush1.bf16.msra.mxu0 %v11535_v60  ;;  %6892 = vrot.lane.b32.xlu0 %v18661_v55, %s11728_s29  ;;  %v11597_v60 = vld [vmem:[%s18261_s5 + $0x504] ss:$8 sps:$4 sm:$0xff]  }
 0x6ed   :  { %v7144_v18 = vsel %vm594_vm7, %v17357_v2, %v17650_v57  ;;  %10371 = vmatprep.subr.bf16.mxu0 %v11543_v3  ;;  %v11568_v2 = vld [vmem:[%s18261_s5 + $0x4e0] ss:$8 sps:$4 sm:$0xff]   ;;  %v11561_v3 = vld [vmem:[%s18261_s5 + $0xa44] ss:$8 sps:$4 sm:$0xff]  }
 0x6ee   :  { %v7193_v6 = vmax.bf16 %v7144_v18, %v17637_v28  ;;  %v17671_v8 = vpop.permute.xlu0 %3341  ;;  %10078 = vmatpush1.bf16.msra.mxu1 %v11562_v26  ;;  %v11553_v28 = vld [vmem:[%s18261_s5 + $0xa30] ss:$8 sps:$4 sm:$0xff]   ;;  %v3354_v18 = vsel %vm471_vm5, %v17224_v61, %v17642_v0 }
 0x6ef   :  { %v3366_v35 = vsel %vm471_vm5, %v17257_v23, %v17671_v8  ;;  %10079 = vmatprep.subr.bf16.mxu1 %v11570_v4  ;;  %v11555_v23 = vld [vmem:[%s18261_s5 + $0xa34] ss:$8 sps:$4 sm:$0xff]  }
 0x6f0   :  { %v17679_v44 = vpop.permute.xlu1 %6886  ;;  %v17684_v36 = vmax.bf16 %v3366_v35, %v3294_v34  ;;  %10372 = vmatpush1.bf16.msra.mxu0 %v11541_v9  ;;  %7013 = vrot.lane.b32.xlu0 %v18661_v55, %s11729_s11  ;;  %v11573_v35 = vld [vmem:[%s18261_s5 + $0xa64] ss:$8 sps:$4 sm:$0xff]  }
 0x6f1   :  { %10373 = vmatprep.subr.bf16.mxu0 %v11549_v30  ;;  %v18663_v30 = vld [vmem:[#allocation20_spill] sm:$0xff] }
 0x6f2   :  { %v17694_v5 = vpop.permute.xlu0 %3438  ;;  %10080 = vmatpush1.bf16.msra.mxu1 %v11568_v2  ;;  %v3282_v49 = vmax.bf16 %v3232_v16, %v18663_v30  ;;  %v11582_v16 = vld [vmem:[%s18261_s5 + $0xa84] ss:$8 sps:$4 sm:$0xff]   ;;  %v18664_v30 = vmax.bf16 %v17398_v56, %v17388_v41 }
 0x6f3   :  { %10081 = vmatprep.subr.bf16.mxu1 %v11576_v42  ;;  %v3475_v61 = vsel %vm594_vm7, %v17286_v37, %v17694_v5  ;;  %v11571_v37 = vld [vmem:[%s18261_s5 + $0xa60] ss:$8 sps:$4 sm:$0xff]   ;;  %v11609_v41 = vld [vmem:[%s18261_s5 + $0x524] ss:$8 sps:$4 sm:$0xff]  }
 0x6f4   :  { %v17699_v53 = vpop.permute.xlu1 %7009  ;;  %10374 = vmatpush1.bf16.msra.mxu0 %v11547_v1  ;;  %7134 = vrot.lane.b32.xlu0 %v18661_v55, %s11731_s16 }
 0x6f5   :  { %10375 = vmatprep.subr.bf16.mxu0 %v11555_v23 }
 0x6f6   :  { %v17712_v26 = vpop.permute.xlu0 %3462  ;;  %10082 = vmatpush1.bf16.msra.mxu1 %v11574_v19 }
 0x6f7   :  { %10104 = vmatprep.subr.bf16.mxu1 %v11597_v60 }
 0x6f8   :  { %v17714_v54 = vpop.permute.xlu1 %7130  ;;  %10376 = vmatpush1.bf16.msra.mxu0 %v11553_v28  ;;  %7255 = vrot.lane.b32.xlu0 %v18661_v55, %s11732_s22 }
 0x6f9   :  { %10377 = vmatprep.subr.bf16.mxu0 %v11561_v3 }
 0x6fa   :  { %v17727_v4 = vpop.permute.xlu0 %3559 }
 0x6fb   :  { %v3597_v1 = vsel %vm3587_vm11, %v17335_v17, %v17727_v4  ;;  %v11577_v17 = vld [vmem:[%s18261_s5 + $0xa70] ss:$8 sps:$4 sm:$0xff]  }
 0x6fc   :  { %v17732_v9 = vpop.permute.xlu1 %7227  ;;  %10378 = vmatpush1.bf16.msra.mxu0 %v11559_v52  ;;  %7376 = vrot.lane.b32.xlu0 %v18661_v55, %s11733_s23  ;;  %v11595_v52 = vld [vmem:[%s18261_s5 + $0x500] ss:$8 sps:$4 sm:$0xff]  }
 0x6fd   :  { %v7265_v34 = vsel %vm3587_vm11, %v17383_v45, %v17732_v9  ;;  %10379 = vmatprep.subr.bf16.mxu0 %v11567_v51  ;;  %v3403_v45 = vmax.bf16 %v3354_v18, %v3282_v49  ;;  %v11603_v51 = vld [vmem:[%s18261_s5 + $0x514] ss:$8 sps:$4 sm:$0xff]   ;;  %v11580_v49 = vld [vmem:[%s18261_s5 + $0xa80] ss:$8 sps:$4 sm:$0xff]  }
 0x6fe   :  { %v17746_v2 = vmax.bf16 %v7265_v34, %v7193_v6  ;;  %v17751_v42 = vpop.permute.xlu0 %3583  ;;  %v11579_v6 = vld [vmem:[%s18261_s5 + $0xa74] ss:$8 sps:$4 sm:$0xff]   ;;  %v11601_v34 = vld [vmem:[%s18261_s5 + $0x510] ss:$8 sps:$4 sm:$0xff]  }
 0x6ff   :  { %v3524_v23 = vmax.bf16 %v3475_v61, %v3403_v45  ;;  %v11607_v45 = vld [vmem:[%s18261_s5 + $0x520] ss:$8 sps:$4 sm:$0xff]  }
 0x700   :  { %10380 = vmatpush1.bf16.msra.mxu0 %v11565_v22  ;;  %v11585_v22 = vld [vmem:[%s18261_s5 + $0xa94] ss:$8 sps:$4 sm:$0xff]  }
 0x701   :  { %10381 = vmatprep.subr.bf16.mxu0 %v11573_v35  ;;  %v3647_v19 = vmax.bf16 %v3597_v1, %v3524_v23  ;;  %v11583_v35 = vld [vmem:[%s18261_s5 + $0xa90] ss:$8 sps:$4 sm:$0xff]   ;;  %v11588_v1 = vld [vmem:[%s18261_s5 + $0xaa4] ss:$8 sps:$4 sm:$0xff]   ;;  %v11615_v23 = vld [vmem:[%s18261_s5 + $0x534] ss:$8 sps:$4 sm:$0xff]  }
 0x702   :  { %v17762_v60 = vpop.permute.xlu0 %3682 }
 0x703   :  { %v3720_v28 = vsel %vm3710_vm12, %v17390_v20, %v17762_v60  ;;  %v17779_v20 = vpop.permute.xlu1 %3196 }
 0x704   :  { %v3770_v3 = vmax.bf16 %v3720_v28, %v3647_v19  ;;  %10382 = vmatpush1.bf16.msra.mxu0 %v11571_v37  ;;  %v11613_v19 = vld [vmem:[%s18261_s5 + $0x530] ss:$8 sps:$4 sm:$0xff]   ;;  %v11591_v28 = vld [vmem:[%s18261_s5 + $0xab4] ss:$8 sps:$4 sm:$0xff]  }
 0x705   :  { %10383 = vmatprep.subr.bf16.mxu0 %v11579_v6  ;;  %v11586_v6 = vld [vmem:[%s18261_s5 + $0xaa0] ss:$8 sps:$4 sm:$0xff]  }
 0x706   :  { %v17781_v18 = vpop.permute.xlu0 %3706  ;;  %10083 = vmatprep.mubr.bf16.mxu1 %v3770_v3  ;;  %v11621_v3 = vld [vmem:[%s18261_s5 + $0x544] ss:$8 sps:$4 sm:$0xff]  }
 0x707   :  { %10084 = vmatmul.mubr.bf16.vlgmr.msra.gmra.mrb[96].mxu1 %v18664_v30  ;;  %v17800_v61 = vpop.permute.xlu1 %7253 }
 0x708   :  { %10384 = vmatpush1.bf16.msra.mxu0 %v11577_v17  ;;  %10105 = vmatpush1.bf16.msra.mxu1 %v11595_v52 }
 0x709   :  { %10385 = vmatprep.subr.bf16.mxu0 %v11582_v16  ;;  %10106 = vmatprep.subr.bf16.mxu1 %v11603_v51  ;;  %v11589_v16 = vld [vmem:[%s18261_s5 + $0xab0] ss:$8 sps:$4 sm:$0xff]   ;;  %v11619_v51 = vld [vmem:[%s18261_s5 + $0x540] ss:$8 sps:$4 sm:$0xff]  }
 0x70a   :  { %v17798_v56 = vpop.permute.xlu0 %6864 }
 0x70b   :  { %v17828_v17 = vpop.permute.xlu1 %7350 }
 0x70c   :  { %10386 = vmatpush1.bf16.msra.mxu0 %v11580_v49  ;;  %10107 = vmatpush1.bf16.msra.mxu1 %v11601_v34  ;;  %v11594_v49 = vld [vmem:[%s18261_s5 + $0xac4] ss:$8 sps:$4 sm:$0xff]   ;;  %v11627_v34 = vld [vmem:[%s18261_s5 + $0x554] ss:$8 sps:$4 sm:$0xff]  }
 0x70d   :  { %10387 = vmatprep.subr.bf16.mxu0 %v11585_v22  ;;  %10108 = vmatprep.subr.bf16.mxu1 %v11609_v41 }
 0x70e   :  { %v17814_v37 = vpop.permute.xlu0 %6884 }
 0x70f   :  { %v6912_v30 = vsel %vm324_vm3, %v17459_v63, %v17814_v37 }
 0x710   :  { %10388 = vmatpush1.bf16.msra.mxu0 %v11583_v35  ;;  %10109 = vmatpush1.bf16.msra.mxu1 %v11607_v45  ;;  %v17852_v35 = vpop.permute.xlu1 %3222  ;;  %v6962_v63 = vmax.bf16 %v6912_v30, %v16781_v12  ;;  %v11592_v45 = vld [vmem:[%s18261_s5 + $0xac0] ss:$8 sps:$4 sm:$0xff]   ;;  %v11633_v12 = vld [vmem:[%s18261_s5 + $0x564] ss:$8 sps:$4 sm:$0xff]   ;;  %v3609_v30 = vsel %vm3587_vm11, %v17362_v21, %v17751_v42  ;;  %v3732_v21 = vsel %vm3710_vm12, %v17415_v10, %v17781_v18  ;;  %v11637_v10 = vld [vmem:[%s18261_s5 + $0x570] ss:$8 sps:$4 sm:$0xff]  }
 0x711   :  { %10389 = vmatprep.subr.bf16.mxu0 %v11588_v1  ;;  %10110 = vmatprep.subr.bf16.mxu1 %v11615_v23  ;;  %v11625_v1 = vld [vmem:[%s18261_s5 + $0x550] ss:$8 sps:$4 sm:$0xff]  }
 0x712   :  { %v17830_v52 = vpop.permute.xlu0 %7007 }
 0x713   :  { %v7034_v41 = vsel %vm471_vm5, %v17488_v31, %v17830_v52  ;;  %v11600_v31 = vld [vmem:[%s18261_s5 + $0xad4] ss:$8 sps:$4 sm:$0xff]  }
 0x714   :  { %10390 = vmatpush1.bf16.msra.mxu0 %v11586_v6  ;;  %10111 = vmatpush1.bf16.msra.mxu1 %v11613_v19  ;;  %v7083_v6 = vmax.bf16 %v7034_v41, %v6962_v63 }
 0x715   :  { %10391 = vmatprep.subr.bf16.mxu0 %v11591_v28  ;;  %10112 = vmatprep.subr.bf16.mxu1 %v11621_v3  ;;  %v3487_v28 = vsel %vm594_vm7, %v17308_v11, %v17712_v26  ;;  %v11606_v11 = vld [vmem:[%s18261_s5 + $0xae4] ss:$8 sps:$4 sm:$0xff]  }
 0x716   :  { %v17847_v22 = vpop.permute.xlu0 %7128 }
 0x717   :  { %v7155_v23 = vsel %vm594_vm7, %v17531_v27, %v17847_v22 }
 0x718   :  { %10392 = vmatpush1.bf16.msra.mxu0 %v11589_v16  ;;  %10113 = vmatpush1.bf16.msra.mxu1 %v11619_v51  ;;  %v7204_v3 = vmax.bf16 %v7155_v23, %v7083_v6  ;;  %v11598_v16 = vld [vmem:[%s18261_s5 + $0xad0] ss:$8 sps:$4 sm:$0xff]   ;;  %v11631_v51 = vld [vmem:[%s18261_s5 + $0x560] ss:$8 sps:$4 sm:$0xff]   ;;  %v11645_v6 = vld [vmem:[%s18261_s5 + $0x584] ss:$8 sps:$4 sm:$0xff]  }
 0x719   :  { %10393 = vmatprep.subr.bf16.mxu0 %v11594_v49  ;;  %10114 = vmatprep.subr.bf16.mxu1 %v11627_v34  ;;  %v3536_v49 = vmax.bf16 %v3487_v28, %v17684_v36  ;;  %v17894_v34 = vpop.permute.xlu1 %7372  ;;  %v11604_v36 = vld [vmem:[%s18261_s5 + $0xae0] ss:$8 sps:$4 sm:$0xff]  }
 0x71a   :  { %v17870_v19 = vpop.permute.xlu0 %7249 }
 0x71b   :  { %v7276_v27 = vsel %vm3587_vm11, %v17567_v29, %v17870_v19  ;;  %v11639_v29 = vld [vmem:[%s18261_s5 + $0x574] ss:$8 sps:$4 sm:$0xff]  }
 0x71c   :  { %10394 = vmatpush1.bf16.msra.mxu0 %v11592_v45  ;;  %10115 = vmatpush1.bf16.msra.mxu1 %v11625_v1  ;;  %v7325_v41 = vmax.bf16 %v7276_v27, %v7204_v3  ;;  %v3659_v1 = vmax.bf16 %v3609_v30, %v3536_v49  ;;  %v11610_v27 = vld [vmem:[%s18261_s5 + $0xaf0] ss:$8 sps:$4 sm:$0xff]   ;;  %v11618_v3 = vld [vmem:[%s18261_s5 + $0xb04] ss:$8 sps:$4 sm:$0xff]  }
 0x71d   :  { %10395 = vmatprep.subr.bf16.mxu0 %v11600_v31  ;;  %10116 = vmatprep.subr.bf16.mxu1 %v11633_v12  ;;  %v11612_v31 = vld [vmem:[%s18261_s5 + $0xaf4] ss:$8 sps:$4 sm:$0xff]   ;;  %v17921_v28 = vpop.permute.xlu1 %3343  ;;  %v11649_v30 = vld [vmem:[%s18261_s5 + $0x590] ss:$8 sps:$4 sm:$0xff]   ;;  %v11657_v49 = vld [vmem:[%s18261_s5 + $0x5a4] ss:$8 sps:$4 sm:$0xff]  }
 0x71e   :  { %v17896_v63 = vpop.permute.xlu0 %7370  ;;  %v3782_v12 = vmax.bf16 %v3732_v21, %v3659_v1  ;;  %v11622_v21 = vld [vmem:[%s18261_s5 + $0xb10] ss:$8 sps:$4 sm:$0xff]   ;;  %v11655_v1 = vld [vmem:[%s18261_s5 + $0x5a0] ss:$8 sps:$4 sm:$0xff]  }
 0x71f   :  { %v7397_v45 = vsel %vm3710_vm12, %v17595_v13, %v17896_v63 }
 0x720   :  { %v7446_v23 = vmax.bf16 %v7397_v45, %v7325_v41  ;;  %10396 = vmatpush1.bf16.msra.mxu0 %v11598_v16  ;;  %10117 = vmatpush1.bf16.msra.mxu1 %v11631_v51  ;;  %v11643_v16 = vld [vmem:[%s18261_s5 + $0x580] ss:$8 sps:$4 sm:$0xff]   ;;  %v11624_v51 = vld [vmem:[%s18261_s5 + $0xb14] ss:$8 sps:$4 sm:$0xff]   ;;  %v18665_v41 = vmax.bf16 %v17423_v25, %v17378_v59  ;;  %v11630_v45 = vld [vmem:[%s18261_s5 + $0xb24] ss:$8 sps:$4 sm:$0xff]  }
 0x721   :  { %10397 = vmatprep.subr.bf16.mxu0 %v11606_v11  ;;  %10118 = vmatprep.subr.bf16.mxu1 %v11639_v29  ;;  %v17946_v11 = vpop.permute.xlu1 %3464  ;;  %v11663_v59 = vld [vmem:[%s18261_s5 + $0x5b4] ss:$8 sps:$4 sm:$0xff]  }
 0x722   :  { %v17913_v13 = vpop.permute.xlu0 %6987  ;;  %10358 = vmatprep.mubr.bf16.mxu0 %v7446_v23 }
 0x723   :  { %10359 = vmatmul.mubr.bf16.gmra.mrb[100].mxu0 %v7445_v14  ;;  %v11616_v14 = vld [vmem:[%s18261_s5 + $0xb00] ss:$8 sps:$4 sm:$0xff]  }
 0x724   :  { %10398 = vmatpush1.bf16.msra.mxu0 %v11604_v36  ;;  %10401 = vmatprep.mubr.bf16.mxu0 %v3782_v12  ;;  %v11628_v36 = vld [vmem:[%s18261_s5 + $0xb20] ss:$8 sps:$4 sm:$0xff]  }
 0x725   :  { %10399 = vmatprep.subr.bf16.mxu0 %v11612_v31  ;;  %10119 = vmatpush1.bf16.msra.mxu1 %v11637_v10  ;;  %v17970_v25 = vpop.permute.xlu1 %3585  ;;  %v11636_v31 = vld [vmem:[%s18261_s5 + $0xb34] ss:$8 sps:$4 sm:$0xff]   ;;  %v11661_v10 = vld [vmem:[%s18261_s5 + $0x5b0] ss:$8 sps:$4 sm:$0xff]  }
 0x726   :  { %v17932_v58 = vpop.permute.xlu0 %7108  ;;  %10120 = vmatprep.subr.bf16.mxu1 %v11645_v6  ;;  %v11669_v6 = vld [vmem:[%s18261_s5 + $0x5c4] ss:$8 sps:$4 sm:$0xff]  }
 0x728   :  { %10400 = vmatpush1.bf16.msra.mxu0 %v11610_v27  ;;  %v11634_v27 = vld [vmem:[%s18261_s5 + $0xb30] ss:$8 sps:$4 sm:$0xff]  }
 0x729   :  { %10422 = vmatprep.subr.bf16.mxu0 %v11618_v3  ;;  %10121 = vmatpush1.bf16.msra.mxu1 %v11643_v16  ;;  %v6902_v3 = vsel %vm324_vm3, %v17438_v32, %v17798_v56  ;;  %v11642_v16 = vld [vmem:[%s18261_s5 + $0xb44] ss:$8 sps:$4 sm:$0xff]   ;;  %v7024_v32 = vsel %vm471_vm5, %v17624_v46, %v17913_v13  ;;  %v11673_v46 = vld [vmem:[%s18261_s5 + $0x5d0] ss:$8 sps:$4 sm:$0xff]  }
 0x72a   :  { %v17948_v29 = vpop.permute.xlu0 %6888  ;;  %10122 = vmatprep.subr.bf16.mxu1 %v11651_v48  ;;  %v11667_v48 = vld [vmem:[%s18261_s5 + $0x5c0] ss:$8 sps:$4 sm:$0xff]  }
 0x72b   :  { %10402 = vmatmul.mubr.bf16.vlgmr.msra.gmra.mrb[96].mxu0 %v18665_v41  ;;  %v11640_v41 = vld [vmem:[%s18261_s5 + $0xb40] ss:$8 sps:$4 sm:$0xff]  }
 0x72c   :  { %10423 = vmatpush1.bf16.msra.mxu0 %v11616_v14  ;;  %v17998_v14 = vpop.permute.xlu1 %6866 }
 0x72d   :  { %10424 = vmatprep.subr.bf16.mxu0 %v11624_v51  ;;  %10123 = vmatpush1.bf16.msra.mxu1 %v11649_v30  ;;  %v11675_v30 = vld [vmem:[%s18261_s5 + $0x5d4] ss:$8 sps:$4 sm:$0xff]  }
 0x72e   :  { %v17965_v23 = vpop.permute.xlu0 %7011  ;;  %10124 = vmatprep.subr.bf16.mxu1 %v11657_v49  ;;  %v6952_v49 = vmax.bf16 %v6902_v3, %v18605_v7 }
 0x730   :  { %10425 = vmatpush1.bf16.msra.mxu0 %v11622_v21  ;;  %v7145_v21 = vsel %vm594_vm7, %v17650_v57, %v17932_v58  ;;  %v7073_v7 = vmax.bf16 %v7024_v32, %v6952_v49  ;;  %v6913_v32 = vsel %vm324_vm3, %v17814_v37, %v17679_v44  ;;  %v7035_v37 = vsel %vm471_vm5, %v17830_v52, %v17699_v53 }
 0x731   :  { %10426 = vmatprep.subr.bf16.mxu0 %v11630_v45  ;;  %10125 = vmatpush1.bf16.msra.mxu1 %v11655_v1  ;;  %v11648_v45 = vld [vmem:[%s18261_s5 + $0xb54] ss:$8 sps:$4 sm:$0xff]  }
 0x732   :  { %v17981_v12 = vpop.permute.xlu0 %7132  ;;  %10126 = vmatprep.subr.bf16.mxu1 %v11663_v59  ;;  %v11681_v59 = vld [vmem:[%s18261_s5 + $0x5e4] ss:$8 sps:$4 sm:$0xff]  }
 0x734   :  { %10427 = vmatpush1.bf16.msra.mxu0 %v11628_v36  ;;  %v18027_v36 = vpop.permute.xlu1 %6890 }
 0x735   :  { %10428 = vmatprep.subr.bf16.mxu0 %v11636_v31  ;;  %10127 = vmatpush1.bf16.msra.mxu1 %v11661_v10  ;;  %v7194_v31 = vmax.bf16 %v7145_v21, %v7073_v7  ;;  %v11646_v10 = vld [vmem:[%s18261_s5 + $0xb50] ss:$8 sps:$4 sm:$0xff]   ;;  %v11652_v21 = vld [vmem:[%s18261_s5 + $0xb60] ss:$8 sps:$4 sm:$0xff]  }
 0x736   :  { %v18000_v51 = vpop.permute.xlu0 %7229  ;;  %10128 = vmatprep.subr.bf16.mxu1 %v11669_v6  ;;  %v11654_v6 = vld [vmem:[%s18261_s5 + $0xb64] ss:$8 sps:$4 sm:$0xff]  }
 0x737   :  { %v7266_v57 = vsel %vm3587_vm11, %v17732_v9, %v18000_v51 }
 0x738   :  { %10429 = vmatpush1.bf16.msra.mxu0 %v11634_v27  ;;  %v11679_v27 = vld [vmem:[%s18261_s5 + $0x5e0] ss:$8 sps:$4 sm:$0xff]   ;;  %v7315_v3 = vmax.bf16 %v7266_v57, %v7194_v31  ;;  %v7156_v31 = vsel %vm594_vm7, %v17847_v22, %v17714_v54 }
 0x739   :  { %10430 = vmatprep.subr.bf16.mxu0 %v11642_v16  ;;  %10129 = vmatpush1.bf16.msra.mxu1 %v11667_v48  ;;  %v11687_v16 = vld [vmem:[%s18261_s5 + $0x5f4] ss:$8 sps:$4 sm:$0xff]  }
 0x73a   :  { %v7252_v1 = vpop.permute.xlu0 %7251  ;;  %10130 = vmatprep.subr.bf16.mxu1 %v11675_v30 }
 0x73b   :  { %v7277_v22 = vsel %vm3587_vm11, %v17870_v19, %v7252_v1  ;;  %v3610_v19 = vsel %vm3587_vm11, %v17751_v42, %v17970_v25  ;;  %v7398_v42 = vsel %vm3710_vm12, %v17896_v63, %v17894_v34 }
 0x73c   :  { %10431 = vmatpush1.bf16.msra.mxu0 %v11640_v41 }
 0x73d   :  { %10432 = vmatprep.subr.bf16.mxu0 %v11648_v45  ;;  %10131 = vmatpush1.bf16.msra.mxu1 %v11673_v46  ;;  %v6914_v45 = vsel %vm324_vm3, %v17679_v44, %v17948_v29  ;;  %v18064_v46 = vpop.permute.xlu1 %6989  ;;  %v6963_v44 = vmax.bf16 %v6913_v32, %v16886_v15  ;;  %v11658_v15 = vld [vmem:[%s18261_s5 + $0xb70] ss:$8 sps:$4 sm:$0xff]  }
 0x73e   :  { %v7349_v9 = vpop.permute.xlu0 %7348  ;;  %10132 = vmatprep.subr.bf16.mxu1 %v11681_v59  ;;  %v7036_v59 = vsel %vm471_vm5, %v17699_v53, %v17965_v23  ;;  %v6964_v52 = vmax.bf16 %v6914_v45, %v16893_v39  ;;  %v3367_v53 = vsel %vm471_vm5, %v17671_v8, %v17921_v28  ;;  %v11666_v39 = vld [vmem:[%s18261_s5 + $0xb84] ss:$8 sps:$4 sm:$0xff]   ;;  %v3488_v8 = vsel %vm594_vm7, %v17712_v26, %v17946_v11  ;;  %v11672_v26 = vld [vmem:[%s18261_s5 + $0xb94] ss:$8 sps:$4 sm:$0xff]  }
 0x73f   :  { %v7386_v48 = vsel %vm3710_vm12, %v17587_v62, %v7349_v9  ;;  %v7387_v30 = vsel %vm3710_vm12, %v7349_v9, %v17828_v17  ;;  %v11660_v62 = vld [vmem:[%s18261_s5 + $0xb74] ss:$8 sps:$4 sm:$0xff]  }
 0x740   :  { %v7435_v49 = vmax.bf16 %v7386_v48, %v17746_v2  ;;  %v7436_v41 = vmax.bf16 %v7387_v30, %v7315_v3  ;;  %10433 = vmatpush1.bf16.msra.mxu0 %v11646_v10  ;;  %v11685_v2 = vld [vmem:[%s18261_s5 + $0x5f0] ss:$8 sps:$4 sm:$0xff]   ;;  %v11664_v30 = vld [vmem:[%s18261_s5 + $0xb80] ss:$8 sps:$4 sm:$0xff]  }
 0x741   :  { %10434 = vmatprep.subr.bf16.mxu0 %v11654_v6  ;;  %10133 = vmatpush1.bf16.msra.mxu1 %v11679_v27  ;;  %v7084_v6 = vmax.bf16 %v7035_v37, %v6963_v44  ;;  %v11670_v37 = vld [vmem:[%s18261_s5 + $0xb90] ss:$8 sps:$4 sm:$0xff]   ;;  %v3233_v44 = vsel %vm324_vm3, %v17410_v38, %v17779_v20 }
 0x742   :  { %v3221_v7 = vpop.permute.xlu0 %3220  ;;  %10093 = vmatprep.mubr.bf16.mxu1 %v7436_v41  ;;  %10134 = vmatprep.subr.bf16.mxu1 %v11687_v16  ;;  %v18096_v16 = vpop.permute.xlu1 %7110 }
 0x743   :  { %v3245_v57 = vsel %vm324_vm3, %v17617_v43, %v3221_v7  ;;  %10094 = vmatmul.mubr.bf16.gmra.mrb[100].mxu1 %v7435_v49  ;;  %v7157_v43 = vsel %vm594_vm7, %v17714_v54, %v17981_v12  ;;  %v7205_v9 = vmax.bf16 %v7156_v31, %v7084_v6  ;;  %v7278_v54 = vsel %vm3587_vm11, %v7252_v1, %v17800_v61  ;;  %v18669_v6 = vld [vmem:[#allocation10_spill] sm:$0xff] }
 0x744   :  { %v3295_v10 = vmax.bf16 %v3245_v57, %v18612_v33  ;;  %10435 = vmatpush1.bf16.msra.mxu0 %v11652_v21  ;;  %v7085_v33 = vmax.bf16 %v7036_v59, %v6964_v52  ;;  %v3246_v45 = vsel %vm324_vm3, %v3221_v7, %v17852_v35  ;;  %v18666_v59 = vld [vmem:[#allocation16_spill] sm:$0xff] }
 0x745   :  { %10436 = vmatprep.subr.bf16.mxu0 %v11660_v62  ;;  %10135 = vmatpush1.bf16.msra.mxu1 %v11685_v2  ;;  %v7326_v49 = vmax.bf16 %v7277_v22, %v7205_v9  ;;  %v3234_v35 = vsel %vm324_vm3, %v17779_v20, %v18666_v59  ;;  %v3296_v57 = vmax.bf16 %v3246_v45, %v18625_v40  ;;  %v18667_v52 = vld [vmem:[#allocation32_spill] sm:$0xff]  ;;  %v11676_v40 = vld [vmem:[%s18261_s5 + $0xba0] ss:$8 sps:$4 sm:$0xff]  }
 0x746   :  { %v3416_v27 = vmax.bf16 %v3367_v53, %v3295_v10  ;;  %v3320_v3 = vpop.permute.xlu0 %3319  ;;  %v7206_v48 = vmax.bf16 %v7157_v43, %v7085_v33  ;;  %v7232_v63 = vpop.permute.xlu1 %7231  ;;  %v6904_v10 = vsel %vm324_vm3, %v17998_v14, %v18667_v52  ;;  %v3283_v53 = vmax.bf16 %v3233_v44, %v18669_v6  ;;  %v18670_v33 = vld [vmem:[#allocation46_spill] sm:$0xff] }
 0x747   :  { %v7447_v7 = vmax.bf16 %v7398_v42, %v7326_v49  ;;  %v3355_v38 = vsel %vm471_vm5, %v17642_v0, %v3320_v3  ;;  %v3284_v43 = vmax.bf16 %v3234_v35, %v18642_v50  ;;  %v7026_v0 = vsel %vm471_vm5, %v18064_v46, %v18670_v33  ;;  %v11684_v50 = vld [vmem:[%s18261_s5 + $0xbb4] ss:$8 sps:$4 sm:$0xff]   ;;  %v11682_v42 = vld [vmem:[%s18261_s5 + $0xbb0] ss:$8 sps:$4 sm:$0xff]  }
 0x748   :  { %10437 = vmatpush1.bf16.msra.mxu0 %v11658_v15  ;;  %v3537_v32 = vmax.bf16 %v3488_v8, %v3416_v27  ;;  %v7327_v1 = vmax.bf16 %v7278_v54, %v7206_v48  ;;  %v18668_v15 = vld [vmem:[#allocation26_spill] sm:$0xff]  ;;  %v18671_v27 = vld [vmem:[#allocation33_spill] sm:$0xff]  ;;  %v6954_v9 = vmax.bf16 %v6904_v10, %v18641_v24  ;;  %v3404_v54 = vmax.bf16 %v3355_v38, %v3283_v53 }
 0x749   :  { %10438 = vmatprep.subr.bf16.mxu0 %v11666_v39  ;;  %v3356_v20 = vsel %vm471_vm5, %v3320_v3, %v18668_v15  ;;  %v3392_v39 = vsel %vm471_vm5, %v17921_v28, 0  ;;  %v7146_v10 = vsel %vm594_vm7, %v17932_v58, %v18096_v16  ;;  %v3636_v6 = vsel %vm3587_vm11, %v17970_v25, 0  ;;  %v11691_v25 = vld [vmem:[%s18261_s5 + $0xbd0] ss:$8 sps:$4 sm:$0xff]  }
 0x74a   :  { %v18107_v41 = vpop.permute.xlu0 %7374  ;;  %v18109_v21 = vmax.bf16 %v3610_v19, %v3537_v32  ;;  %v3417_v8 = vmax.bf16 %v3392_v39, %v3296_v57  ;;  %v3405_v28 = vmax.bf16 %v3356_v20, %v3284_v43  ;;  %v18673_v19 = vld [vmem:[#allocation47_spill] sm:$0xff]  ;;  %v7353_v24 = vpop.permute.xlu1 %7352  ;;  %v7267_v58 = vsel %vm3587_vm11, %v18000_v51, %v7232_v63 }
 0x74b   :  { %v7399_v62 = vsel %vm3710_vm12, %v17894_v34, %v18107_v41  ;;  %v11678_v34 = vld [vmem:[%s18261_s5 + $0xba4] ss:$8 sps:$4 sm:$0xff]  }
 0x74c   :  { %v7448_v2 = vmax.bf16 %v7399_v62, %v7327_v1  ;;  %10439 = vmatpush1.bf16.msra.mxu0 %v11664_v30  ;;  %v18672_v30 = vld [vmem:[#allocation49_spill] sm:$0xff]  ;;  %v7075_v1 = vmax.bf16 %v7026_v0, %v6954_v9  ;;  %v11696_v51 = vld [vmem:[%s18261_s5 + $0xbe4] ss:$8 sps:$4 sm:$0xff]  }
 0x74d   :  { %10440 = vmatprep.subr.bf16.mxu0 %v11672_v26  ;;  %v7147_v32 = vsel %vm594_vm7, %v18096_v16, %v18672_v30  ;;  %v6903_v26 = vsel %vm324_vm3, %v17798_v56, %v17998_v14  ;;  %v11690_v56 = vld [vmem:[%s18261_s5 + $0xbc4] ss:$8 sps:$4 sm:$0xff]   ;;  %v11699_v9 = vld [vmem:[%s18261_s5 + $0xbf4] ss:$8 sps:$4 sm:$0xff]  }
 0x74e   :  { %v3441_v31 = vpop.permute.xlu0 %3440  ;;  %10411 = vmatprep.mubr.bf16.mxu0 %v7448_v2  ;;  %v3513_v2 = vsel %vm594_vm7, %v17946_v11, 0  ;;  %v7196_v14 = vmax.bf16 %v7147_v32, %v7075_v1  ;;  %v6953_v57 = vmax.bf16 %v6903_v26, %v18617_v47  ;;  %v18675_v11 = vld [vmem:[#allocation51_spill] sm:$0xff] }
 0x74f   :  { %10412 = vmatmul.mubr.bf16.gmra.mrb[100].mxu0 %v7447_v7  ;;  %v3476_v22 = vsel %vm594_vm7, %v17694_v5, %v3441_v31  ;;  %v3477_v3 = vsel %vm594_vm7, %v3441_v31, %v18671_v27  ;;  %v7389_v31 = vsel %vm3710_vm12, %v7353_v24, %v18675_v11  ;;  %v11688_v47 = vld [vmem:[%s18261_s5 + $0xbc0] ss:$8 sps:$4 sm:$0xff]   ;;  %v7388_v27 = vsel %vm3710_vm12, %v17828_v17, %v7353_v24 }
 0x750   :  { %10441 = vmatpush1.bf16.msra.mxu0 %v11670_v37  ;;  %v3525_v45 = vmax.bf16 %v3476_v22, %v3404_v54  ;;  %v3526_v62 = vmax.bf16 %v3477_v3, %v3405_v28  ;;  %v18674_v37 = vld [vmem:[#allocation40_spill] sm:$0xff]  ;;  %v11694_v3 = vld [vmem:[%s18261_s5 + $0xbe0] ss:$8 sps:$4 sm:$0xff]   ;;  %v6915_v17 = vsel %vm324_vm3, %v17948_v29, %v18027_v36 }
 0x751   :  { %10442 = vmatprep.subr.bf16.mxu0 %v11678_v34  ;;  %v7268_v44 = vsel %vm3587_vm11, %v7232_v63, %v18674_v37  ;;  %v3538_v34 = vmax.bf16 %v3513_v2, %v3417_v8  ;;  %v11697_v54 = vld [vmem:[%s18261_s5 + $0xbf0] ss:$8 sps:$4 sm:$0xff]   ;;  %v7907_v11 = vld [vmem:[%s18262_s6] sm:$0x3]  ;;  %s11734_s6 = smov [#allocation3]  }
 0x752   :  { %v3562_v48 = vpop.permute.xlu0 %3561  ;;  %v7317_v38 = vmax.bf16 %v7268_v44, %v7196_v14  ;;  %s10497_s24 = sshll.u32 %s11734_s6, 4  ;;  %s10498_s24 = int_to_ptr.vmem [resolvable:$true] %s10497_s24 }
 0x753   :  { %v3598_v5 = vsel %vm3587_vm11, %v17727_v4, %v3562_v48  ;;  %v3599_v49 = vsel %vm3587_vm11, %v3562_v48, %v18673_v19  ;;  %v7025_v4 = vsel %vm471_vm5, %v17913_v13, %v18064_v46  ;;  %v18676_v46 = vld [vmem:[#allocation50_spill] sm:$0xff]  ;;  %v18677_v19 = vld [vmem:[#allocation31_spill] sm:$0xff]  ;;  %s11703_s3 = scalar_lea.vmem %s10498_s24, 1024  ;;  %p11708_p1 = scmp.lt.s32.totalorder %s10498_s24, %s10498_s24 }
 0x754   :  { %10443 = vmatpush1.bf16.msra.mxu0 %v11676_v40  ;;  %v3648_v59 = vmax.bf16 %v3598_v5, %v3525_v45  ;;  %v3649_v35 = vmax.bf16 %v3599_v49, %v3526_v62  ;;  %v7074_v53 = vmax.bf16 %v7025_v4, %v6953_v57  ;;  %v7438_v43 = vmax.bf16 %v7389_v31, %v7317_v38  ;;  %p11704_p0 = scmp.ne.s32.totalorder %s10498_s24, %s11703_s3  ;;  %p11709_p2 = scmp.lt.s32.totalorder %s11703_s3, %s11703_s3 }
 0x755   :  { %10444 = vmatprep.subr.bf16.mxu0 %v11684_v50  ;;  %v3661_v40 = vmax.bf16 %v3636_v6, %v3538_v34  ;;  %v6965_v49 = vmax.bf16 %v6915_v17, %v18677_v19 }
 0x756   :  { %v3685_v7 = vpop.permute.xlu0 %3684  ;;  %v7195_v39 = vmax.bf16 %v7146_v10, %v7074_v53  ;;  %p11710_p3 = por %p11709_p2, %p11708_p1 }
 0x757   :  { %v3721_v13 = vsel %vm3710_vm12, %v17762_v60, %v3685_v7  ;;  %v3722_v52 = vsel %vm3710_vm12, %v3685_v7, %v18676_v46  ;;  %v11693_v60 = vld [vmem:[%s18261_s5 + $0xbd4] ss:$8 sps:$4 sm:$0xff]  }
 0x758   :  { %v3771_v15 = vmax.bf16 %v3721_v13, %v3648_v59  ;;  %v3772_v20 = vmax.bf16 %v3722_v52, %v3649_v35  ;;  %10445 = vmatpush1.bf16.msra.mxu0 %v11682_v42  ;;  %v7316_v22 = vmax.bf16 %v7267_v58, %v7195_v39  ;;  %v18678_v35 = vlaneseq  ;;  %p11711_p4 = pnand %p11710_p3, %p11704_p0 }
 0x759   :  { %10446 = vmatprep.subr.bf16.mxu0 %v11690_v56 }
 0x75a   :  { %v3709_v16 = vpop.permute.xlu0 %3708  ;;  %10136 = vmatprep.mubr.bf16.mxu1 %v3772_v20  ;;  %v7437_v50 = vmax.bf16 %v7388_v27, %v7316_v22  ;;  %v7910_v7 = vshrl.u32 %v18678_v35, 7 }
 0x75b   :  { %v3759_v33 = vsel %vm3710_vm12, %v3709_v16, 0  ;;  %10137 = vmatmul.mubr.bf16.vlgmr.msra.gmra.mrb[96].mxu1 %v3771_v15  ;;  %v3733_v48 = vsel %vm3710_vm12, %v17781_v18, %v3709_v16 }
 0x75c   :  { %v3784_v0 = vmax.bf16 %v3759_v33, %v3661_v40  ;;  %10447 = vmatpush1.bf16.msra.mxu0 %v11688_v47  ;;  %10146 = vmatprep.mubr.bf16.mxu1 %v7438_v43  ;;  %v3783_v29 = vmax.bf16 %v3733_v48, %v18109_v21  ;;  %v7911_v57 = vsub.s32 0, %v7910_v7  ;;  %v7915_v31 = vsub.s32 1, %v7910_v7 }
 0x75d   :  { %10448 = vmatprep.subr.bf16.mxu0 %v11693_v60 }
 0x75e   :  { %v6893_v63 = vpop.permute.xlu0 %6892  ;;  %10454 = vmatprep.mubr.bf16.mxu0 %v3784_v0  ;;  %v7912_v52 = vrot.slane %v7907_v11, %v7911_v57  ;;  %v7916_v38 = vrot.slane %v7907_v11, %v7915_v31 }
 0x75f   :  { %v6916_v28 = vsel %vm324_vm3, %v18027_v36, %v6893_v63 }
 0x760   :  { %10449 = vmatpush1.bf16.msra.mxu0 %v11691_v25  ;;  %v6966_v26 = vmax.bf16 %v6916_v28, %v18661_v55 }
 0x761   :  { %10450 = vmatprep.subr.bf16.mxu0 %v11696_v51 }
 0x762   :  { %v7014_v8 = vpop.permute.xlu0 %7013 }
 0x763   :  { %10147 = vmatmul.mubr.bf16.gmra.mrb[100].mxu1 %v7437_v50  ;;  %v7037_v32 = vsel %vm471_vm5, %v17965_v23, %v7014_v8  ;;  %v7062_v5 = vsel %vm471_vm5, %v7014_v8, 0 }
 0x764   :  { %10451 = vmatpush1.bf16.msra.mxu0 %v11694_v3  ;;  %v7086_v24 = vmax.bf16 %v7037_v32, %v6965_v49  ;;  %v7087_v18 = vmax.bf16 %v7062_v5, %v6966_v26 }
 0x765   :  { %10452 = vmatprep.subr.bf16.mxu0 %v11699_v9 }
 0x766   :  { %v7135_v30 = vpop.permute.xlu0 %7134 }
 0x767   :  { %v7158_v36 = vsel %vm594_vm7, %v17981_v12, %v7135_v30  ;;  %v7183_v1 = vsel %vm594_vm7, %v7135_v30, 0 }
 0x768   :  { %10453 = vmatpush1.bf16.msra.mxu0 %v11697_v54  ;;  %v7207_v42 = vmax.bf16 %v7158_v36, %v7086_v24  ;;  %v7208_v2 = vmax.bf16 %v7183_v1, %v7087_v18 }
 0x76a   :  { %v7256_v45 = vpop.permute.xlu0 %7255 }
 0x76b   :  { %v7279_v23 = vsel %vm3587_vm11, %v17800_v61, %v7256_v45  ;;  %v7304_v62 = vsel %vm3587_vm11, %v7256_v45, 0  ;;  %10455 = vmatmul.mubr.bf16.vlgmr.msra.gmra.mrb[96].mxu0 %v3783_v29 }
 0x76c   :  { %v7328_v55 = vmax.bf16 %v7279_v23, %v7207_v42  ;;  %v7329_v4 = vmax.bf16 %v7304_v62, %v7208_v2 }
 0x76e   :  { %v7377_v37 = vpop.permute.xlu0 %7376 }
 0x76f   :  { %v7400_v21 = vsel %vm3710_vm12, %v18107_v41, %v7377_v37  ;;  %v7425_v12 = vsel %vm3710_vm12, %v7377_v37, 0 }
 0x770   :  { %v7449_v44 = vmax.bf16 %v7400_v21, %v7328_v55  ;;  %v7450_v56 = vmax.bf16 %v7425_v12, %v7329_v4 }
 0x772   :  { %10464 = vmatprep.mubr.bf16.mxu0 %v7450_v56 }
 0x773   :  { %10465 = vmatmul.mubr.bf16.gmra.mrb[100].mxu0 %v7449_v44 }
 0x82e   :  { %v10138_v14 = vpop.f32.mrb[96].mxu1 }
 0x82f   :  { %v10140_v59 = vpop.f32.mrb[97].mxu1  ;;  %v11014_v15 = vadd.f32 %v10138_v14, %v7912_v52 }
 0x830   :  { %v10142_v61 = vpop.f32.mrb[98].mxu1  ;;  %v11016_v20 = vadd.f32 %v10140_v59, %v7916_v38 }
 0x831   :  { %v10144_v34 = vpop.f32.mrb[99].mxu1  ;;  %v11018_v6 = vadd.f32 %v10142_v61, %v7912_v52 }
 0x832   :  { %v11020_v43 = vadd.f32 %v10144_v34, %v7916_v38 }
 0x836   :  { %v10148_v13 = vpop.f32.mrb[100].mxu1 }
 0x837   :  { %v10150_v41 = vpop.f32.mrb[101].mxu1  ;;  %v11022_v63 = vadd.f32 %v10148_v13, %v7912_v52 }
 0x838   :  { %v10152_v46 = vpop.f32.mrb[102].mxu1  ;;  %v11024_v27 = vadd.f32 %v10150_v41, %v7916_v38 }
 0x839   :  { %v10154_v10 = vpop.f32.mrb[103].mxu1  ;;  %v11026_v50 = vadd.f32 %v10152_v46, %v7912_v52 }
 0x83a   :  { %v11028_v54 = vadd.f32 %v10154_v10, %v7916_v38 }
 0x83e   :  { %v10456_v47 = vpop.f32.mrb[96].mxu0 }
 0x83f   :  { %v11015_v53 = vadd.f32 %v11014_v15, %v10456_v47  ;;  %v10458_v60 = vpop.f32.mrb[97].mxu0 }
 0x840   :  { %v11017_v58 = vadd.f32 %v11016_v20, %v10458_v60  ;;  %v10460_v16 = vpop.f32.mrb[98].mxu0 }
 0x841   :  { %v10475_v40 = vmax.f32 %v11015_v53, 0.0  ;;  %v11019_v39 = vadd.f32 %v11018_v6, %v10460_v16  ;;  %v10462_v33 = vpop.f32.mrb[99].mxu0 }
 0x842   :  { %v10476_v0 = vmax.f32 %v11017_v58, 0.0  ;;  %v11021_v25 = vadd.f32 %v11020_v43, %v10462_v33 }
 0x843   :  { %10483 = vst [vmem:[#allocation3] sm:$0xff] %v10475_v40  ;;  %v10477_v22 = vmax.f32 %v11019_v39, 0.0 }
 0x844   :  { %10484 = vst [vmem:[#allocation3 + $0x8] sm:$0xff] %v10476_v0  ;;  %v10478_v51 = vmax.f32 %v11021_v25, 0.0 }
 0x845   :  { %10485 = vst [vmem:[#allocation3 + $0x10] sm:$0xff] %v10477_v22 }
 0x846   :  { %10486 = vst [vmem:[#allocation3 + $0x18] sm:$0xff] %v10478_v51  ;;  %v10466_v3 = vpop.f32.mrb[100].mxu0 }
 0x847   :  { %v11023_v9 = vadd.f32 %v11022_v63, %v10466_v3  ;;  %v10468_v8 = vpop.f32.mrb[101].mxu0 }
 0x848   :  { %v11025_v17 = vadd.f32 %v11024_v27, %v10468_v8  ;;  %v10470_v28 = vpop.f32.mrb[102].mxu0 }
 0x849   :  { %v10479_v48 = vmax.f32 %v11023_v9, 0.0  ;;  %v11027_v30 = vadd.f32 %v11026_v50, %v10470_v28  ;;  %v10472_v32 = vpop.f32.mrb[103].mxu0 }
 0x84a   :  { %v10480_v5 = vmax.f32 %v11025_v17, 0.0  ;;  %v11029_v19 = vadd.f32 %v11028_v54, %v10472_v32 }
 0x84b   :  { %10488 = vst [vmem:[#allocation3 + $0x20] sm:$0xff] %v10479_v48  ;;  %v10481_v49 = vmax.f32 %v11027_v30, 0.0 }
 0x84c   :  { %10489 = vst [vmem:[#allocation3 + $0x28] sm:$0xff] %v10480_v5  ;;  %v10482_v26 = vmax.f32 %v11029_v19, 0.0 }
 0x84d   :  { %10490 = vst [vmem:[#allocation3 + $0x30] sm:$0xff] %v10481_v49 }
 0x84e   :  { %10491 = vst [vmem:[#allocation3 + $0x38] sm:$0xff] %v10482_v26 }
 0x84f   :  { %11714 = shalt.err (!%p11711_p4)
}
 0x850   :  { %s11715_s26 = scalar_lea.hbm %s18263_s7, 1024 }
 0x851   :  { %p11716_p5 = scmp.ne.s32.totalorder %s18263_s7, %s11715_s26  ;;  %p11719_p6 = scmp.lt.u32.totalorder %s11715_s26, %s18263_s7 }
 0x853   :  { %p11721_p7 = pnand %p11719_p6, %p11716_p5 }
 0x855   :  { %11724 = shalt.err (!%p11721_p7)
}
 0x856   :  { %s11735_s29 = smov 256   ;;  %s11736_s1 = smov 16  }
 0x857   :  { %10503 = dma.vmem_to_hbm [thread:$0]  %s10498_s24, 1024, %s18263_s7, [#allocation4], %s11735_s29, %s11735_s29, %s11736_s1  }
 0x858   :  { %11725 = dma.done.wait [#allocation4], 1024  }
 0x859   :  { %11726 = vsyncadd [#allocation4], 4294966272 }
 0x85a   :  { %10507 = vsyncpa [#allocation4], 1 }

</bundles_post_ra>
